<compile_context>
chip_gen: v5e
topology: v5e:2x2
jax: 0.10.0
libtpu: 0.0.40
codegen_flags: <defaults>
</compile_context>

<pallas_src>
import jax
import jax.numpy as jnp
from jax.experimental import pallas as pl
from jax.experimental.pallas import tpu as pltpu

EPS = 1e-5

# TODO(synk): BatchNorm running_mean / running_var buffer updates (momentum) are
# not modeled; the forward normalizes with batch statistics (training mode),
# which matches the PyTorch module's forward output in train().


# ----------------------------- in-kernel helpers -----------------------------

def _conv3x3(x4d, w_bf16, bias=None):
    """3x3 'same' conv as one fused im2col matmul.

    x4d:    (N, H, W, Cin) float32 value.
    w_bf16: (9*Cin, Cout) bfloat16 value, rows ordered (ky, kx, cin).
    bias:   optional (1, Cout) float32 value.
    returns (N*H*W, Cout) float32.
    """
    n, h, w, cin = x4d.shape
    # zero-pad H and W by 1 inside the kernel (no wrapper jnp.pad, no scratch)
    zr = jnp.zeros((n, 1, w, cin), jnp.float32)
    xp = jnp.concatenate([zr, x4d, zr], axis=1)            # (n, h+2, w,   cin)
    zc = jnp.zeros((n, h + 2, 1, cin), jnp.float32)
    xp = jnp.concatenate([zc, xp, zc], axis=2)             # (n, h+2, w+2, cin)
    # im2col: 3 width shifts, then 3 height shifts -> columns ordered (ky,kx,c)
    xw = jnp.concatenate([xp[:, :, kx:kx + w, :] for kx in range(3)],
                         axis=3)                           # (n, h+2, w, 3*cin)
    slab = jnp.concatenate([xw[:, ky:ky + h, :, :] for ky in range(3)],
                           axis=3)                         # (n, h, w, 9*cin)
    slab = slab.reshape(n * h * w, 9 * cin).astype(jnp.bfloat16)
    y = jnp.dot(slab, w_bf16, preferred_element_type=jnp.float32)
    if bias is not None:
        y = y + bias
    return y


def _bn_stats(y):
    """One-pass per-column batch stats (biased variance, PyTorch semantics)."""
    inv = 1.0 / y.shape[0]
    s = jnp.sum(y, axis=0, keepdims=True)
    sq = jnp.sum(y * y, axis=0, keepdims=True)
    mean = s * inv
    var = jnp.maximum(sq * inv - mean * mean, 0.0)
    return mean, var


def _bn_relu(y, gamma, beta):
    """Training-mode BatchNorm folded to scale/shift, fused with ReLU."""
    mean, var = _bn_stats(y)
    scale = gamma * jax.lax.rsqrt(var + EPS)
    shift = beta - mean * scale
    return jnp.maximum(y * scale + shift, 0.0)


# --------------------------------- kernels -----------------------------------

def _trunk_kernel(x_ref, w_in_ref, b_in_ref,
                  hw1_ref, hg1_ref, hbe1_ref,
                  hw2_ref, hg2_ref, hbe2_ref, o_ref):
    """input conv + ReLU, then hidden_layers x (conv-BN-ReLU, conv-BN-ReLU)."""
    N, H, W, _ = x_ref.shape
    C = o_ref.shape[-1]
    L = hw1_ref.shape[0]

    x = x_ref[...]
    # input conv (12 -> C): bias kept (followed by ReLU only, no BN)
    h = jnp.maximum(_conv3x3(x, w_in_ref[...], b_in_ref[...]), 0.0)  # (N*H*W, C)

    # hidden `Net` blocks (static trip count, unrolled)
    for l in range(L):
        # conv bias omitted: cancelled by training-mode BN mean subtraction
        y = _conv3x3(h.reshape(N, H, W, C), hw1_ref[l])
        h = _bn_relu(y, hg1_ref[l], hbe1_ref[l])
        y = _conv3x3(h.reshape(N, H, W, C), hw2_ref[l])
        h = _bn_relu(y, hg2_ref[l], hbe2_ref[l])

    o_ref[...] = h.reshape(N, H, W, C)


def _head_kernel(feat_ref, src_ref, fc1w_ref, fc1b_ref,
                 srcw_ref, srcb_ref, bng_ref, bnbe_ref,
                 outw_ref, outb_ref, o_ref):
    """flatten head: fc1+ReLU, source linear, add, BatchNorm1d, fc, sigmoid."""
    chess = jnp.dot(feat_ref[...].astype(jnp.bfloat16), fc1w_ref[...],
                    preferred_element_type=jnp.float32) + fc1b_ref[...]
    chess = jnp.maximum(chess, 0.0)

    src = jnp.dot(src_ref[...].astype(jnp.bfloat16), srcw_ref[...],
                  preferred_element_type=jnp.float32) + srcb_ref[...]

    merge = chess + src
    mean, var = _bn_stats(merge)                      # BatchNorm1d, batch stats
    scale = bng_ref[...] * jax.lax.rsqrt(var + EPS)
    shift = bnbe_ref[...] - mean * scale
    merge = merge * scale + shift

    logits = jnp.dot(merge.astype(jnp.bfloat16), outw_ref[...],
                     preferred_element_type=jnp.float32) + outb_ref[...]
    o_ref[...] = 1.0 / (1.0 + jnp.exp(-logits))       # sigmoid


# --------------------------------- wrapper ------------------------------------

def plain_chessnet_forward(chessboard_nchw, source, params):
    """chessboard_nchw: (N, 12, H, W) f32; source: (N, 64) f32 -> (N, 64) f32."""
    (w_in, b_in, hw1, hg1, hbe1, hw2, hg2, hbe2,
     fc1_w, fc1_b, src_w, src_b, bn_g, bn_be, out_w, out_b) = params
    N, _, H, W = chessboard_nchw.shape
    C = w_in.shape[1]

    x_nhwc = jnp.transpose(chessboard_nchw, (0, 2, 3, 1)).astype(jnp.float32)

    vmem = pl.BlockSpec(memory_space=pltpu.MemorySpace.VMEM)

    # NOTE: at these toy sizes everything is VMEM-resident (<1 MiB); if the model
    # grows (hidden_size=128+, bigger batch), introduce a grid over output-channel
    # blocks (legal: BN stats are per-channel) marked "parallel" so v7x's two
    # TensorCores split the work and VMEM stays within the 64 MiB budget.
    h_nhwc = pl.pallas_call(
        _trunk_kernel,
        out_shape=jax.ShapeDtypeStruct((N, H, W, C), jnp.float32),
        in_specs=[vmem] * 9,
        out_specs=vmem,
    )(x_nhwc, w_in, b_in, hw1, hg1, hbe1, hw2, hg2, hbe2)

    # PyTorch nn.Flatten on NCHW: feature order is (c, h, w); lane-dense slab.
    feat = jnp.transpose(h_nhwc, (0, 3, 1, 2)).reshape(N, C * H * W)

    out = pl.pallas_call(
        _head_kernel,
        out_shape=jax.ShapeDtypeStruct((N, 64), jnp.float32),
        in_specs=[vmem] * 10,
        out_specs=vmem,
    )(feat, source.astype(jnp.float32), fc1_w, fc1_b, src_w, src_b,
      bn_g, bn_be, out_w, out_b)
    return out


# --------------------------------- params -------------------------------------

def init_params(key, hidden_size, hidden_layers, in_planes=12, board=8):
    C = hidden_size
    ks = jax.random.split(key, 10)

    def conv_w(k, cin, cout):
        # (3, 3, cin, cout) -> im2col layout (9*cin, cout), bf16 for the MXU
        w = jax.random.normal(k, (3, 3, cin, cout), jnp.float32)
        w = w * (1.0 / jnp.sqrt(9.0 * cin))
        return w.reshape(9 * cin, cout).astype(jnp.bfloat16)

    w_in = conv_w(ks[0], in_planes, C)
    b_in = jax.random.normal(ks[1], (1, C), jnp.float32) * 0.05

    hw1 = jnp.stack([conv_w(k, C, C) for k in jax.random.split(ks[2], hidden_layers)])
    hw2 = jnp.stack([conv_w(k, C, C) for k in jax.random.split(ks[3], hidden_layers)])
    # conv biases inside Net blocks intentionally not created: redundant before
    # training-mode BatchNorm (mean subtraction cancels them exactly).
    hg1 = jnp.ones((hidden_layers, 1, C), jnp.float32)
    hbe1 = jnp.zeros((hidden_layers, 1, C), jnp.float32)
    hg2 = jnp.ones((hidden_layers, 1, C), jnp.float32)
    hbe2 = jnp.zeros((hidden_layers, 1, C), jnp.float32)

    F = C * board * board
    fc1_w = (jax.random.normal(ks[4], (F, 64), jnp.float32) /
             jnp.sqrt(jnp.float32(F))).astype(jnp.bfloat16)
    fc1_b = jax.random.normal(ks[5], (1, 64), jnp.float32) * 0.05
    src_w = (jax.random.normal(ks[6], (64, 64), jnp.float32) / 8.0).astype(jnp.bfloat16)
    src_b = jax.random.normal(ks[7], (1, 64), jnp.float32) * 0.05
    bn_g = jnp.ones((1, 64), jnp.float32)
    bn_be = jnp.zeros((1, 64), jnp.float32)
    out_w = (jax.random.normal(ks[8], (64, 64), jnp.float32) / 8.0).astype(jnp.bfloat16)
    out_b = jax.random.normal(ks[9], (1, 64), jnp.float32) * 0.05

    return (w_in, b_in, hw1, hg1, hbe1, hw2, hg2, hbe2,
            fc1_w, fc1_b, src_w, src_b, bn_g, bn_be, out_w, out_b)


if __name__ == "__main__":
    hidden_size, hidden_layers = 32, 2   # small demo config (PyTorch default: 128, 2)
    N, H, W, IN_PLANES = 2, 8, 8, 12     # 8x8 board is implied by fc1 (hidden*64)

    key = jax.random.PRNGKey(0)
    kx, ksrc, kp = jax.random.split(key, 3)
    chessboard = jax.random.normal(kx, (N, IN_PLANES, H, W), jnp.float32)
    source = jax.random.normal(ksrc, (N, 64), jnp.float32)
    params = init_params(kp, hidden_size, hidden_layers, IN_PLANES, H)

    out = jax.jit(plain_chessnet_forward)(chessboard, source, params)
    out = jax.block_until_ready(out)

    assert out.shape == (N, 64)
    assert bool(jnp.all(jnp.isfinite(out)))
    assert bool(jnp.all((out >= 0.0) & (out <= 1.0)))   # sigmoid output range
    print("KERNEL_OK")
</pallas_src>

<mosaic_0001>
module attributes {stable_mosaic.version = 11 : i64} {
  func.func @_trunk_kernel(%arg0: memref<2x8x8x12xf32, #tpu.memory_space<vmem>>, %arg1: memref<108x32xbf16, #tpu.memory_space<vmem>>, %arg2: memref<1x32xf32, #tpu.memory_space<vmem>>, %arg3: memref<2x288x32xbf16, #tpu.memory_space<vmem>>, %arg4: memref<2x1x32xf32, #tpu.memory_space<vmem>>, %arg5: memref<2x1x32xf32, #tpu.memory_space<vmem>>, %arg6: memref<2x288x32xbf16, #tpu.memory_space<vmem>>, %arg7: memref<2x1x32xf32, #tpu.memory_space<vmem>>, %arg8: memref<2x1x32xf32, #tpu.memory_space<vmem>>, %arg9: memref<2x8x8x32xf32, #tpu.memory_space<vmem>>) attributes {dimension_semantics = [], scalar_prefetch = 0 : i64, scratch_operands = 0 : i64, tpu.core_type = #tpu.core_type<tc>} {
    %c0 = arith.constant 0 : index
    %c0_0 = arith.constant 0 : index
    %c0_1 = arith.constant 0 : index
    %c0_2 = arith.constant 0 : index
    %0 = vector.load %arg0[%c0, %c0_0, %c0_1, %c0_2] : memref<2x8x8x12xf32, #tpu.memory_space<vmem>>, vector<2x8x8x12xf32>
    %c0_3 = arith.constant 0 : index
    %c0_4 = arith.constant 0 : index
    %1 = vector.load %arg1[%c0_3, %c0_4] : memref<108x32xbf16, #tpu.memory_space<vmem>>, vector<108x32xbf16>
    %c0_5 = arith.constant 0 : index
    %c0_6 = arith.constant 0 : index
    %2 = vector.load %arg2[%c0_5, %c0_6] : memref<1x32xf32, #tpu.memory_space<vmem>>, vector<1x32xf32>
    %cst = arith.constant 0.000000e+00 : f32
    %3 = vector.broadcast %cst : f32 to vector<2x1x8x12xf32>
    %4 = tpu.concatenate %3, %0, %3 in 1 : vector<2x1x8x12xf32>, vector<2x8x8x12xf32>, vector<2x1x8x12xf32> -> vector<2x10x8x12xf32>
    %cst_7 = arith.constant 0.000000e+00 : f32
    %5 = vector.broadcast %cst_7 : f32 to vector<2x10x1x12xf32>
    %6 = tpu.concatenate %5, %4, %5 in 2 : vector<2x10x1x12xf32>, vector<2x10x8x12xf32>, vector<2x10x1x12xf32> -> vector<2x10x10x12xf32>
    %7 = vector.extract_strided_slice %6 {offsets = [0, 0, 0, 0], sizes = [2, 10, 8, 12], strides = [1, 1, 1, 1]} : vector<2x10x10x12xf32> to vector<2x10x8x12xf32>
    %8 = vector.extract_strided_slice %6 {offsets = [0, 0, 1, 0], sizes = [2, 10, 8, 12], strides = [1, 1, 1, 1]} : vector<2x10x10x12xf32> to vector<2x10x8x12xf32>
    %9 = vector.extract_strided_slice %6 {offsets = [0, 0, 2, 0], sizes = [2, 10, 8, 12], strides = [1, 1, 1, 1]} : vector<2x10x10x12xf32> to vector<2x10x8x12xf32>
    %10 = tpu.concatenate %7, %8, %9 in 3 : vector<2x10x8x12xf32>, vector<2x10x8x12xf32>, vector<2x10x8x12xf32> -> vector<2x10x8x36xf32>
    %11 = vector.extract_strided_slice %10 {offsets = [0, 0, 0, 0], sizes = [2, 8, 8, 36], strides = [1, 1, 1, 1]} : vector<2x10x8x36xf32> to vector<2x8x8x36xf32>
    %12 = vector.extract_strided_slice %10 {offsets = [0, 1, 0, 0], sizes = [2, 8, 8, 36], strides = [1, 1, 1, 1]} : vector<2x10x8x36xf32> to vector<2x8x8x36xf32>
    %13 = vector.extract_strided_slice %10 {offsets = [0, 2, 0, 0], sizes = [2, 8, 8, 36], strides = [1, 1, 1, 1]} : vector<2x10x8x36xf32> to vector<2x8x8x36xf32>
    %14 = tpu.concatenate %11, %12, %13 in 3 : vector<2x8x8x36xf32>, vector<2x8x8x36xf32>, vector<2x8x8x36xf32> -> vector<2x8x8x108xf32>
    %15 = vector.shape_cast %14 : vector<2x8x8x108xf32> to vector<128x108xf32>
    %16 = arith.truncf %15 : vector<128x108xf32> to vector<128x108xbf16>
    %cst_8 = arith.constant dense<0.000000e+00> : vector<128x32xf32>
    %17 = tpu.matmul %16, %1, %cst_8 {dimension_numbers = #tpu.dot_dimension_numbers<[1], [0], [0], [1], [0, 0, 1, 1], [], []>} : vector<128x108xbf16>, vector<108x32xbf16>, vector<128x32xf32> -> vector<128x32xf32>
    %18 = vector.broadcast %2 : vector<1x32xf32> to vector<128x32xf32>
    %19 = arith.addf %17, %18 : vector<128x32xf32>
    %cst_9 = arith.constant 0.000000e+00 : f32
    %20 = vector.broadcast %cst_9 : f32 to vector<128x32xf32>
    %21 = arith.maximumf %19, %20 : vector<128x32xf32>
    %22 = vector.shape_cast %21 : vector<128x32xf32> to vector<2x8x8x32xf32>
    %c0_10 = arith.constant 0 : index
    %c0_11 = arith.constant 0 : index
    %c0_12 = arith.constant 0 : index
    %23 = vector.load %arg3[%c0_10, %c0_11, %c0_12] : memref<2x288x32xbf16, #tpu.memory_space<vmem>>, vector<1x288x32xbf16>
    %24 = vector.shape_cast %23 : vector<1x288x32xbf16> to vector<288x32xbf16>
    %cst_13 = arith.constant 0.000000e+00 : f32
    %25 = vector.broadcast %cst_13 : f32 to vector<2x1x8x32xf32>
    %26 = tpu.concatenate %25, %22, %25 in 1 : vector<2x1x8x32xf32>, vector<2x8x8x32xf32>, vector<2x1x8x32xf32> -> vector<2x10x8x32xf32>
    %cst_14 = arith.constant 0.000000e+00 : f32
    %27 = vector.broadcast %cst_14 : f32 to vector<2x10x1x32xf32>
    %28 = tpu.concatenate %27, %26, %27 in 2 : vector<2x10x1x32xf32>, vector<2x10x8x32xf32>, vector<2x10x1x32xf32> -> vector<2x10x10x32xf32>
    %29 = vector.extract_strided_slice %28 {offsets = [0, 0, 0, 0], sizes = [2, 10, 8, 32], strides = [1, 1, 1, 1]} : vector<2x10x10x32xf32> to vector<2x10x8x32xf32>
    %30 = vector.extract_strided_slice %28 {offsets = [0, 0, 1, 0], sizes = [2, 10, 8, 32], strides = [1, 1, 1, 1]} : vector<2x10x10x32xf32> to vector<2x10x8x32xf32>
    %31 = vector.extract_strided_slice %28 {offsets = [0, 0, 2, 0], sizes = [2, 10, 8, 32], strides = [1, 1, 1, 1]} : vector<2x10x10x32xf32> to vector<2x10x8x32xf32>
    %32 = tpu.concatenate %29, %30, %31 in 3 : vector<2x10x8x32xf32>, vector<2x10x8x32xf32>, vector<2x10x8x32xf32> -> vector<2x10x8x96xf32>
    %33 = vector.extract_strided_slice %32 {offsets = [0, 0, 0, 0], sizes = [2, 8, 8, 96], strides = [1, 1, 1, 1]} : vector<2x10x8x96xf32> to vector<2x8x8x96xf32>
    %34 = vector.extract_strided_slice %32 {offsets = [0, 1, 0, 0], sizes = [2, 8, 8, 96], strides = [1, 1, 1, 1]} : vector<2x10x8x96xf32> to vector<2x8x8x96xf32>
    %35 = vector.extract_strided_slice %32 {offsets = [0, 2, 0, 0], sizes = [2, 8, 8, 96], strides = [1, 1, 1, 1]} : vector<2x10x8x96xf32> to vector<2x8x8x96xf32>
    %36 = tpu.concatenate %33, %34, %35 in 3 : vector<2x8x8x96xf32>, vector<2x8x8x96xf32>, vector<2x8x8x96xf32> -> vector<2x8x8x288xf32>
    %37 = vector.shape_cast %36 : vector<2x8x8x288xf32> to vector<128x288xf32>
    %38 = arith.truncf %37 : vector<128x288xf32> to vector<128x288xbf16>
    %cst_15 = arith.constant dense<0.000000e+00> : vector<128x32xf32>
    %39 = tpu.matmul %38, %24, %cst_15 {dimension_numbers = #tpu.dot_dimension_numbers<[1], [0], [0], [1], [0, 0, 1, 1], [], []>} : vector<128x288xbf16>, vector<288x32xbf16>, vector<128x32xf32> -> vector<128x32xf32>
    %c0_16 = arith.constant 0 : index
    %c0_17 = arith.constant 0 : index
    %c0_18 = arith.constant 0 : index
    %40 = vector.load %arg4[%c0_16, %c0_17, %c0_18] : memref<2x1x32xf32, #tpu.memory_space<vmem>>, vector<1x1x32xf32>
    %41 = vector.shape_cast %40 : vector<1x1x32xf32> to vector<1x32xf32>
    %c0_19 = arith.constant 0 : index
    %c0_20 = arith.constant 0 : index
    %c0_21 = arith.constant 0 : index
    %42 = vector.load %arg5[%c0_19, %c0_20, %c0_21] : memref<2x1x32xf32, #tpu.memory_space<vmem>>, vector<1x1x32xf32>
    %43 = vector.shape_cast %42 : vector<1x1x32xf32> to vector<1x32xf32>
    %cst_22 = arith.constant dense<0.000000e+00> : vector<32xf32>
    %44 = vector.multi_reduction <add>, %39, %cst_22 [0] : vector<128x32xf32> to vector<32xf32>
    %45 = vector.shape_cast %44 : vector<32xf32> to vector<1x32xf32>
    %46 = arith.mulf %39, %39 : vector<128x32xf32>
    %cst_23 = arith.constant dense<0.000000e+00> : vector<32xf32>
    %47 = vector.multi_reduction <add>, %46, %cst_23 [0] : vector<128x32xf32> to vector<32xf32>
    %48 = vector.shape_cast %47 : vector<32xf32> to vector<1x32xf32>
    %cst_24 = arith.constant 7.812500e-03 : f32
    %49 = vector.broadcast %cst_24 : f32 to vector<1x32xf32>
    %50 = arith.mulf %45, %49 : vector<1x32xf32>
    %cst_25 = arith.constant 7.812500e-03 : f32
    %51 = vector.broadcast %cst_25 : f32 to vector<1x32xf32>
    %52 = arith.mulf %48, %51 : vector<1x32xf32>
    %53 = arith.mulf %50, %50 : vector<1x32xf32>
    %54 = arith.subf %52, %53 : vector<1x32xf32>
    %cst_26 = arith.constant 0.000000e+00 : f32
    %55 = vector.broadcast %cst_26 : f32 to vector<1x32xf32>
    %56 = arith.maximumf %54, %55 : vector<1x32xf32>
    %cst_27 = arith.constant 9.99999974E-6 : f32
    %57 = vector.broadcast %cst_27 : f32 to vector<1x32xf32>
    %58 = arith.addf %56, %57 : vector<1x32xf32>
    %59 = math.rsqrt %58 : vector<1x32xf32>
    %60 = arith.mulf %41, %59 : vector<1x32xf32>
    %61 = arith.mulf %50, %60 : vector<1x32xf32>
    %62 = arith.subf %43, %61 : vector<1x32xf32>
    %63 = vector.broadcast %60 : vector<1x32xf32> to vector<128x32xf32>
    %64 = arith.mulf %39, %63 : vector<128x32xf32>
    %65 = vector.broadcast %62 : vector<1x32xf32> to vector<128x32xf32>
    %66 = arith.addf %64, %65 : vector<128x32xf32>
    %cst_28 = arith.constant 0.000000e+00 : f32
    %67 = vector.broadcast %cst_28 : f32 to vector<128x32xf32>
    %68 = arith.maximumf %66, %67 : vector<128x32xf32>
    %69 = vector.shape_cast %68 : vector<128x32xf32> to vector<2x8x8x32xf32>
    %c0_29 = arith.constant 0 : index
    %c0_30 = arith.constant 0 : index
    %c0_31 = arith.constant 0 : index
    %70 = vector.load %arg6[%c0_29, %c0_30, %c0_31] : memref<2x288x32xbf16, #tpu.memory_space<vmem>>, vector<1x288x32xbf16>
    %71 = vector.shape_cast %70 : vector<1x288x32xbf16> to vector<288x32xbf16>
    %cst_32 = arith.constant 0.000000e+00 : f32
    %72 = vector.broadcast %cst_32 : f32 to vector<2x1x8x32xf32>
    %73 = tpu.concatenate %72, %69, %72 in 1 : vector<2x1x8x32xf32>, vector<2x8x8x32xf32>, vector<2x1x8x32xf32> -> vector<2x10x8x32xf32>
    %cst_33 = arith.constant 0.000000e+00 : f32
    %74 = vector.broadcast %cst_33 : f32 to vector<2x10x1x32xf32>
    %75 = tpu.concatenate %74, %73, %74 in 2 : vector<2x10x1x32xf32>, vector<2x10x8x32xf32>, vector<2x10x1x32xf32> -> vector<2x10x10x32xf32>
    %76 = vector.extract_strided_slice %75 {offsets = [0, 0, 0, 0], sizes = [2, 10, 8, 32], strides = [1, 1, 1, 1]} : vector<2x10x10x32xf32> to vector<2x10x8x32xf32>
    %77 = vector.extract_strided_slice %75 {offsets = [0, 0, 1, 0], sizes = [2, 10, 8, 32], strides = [1, 1, 1, 1]} : vector<2x10x10x32xf32> to vector<2x10x8x32xf32>
    %78 = vector.extract_strided_slice %75 {offsets = [0, 0, 2, 0], sizes = [2, 10, 8, 32], strides = [1, 1, 1, 1]} : vector<2x10x10x32xf32> to vector<2x10x8x32xf32>
    %79 = tpu.concatenate %76, %77, %78 in 3 : vector<2x10x8x32xf32>, vector<2x10x8x32xf32>, vector<2x10x8x32xf32> -> vector<2x10x8x96xf32>
    %80 = vector.extract_strided_slice %79 {offsets = [0, 0, 0, 0], sizes = [2, 8, 8, 96], strides = [1, 1, 1, 1]} : vector<2x10x8x96xf32> to vector<2x8x8x96xf32>
    %81 = vector.extract_strided_slice %79 {offsets = [0, 1, 0, 0], sizes = [2, 8, 8, 96], strides = [1, 1, 1, 1]} : vector<2x10x8x96xf32> to vector<2x8x8x96xf32>
    %82 = vector.extract_strided_slice %79 {offsets = [0, 2, 0, 0], sizes = [2, 8, 8, 96], strides = [1, 1, 1, 1]} : vector<2x10x8x96xf32> to vector<2x8x8x96xf32>
    %83 = tpu.concatenate %80, %81, %82 in 3 : vector<2x8x8x96xf32>, vector<2x8x8x96xf32>, vector<2x8x8x96xf32> -> vector<2x8x8x288xf32>
    %84 = vector.shape_cast %83 : vector<2x8x8x288xf32> to vector<128x288xf32>
    %85 = arith.truncf %84 : vector<128x288xf32> to vector<128x288xbf16>
    %cst_34 = arith.constant dense<0.000000e+00> : vector<128x32xf32>
    %86 = tpu.matmul %85, %71, %cst_34 {dimension_numbers = #tpu.dot_dimension_numbers<[1], [0], [0], [1], [0, 0, 1, 1], [], []>} : vector<128x288xbf16>, vector<288x32xbf16>, vector<128x32xf32> -> vector<128x32xf32>
    %c0_35 = arith.constant 0 : index
    %c0_36 = arith.constant 0 : index
    %c0_37 = arith.constant 0 : index
    %87 = vector.load %arg7[%c0_35, %c0_36, %c0_37] : memref<2x1x32xf32, #tpu.memory_space<vmem>>, vector<1x1x32xf32>
    %88 = vector.shape_cast %87 : vector<1x1x32xf32> to vector<1x32xf32>
    %c0_38 = arith.constant 0 : index
    %c0_39 = arith.constant 0 : index
    %c0_40 = arith.constant 0 : index
    %89 = vector.load %arg8[%c0_38, %c0_39, %c0_40] : memref<2x1x32xf32, #tpu.memory_space<vmem>>, vector<1x1x32xf32>
    %90 = vector.shape_cast %89 : vector<1x1x32xf32> to vector<1x32xf32>
    %cst_41 = arith.constant dense<0.000000e+00> : vector<32xf32>
    %91 = vector.multi_reduction <add>, %86, %cst_41 [0] : vector<128x32xf32> to vector<32xf32>
    %92 = vector.shape_cast %91 : vector<32xf32> to vector<1x32xf32>
    %93 = arith.mulf %86, %86 : vector<128x32xf32>
    %cst_42 = arith.constant dense<0.000000e+00> : vector<32xf32>
    %94 = vector.multi_reduction <add>, %93, %cst_42 [0] : vector<128x32xf32> to vector<32xf32>
    %95 = vector.shape_cast %94 : vector<32xf32> to vector<1x32xf32>
    %cst_43 = arith.constant 7.812500e-03 : f32
    %96 = vector.broadcast %cst_43 : f32 to vector<1x32xf32>
    %97 = arith.mulf %92, %96 : vector<1x32xf32>
    %cst_44 = arith.constant 7.812500e-03 : f32
    %98 = vector.broadcast %cst_44 : f32 to vector<1x32xf32>
    %99 = arith.mulf %95, %98 : vector<1x32xf32>
    %100 = arith.mulf %97, %97 : vector<1x32xf32>
    %101 = arith.subf %99, %100 : vector<1x32xf32>
    %cst_45 = arith.constant 0.000000e+00 : f32
    %102 = vector.broadcast %cst_45 : f32 to vector<1x32xf32>
    %103 = arith.maximumf %101, %102 : vector<1x32xf32>
    %cst_46 = arith.constant 9.99999974E-6 : f32
    %104 = vector.broadcast %cst_46 : f32 to vector<1x32xf32>
    %105 = arith.addf %103, %104 : vector<1x32xf32>
    %106 = math.rsqrt %105 : vector<1x32xf32>
    %107 = arith.mulf %88, %106 : vector<1x32xf32>
    %108 = arith.mulf %97, %107 : vector<1x32xf32>
    %109 = arith.subf %90, %108 : vector<1x32xf32>
    %110 = vector.broadcast %107 : vector<1x32xf32> to vector<128x32xf32>
    %111 = arith.mulf %86, %110 : vector<128x32xf32>
    %112 = vector.broadcast %109 : vector<1x32xf32> to vector<128x32xf32>
    %113 = arith.addf %111, %112 : vector<128x32xf32>
    %cst_47 = arith.constant 0.000000e+00 : f32
    %114 = vector.broadcast %cst_47 : f32 to vector<128x32xf32>
    %115 = arith.maximumf %113, %114 : vector<128x32xf32>
    %116 = vector.shape_cast %115 : vector<128x32xf32> to vector<2x8x8x32xf32>
    %c1 = arith.constant 1 : index
    %c0_48 = arith.constant 0 : index
    %c0_49 = arith.constant 0 : index
    %117 = vector.load %arg3[%c1, %c0_48, %c0_49] : memref<2x288x32xbf16, #tpu.memory_space<vmem>>, vector<1x288x32xbf16>
    %118 = vector.shape_cast %117 : vector<1x288x32xbf16> to vector<288x32xbf16>
    %cst_50 = arith.constant 0.000000e+00 : f32
    %119 = vector.broadcast %cst_50 : f32 to vector<2x1x8x32xf32>
    %120 = tpu.concatenate %119, %116, %119 in 1 : vector<2x1x8x32xf32>, vector<2x8x8x32xf32>, vector<2x1x8x32xf32> -> vector<2x10x8x32xf32>
    %cst_51 = arith.constant 0.000000e+00 : f32
    %121 = vector.broadcast %cst_51 : f32 to vector<2x10x1x32xf32>
    %122 = tpu.concatenate %121, %120, %121 in 2 : vector<2x10x1x32xf32>, vector<2x10x8x32xf32>, vector<2x10x1x32xf32> -> vector<2x10x10x32xf32>
    %123 = vector.extract_strided_slice %122 {offsets = [0, 0, 0, 0], sizes = [2, 10, 8, 32], strides = [1, 1, 1, 1]} : vector<2x10x10x32xf32> to vector<2x10x8x32xf32>
    %124 = vector.extract_strided_slice %122 {offsets = [0, 0, 1, 0], sizes = [2, 10, 8, 32], strides = [1, 1, 1, 1]} : vector<2x10x10x32xf32> to vector<2x10x8x32xf32>
    %125 = vector.extract_strided_slice %122 {offsets = [0, 0, 2, 0], sizes = [2, 10, 8, 32], strides = [1, 1, 1, 1]} : vector<2x10x10x32xf32> to vector<2x10x8x32xf32>
    %126 = tpu.concatenate %123, %124, %125 in 3 : vector<2x10x8x32xf32>, vector<2x10x8x32xf32>, vector<2x10x8x32xf32> -> vector<2x10x8x96xf32>
    %127 = vector.extract_strided_slice %126 {offsets = [0, 0, 0, 0], sizes = [2, 8, 8, 96], strides = [1, 1, 1, 1]} : vector<2x10x8x96xf32> to vector<2x8x8x96xf32>
    %128 = vector.extract_strided_slice %126 {offsets = [0, 1, 0, 0], sizes = [2, 8, 8, 96], strides = [1, 1, 1, 1]} : vector<2x10x8x96xf32> to vector<2x8x8x96xf32>
    %129 = vector.extract_strided_slice %126 {offsets = [0, 2, 0, 0], sizes = [2, 8, 8, 96], strides = [1, 1, 1, 1]} : vector<2x10x8x96xf32> to vector<2x8x8x96xf32>
    %130 = tpu.concatenate %127, %128, %129 in 3 : vector<2x8x8x96xf32>, vector<2x8x8x96xf32>, vector<2x8x8x96xf32> -> vector<2x8x8x288xf32>
    %131 = vector.shape_cast %130 : vector<2x8x8x288xf32> to vector<128x288xf32>
    %132 = arith.truncf %131 : vector<128x288xf32> to vector<128x288xbf16>
    %cst_52 = arith.constant dense<0.000000e+00> : vector<128x32xf32>
    %133 = tpu.matmul %132, %118, %cst_52 {dimension_numbers = #tpu.dot_dimension_numbers<[1], [0], [0], [1], [0, 0, 1, 1], [], []>} : vector<128x288xbf16>, vector<288x32xbf16>, vector<128x32xf32> -> vector<128x32xf32>
    %c1_53 = arith.constant 1 : index
    %c0_54 = arith.constant 0 : index
    %c0_55 = arith.constant 0 : index
    %134 = vector.load %arg4[%c1_53, %c0_54, %c0_55] : memref<2x1x32xf32, #tpu.memory_space<vmem>>, vector<1x1x32xf32>
    %135 = vector.shape_cast %134 : vector<1x1x32xf32> to vector<1x32xf32>
    %c1_56 = arith.constant 1 : index
    %c0_57 = arith.constant 0 : index
    %c0_58 = arith.constant 0 : index
    %136 = vector.load %arg5[%c1_56, %c0_57, %c0_58] : memref<2x1x32xf32, #tpu.memory_space<vmem>>, vector<1x1x32xf32>
    %137 = vector.shape_cast %136 : vector<1x1x32xf32> to vector<1x32xf32>
    %cst_59 = arith.constant dense<0.000000e+00> : vector<32xf32>
    %138 = vector.multi_reduction <add>, %133, %cst_59 [0] : vector<128x32xf32> to vector<32xf32>
    %139 = vector.shape_cast %138 : vector<32xf32> to vector<1x32xf32>
    %140 = arith.mulf %133, %133 : vector<128x32xf32>
    %cst_60 = arith.constant dense<0.000000e+00> : vector<32xf32>
    %141 = vector.multi_reduction <add>, %140, %cst_60 [0] : vector<128x32xf32> to vector<32xf32>
    %142 = vector.shape_cast %141 : vector<32xf32> to vector<1x32xf32>
    %cst_61 = arith.constant 7.812500e-03 : f32
    %143 = vector.broadcast %cst_61 : f32 to vector<1x32xf32>
    %144 = arith.mulf %139, %143 : vector<1x32xf32>
    %cst_62 = arith.constant 7.812500e-03 : f32
    %145 = vector.broadcast %cst_62 : f32 to vector<1x32xf32>
    %146 = arith.mulf %142, %145 : vector<1x32xf32>
    %147 = arith.mulf %144, %144 : vector<1x32xf32>
    %148 = arith.subf %146, %147 : vector<1x32xf32>
    %cst_63 = arith.constant 0.000000e+00 : f32
    %149 = vector.broadcast %cst_63 : f32 to vector<1x32xf32>
    %150 = arith.maximumf %148, %149 : vector<1x32xf32>
    %cst_64 = arith.constant 9.99999974E-6 : f32
    %151 = vector.broadcast %cst_64 : f32 to vector<1x32xf32>
    %152 = arith.addf %150, %151 : vector<1x32xf32>
    %153 = math.rsqrt %152 : vector<1x32xf32>
    %154 = arith.mulf %135, %153 : vector<1x32xf32>
    %155 = arith.mulf %144, %154 : vector<1x32xf32>
    %156 = arith.subf %137, %155 : vector<1x32xf32>
    %157 = vector.broadcast %154 : vector<1x32xf32> to vector<128x32xf32>
    %158 = arith.mulf %133, %157 : vector<128x32xf32>
    %159 = vector.broadcast %156 : vector<1x32xf32> to vector<128x32xf32>
    %160 = arith.addf %158, %159 : vector<128x32xf32>
    %cst_65 = arith.constant 0.000000e+00 : f32
    %161 = vector.broadcast %cst_65 : f32 to vector<128x32xf32>
    %162 = arith.maximumf %160, %161 : vector<128x32xf32>
    %163 = vector.shape_cast %162 : vector<128x32xf32> to vector<2x8x8x32xf32>
    %c1_66 = arith.constant 1 : index
    %c0_67 = arith.constant 0 : index
    %c0_68 = arith.constant 0 : index
    %164 = vector.load %arg6[%c1_66, %c0_67, %c0_68] : memref<2x288x32xbf16, #tpu.memory_space<vmem>>, vector<1x288x32xbf16>
    %165 = vector.shape_cast %164 : vector<1x288x32xbf16> to vector<288x32xbf16>
    %cst_69 = arith.constant 0.000000e+00 : f32
    %166 = vector.broadcast %cst_69 : f32 to vector<2x1x8x32xf32>
    %167 = tpu.concatenate %166, %163, %166 in 1 : vector<2x1x8x32xf32>, vector<2x8x8x32xf32>, vector<2x1x8x32xf32> -> vector<2x10x8x32xf32>
    %cst_70 = arith.constant 0.000000e+00 : f32
    %168 = vector.broadcast %cst_70 : f32 to vector<2x10x1x32xf32>
    %169 = tpu.concatenate %168, %167, %168 in 2 : vector<2x10x1x32xf32>, vector<2x10x8x32xf32>, vector<2x10x1x32xf32> -> vector<2x10x10x32xf32>
    %170 = vector.extract_strided_slice %169 {offsets = [0, 0, 0, 0], sizes = [2, 10, 8, 32], strides = [1, 1, 1, 1]} : vector<2x10x10x32xf32> to vector<2x10x8x32xf32>
    %171 = vector.extract_strided_slice %169 {offsets = [0, 0, 1, 0], sizes = [2, 10, 8, 32], strides = [1, 1, 1, 1]} : vector<2x10x10x32xf32> to vector<2x10x8x32xf32>
    %172 = vector.extract_strided_slice %169 {offsets = [0, 0, 2, 0], sizes = [2, 10, 8, 32], strides = [1, 1, 1, 1]} : vector<2x10x10x32xf32> to vector<2x10x8x32xf32>
    %173 = tpu.concatenate %170, %171, %172 in 3 : vector<2x10x8x32xf32>, vector<2x10x8x32xf32>, vector<2x10x8x32xf32> -> vector<2x10x8x96xf32>
    %174 = vector.extract_strided_slice %173 {offsets = [0, 0, 0, 0], sizes = [2, 8, 8, 96], strides = [1, 1, 1, 1]} : vector<2x10x8x96xf32> to vector<2x8x8x96xf32>
    %175 = vector.extract_strided_slice %173 {offsets = [0, 1, 0, 0], sizes = [2, 8, 8, 96], strides = [1, 1, 1, 1]} : vector<2x10x8x96xf32> to vector<2x8x8x96xf32>
    %176 = vector.extract_strided_slice %173 {offsets = [0, 2, 0, 0], sizes = [2, 8, 8, 96], strides = [1, 1, 1, 1]} : vector<2x10x8x96xf32> to vector<2x8x8x96xf32>
    %177 = tpu.concatenate %174, %175, %176 in 3 : vector<2x8x8x96xf32>, vector<2x8x8x96xf32>, vector<2x8x8x96xf32> -> vector<2x8x8x288xf32>
    %178 = vector.shape_cast %177 : vector<2x8x8x288xf32> to vector<128x288xf32>
    %179 = arith.truncf %178 : vector<128x288xf32> to vector<128x288xbf16>
    %cst_71 = arith.constant dense<0.000000e+00> : vector<128x32xf32>
    %180 = tpu.matmul %179, %165, %cst_71 {dimension_numbers = #tpu.dot_dimension_numbers<[1], [0], [0], [1], [0, 0, 1, 1], [], []>} : vector<128x288xbf16>, vector<288x32xbf16>, vector<128x32xf32> -> vector<128x32xf32>
    %c1_72 = arith.constant 1 : index
    %c0_73 = arith.constant 0 : index
    %c0_74 = arith.constant 0 : index
    %181 = vector.load %arg7[%c1_72, %c0_73, %c0_74] : memref<2x1x32xf32, #tpu.memory_space<vmem>>, vector<1x1x32xf32>
    %182 = vector.shape_cast %181 : vector<1x1x32xf32> to vector<1x32xf32>
    %c1_75 = arith.constant 1 : index
    %c0_76 = arith.constant 0 : index
    %c0_77 = arith.constant 0 : index
    %183 = vector.load %arg8[%c1_75, %c0_76, %c0_77] : memref<2x1x32xf32, #tpu.memory_space<vmem>>, vector<1x1x32xf32>
    %184 = vector.shape_cast %183 : vector<1x1x32xf32> to vector<1x32xf32>
    %cst_78 = arith.constant dense<0.000000e+00> : vector<32xf32>
    %185 = vector.multi_reduction <add>, %180, %cst_78 [0] : vector<128x32xf32> to vector<32xf32>
    %186 = vector.shape_cast %185 : vector<32xf32> to vector<1x32xf32>
    %187 = arith.mulf %180, %180 : vector<128x32xf32>
    %cst_79 = arith.constant dense<0.000000e+00> : vector<32xf32>
    %188 = vector.multi_reduction <add>, %187, %cst_79 [0] : vector<128x32xf32> to vector<32xf32>
    %189 = vector.shape_cast %188 : vector<32xf32> to vector<1x32xf32>
    %cst_80 = arith.constant 7.812500e-03 : f32
    %190 = vector.broadcast %cst_80 : f32 to vector<1x32xf32>
    %191 = arith.mulf %186, %190 : vector<1x32xf32>
    %cst_81 = arith.constant 7.812500e-03 : f32
    %192 = vector.broadcast %cst_81 : f32 to vector<1x32xf32>
    %193 = arith.mulf %189, %192 : vector<1x32xf32>
    %194 = arith.mulf %191, %191 : vector<1x32xf32>
    %195 = arith.subf %193, %194 : vector<1x32xf32>
    %cst_82 = arith.constant 0.000000e+00 : f32
    %196 = vector.broadcast %cst_82 : f32 to vector<1x32xf32>
    %197 = arith.maximumf %195, %196 : vector<1x32xf32>
    %cst_83 = arith.constant 9.99999974E-6 : f32
    %198 = vector.broadcast %cst_83 : f32 to vector<1x32xf32>
    %199 = arith.addf %197, %198 : vector<1x32xf32>
    %200 = math.rsqrt %199 : vector<1x32xf32>
    %201 = arith.mulf %182, %200 : vector<1x32xf32>
    %202 = arith.mulf %191, %201 : vector<1x32xf32>
    %203 = arith.subf %184, %202 : vector<1x32xf32>
    %204 = vector.broadcast %201 : vector<1x32xf32> to vector<128x32xf32>
    %205 = arith.mulf %180, %204 : vector<128x32xf32>
    %206 = vector.broadcast %203 : vector<1x32xf32> to vector<128x32xf32>
    %207 = arith.addf %205, %206 : vector<128x32xf32>
    %cst_84 = arith.constant 0.000000e+00 : f32
    %208 = vector.broadcast %cst_84 : f32 to vector<128x32xf32>
    %209 = arith.maximumf %207, %208 : vector<128x32xf32>
    %210 = vector.shape_cast %209 : vector<128x32xf32> to vector<2x8x8x32xf32>
    %c0_85 = arith.constant 0 : index
    %c0_86 = arith.constant 0 : index
    %c0_87 = arith.constant 0 : index
    %c0_88 = arith.constant 0 : index
    %211 = vector.load %arg9[%c0_85, %c0_86, %c0_87, %c0_88] : memref<2x8x8x32xf32, #tpu.memory_space<vmem>>, vector<2x8x8x32xf32>
    tpu.vector_store %arg9[%c0_85, %c0_86, %c0_87, %c0_88], %210 {strides = array<i32>} : memref<2x8x8x32xf32, #tpu.memory_space<vmem>>, vector<2x8x8x32xf32>,
    return
  }
}

module attributes {stable_mosaic.version = 11 : i64} {
  func.func @_head_kernel(%arg0: memref<2x2048xf32, #tpu.memory_space<vmem>>, %arg1: memref<2x64xf32, #tpu.memory_space<vmem>>, %arg2: memref<2048x64xbf16, #tpu.memory_space<vmem>>, %arg3: memref<1x64xf32, #tpu.memory_space<vmem>>, %arg4: memref<64x64xbf16, #tpu.memory_space<vmem>>, %arg5: memref<1x64xf32, #tpu.memory_space<vmem>>, %arg6: memref<1x64xf32, #tpu.memory_space<vmem>>, %arg7: memref<1x64xf32, #tpu.memory_space<vmem>>, %arg8: memref<64x64xbf16, #tpu.memory_space<vmem>>, %arg9: memref<1x64xf32, #tpu.memory_space<vmem>>, %arg10: memref<2x64xf32, #tpu.memory_space<vmem>>) attributes {dimension_semantics = [], scalar_prefetch = 0 : i64, scratch_operands = 0 : i64, tpu.core_type = #tpu.core_type<tc>} {
    %c0 = arith.constant 0 : index
    %c0_0 = arith.constant 0 : index
    %0 = vector.load %arg0[%c0, %c0_0] : memref<2x2048xf32, #tpu.memory_space<vmem>>, vector<2x2048xf32>
    %1 = arith.truncf %0 : vector<2x2048xf32> to vector<2x2048xbf16>
    %c0_1 = arith.constant 0 : index
    %c0_2 = arith.constant 0 : index
    %2 = vector.load %arg2[%c0_1, %c0_2] : memref<2048x64xbf16, #tpu.memory_space<vmem>>, vector<2048x64xbf16>
    %cst = arith.constant dense<0.000000e+00> : vector<2x64xf32>
    %3 = tpu.matmul %1, %2, %cst {dimension_numbers = #tpu.dot_dimension_numbers<[1], [0], [0], [1], [0, 0, 1, 1], [], []>} : vector<2x2048xbf16>, vector<2048x64xbf16>, vector<2x64xf32> -> vector<2x64xf32>
    %c0_3 = arith.constant 0 : index
    %c0_4 = arith.constant 0 : index
    %4 = vector.load %arg3[%c0_3, %c0_4] : memref<1x64xf32, #tpu.memory_space<vmem>>, vector<1x64xf32>
    %5 = vector.broadcast %4 : vector<1x64xf32> to vector<2x64xf32>
    %6 = arith.addf %3, %5 : vector<2x64xf32>
    %cst_5 = arith.constant 0.000000e+00 : f32
    %7 = vector.broadcast %cst_5 : f32 to vector<2x64xf32>
    %8 = arith.maximumf %6, %7 : vector<2x64xf32>
    %c0_6 = arith.constant 0 : index
    %c0_7 = arith.constant 0 : index
    %9 = vector.load %arg1[%c0_6, %c0_7] : memref<2x64xf32, #tpu.memory_space<vmem>>, vector<2x64xf32>
    %10 = arith.truncf %9 : vector<2x64xf32> to vector<2x64xbf16>
    %c0_8 = arith.constant 0 : index
    %c0_9 = arith.constant 0 : index
    %11 = vector.load %arg4[%c0_8, %c0_9] : memref<64x64xbf16, #tpu.memory_space<vmem>>, vector<64x64xbf16>
    %cst_10 = arith.constant dense<0.000000e+00> : vector<2x64xf32>
    %12 = tpu.matmul %10, %11, %cst_10 {dimension_numbers = #tpu.dot_dimension_numbers<[1], [0], [0], [1], [0, 0, 1, 1], [], []>} : vector<2x64xbf16>, vector<64x64xbf16>, vector<2x64xf32> -> vector<2x64xf32>
    %c0_11 = arith.constant 0 : index
    %c0_12 = arith.constant 0 : index
    %13 = vector.load %arg5[%c0_11, %c0_12] : memref<1x64xf32, #tpu.memory_space<vmem>>, vector<1x64xf32>
    %14 = vector.broadcast %13 : vector<1x64xf32> to vector<2x64xf32>
    %15 = arith.addf %12, %14 : vector<2x64xf32>
    %16 = arith.addf %8, %15 : vector<2x64xf32>
    %cst_13 = arith.constant dense<0.000000e+00> : vector<64xf32>
    %17 = vector.multi_reduction <add>, %16, %cst_13 [0] : vector<2x64xf32> to vector<64xf32>
    %18 = vector.shape_cast %17 : vector<64xf32> to vector<1x64xf32>
    %19 = arith.mulf %16, %16 : vector<2x64xf32>
    %cst_14 = arith.constant dense<0.000000e+00> : vector<64xf32>
    %20 = vector.multi_reduction <add>, %19, %cst_14 [0] : vector<2x64xf32> to vector<64xf32>
    %21 = vector.shape_cast %20 : vector<64xf32> to vector<1x64xf32>
    %cst_15 = arith.constant 5.000000e-01 : f32
    %22 = vector.broadcast %cst_15 : f32 to vector<1x64xf32>
    %23 = arith.mulf %18, %22 : vector<1x64xf32>
    %cst_16 = arith.constant 5.000000e-01 : f32
    %24 = vector.broadcast %cst_16 : f32 to vector<1x64xf32>
    %25 = arith.mulf %21, %24 : vector<1x64xf32>
    %26 = arith.mulf %23, %23 : vector<1x64xf32>
    %27 = arith.subf %25, %26 : vector<1x64xf32>
    %cst_17 = arith.constant 0.000000e+00 : f32
    %28 = vector.broadcast %cst_17 : f32 to vector<1x64xf32>
    %29 = arith.maximumf %27, %28 : vector<1x64xf32>
    %c0_18 = arith.constant 0 : index
    %c0_19 = arith.constant 0 : index
    %30 = vector.load %arg6[%c0_18, %c0_19] : memref<1x64xf32, #tpu.memory_space<vmem>>, vector<1x64xf32>
    %cst_20 = arith.constant 9.99999974E-6 : f32
    %31 = vector.broadcast %cst_20 : f32 to vector<1x64xf32>
    %32 = arith.addf %29, %31 : vector<1x64xf32>
    %33 = math.rsqrt %32 : vector<1x64xf32>
    %34 = arith.mulf %30, %33 : vector<1x64xf32>
    %c0_21 = arith.constant 0 : index
    %c0_22 = arith.constant 0 : index
    %35 = vector.load %arg7[%c0_21, %c0_22] : memref<1x64xf32, #tpu.memory_space<vmem>>, vector<1x64xf32>
    %36 = arith.mulf %23, %34 : vector<1x64xf32>
    %37 = arith.subf %35, %36 : vector<1x64xf32>
    %38 = vector.broadcast %34 : vector<1x64xf32> to vector<2x64xf32>
    %39 = arith.mulf %16, %38 : vector<2x64xf32>
    %40 = vector.broadcast %37 : vector<1x64xf32> to vector<2x64xf32>
    %41 = arith.addf %39, %40 : vector<2x64xf32>
    %42 = arith.truncf %41 : vector<2x64xf32> to vector<2x64xbf16>
    %c0_23 = arith.constant 0 : index
    %c0_24 = arith.constant 0 : index
    %43 = vector.load %arg8[%c0_23, %c0_24] : memref<64x64xbf16, #tpu.memory_space<vmem>>, vector<64x64xbf16>
    %cst_25 = arith.constant dense<0.000000e+00> : vector<2x64xf32>
    %44 = tpu.matmul %42, %43, %cst_25 {dimension_numbers = #tpu.dot_dimension_numbers<[1], [0], [0], [1], [0, 0, 1, 1], [], []>} : vector<2x64xbf16>, vector<64x64xbf16>, vector<2x64xf32> -> vector<2x64xf32>
    %c0_26 = arith.constant 0 : index
    %c0_27 = arith.constant 0 : index
    %45 = vector.load %arg9[%c0_26, %c0_27] : memref<1x64xf32, #tpu.memory_space<vmem>>, vector<1x64xf32>
    %46 = vector.broadcast %45 : vector<1x64xf32> to vector<2x64xf32>
    %47 = arith.addf %44, %46 : vector<2x64xf32>
    %cst_28 = arith.constant 0.000000e+00 : f32
    %48 = vector.broadcast %cst_28 : f32 to vector<2x64xf32>
    %49 = arith.subf %48, %47 : vector<2x64xf32>
    %50 = math.exp %49 : vector<2x64xf32>
    %cst_29 = arith.constant 1.000000e+00 : f32
    %51 = vector.broadcast %cst_29 : f32 to vector<2x64xf32>
    %52 = arith.addf %51, %50 : vector<2x64xf32>
    %cst_30 = arith.constant 1.000000e+00 : f32
    %53 = vector.broadcast %cst_30 : f32 to vector<2x64xf32>
    %54 = arith.divf %53, %52 : vector<2x64xf32>
    %c0_31 = arith.constant 0 : index
    %c0_32 = arith.constant 0 : index
    %55 = vector.load %arg10[%c0_31, %c0_32] : memref<2x64xf32, #tpu.memory_space<vmem>>, vector<2x64xf32>
    tpu.vector_store %arg10[%c0_31, %c0_32], %54 {strides = array<i32>} : memref<2x64xf32, #tpu.memory_space<vmem>>, vector<2x64xf32>,
    return
  }
}

</mosaic_0001>

<bundles_post_ra>
// kernel: plain_chessnet_forward.3
= control target key start
LH: loop header
LB: loop body
LE: loop exit
PB: predicated region body
PF: predicated region fallthrough
CT: control target
= control target key end

     0   :  { %s2761_s0 = inlined_call_operand.vmem [shape: f32[2,2048], index: 0, kind: input, shape index: {}]   ;;  %s2762_s1 = inlined_call_operand.vmem [shape: f32[2,64], index: 1, kind: input, shape index: {}]   ;;  %s2763_s2 = inlined_call_operand.vmem [shape: bf16[2048,64], index: 2, kind: input, shape index: {}]   ;;  %s2764_s3 = inlined_call_operand.vmem [shape: f32[1,64], index: 3, kind: input, shape index: {}]   ;;  %s2765_s4 = inlined_call_operand.vmem [shape: bf16[64,64], index: 4, kind: input, shape index: {}]   ;;  %s2766_s5 = inlined_call_operand.vmem [shape: f32[1,64], index: 5, kind: input, shape index: {}]   ;;  %s2767_s6 = inlined_call_operand.vmem [shape: f32[1,64], index: 6, kind: input, shape index: {}]   ;;  %s2768_s7 = inlined_call_operand.vmem [shape: f32[1,64], index: 7, kind: input, shape index: {}]   ;;  %s2769_s8 = inlined_call_operand.vmem [shape: bf16[64,64], index: 8, kind: input, shape index: {}]   ;;  %s2770_s9 = inlined_call_operand.vmem [shape: f32[1,64], index: 9, kind: input, shape index: {}]   ;;  %s2771_s10 = inlined_call_operand.hbm [shape: f32[2,64], index: 10, kind: output, shape index: {}]  }
   0x1   :  { %v2078_v0 = vld [vmem:[%s2763_s2 + $0x38] sm:$0xff]  ;;  %v2077_v4 = vld [vmem:[%s2763_s2 + $0x30] sm:$0xff]  ;;  %v2076_v8 = vld [vmem:[%s2763_s2 + $0x28] sm:$0xff] }
   0x2   :  { %v2094_v1 = vld [vmem:[%s2763_s2 + $0xb8] sm:$0xff]  ;;  %1126 = vmatpush.bf16.msra.mxu0 %v2078_v0  ;;  %v2093_v5 = vld [vmem:[%s2763_s2 + $0xb0] sm:$0xff]  ;;  %v2092_v9 = vld [vmem:[%s2763_s2 + $0xa8] sm:$0xff] }
   0x3   :  { %v2102_v2 = vld [vmem:[%s2763_s2 + $0xf8] sm:$0xff]  ;;  %1152 = vmatpush.bf16.msra.mxu2 %v2094_v1  ;;  %v2101_v6 = vld [vmem:[%s2763_s2 + $0xf0] sm:$0xff]  ;;  %v2100_v10 = vld [vmem:[%s2763_s2 + $0xe8] sm:$0xff] }
   0x4   :  { %v2086_v3 = vld [vmem:[%s2763_s2 + $0x78] sm:$0xff]  ;;  %1165 = vmatpush.bf16.msra.mxu3 %v2102_v2  ;;  %v2085_v7 = vld [vmem:[%s2763_s2 + $0x70] sm:$0xff]  ;;  %v2084_v11 = vld [vmem:[%s2763_s2 + $0x68] sm:$0xff] }
   0x5   :  { %1139 = vmatpush.bf16.msra.mxu1 %v2086_v3  ;;  %v2075_v12 = vld [vmem:[%s2763_s2 + $0x20] sm:$0xff]  ;;  %v2074_v16 = vld [vmem:[%s2763_s2 + $0x18] sm:$0xff]  ;;  %v2073_v20 = vld [vmem:[%s2763_s2 + $0x10] sm:$0xff] }
   0x6   :  { %1127 = vmatpush.bf16.msra.mxu0 %v2077_v4  ;;  %v2091_v13 = vld [vmem:[%s2763_s2 + $0xa0] sm:$0xff]  ;;  %v2090_v17 = vld [vmem:[%s2763_s2 + $0x98] sm:$0xff]  ;;  %v2089_v22 = vld [vmem:[%s2763_s2 + $0x90] sm:$0xff] }
   0x7   :  { %1153 = vmatpush.bf16.msra.mxu2 %v2093_v5  ;;  %v2099_v14 = vld [vmem:[%s2763_s2 + $0xe0] sm:$0xff]  ;;  %v2098_v18 = vld [vmem:[%s2763_s2 + $0xd8] sm:$0xff]  ;;  %v2097_v23 = vld [vmem:[%s2763_s2 + $0xd0] sm:$0xff] }
   0x8   :  { %1166 = vmatpush.bf16.msra.mxu3 %v2101_v6  ;;  %v2083_v15 = vld [vmem:[%s2763_s2 + $0x60] sm:$0xff]  ;;  %v2082_v19 = vld [vmem:[%s2763_s2 + $0x58] sm:$0xff]  ;;  %v2081_v24 = vld [vmem:[%s2763_s2 + $0x50] sm:$0xff] }
   0x9   :  { %1140 = vmatpush.bf16.msra.mxu1 %v2085_v7  ;;  %v37_v21 = vld [vmem:[%s2761_s0] sm:$0xff] }
   0xa   :  { %1128 = vmatpush.bf16.msra.mxu0 %v2076_v8  ;;  %45 = vst [vmem:[#allocation1] ss:$4 sm:$0xff] %v37_v21 }
   0xb   :  { %1154 = vmatpush.bf16.msra.mxu2 %v2092_v9 }
   0xc   :  { %1167 = vmatpush.bf16.msra.mxu3 %v2100_v10 }
   0xd   :  { %1141 = vmatpush.bf16.msra.mxu1 %v2084_v11 }
   0xe   :  { %1129 = vmatpush.bf16.msra.mxu0 %v2075_v12 }
   0xf   :  { %1155 = vmatpush.bf16.msra.mxu2 %v2091_v13 }
  0x10   :  { %1168 = vmatpush.bf16.msra.mxu3 %v2099_v14 }
  0x11   :  { %1142 = vmatpush.bf16.msra.mxu1 %v2083_v15 }
  0x12   :  { %1130 = vmatpush.bf16.msra.mxu0 %v2074_v16 }
  0x13   :  { %1156 = vmatpush.bf16.msra.mxu2 %v2090_v17 }
  0x14   :  { %1169 = vmatpush.bf16.msra.mxu3 %v2098_v18 }
  0x15   :  { %1143 = vmatpush.bf16.msra.mxu1 %v2082_v19 }
  0x16   :  { %15 = vsyncpa [#allocation3], 0  ;;  %1131 = vmatpush.bf16.msra.mxu0 %v2073_v20  ;;  %v2072_v25 = vld [vmem:[%s2763_s2 + $0x8] sm:$0xff]  ;;  %v2071_v29 = vld [vmem:[%s2763_s2] sm:$0xff]  ;;  %vm1373_vm0 = vcmask 523264   ;;  %vm1391_vm1 = vcmask 517120  }
  0x17   :  { %1157 = vmatpush.bf16.msra.mxu2 %v2089_v22  ;;  %v2088_v26 = vld [vmem:[%s2763_s2 + $0x88] sm:$0xff]  ;;  %v2087_v30 = vld [vmem:[%s2763_s2 + $0x80] sm:$0xff]  ;;  %v39_v31 = vld [vmem:[%s2761_s0 + $0x10] sm:$0xff]  ;;  %s1516_s11 = sshll.u32 %s2771_s10, 4  ;;  %s1517_s11 = int_to_ptr.hbm [resolvable:$true] %s1516_s11 }
  0x18   :  { %1170 = vmatpush.bf16.msra.mxu3 %v2097_v23  ;;  %v2096_v27 = vld [vmem:[%s2763_s2 + $0xc8] sm:$0xff]  ;;  %v50_v32 = vld.sshfl [vmem:[#allocation1 + $0x10] sm:$0xff pattern:$0x73625140]  ;;  %v2095_v36 = vld [vmem:[%s2763_s2 + $0xc0] sm:$0xff] }
  0x19   :  { %1144 = vmatpush.bf16.msra.mxu1 %v2081_v24  ;;  %v2080_v28 = vld [vmem:[%s2763_s2 + $0x48] sm:$0xff]  ;;  %v48_v33 = vld.sshfl [vmem:[#allocation1] sm:$0xff pattern:$0x73625140]  ;;  %v2110_v37 = vld [vmem:[%s2763_s2 + $0x138] sm:$0xff]  ;;  %v84_v41 = vpack.c.bf16 %v50_v32, %v50_v32 }
  0x1a   :  { %1132 = vmatpush.bf16.msra.mxu0 %v2072_v25  ;;  %v51_v34 = vld.sshfl [vmem:[#allocation1 + $0x18] sm:$0xff pattern:$0x73625140]  ;;  %v49_v35 = vld.sshfl [vmem:[#allocation1 + $0x8] sm:$0xff pattern:$0x73625140]  ;;  %v82_v44 = vpack.c.bf16 %v48_v33, %v48_v33 }
  0x1b   :  { %1158 = vmatpush.bf16.msra.mxu2 %v2088_v26  ;;  %56 = vst [vmem:[#allocation1] ss:$4 sm:$0xff] %v39_v31  ;;  %v2126_v38 = vld [vmem:[%s2763_s2 + $0x1b8] sm:$0xff]  ;;  %v2079_v40 = vld [vmem:[%s2763_s2 + $0x40] sm:$0xff]  ;;  %v38_v42 = vld [vmem:[%s2761_s0 + $0x8] sm:$0xff]  ;;  %v85_v46 = vpack.c.bf16 %v51_v34, %v51_v34  ;;  %v83_v49 = vpack.c.bf16 %v49_v35, %v49_v35 }
  0x1c   :  { %1171 = vmatpush.bf16.msra.mxu3 %v2096_v27  ;;  %v2134_v39 = vld [vmem:[%s2763_s2 + $0x1f8] sm:$0xff]  ;;  %47 = vst [vmem:[#allocation1 + $0x20] ss:$4 sm:$0xff] %v38_v42  ;;  %v2109_v45 = vld [vmem:[%s2763_s2 + $0x130] sm:$0xff]  ;;  %v2108_v51 = vld [vmem:[%s2763_s2 + $0x128] sm:$0xff] }
  0x1d   :  { %1145 = vmatpush.bf16.msra.mxu1 %v2080_v28  ;;  %v2118_v43 = vld [vmem:[%s2763_s2 + $0x178] sm:$0xff]  ;;  %v2125_v47 = vld [vmem:[%s2763_s2 + $0x1b0] sm:$0xff]  ;;  %v2124_v52 = vld [vmem:[%s2763_s2 + $0x1a8] sm:$0xff] }
  0x1e   :  { %1133 = vmatpush.bf16.msra.mxu0 %v2071_v29  ;;  %v2133_v48 = vld [vmem:[%s2763_s2 + $0x1f0] sm:$0xff]  ;;  %v2132_v53 = vld [vmem:[%s2763_s2 + $0x1e8] sm:$0xff]  ;;  %v2107_v56 = vld [vmem:[%s2763_s2 + $0x120] sm:$0xff] }
  0x1f   :  { %1159 = vmatpush.bf16.msra.mxu2 %v2087_v30  ;;  %v2117_v50 = vld [vmem:[%s2763_s2 + $0x170] sm:$0xff]  ;;  %v2116_v54 = vld [vmem:[%s2763_s2 + $0x168] sm:$0xff]  ;;  %v40_v58 = vld [vmem:[%s2761_s0 + $0x18] sm:$0xff] }
  0x20   :  { %1172 = vmatpush.bf16.msra.mxu3 %v2095_v36  ;;  %v2123_v61 = vld [vmem:[%s2763_s2 + $0x1a0] sm:$0xff]  ;;  %v2106_v0 = vld [vmem:[%s2763_s2 + $0x118] sm:$0xff]  ;;  %v2105_v4 = vld [vmem:[%s2763_s2 + $0x110] sm:$0xff] }
  0x21   :  { %1146 = vmatpush.bf16.msra.mxu1 %v2079_v40  ;;  %1134 = vmatmul.bf16.vlgmr.msra.gmra.mxu0 %v82_v44  ;;  %v2131_v62 = vld [vmem:[%s2763_s2 + $0x1e0] sm:$0xff]  ;;  %v2122_v1 = vld [vmem:[%s2763_s2 + $0x198] sm:$0xff]  ;;  %v2121_v5 = vld [vmem:[%s2763_s2 + $0x190] sm:$0xff] }
  0x22   :  { %1178 = vmatpush.bf16.msrb.mxu0 %v2110_v37  ;;  %1160 = vmatmul.bf16.vlgmr.msra.gmra.mxu2 %v84_v41  ;;  %v2115_v63 = vld [vmem:[%s2763_s2 + $0x160] sm:$0xff]  ;;  %v2130_v2 = vld [vmem:[%s2763_s2 + $0x1d8] sm:$0xff]  ;;  %v2129_v6 = vld [vmem:[%s2763_s2 + $0x1d0] sm:$0xff] }
  0x23   :  { %1204 = vmatpush.bf16.msrb.mxu2 %v2126_v38  ;;  %1173 = vmatmul.bf16.vlgmr.msra.gmra.mxu3 %v85_v46  ;;  %v2440_v55 = vld.sshfl [vmem:[#allocation1 + $0x30] sm:$0xff pattern:$0x73625140]  ;;  %v2445_v57 = vld.sshfl [vmem:[#allocation1 + $0x20] sm:$0xff pattern:$0x73625140] }
  0x24   :  { %1217 = vmatpush.bf16.msrb.mxu3 %v2134_v39  ;;  %1147 = vmatmul.bf16.vlgmr.msra.gmra.mxu1 %v83_v49  ;;  %v2450_v59 = vld.sshfl [vmem:[#allocation1 + $0x38] sm:$0xff pattern:$0x73625140]  ;;  %v2452_v60 = vld.sshfl [vmem:[#allocation1 + $0x28] sm:$0xff pattern:$0x73625140]  ;;  %v88_v20 = vpack.c.bf16 %v2440_v55, %v2440_v55  ;;  %v86_v21 = vpack.c.bf16 %v2445_v57, %v2445_v57 }
  0x25   :  { %1191 = vmatpush.bf16.msrb.mxu1 %v2118_v43  ;;  %57 = vst [vmem:[#allocation1 + $0x20] ss:$4 sm:$0xff] %v40_v58  ;;  %v2114_v3 = vld [vmem:[%s2763_s2 + $0x158] sm:$0xff]  ;;  %v2113_v7 = vld [vmem:[%s2763_s2 + $0x150] sm:$0xff]  ;;  %v2104_v8 = vld [vmem:[%s2763_s2 + $0x108] sm:$0xff]  ;;  %v89_v22 = vpack.c.bf16 %v2450_v59, %v2450_v59  ;;  %v87_v26 = vpack.c.bf16 %v2452_v60, %v2452_v60 }
  0x26   :  { %1179 = vmatpush.bf16.msrb.mxu0 %v2109_v45  ;;  %v2120_v9 = vld [vmem:[%s2763_s2 + $0x188] sm:$0xff]  ;;  %v2103_v12 = vld [vmem:[%s2763_s2 + $0x100] sm:$0xff]  ;;  %v2142_v15 = vld [vmem:[%s2763_s2 + $0x238] sm:$0xff] }
  0x27   :  { %1205 = vmatpush.bf16.msrb.mxu2 %v2125_v47  ;;  %v2128_v10 = vld [vmem:[%s2763_s2 + $0x1c8] sm:$0xff]  ;;  %v2119_v13 = vld [vmem:[%s2763_s2 + $0x180] sm:$0xff]  ;;  %v2158_v16 = vld [vmem:[%s2763_s2 + $0x2b8] sm:$0xff] }
  0x28   :  { %1218 = vmatpush.bf16.msrb.mxu3 %v2133_v48  ;;  %v2112_v11 = vld [vmem:[%s2763_s2 + $0x148] sm:$0xff]  ;;  %v2127_v14 = vld [vmem:[%s2763_s2 + $0x1c0] sm:$0xff]  ;;  %v2166_v17 = vld [vmem:[%s2763_s2 + $0x2f8] sm:$0xff] }
  0x29   :  { %1192 = vmatpush.bf16.msrb.mxu1 %v2117_v50  ;;  %v2111_v18 = vld [vmem:[%s2763_s2 + $0x140] sm:$0xff]  ;;  %v2150_v19 = vld [vmem:[%s2763_s2 + $0x278] sm:$0xff]  ;;  %v2141_v23 = vld [vmem:[%s2763_s2 + $0x230] sm:$0xff] }
  0x2a   :  { %1180 = vmatpush.bf16.msrb.mxu0 %v2108_v51  ;;  %v2157_v24 = vld [vmem:[%s2763_s2 + $0x2b0] sm:$0xff]  ;;  %v2140_v28 = vld [vmem:[%s2763_s2 + $0x228] sm:$0xff]  ;;  %v2139_v32 = vld [vmem:[%s2763_s2 + $0x220] sm:$0xff] }
  0x2b   :  { %1206 = vmatpush.bf16.msrb.mxu2 %v2124_v52  ;;  %v2165_v25 = vld [vmem:[%s2763_s2 + $0x2f0] sm:$0xff]  ;;  %v2156_v29 = vld [vmem:[%s2763_s2 + $0x2a8] sm:$0xff]  ;;  %v2155_v33 = vld [vmem:[%s2763_s2 + $0x2a0] sm:$0xff] }
  0x2c   :  { %1219 = vmatpush.bf16.msrb.mxu3 %v2132_v53  ;;  %v2149_v27 = vld [vmem:[%s2763_s2 + $0x270] sm:$0xff]  ;;  %v2164_v30 = vld [vmem:[%s2763_s2 + $0x2e8] sm:$0xff]  ;;  %v2163_v34 = vld [vmem:[%s2763_s2 + $0x2e0] sm:$0xff] }
  0x2d   :  { %1193 = vmatpush.bf16.msrb.mxu1 %v2116_v54  ;;  %v2148_v31 = vld [vmem:[%s2763_s2 + $0x268] sm:$0xff]  ;;  %v2147_v35 = vld [vmem:[%s2763_s2 + $0x260] sm:$0xff]  ;;  %v2138_v36 = vld [vmem:[%s2763_s2 + $0x218] sm:$0xff] }
  0x2e   :  { %1181 = vmatpush.bf16.msrb.mxu0 %v2107_v56  ;;  %v2154_v37 = vld [vmem:[%s2763_s2 + $0x298] sm:$0xff]  ;;  %v2137_v40 = vld [vmem:[%s2763_s2 + $0x210] sm:$0xff]  ;;  %v2136_v44 = vld [vmem:[%s2763_s2 + $0x208] sm:$0xff] }
  0x2f   :  { %1207 = vmatpush.bf16.msrb.mxu2 %v2123_v61  ;;  %v2162_v38 = vld [vmem:[%s2763_s2 + $0x2d8] sm:$0xff]  ;;  %v2153_v41 = vld [vmem:[%s2763_s2 + $0x290] sm:$0xff]  ;;  %v2152_v45 = vld [vmem:[%s2763_s2 + $0x288] sm:$0xff] }
  0x30   :  { %1220 = vmatpush.bf16.msrb.mxu3 %v2131_v62  ;;  %v2146_v39 = vld [vmem:[%s2763_s2 + $0x258] sm:$0xff]  ;;  %v2161_v42 = vld [vmem:[%s2763_s2 + $0x2d0] sm:$0xff]  ;;  %v2160_v46 = vld [vmem:[%s2763_s2 + $0x2c8] sm:$0xff] }
  0x31   :  { %1194 = vmatpush.bf16.msrb.mxu1 %v2115_v63  ;;  %v2145_v43 = vld [vmem:[%s2763_s2 + $0x250] sm:$0xff]  ;;  %v2144_v47 = vld [vmem:[%s2763_s2 + $0x248] sm:$0xff]  ;;  %v2135_v48 = vld [vmem:[%s2763_s2 + $0x200] sm:$0xff] }
  0x32   :  { %1182 = vmatpush.bf16.msrb.mxu0 %v2106_v0  ;;  %v2151_v49 = vld [vmem:[%s2763_s2 + $0x280] sm:$0xff]  ;;  %v2174_v52 = vld [vmem:[%s2763_s2 + $0x338] sm:$0xff]  ;;  %v60_v53 = vld.sshfl [vmem:[#allocation1 + $0x10] sm:$0xff pattern:$0x73625140] }
  0x33   :  { %1208 = vmatpush.bf16.msrb.mxu2 %v2122_v1  ;;  %v58_v50 = vld.sshfl [vmem:[#allocation1] sm:$0xff pattern:$0x73625140]  ;;  %v2190_v54 = vld [vmem:[%s2763_s2 + $0x3b8] sm:$0xff]  ;;  %v92_v60 = vpack.c.bf16 %v60_v53, %v60_v53  ;;  %v2173_v63 = vld [vmem:[%s2763_s2 + $0x330] sm:$0xff] }
  0x34   :  { %1221 = vmatpush.bf16.msrb.mxu3 %v2130_v2  ;;  %v2159_v51 = vld [vmem:[%s2763_s2 + $0x2c0] sm:$0xff]  ;;  %v2198_v55 = vld [vmem:[%s2763_s2 + $0x3f8] sm:$0xff]  ;;  %v90_v58 = vpack.c.bf16 %v58_v50, %v58_v50  ;;  %v59_v59 = vld.sshfl [vmem:[#allocation1 + $0x8] sm:$0xff pattern:$0x73625140] }
  0x35   :  { %1195 = vmatpush.bf16.msrb.mxu1 %v2114_v3  ;;  %v61_v56 = vld.sshfl [vmem:[#allocation1 + $0x18] sm:$0xff pattern:$0x73625140]  ;;  %v2143_v57 = vld [vmem:[%s2763_s2 + $0x240] sm:$0xff]  ;;  %v91_v0 = vpack.c.bf16 %v59_v59, %v59_v59  ;;  %v2189_v1 = vld [vmem:[%s2763_s2 + $0x3b0] sm:$0xff] }
  0x36   :  { %1183 = vmatpush.bf16.msrb.mxu0 %v2105_v4  ;;  %v2182_v61 = vld [vmem:[%s2763_s2 + $0x378] sm:$0xff]  ;;  %v93_v62 = vpack.c.bf16 %v61_v56, %v61_v56  ;;  %v2197_v2 = vld [vmem:[%s2763_s2 + $0x3f0] sm:$0xff]  ;;  %v2172_v4 = vld [vmem:[%s2763_s2 + $0x328] sm:$0xff] }
  0x37   :  { %1209 = vmatpush.bf16.msrb.mxu2 %v2121_v5  ;;  %v2181_v3 = vld [vmem:[%s2763_s2 + $0x370] sm:$0xff]  ;;  %v2188_v5 = vld [vmem:[%s2763_s2 + $0x3a8] sm:$0xff] }
  0x38   :  { %1222 = vmatpush.bf16.msrb.mxu3 %v2129_v6  ;;  %v2196_v6 = vld [vmem:[%s2763_s2 + $0x3e8] sm:$0xff] }
  0x39   :  { %1196 = vmatpush.bf16.msrb.mxu1 %v2113_v7  ;;  %v2180_v7 = vld [vmem:[%s2763_s2 + $0x368] sm:$0xff] }
  0x3a   :  { %1184 = vmatpush.bf16.msrb.mxu0 %v2104_v8  ;;  %v2171_v8 = vld [vmem:[%s2763_s2 + $0x320] sm:$0xff] }
  0x3b   :  { %1210 = vmatpush.bf16.msrb.mxu2 %v2120_v9  ;;  %v2187_v9 = vld [vmem:[%s2763_s2 + $0x3a0] sm:$0xff] }
  0x3c   :  { %1223 = vmatpush.bf16.msrb.mxu3 %v2128_v10  ;;  %v2195_v10 = vld [vmem:[%s2763_s2 + $0x3e0] sm:$0xff] }
  0x3d   :  { %1197 = vmatpush.bf16.msrb.mxu1 %v2112_v11  ;;  %v2179_v11 = vld [vmem:[%s2763_s2 + $0x360] sm:$0xff] }
  0x3e   :  { %1185 = vmatpush.bf16.msrb.mxu0 %v2103_v12  ;;  %v2170_v12 = vld [vmem:[%s2763_s2 + $0x318] sm:$0xff] }
  0x3f   :  { %1211 = vmatpush.bf16.msrb.mxu2 %v2119_v13  ;;  %v2186_v13 = vld [vmem:[%s2763_s2 + $0x398] sm:$0xff] }
  0x40   :  { %1224 = vmatpush.bf16.msrb.mxu3 %v2127_v14  ;;  %v2194_v14 = vld [vmem:[%s2763_s2 + $0x3d8] sm:$0xff] }
  0x41   :  { %1198 = vmatpush.bf16.msrb.mxu1 %v2111_v18  ;;  %1186 = vmatmul.bf16.vlgmr.msrb.gmra.mxu0 %v86_v21  ;;  %v2193_v18 = vld [vmem:[%s2763_s2 + $0x3d0] sm:$0xff]  ;;  %v2184_v21 = vld [vmem:[%s2763_s2 + $0x388] sm:$0xff] }
  0x42   :  { %1230 = vmatpush.bf16.msra.mxu0 %v2142_v15  ;;  %1212 = vmatmul.bf16.vlgmr.msrb.gmra.mxu2 %v88_v20  ;;  %v2178_v15 = vld [vmem:[%s2763_s2 + $0x358] sm:$0xff]  ;;  %v2168_v20 = vld [vmem:[%s2763_s2 + $0x308] sm:$0xff] }
  0x43   :  { %1256 = vmatpush.bf16.msra.mxu2 %v2158_v16  ;;  %1225 = vmatmul.bf16.vlgmr.msrb.gmra.mxu3 %v89_v22  ;;  %v2169_v16 = vld [vmem:[%s2763_s2 + $0x310] sm:$0xff]  ;;  %v2192_v22 = vld [vmem:[%s2763_s2 + $0x3c8] sm:$0xff] }
  0x44   :  { %1269 = vmatpush.bf16.msra.mxu3 %v2166_v17  ;;  %1199 = vmatmul.bf16.vlgmr.msrb.gmra.mxu1 %v87_v26  ;;  %v2185_v17 = vld [vmem:[%s2763_s2 + $0x390] sm:$0xff]  ;;  %v2183_v26 = vld [vmem:[%s2763_s2 + $0x380] sm:$0xff] }
  0x45   :  { %1243 = vmatpush.bf16.msra.mxu1 %v2150_v19  ;;  %v2177_v19 = vld [vmem:[%s2763_s2 + $0x350] sm:$0xff] }
  0x46   :  { %1231 = vmatpush.bf16.msra.mxu0 %v2141_v23  ;;  %v2176_v23 = vld [vmem:[%s2763_s2 + $0x348] sm:$0xff] }
  0x47   :  { %1257 = vmatpush.bf16.msra.mxu2 %v2157_v24  ;;  %v2167_v24 = vld [vmem:[%s2763_s2 + $0x300] sm:$0xff] }
  0x48   :  { %1270 = vmatpush.bf16.msra.mxu3 %v2165_v25  ;;  %v62_v25 = vld.sshfl [vmem:[#allocation1 + $0x20] sm:$0xff pattern:$0x73625140] }
  0x49   :  { %1244 = vmatpush.bf16.msra.mxu1 %v2149_v27  ;;  %v64_v27 = vld.sshfl [vmem:[#allocation1 + $0x30] sm:$0xff pattern:$0x73625140] }
  0x4a   :  { %1232 = vmatpush.bf16.msra.mxu0 %v2140_v28  ;;  %v2202_v28 = vld [vmem:[%s2765_s4 + $0x18] sm:$0xff] }
  0x4b   :  { %1258 = vmatpush.bf16.msra.mxu2 %v2156_v29  ;;  %v2191_v29 = vld [vmem:[%s2763_s2 + $0x3c0] sm:$0xff] }
  0x4c   :  { %1271 = vmatpush.bf16.msra.mxu3 %v2164_v30  ;;  %v65_v30 = vld.sshfl [vmem:[#allocation1 + $0x38] sm:$0xff pattern:$0x73625140] }
  0x4d   :  { %1245 = vmatpush.bf16.msra.mxu1 %v2148_v31  ;;  %v2175_v31 = vld [vmem:[%s2763_s2 + $0x340] sm:$0xff] }
  0x4e   :  { %1233 = vmatpush.bf16.msra.mxu0 %v2139_v32  ;;  %v94_v32 = vpack.c.bf16 %v62_v25, %v62_v25  ;;  %v2209_v25 = vld [vmem:[%s2766_s5] ss:$0 sm:$0xff] }
  0x4f   :  { %1259 = vmatpush.bf16.msra.mxu2 %v2155_v33  ;;  %v63_v33 = vld.sshfl [vmem:[#allocation1 + $0x28] sm:$0xff pattern:$0x73625140] }
  0x50   :  { %1272 = vmatpush.bf16.msra.mxu3 %v2163_v34  ;;  %v96_v34 = vpack.c.bf16 %v64_v27, %v64_v27 }
  0x51   :  { %1246 = vmatpush.bf16.msra.mxu1 %v2147_v35  ;;  %v97_v35 = vpack.c.bf16 %v65_v30, %v65_v30 }
  0x52   :  { %1234 = vmatpush.bf16.msra.mxu0 %v2138_v36  ;;  %v2201_v36 = vld [vmem:[%s2765_s4 + $0x10] sm:$0xff] }
  0x53   :  { %1260 = vmatpush.bf16.msra.mxu2 %v2154_v37  ;;  %v95_v37 = vpack.c.bf16 %v63_v33, %v63_v33 }
  0x54   :  { %1273 = vmatpush.bf16.msra.mxu3 %v2162_v38  ;;  %v2200_v38 = vld [vmem:[%s2765_s4 + $0x8] sm:$0xff] }
  0x55   :  { %1247 = vmatpush.bf16.msra.mxu1 %v2146_v39  ;;  %v2199_v39 = vld [vmem:[%s2765_s4] sm:$0xff] }
  0x56   :  { %1235 = vmatpush.bf16.msra.mxu0 %v2137_v40  ;;  %v1335_v40 = vld [vmem:[%s2762_s1] sm:$0x3] }
  0x57   :  { %1261 = vmatpush.bf16.msra.mxu2 %v2153_v41  ;;  %v1336_v41 = vpack.c.bf16 %v1335_v40, %v1335_v40 }
  0x58   :  { %1274 = vmatpush.bf16.msra.mxu3 %v2161_v42  ;;  %v2208_v42 = vld [vmem:[%s2764_s3] ss:$0 sm:$0xff] }
  0x59   :  { %1248 = vmatpush.bf16.msra.mxu1 %v2145_v43 }
  0x5a   :  { %1236 = vmatpush.bf16.msra.mxu0 %v2136_v44 }
  0x5b   :  { %1262 = vmatpush.bf16.msra.mxu2 %v2152_v45 }
  0x5c   :  { %1275 = vmatpush.bf16.msra.mxu3 %v2160_v46 }
  0x5d   :  { %1249 = vmatpush.bf16.msra.mxu1 %v2144_v47 }
  0x5e   :  { %1237 = vmatpush.bf16.msra.mxu0 %v2135_v48 }
  0x5f   :  { %1263 = vmatpush.bf16.msra.mxu2 %v2151_v49 }
  0x60   :  { %1276 = vmatpush.bf16.msra.mxu3 %v2159_v51 }
  0x61   :  { %1250 = vmatpush.bf16.msra.mxu1 %v2143_v57  ;;  %1238 = vmatmul.bf16.vlgmr.msra.gmra.mxu0 %v90_v58 }
  0x62   :  { %1282 = vmatpush.bf16.msrb.mxu0 %v2174_v52  ;;  %1264 = vmatmul.bf16.vlgmr.msra.gmra.mxu2 %v92_v60 }
  0x63   :  { %1308 = vmatpush.bf16.msrb.mxu2 %v2190_v54  ;;  %1277 = vmatmul.bf16.vlgmr.msra.gmra.mxu3 %v93_v62 }
  0x64   :  { %1321 = vmatpush.bf16.msrb.mxu3 %v2198_v55  ;;  %1251 = vmatmul.bf16.vlgmr.msra.gmra.mxu1 %v91_v0 }
  0x65   :  { %1295 = vmatpush.bf16.msrb.mxu1 %v2182_v61 }
  0x66   :  { %1283 = vmatpush.bf16.msrb.mxu0 %v2173_v63 }
  0x67   :  { %1309 = vmatpush.bf16.msrb.mxu2 %v2189_v1 }
  0x68   :  { %1322 = vmatpush.bf16.msrb.mxu3 %v2197_v2 }
  0x69   :  { %1296 = vmatpush.bf16.msrb.mxu1 %v2181_v3 }
  0x6a   :  { %1284 = vmatpush.bf16.msrb.mxu0 %v2172_v4 }
  0x6b   :  { %1310 = vmatpush.bf16.msrb.mxu2 %v2188_v5 }
  0x6c   :  { %1323 = vmatpush.bf16.msrb.mxu3 %v2196_v6 }
  0x6d   :  { %1297 = vmatpush.bf16.msrb.mxu1 %v2180_v7 }
  0x6e   :  { %1285 = vmatpush.bf16.msrb.mxu0 %v2171_v8 }
  0x6f   :  { %1311 = vmatpush.bf16.msrb.mxu2 %v2187_v9 }
  0x70   :  { %1324 = vmatpush.bf16.msrb.mxu3 %v2195_v10 }
  0x71   :  { %1298 = vmatpush.bf16.msrb.mxu1 %v2179_v11 }
  0x72   :  { %1286 = vmatpush.bf16.msrb.mxu0 %v2170_v12 }
  0x73   :  { %1312 = vmatpush.bf16.msrb.mxu2 %v2186_v13 }
  0x74   :  { %1325 = vmatpush.bf16.msrb.mxu3 %v2194_v14 }
  0x75   :  { %1299 = vmatpush.bf16.msrb.mxu1 %v2178_v15 }
  0x76   :  { %1287 = vmatpush.bf16.msrb.mxu0 %v2169_v16 }
  0x77   :  { %1313 = vmatpush.bf16.msrb.mxu2 %v2185_v17 }
  0x78   :  { %1326 = vmatpush.bf16.msrb.mxu3 %v2193_v18 }
  0x79   :  { %1300 = vmatpush.bf16.msrb.mxu1 %v2177_v19 }
  0x7a   :  { %1288 = vmatpush.bf16.msrb.mxu0 %v2168_v20 }
  0x7b   :  { %1314 = vmatpush.bf16.msrb.mxu2 %v2184_v21 }
  0x7c   :  { %1327 = vmatpush.bf16.msrb.mxu3 %v2192_v22 }
  0x7d   :  { %1301 = vmatpush.bf16.msrb.mxu1 %v2176_v23 }
  0x7e   :  { %1289 = vmatpush.bf16.msrb.mxu0 %v2167_v24 }
  0x7f   :  { %1315 = vmatpush.bf16.msrb.mxu2 %v2183_v26 }
  0x80   :  { %1328 = vmatpush.bf16.msrb.mxu3 %v2191_v29 }
  0x81   :  { %1302 = vmatpush.bf16.msrb.mxu1 %v2175_v31  ;;  %1290 = vmatmul.bf16.vlgmr.msrb.gmra.mxu0 %v94_v32 }
  0x82   :  { %1381 = vmatpush.bf16.msra.mxu0 %v2202_v28  ;;  %1316 = vmatmul.bf16.vlgmr.msrb.gmra.mxu2 %v96_v34 }
  0x83   :  { %1329 = vmatmul.bf16.vlgmr.msrb.gmra.mxu3 %v97_v35 }
  0x84   :  { %1303 = vmatmul.bf16.vlgmr.msrb.gmra.mxu1 %v95_v37 }
  0x86   :  { %1382 = vmatpush.bf16.msra.mxu0 %v2201_v36 }
  0x8a   :  { %1383 = vmatpush.bf16.msra.mxu0 %v2200_v38 }
  0x8e   :  { %1384 = vmatpush.bf16.msra.mxu0 %v2199_v39 }
  0x91   :  { %2053 = vmatmul.msk.bf16.vlgmr.msra.gmra.mxu0 %vm1373_vm0, %v1336_v41  ;;  %v2206_v41 = vld [vmem:[%s2769_s8 + $0x18] sm:$0xff] }
  0x92   :  { %1480 = vmatpush.bf16.msra.mxu1 %v2206_v41 }
  0x9e   :  { %v1135_v43 = vpop.f32.mrf.mxu0 }
  0x9f   :  { %v1136_v44 = vadd.f32 %v2208_v42, %v1135_v43 }
  0xa1   :  { %v1148_v45 = vpop.f32.mrf.mxu1 }
  0xa2   :  { %v1149_v46 = vadd.f32 %v1148_v45, %v1136_v44 }
  0xa5   :  { %v1161_v47 = vpop.f32.mrf.mxu2 }
  0xa6   :  { %v1162_v48 = vadd.f32 %v1161_v47, %v1149_v46  ;;  %v1174_v49 = vpop.f32.mrf.mxu3  ;;  %v1137_v51 = vpop.f32.mrf.mxu0  ;;  %v2205_v46 = vld [vmem:[%s2769_s8 + $0x10] sm:$0xff] }
  0xa7   :  { %1481 = vmatpush.bf16.msra.mxu1 %v2205_v46  ;;  %v2204_v51 = vld [vmem:[%s2769_s8 + $0x8] sm:$0xff] }
  0xa8   :  { %v1175_v50 = vadd.f32 %v1174_v49, %v1162_v48 }
  0xa9   :  { %v1150_v52 = vpop.f32.mrf.mxu1 }
  0xab   :  { %1482 = vmatpush.bf16.msra.mxu1 %v2204_v51 }
  0xad   :  { %v1163_v53 = vpop.f32.mrf.mxu2 }
  0xae   :  { %v1176_v54 = vpop.f32.mrf.mxu3 }
  0xbe   :  { %v1187_v55 = vpop.f32.mrf.mxu0 }
  0xbf   :  { %v1188_v1 = vadd.f32 %v1187_v55, %v1175_v50  ;;  %v2203_v55 = vld [vmem:[%s2769_s8] sm:$0xff] }
  0xc0   :  { %1483 = vmatpush.bf16.msra.mxu1 %v2203_v55 }
  0xc1   :  { %v1200_v56 = vpop.f32.mrf.mxu1 }
  0xc2   :  { %v1201_v5 = vadd.f32 %v1200_v56, %v1188_v1 }
  0xc5   :  { %v1213_v57 = vpop.f32.mrf.mxu2 }
  0xc6   :  { %v1226_v58 = vpop.f32.mrf.mxu3  ;;  %v1189_v59 = vpop.f32.mrf.mxu0  ;;  %v1214_v7 = vadd.f32 %v1213_v57, %v1201_v5 }
  0xc8   :  { %v1227_v10 = vadd.f32 %v1226_v58, %v1214_v7 }
  0xc9   :  { %v1202_v60 = vpop.f32.mrf.mxu1 }
  0xcd   :  { %v1215_v61 = vpop.f32.mrf.mxu2 }
  0xce   :  { %v1228_v62 = vpop.f32.mrf.mxu3 }
  0xde   :  { %v1239_v63 = vpop.f32.mrf.mxu0 }
  0xdf   :  { %v1240_v11 = vadd.f32 %v1239_v63, %v1227_v10  ;;  %v1412_v63 = vld [vmem:[%s2767_s6] sm:$0x1] }
  0xe1   :  { %v1252_v0 = vpop.f32.mrf.mxu1 }
  0xe2   :  { %v1253_v12 = vadd.f32 %v1252_v0, %v1240_v11  ;;  %v2210_v11 = vld [vmem:[%s2770_s9] ss:$0 sm:$0xff] }
  0xe5   :  { %v1265_v2 = vpop.f32.mrf.mxu2 }
  0xe6   :  { %v1278_v3 = vpop.f32.mrf.mxu3  ;;  %v1241_v4 = vpop.f32.mrf.mxu0  ;;  %v1266_v13 = vadd.f32 %v1265_v2, %v1253_v12 }
  0xe8   :  { %v1279_v15 = vadd.f32 %v1278_v3, %v1266_v13  ;;  %v1425_v3 = vld [vmem:[%s2768_s7] sm:$0x1]  ;;  %s2243_s7 = smov [#allocation2]  }
  0xe9   :  { %v1254_v6 = vpop.f32.mrf.mxu1  ;;  %s1514_s29 = sshll.u32 %s2243_s7, 4  ;;  %s1515_s29 = int_to_ptr.vmem [resolvable:$true] %s1514_s29 }
  0xed   :  { %v1267_v8 = vpop.f32.mrf.mxu2 }
  0xee   :  { %v1280_v9 = vpop.f32.mrf.mxu3 }
  0xfe   :  { %v1291_v14 = vpop.f32.mrf.mxu0 }
  0xff   :  { %v1292_v16 = vadd.f32 %v1291_v14, %v1279_v15 }
 0x101   :  { %v1304_v17 = vpop.f32.mrf.mxu1 }
 0x102   :  { %v1305_v18 = vadd.f32 %v1304_v17, %v1292_v16 }
 0x105   :  { %v1317_v19 = vpop.f32.mrf.mxu2 }
 0x106   :  { %v1330_v20 = vpop.f32.mrf.mxu3  ;;  %v1293_v21 = vpop.f32.mrf.mxu0  ;;  %v1318_v22 = vadd.f32 %v1317_v19, %v1305_v18 }
 0x108   :  { %v1331_v24 = vadd.f32 %v1330_v20, %v1318_v22 }
 0x109   :  { %v1306_v23 = vpop.f32.mrf.mxu1 }
 0x10a   :  { %v1334_v29 = vmax.f32 %v1331_v24, 0.0 }
 0x10d   :  { %v1319_v26 = vpop.f32.mrf.mxu2 }
 0x10e   :  { %v1332_v27 = vpop.f32.mrf.mxu3  ;;  %v1386_v28 = vpop.f32.mrf.mxu0 }
 0x10f   :  { %v1387_v30 = vadd.f32 %v2209_v25, %v1386_v28 }
 0x111   :  { %v1390_v31 = vadd.f32 %v1387_v30, %v1334_v29 }
 0x113   :  { %v1392_v32 = vsel %vm1391_vm1, %v1390_v31, 0.0  ;;  %v1399_v33 = vmul.f32 %v1390_v31, %v1390_v31 }
 0x114   :  { %v1393_v34 = vrot.slane %v1392_v32, 4 }
 0x115   :  { %v1400_v35 = vsel %vm1391_vm1, %v1399_v33, 0.0 }
 0x116   :  { %v1394_v36 = vadd.f32 %v1393_v34, %v1392_v32  ;;  %v1401_v37 = vrot.slane %v1400_v35, 4  ;;  %v1388_v38 = vpop.f32.mrf.mxu0 }
 0x118   :  { %v1395_v39 = vrot.slane %v1394_v36, 2  ;;  %v1402_v40 = vadd.f32 %v1401_v37, %v1400_v35 }
 0x11a   :  { %v1396_v42 = vadd.f32 %v1395_v39, %v1394_v36  ;;  %v1403_v43 = vrot.slane %v1402_v40, 2 }
 0x11c   :  { %v1397_v44 = vrot.slane %v1396_v42, 1  ;;  %v1404_v45 = vadd.f32 %v1403_v43, %v1402_v40 }
 0x11e   :  { %v1398_v47 = vadd.f32 %v1397_v44, %v1396_v42  ;;  %v1405_v48 = vrot.slane %v1404_v45, 1 }
 0x120   :  { %v1406_v49 = vadd.f32 %v1405_v48, %v1404_v45  ;;  %v1407_v50 = vmul.f32 0.5, %v1398_v47 }
 0x122   :  { %v1408_v52 = vmul.f32 0.5, %v1406_v49  ;;  %v1409_v53 = vmul.f32 %v1407_v50, %v1407_v50 }
 0x124   :  { %v1410_v54 = vsub.f32 %v1408_v52, %v1409_v53 }
 0x126   :  { %v1411_v56 = vmax.f32 %v1410_v54, 0.0 }
 0x128   :  { %v1413_v57 = vadd.f32 1e-05, %v1411_v56 }
 0x12a   :  { %2211 = vrsqrt.f32 %v1413_v57  ;;  %vm1420_vm3 = vweird.f32 %v1413_v57 }
 0x130   :  { %v2212_v58 = vpop.eup %2211 }
 0x131   :  { %v1415_v59 = vmul.f32 %v2212_v58, %v1413_v57  ;;  %vm1421_vm2 = vweird.f32 %v2212_v58 }
 0x132   :  { %vm1422_vm4 = vmor %vm1420_vm3, %vm1421_vm2 }
 0x133   :  { %v1416_v60 = vmul.f32 %v2212_v58, %v1415_v59 }
 0x135   :  { %v1417_v61 = vmul.f32 0.5, %v1416_v60 }
 0x137   :  { %v1418_v62 = vsub.f32 1.5, %v1417_v61 }
 0x139   :  { %v1419_v0 = vmul.f32 %v2212_v58, %v1418_v62 }
 0x13b   :  { %v1423_v1 = vsel %vm1422_vm4, %v2212_v58, %v1419_v0 }
 0x13c   :  { %v1424_v2 = vmul.f32 %v1423_v1, %v1412_v63 }
 0x13e   :  { %v1426_v4 = vmul.f32 %v1424_v2, %v1407_v50  ;;  %v1429_v5 = vperm.slane %v1424_v2, 0 }
 0x140   :  { %v1427_v6 = vsub.f32 %v1425_v3, %v1426_v4  ;;  %v1431_v7 = vmul.f32 %v1429_v5, %v1390_v31 }
 0x142   :  { %v1433_v8 = vperm.slane %v1427_v6, 0 }
 0x144   :  { %v1435_v9 = vadd.f32 %v1433_v8, %v1431_v7 }
 0x146   :  { %v1436_v10 = vpack.c.bf16 %v1435_v9, %v1435_v9 }
 0x148   :  { %2070 = vmatmul.msk.bf16.vlgmr.msra.gmra.mxu1 %vm1373_vm0, %v1436_v10 }
 0x1c5   :  { %v1485_v12 = vpop.f32.mrf.mxu1 }
 0x1c6   :  { %v1486_v13 = vadd.f32 %v2210_v11, %v1485_v12 }
 0x1c8   :  { %v1489_v14 = vsub.f32 0.0, %v1486_v13 }
 0x1ca   :  { %v1490_v15 = vmul.f32 1.442695, %v1489_v14 }
 0x1cc   :  { %2213 = vpow2.f32 %v1490_v15 }
 0x1cd   :  { %v1487_v16 = vpop.f32.mrf.mxu1 }
 0x1d2   :  { %v2214_v17 = vpop.eup %2213 }
 0x1d3   :  { %v1492_v18 = vadd.f32 1.0, %v2214_v17 }
 0x1d5   :  { %2215 = vrcp.f32 %v1492_v18  ;;  %v1504_v22 = vand.u32 2147483648, %v1492_v18  ;;  %v1502_v24 = vand.u32 2147483647, %v1492_v18  ;;  %vm1498_vm6 = vweird.f32 %v1492_v18 }
 0x1d7   :  { %v1505_v26 = vor.u32 1.1754944e-38, %v1504_v22  ;;  %vm1503_vm8 = vcmp.eq.f32.partialorder %v1502_v24, 8.507059e+37 }
 0x1db   :  { %v2216_v19 = vpop.eup %2215 }
 0x1dc   :  { %v1494_v20 = vmul.f32 %v2216_v19, %v1492_v18  ;;  %vm1499_vm5 = vweird.f32 %v2216_v19 }
 0x1dd   :  { %vm1500_vm7 = vmor %vm1498_vm6, %vm1499_vm5 }
 0x1de   :  { %v1495_v21 = vsub.f32 1.0, %v1494_v20 }
 0x1e0   :  { %v1496_v23 = vmul.f32 %v2216_v19, %v1495_v21 }
 0x1e2   :  { %v1497_v25 = vadd.f32 %v2216_v19, %v1496_v23 }
 0x1e4   :  { %v1501_v27 = vsel %vm1500_vm7, %v2216_v19, %v1497_v25 }
 0x1e5   :  { %v1506_v28 = vsel %vm1503_vm8, %v1505_v26, %v1501_v27 }
 0x1e6   :  { %1508 = vst.msk [vmem:[#allocation2] sm:$0x3] %vm1391_vm1, %v1506_v28 }
 0x1e7   :  { %1519 = dma.vmem_to_hbm [thread:$0]  %s1515_s29, 32, %s1517_s11, [#allocation3]  }
 0x1e8   :  { %2241 = dma.done.wait [#allocation3], 32  }
 0x1e9   :  { %2242 = vsyncadd [#allocation3], 4294967264 }
 0x1ea   :  { %1524 = vsyncpa [#allocation3], 1 }

// kernel: plain_chessnet_forward.2
= control target key start
LH: loop header
LB: loop body
LE: loop exit
PB: predicated region body
PF: predicated region fallthrough
CT: control target
= control target key end

     0   :  { %vm115_vm0 = vcmask 1040384   ;;  %vm184_vm1 = vcmask 1046528   ;;  %v5952_v3 = vmov 0.0   ;;  %vm287_vm2 = vcmask 1045504   ;;  %s5953_s19 = smov 12   ;;  %s5954_s20 = smov 24   ;;  %s9015_s0 = inlined_call_operand.vmem [shape: f32[2,8,8,12], index: 0, kind: input, shape index: {}]   ;;  %s9016_s1 = inlined_call_operand.vmem [shape: bf16[108,32], index: 1, kind: input, shape index: {}]   ;;  %s9017_s2 = inlined_call_operand.vmem [shape: f32[1,32], index: 2, kind: input, shape index: {}]   ;;  %s9018_s3 = inlined_call_operand.vmem [shape: bf16[2,288,32], index: 3, kind: input, shape index: {}]   ;;  %s9019_s4 = inlined_call_operand.vmem [shape: f32[2,1,32], index: 4, kind: input, shape index: {}]   ;;  %s9020_s5 = inlined_call_operand.vmem [shape: f32[2,1,32], index: 5, kind: input, shape index: {}]   ;;  %s9021_s6 = inlined_call_operand.vmem [shape: bf16[2,288,32], index: 6, kind: input, shape index: {}]   ;;  %s9022_s7 = inlined_call_operand.vmem [shape: f32[2,1,32], index: 7, kind: input, shape index: {}]   ;;  %s9023_s8 = inlined_call_operand.vmem [shape: f32[2,1,32], index: 8, kind: input, shape index: {}]   ;;  %s9024_s9 = inlined_call_operand.vmem [shape: f32[2,8,8,32], index: 9, kind: output, shape index: {}]  }
   0x1   :  { %v33_v0 = vld [vmem:[%s9015_s0] sm:$0xff]  ;;  %v34_v1 = vld [vmem:[%s9015_s0 + $0x8] sm:$0xff]  ;;  %v35_v2 = vld [vmem:[%s9015_s0 + $0x10] sm:$0xff]  ;;  %v81_v4 = vrot.slane %v5952_v3, 7  ;;  %vm390_vm3 = vcmask 97280   ;;  %vm408_vm4 = vcmask 195584  }
   0x2   :  { %v82_v5 = vrot.slane %v33_v0, 7  ;;  %v83_v6 = vrot.slane %v34_v1, 7  ;;  %v36_v7 = vld [vmem:[%s9015_s0 + $0x18] sm:$0xff]  ;;  %v84_v8 = vrot.slane %v35_v2, 7  ;;  %v39_v9 = vld [vmem:[%s9015_s0 + $0x30] sm:$0xff]  ;;  %v37_v50 = vld [vmem:[%s9015_s0 + $0x20] sm:$0xff] }
   0x3   :  { %v85_v10 = vrot.slane %v36_v7, 7  ;;  %v88_v11 = vrot.slane %v39_v9, 7  ;;  %v6026_v12 = vsel %vm115_vm0, 0.0, %v81_v4  ;;  %v133_v13 = vsel %vm115_vm0, %v81_v4, 0.0  ;;  %v38_v54 = vld [vmem:[%s9015_s0 + $0x28] sm:$0xff]  ;;  %v40_v59 = vld [vmem:[%s9015_s0 + $0x38] sm:$0xff] }
   0x4   :  { %v6030_v14 = vsel %vm115_vm0, 0.0, %v82_v5  ;;  %v6033_v15 = vsel %vm115_vm0, 0.0, %v83_v6  ;;  %v134_v16 = vsel %vm115_vm0, %v82_v5, 0.0  ;;  %v135_v17 = vsel %vm115_vm0, %v83_v6, 0.0  ;;  %v41_v6 = vld [vmem:[%s9015_s0 + $0x40] sm:$0xff]  ;;  %s5955_s12 = smov 36  }
   0x5   :  { %v188_v18 = vrot.slane %v6030_v14, 1  ;;  %v189_v19 = vrot.slane %v134_v16, 1  ;;  %v191_v20 = vrot.slane %v6033_v15, 1  ;;  %v192_v21 = vrot.slane %v135_v17, 1  ;;  %s5956_s17 = smov 72  }
   0x6   :  { %v291_v22 = vrot.slane %v6030_v14, 2  ;;  %v292_v23 = vrot.slane %v134_v16, 2  ;;  %v294_v24 = vrot.slane %v6033_v15, 2  ;;  %v295_v25 = vrot.slane %v135_v17, 2 }
   0x7   :  { %v190_v26 = vsel %vm184_vm1, %v188_v18, %v189_v19  ;;  %v193_v27 = vsel %vm184_vm1, %v191_v20, %v192_v21  ;;  %v6044_v28 = vsel %vm115_vm0, 0.0, %v84_v8  ;;  %v6047_v29 = vsel %vm115_vm0, 0.0, %v85_v10 }
   0x8   :  { %v5198_v30 = vpack.i.bf16 %v193_v27, %v190_v26  ;;  %v293_v31 = vsel %vm287_vm2, %v291_v22, %v292_v23  ;;  %v296_v32 = vsel %vm287_vm2, %v294_v24, %v295_v25  ;;  %v136_v33 = vsel %vm115_vm0, %v84_v8, 0.0 }
   0x9   :  { %v5208_v34 = vpack.i.bf16 %v296_v32, %v293_v31  ;;  %v137_v35 = vsel %vm115_vm0, %v85_v10, 0.0  ;;  %v194_v36 = vrot.slane %v6044_v28, 1  ;;  %v195_v37 = vrot.slane %v136_v33, 1 }
   0xa   :  { %5199 = vrot.lane.b32.xlu0 %v5198_v30, %s5953_s19  ;;  %v197_v38 = vrot.slane %v6047_v29, 1  ;;  %v198_v39 = vrot.slane %v137_v35, 1  ;;  %v297_v40 = vrot.slane %v6044_v28, 2  ;;  %v298_v41 = vrot.slane %v136_v33, 2 }
   0xb   :  { %5209 = vrot.lane.b32.xlu1 %v5208_v34, %s5954_s20  ;;  %v196_v42 = vsel %vm184_vm1, %v194_v36, %v195_v37  ;;  %v300_v43 = vrot.slane %v6047_v29, 2  ;;  %v301_v44 = vrot.slane %v137_v35, 2  ;;  %v6061_v45 = vsel %vm115_vm0, 0.0, %v88_v11 }
   0xc   :  { %v199_v46 = vsel %vm184_vm1, %v197_v38, %v198_v39  ;;  %v299_v47 = vsel %vm287_vm2, %v297_v40, %v298_v41  ;;  %v140_v48 = vsel %vm115_vm0, %v88_v11, 0.0  ;;  %v185_v49 = vrot.slane %v6026_v12, 1 }
   0xd   :  { %v302_v51 = vsel %vm287_vm2, %v300_v43, %v301_v44  ;;  %v186_v52 = vrot.slane %v133_v13, 1  ;;  %v206_v53 = vrot.slane %v6061_v45, 1  ;;  %v5203_v55 = vpack.i.bf16 %v199_v46, %v196_v42  ;;  %v42_v46 = vld [vmem:[%s9015_s0 + $0x48] sm:$0xff] }
   0xe   :  { %v207_v56 = vrot.slane %v140_v48, 1  ;;  %v288_v57 = vrot.slane %v6026_v12, 2  ;;  %v289_v58 = vrot.slane %v133_v13, 2  ;;  %v5213_v60 = vpack.i.bf16 %v302_v51, %v299_v47 }
   0xf   :  { %v309_v61 = vrot.slane %v6061_v45, 2  ;;  %v310_v62 = vrot.slane %v140_v48, 2  ;;  %v86_v63 = vrot.slane %v37_v50, 7  ;;  %v6081_v0 = vsel %vm184_vm1, %v185_v49, %v186_v52 }
  0x10   :  { %v208_v1 = vsel %vm184_vm1, %v206_v53, %v207_v56  ;;  %v87_v2 = vrot.slane %v38_v54, 7  ;;  %v6085_v3 = vsel %vm287_vm2, %v288_v57, %v289_v58  ;;  %v89_v7 = vrot.slane %v40_v59, 7 }
  0x11   :  { %v6088_v4 = vsel %vm115_vm0, 0.0, %v86_v63  ;;  %v138_v5 = vsel %vm115_vm0, %v86_v63, 0.0  ;;  %v311_v8 = vsel %vm287_vm2, %v309_v61, %v310_v62  ;;  %v90_v22 = vrot.slane %v41_v6, 7 }
  0x12   :  { %5204 = vrot.lane.b32.xlu0 %v5203_v55, %s5953_s19  ;;  %v6097_v9 = vsel %vm115_vm0, 0.0, %v87_v2  ;;  %v139_v10 = vsel %vm115_vm0, %v87_v2, 0.0  ;;  %v200_v11 = vrot.slane %v6088_v4, 1  ;;  %v201_v13 = vrot.slane %v138_v5, 1  ;;  %v43_v55 = vld [vmem:[%s9015_s0 + $0x50] sm:$0xff] }
  0x13   :  { %5214 = vrot.lane.b32.xlu1 %v5213_v60, %s5954_s20  ;;  %v203_v16 = vrot.slane %v6097_v9, 1  ;;  %v204_v17 = vrot.slane %v139_v10, 1  ;;  %v304_v18 = vrot.slane %v138_v5, 2  ;;  %v307_v19 = vrot.slane %v139_v10, 2 }
  0x14   :  { %v303_v20 = vrot.slane %v6088_v4, 2  ;;  %v306_v21 = vrot.slane %v6097_v9, 2  ;;  %v202_v23 = vsel %vm184_vm1, %v200_v11, %v201_v13  ;;  %v6108_v25 = vsel %vm115_vm0, 0.0, %v89_v7 }
  0x15   :  { %v205_v24 = vsel %vm184_vm1, %v203_v16, %v204_v17  ;;  %v141_v26 = vsel %vm115_vm0, %v89_v7, 0.0  ;;  %v5228_v27 = vpack.i.bf16 %v6081_v0, %v208_v1  ;;  %v6113_v31 = vsel %vm115_vm0, 0.0, %v90_v22 }
  0x16   :  { %v5218_v30 = vpack.i.bf16 %v205_v24, %v202_v23  ;;  %v5233_v32 = vpack.i.bf16 %v6085_v3, %v311_v8  ;;  %v142_v33 = vsel %vm115_vm0, %v90_v22, 0.0  ;;  %v209_v34 = vrot.slane %v6108_v25, 1 }
  0x17   :  { %v210_v35 = vrot.slane %v141_v26, 1  ;;  %v212_v36 = vrot.slane %v6113_v31, 1  ;;  %v213_v37 = vrot.slane %v142_v33, 1  ;;  %v305_v38 = vsel %vm287_vm2, %v303_v20, %v304_v18 }
  0x18   :  { %5219 = vrot.lane.b32.xlu2 %v5218_v30, %s5953_s19  ;;  %v308_v39 = vsel %vm287_vm2, %v306_v21, %v307_v19  ;;  %v312_v48 = vrot.slane %v6108_v25, 2  ;;  %v313_v49 = vrot.slane %v141_v26, 2  ;;  %v315_v53 = vrot.slane %v6113_v31, 2  ;;  %v45_v30 = vld [vmem:[%s9015_s0 + $0x60] sm:$0xff] }
  0x19   :  { %v5223_v40 = vpack.i.bf16 %v308_v39, %v305_v38  ;;  %v211_v41 = vsel %vm184_vm1, %v209_v34, %v210_v35  ;;  %v214_v42 = vsel %vm184_vm1, %v212_v36, %v213_v37  ;;  %v316_v54 = vrot.slane %v142_v33, 2 }
  0x1a   :  { %5229 = vrot.lane.b32.xlu0 %v5228_v27, %s5953_s19  ;;  %v5248_v43 = vpack.i.bf16 %v214_v42, %v211_v41  ;;  %v91_v58 = vrot.slane %v42_v46, 7  ;;  %v92_v2 = vrot.slane %v43_v55, 7  ;;  %v314_v6 = vsel %vm287_vm2, %v312_v48, %v313_v49 }
  0x1b   :  { %5234 = vrot.lane.b32.xlu1 %v5233_v32, %s5954_s20  ;;  %v317_v7 = vsel %vm287_vm2, %v315_v53, %v316_v54  ;;  %v94_v41 = vrot.slane %v45_v30, 7  ;;  %v46_v53 = vld [vmem:[%s9015_s0 + $0x68] sm:$0xff]  ;;  %v47_v54 = vld [vmem:[%s9015_s0 + $0x70] sm:$0xff]  ;;  %vm536_vm5 = vcmask 293888   ;;  %vm553_vm6 = vcmask 588800  }
  0x1c   :  { %v6151_v8 = vsel %vm115_vm0, 0.0, %v91_v58  ;;  %v143_v10 = vsel %vm115_vm0, %v91_v58, 0.0  ;;  %v5253_v13 = vpack.i.bf16 %v317_v7, %v314_v6  ;;  %v6158_v16 = vsel %vm115_vm0, 0.0, %v92_v2 }
  0x1d   :  { %v144_v17 = vsel %vm115_vm0, %v92_v2, 0.0  ;;  %v215_v22 = vrot.slane %v6151_v8, 1  ;;  %v216_v27 = vrot.slane %v143_v10, 1  ;;  %v218_v34 = vrot.slane %v6158_v16, 1 }
  0x1e   :  { %v219_v35 = vrot.slane %v144_v17, 1  ;;  %v146_v49 = vsel %vm115_vm0, %v94_v41, 0.0  ;;  %v95_v6 = vrot.slane %v46_v53, 7  ;;  %v96_v7 = vrot.slane %v47_v54, 7  ;;  %v5103_v53 = vld [vmem:[%s9016_s1 + $0x18] sm:$0xff]  ;;  %v5102_v54 = vld [vmem:[%s9016_s1 + $0x10] sm:$0xff] }
  0x1f   :  { %v217_v42 = vsel %vm184_vm1, %v215_v22, %v216_v27  ;;  %v328_v2 = vrot.slane %v146_v49, 2  ;;  %v225_v27 = vrot.slane %v146_v49, 1  ;;  %vm622_vm7 = vcmask 883712  }
  0x20   :  { %5224 = vrot.lane.b32.xlu2 %v5223_v40, %s5954_s20  ;;  %vm1061_vm8 = vcmask 261120   ;;  %vm1079_vm9 = vcmask 523264   ;;  %vm1207_vm10 = vcmask 785408  }
  0x23   :  { %5249 = vrot.lane.b32.xlu1 %v5248_v43, %s5953_s19  ;;  %v220_v43 = vsel %vm184_vm1, %v218_v34, %v219_v35 }
  0x72   :  { %v5220_v44 = vpop.permute.xlu2 %5219 }
  0x73   :  { %v5221_v60 = vunpack.i.l.bf16 %v5220_v44  ;;  %v5222_v18 = vunpack.i.h.bf16 %v5220_v44 }
  0x75   :  { %v397_v40 = vsel %vm390_vm3, %v6097_v9, %v5222_v18  ;;  %v6234_v18 = vsel %vm115_vm0, 0.0, %v95_v6 }
  0x7a   :  { %v5225_v62 = vpop.permute.xlu2 %5224 }
  0x7b   :  { %v5227_v36 = vunpack.i.h.bf16 %v5225_v62 }
  0x7c   :  { %v5200_v47 = vpop.permute.xlu0 %5199 }
  0x7d   :  { %v5202_v50 = vunpack.i.h.bf16 %v5200_v47  ;;  %v5201_v51 = vunpack.i.l.bf16 %v5200_v47  ;;  %v5210_v52 = vpop.permute.xlu1 %5209  ;;  %v6194_v9 = vsel %vm408_vm4, %v397_v40, %v5227_v36  ;;  %v6202_v47 = vsel %vm115_vm0, 0.0, %v94_v41 }
  0x7e   :  { %v5212_v56 = vunpack.i.h.bf16 %v5210_v52  ;;  %v5211_v57 = vunpack.i.l.bf16 %v5210_v52  ;;  %v319_v52 = vrot.slane %v143_v10, 2 }
  0x7f   :  { %v393_v59 = vsel %vm390_vm3, %v6033_v15, %v5202_v50  ;;  %v392_v61 = vsel %vm390_vm3, %v6030_v14, %v5201_v51  ;;  %v5226_v15 = vunpack.i.l.bf16 %v5225_v62  ;;  %v396_v14 = vsel %vm390_vm3, %v6088_v4, %v5221_v60  ;;  %v44_v4 = vld [vmem:[%s9015_s0 + $0x58] sm:$0xff] }
  0x80   :  { %v6141_v63 = vsel %vm408_vm4, %v392_v61, %v5211_v57  ;;  %v6144_v1 = vsel %vm408_vm4, %v393_v59, %v5212_v56  ;;  %v93_v39 = vrot.slane %v44_v4, 7  ;;  %v5268_v50 = vpack.i.bf16 %v220_v43, %v217_v42  ;;  %v4694_v43 = vld [vmem:[%s9016_s1 + $0x30] sm:$0xf] }
  0x81   :  { %v5238_v5 = vpack.i.bf16 %v6144_v1, %v6141_v63  ;;  %v6166_v26 = vsel %vm408_vm4, %v396_v14, %v5226_v15  ;;  %v318_v51 = vrot.slane %v6151_v8, 2  ;;  %v321_v56 = vrot.slane %v6158_v16, 2 }
  0x82   :  { %v6197_v44 = vsel %vm115_vm0, 0.0, %v93_v39  ;;  %v145_v48 = vsel %vm115_vm0, %v93_v39, 0.0  ;;  %v5278_v55 = vpack.i.bf16 %v6194_v9, %v6166_v26  ;;  %v322_v57 = vrot.slane %v144_v17, 2 }
  0x83   :  { %5239 = vrot.lane.b32.xlu2 %v5238_v5, %s5955_s12  ;;  %v324_v58 = vrot.slane %v6197_v44, 2  ;;  %v325_v61 = vrot.slane %v145_v48, 2  ;;  %v327_v62 = vrot.slane %v6202_v47, 2  ;;  %v320_v14 = vsel %vm287_vm2, %v318_v51, %v319_v52  ;;  %v5105_v51 = vld [vmem:[%s9016_s1 + $0x28] sm:$0xff]  ;;  %v5104_v52 = vld [vmem:[%s9016_s1 + $0x20] sm:$0xff] }
  0x84   :  { %v5205_v11 = vpop.permute.xlu0 %5204  ;;  %v323_v10 = vsel %vm287_vm2, %v321_v56, %v322_v57  ;;  %v222_v4 = vrot.slane %v145_v48, 1  ;;  %v5106_v48 = vld [vmem:[%s9016_s1 + $0x30] sm:$0x30]  ;;  %v5100_v57 = vld [vmem:[%s9016_s1] sm:$0xff] }
  0x85   :  { %v5207_v19 = vunpack.i.h.bf16 %v5205_v11  ;;  %v5206_v20 = vunpack.i.l.bf16 %v5205_v11  ;;  %v5215_v21 = vpop.permute.xlu1 %5214  ;;  %v329_v17 = vsel %vm287_vm2, %v327_v62, %v328_v2  ;;  %v5273_v22 = vpack.i.bf16 %v323_v10, %v320_v14 }
  0x86   :  { %v5217_v23 = vunpack.i.h.bf16 %v5215_v21  ;;  %v5216_v24 = vunpack.i.l.bf16 %v5215_v21  ;;  %v6243_v21 = vsel %vm115_vm0, %v96_v7, 0.0  ;;  %v4695_v49 = vor.u32 %v5106_v48, %v4694_v43 }
  0x87   :  { %v395_v32 = vsel %vm390_vm3, %v6047_v29, %v5207_v19  ;;  %v394_v33 = vsel %vm390_vm3, %v6044_v28, %v5206_v20  ;;  %v6237_v19 = vsel %vm115_vm0, 0.0, %v96_v7  ;;  %v6240_v20 = vsel %vm115_vm0, %v95_v6, 0.0 }
  0x88   :  { %v6177_v37 = vsel %vm408_vm4, %v395_v32, %v5217_v23  ;;  %v6180_v38 = vsel %vm408_vm4, %v394_v33, %v5216_v24  ;;  %v224_v24 = vrot.slane %v6202_v47, 1  ;;  %v227_v32 = vrot.slane %v6234_v18, 1 }
  0x89   :  { %v5263_v29 = vpack.i.bf16 %v6166_v26, %v6177_v37  ;;  %v5243_v28 = vpack.i.bf16 %v6180_v38, %v6144_v1  ;;  %v5258_v5 = vpack.i.bf16 %v6177_v37, %v6180_v38  ;;  %v228_v33 = vrot.slane %v6240_v20, 1 }
  0x8a   :  { %v230_v34 = vrot.slane %v6237_v19, 1  ;;  %v231_v35 = vrot.slane %v6243_v21, 1  ;;  %v226_v40 = vsel %vm184_vm1, %v224_v24, %v225_v27  ;;  %v331_v10 = vrot.slane %v6240_v20, 2  ;;  %v48_v20 = vld [vmem:[%s9015_s0 + $0x78] sm:$0xff] }
  0x8b   :  { %5264 = vrot.lane.b32.xlu1 %v5263_v29, %s5956_s17  ;;  %5244 = vrot.lane.b32.xlu0 %v5243_v28, %s5956_s17  ;;  %v229_v29 = vsel %vm184_vm1, %v227_v32, %v228_v33 }
  0x8c   :  { %5254 = vrot.lane.b32.xlu2 %v5253_v13, %s5954_s20  ;;  %v6199_v46 = vpop.permute.xlu0 %5229  ;;  %v326_v13 = vsel %vm287_vm2, %v324_v58, %v325_v61  ;;  %v232_v28 = vsel %vm184_vm1, %v230_v34, %v231_v35 }
  0x8d   :  { %v5231_v59 = vunpack.i.l.bf16 %v6199_v46  ;;  %v6218_v60 = vpop.permute.xlu1 %5234  ;;  %v5293_v30 = vpack.i.bf16 %v329_v17, %v326_v13  ;;  %v5308_v42 = vpack.i.bf16 %v232_v28, %v229_v29 }
  0x8e   :  { %v5236_v15 = vunpack.i.l.bf16 %v6218_v60  ;;  %v5237_v62 = vunpack.i.h.bf16 %v6218_v60  ;;  %v333_v60 = vrot.slane %v6237_v19, 2 }
  0x8f   :  { %v398_v11 = vsel %vm390_vm3, %v6061_v45, %v5231_v59  ;;  %v221_v45 = vrot.slane %v6197_v44, 1  ;;  %v5232_v59 = vunpack.i.h.bf16 %v6199_v46  ;;  %v330_v46 = vrot.slane %v6234_v18, 2 }
  0x90   :  { %v6247_v23 = vsel %vm408_vm4, %v398_v11, %v5236_v15  ;;  %v334_v11 = vrot.slane %v6243_v21, 2  ;;  %v97_v21 = vrot.slane %v48_v20, 7 }
  0x91   :  { %v5283_v36 = vpack.i.bf16 %v6247_v23, %v6194_v9  ;;  %v223_v39 = vsel %vm184_vm1, %v221_v45, %v222_v4  ;;  %v391_v2 = vsel %vm390_vm3, %v6026_v12, %v5232_v59 }
  0x92   :  { %v5288_v41 = vpack.i.bf16 %v226_v40, %v223_v39  ;;  %v6303_v15 = vsel %vm408_vm4, %v391_v2, %v5237_v62  ;;  %v6321_v27 = vsel %vm115_vm0, 0.0, %v97_v21 }
  0x93   :  { %5279 = vrot.lane.b32.xlu1 %v5278_v55, %s5955_s12  ;;  %5259 = vrot.lane.b32.xlu0 %v5258_v5, %s5955_s12  ;;  %v5101_v55 = vld [vmem:[%s9016_s1 + $0x8] sm:$0xff]  ;;  %v233_v32 = vrot.slane %v6321_v27, 1 }
  0x94   :  { %5269 = vrot.lane.b32.xlu2 %v5268_v50, %s5953_s19  ;;  %v648_v50 = vsel %vm287_vm2, %v4695_v49, 0 }
  0x95   :  { %651 = vmatpush.bf16.msra.mxu0 %v648_v50  ;;  %5179 = vmatpush.bf16.msra.mxu1 %v648_v50  ;;  %v6290_v58 = vpop.permute.xlu1 %5249 }
  0x96   :  { %v5251_v61 = vunpack.i.l.bf16 %v6290_v58 }
  0x98   :  { %v399_v6 = vsel %vm390_vm3, %v6108_v25, %v5251_v61  ;;  %v332_v25 = vsel %vm287_vm2, %v330_v46, %v331_v10 }
  0x99   :  { %652 = vmatpush.bf16.msra.mxu0 %v5105_v51  ;;  %5180 = vmatpush.bf16.msra.mxu1 %v5105_v51 }
  0x9b   :  { %5274 = vrot.lane.b32.xlu0 %v5273_v22, %s5954_s20  ;;  %5294 = vrot.lane.b32.xlu1 %v5293_v30, %s5954_s20  ;;  %v335_v22 = vsel %vm287_vm2, %v333_v60, %v334_v11  ;;  %v149_v30 = vsel %vm115_vm0, %v97_v21, 0.0  ;;  %v336_v11 = vrot.slane %v6321_v27, 2 }
  0x9c   :  { %5284 = vrot.lane.b32.xlu2 %v5283_v36, %s5956_s17  ;;  %v5313_v45 = vpack.i.bf16 %v335_v22, %v332_v25  ;;  %v234_v33 = vrot.slane %v149_v30, 1 }
  0x9d   :  { %653 = vmatpush.bf16.msra.mxu0 %v5104_v52  ;;  %5181 = vmatpush.bf16.msra.mxu1 %v5104_v52  ;;  %v5252_v52 = vunpack.i.h.bf16 %v6290_v58 }
  0x9e   :  { %v235_v29 = vsel %vm184_vm1, %v233_v32, %v234_v33 }
  0xa1   :  { %654 = vmatpush.bf16.msra.mxu0 %v5103_v53  ;;  %5182 = vmatpush.bf16.msra.mxu1 %v5103_v53 }
  0xa3   :  { %5289 = vrot.lane.b32.xlu0 %v5288_v41, %s5953_s19  ;;  %5309 = vrot.lane.b32.xlu1 %v5308_v42, %s5953_s19 }
  0xa5   :  { %655 = vmatpush.bf16.msra.mxu0 %v5102_v54  ;;  %5183 = vmatpush.bf16.msra.mxu1 %v5102_v54 }
  0xa9   :  { %656 = vmatpush.bf16.msra.mxu0 %v5101_v55  ;;  %5184 = vmatpush.bf16.msra.mxu1 %v5101_v55 }
  0xad   :  { %657 = vmatpush.bf16.msra.mxu0 %v5100_v57  ;;  %5185 = vmatpush.bf16.msra.mxu1 %v5100_v57 }
  0xdd   :  { %v5240_v56 = vpop.permute.xlu2 %5239 }
  0xde   :  { %v5242_v4 = vunpack.i.h.bf16 %v5240_v56  ;;  %v5241_v24 = vunpack.i.l.bf16 %v5240_v56 }
  0xe0   :  { %v537_v39 = vsel %vm536_vm5, %v6303_v15, %v5241_v24  ;;  %v538_v40 = vsel %vm536_vm5, %v6141_v63, %v5242_v4 }
  0xe6   :  { %v6297_v5 = vpop.permute.xlu2 %5254 }
  0xe7   :  { %v5256_v7 = vunpack.i.l.bf16 %v6297_v5  ;;  %v5257_v57 = vunpack.i.h.bf16 %v6297_v5 }
  0xe9   :  { %v417_v14 = vsel %vm408_vm4, %v399_v6, %v5256_v7  ;;  %v400_v6 = vsel %vm390_vm3, %v6113_v31, %v5252_v52 }
  0xea   :  { %v5303_v13 = vpack.i.bf16 %v6303_v15, %v417_v14  ;;  %v5298_v17 = vpack.i.bf16 %v417_v14, %v6247_v23  ;;  %v6349_v5 = vsel %vm408_vm4, %v400_v6, %v5257_v57 }
  0xec   :  { %5304 = vrot.lane.b32.xlu0 %v5303_v13, %s5956_s17  ;;  %5299 = vrot.lane.b32.xlu2 %v5298_v17, %s5955_s12  ;;  %v337_v13 = vrot.slane %v149_v30, 2 }
  0xee   :  { %v5270_v51 = vpop.permute.xlu2 %5269  ;;  %v338_v33 = vsel %vm287_vm2, %v336_v11, %v337_v13 }
  0xef   :  { %v5272_v63 = vunpack.i.h.bf16 %v5270_v51  ;;  %v5271_v53 = vunpack.i.l.bf16 %v5270_v51 }
  0xf1   :  { %v402_v62 = vsel %vm390_vm3, %v6158_v16, %v5272_v63  ;;  %v401_v2 = vsel %vm390_vm3, %v6151_v8, %v5271_v53 }
  0xf4   :  { %5314 = vrot.lane.b32.xlu2 %v5313_v45, %s5954_s20 }
  0xfc   :  { %268 = vrot.lane.b32.xlu2 %v235_v29, %s5953_s19 }
  0xfd   :  { %v5245_v34 = vpop.permute.xlu0 %5244  ;;  %v5265_v28 = vpop.permute.xlu1 %5264 }
  0xfe   :  { %v5247_v35 = vunpack.i.h.bf16 %v5245_v34  ;;  %v5246_v36 = vunpack.i.l.bf16 %v5245_v34  ;;  %v5267_v59 = vunpack.i.h.bf16 %v5265_v28  ;;  %v5266_v61 = vunpack.i.l.bf16 %v5265_v28  ;;  %v5285_v34 = vpop.permute.xlu2 %5284 }
  0xff   :  { %v5286_v29 = vunpack.i.l.bf16 %v5285_v34 }
 0x100   :  { %v554_v41 = vsel %vm553_vm6, %v537_v39, %v5246_v36  ;;  %v555_v42 = vsel %vm553_vm6, %v538_v40, %v5247_v35  ;;  %v5287_v40 = vunpack.i.h.bf16 %v5285_v34 }
 0x101   :  { %v570_v43 = vpack.c.bf16 %v555_v42, %v554_v41 }
 0x103   :  { %4696 = vmatmul.msk.bf16.vlgmr.msra.gmra.mxu0 %vm622_vm7, %v570_v43 }
 0x105   :  { %v5260_v48 = vpop.permute.xlu0 %5259  ;;  %v5280_v54 = vpop.permute.xlu1 %5279 }
 0x106   :  { %v5262_v49 = vunpack.i.h.bf16 %v5260_v48  ;;  %v5261_v50 = vunpack.i.l.bf16 %v5260_v48  ;;  %v5282_v21 = vunpack.i.h.bf16 %v5280_v54  ;;  %v5281_v4 = vunpack.i.l.bf16 %v5280_v54 }
 0x108   :  { %v539_v55 = vsel %vm536_vm5, %v6144_v1, %v5261_v50  ;;  %v540_v56 = vsel %vm536_vm5, %v6180_v38, %v5262_v49 }
 0x109   :  { %v556_v1 = vsel %vm553_vm6, %v539_v55, %v5266_v61  ;;  %v557_v38 = vsel %vm553_vm6, %v540_v56, %v5267_v59 }
 0x10a   :  { %v571_v10 = vpack.c.bf16 %v557_v38, %v556_v1 }
 0x10d   :  { %v5275_v58 = vpop.permute.xlu0 %5274  ;;  %v5295_v60 = vpop.permute.xlu1 %5294 }
 0x10e   :  { %v5277_v7 = vunpack.i.h.bf16 %v5275_v58  ;;  %v5276_v46 = vunpack.i.l.bf16 %v5275_v58  ;;  %v5297_v25 = vunpack.i.h.bf16 %v5295_v60  ;;  %v5296_v22 = vunpack.i.l.bf16 %v5295_v60 }
 0x110   :  { %v6352_v14 = vsel %vm408_vm4, %v401_v2, %v5276_v46  ;;  %v6355_v16 = vsel %vm408_vm4, %v402_v62, %v5277_v7  ;;  %v6422_v46 = vld [vmem:[%s9017_s2] ss:$0 sm:$0xff]  ;;  %s5957_s2 = smov 32  }
 0x111   :  { %v5318_v8 = vpack.i.bf16 %v6352_v14, %v6349_v5  ;;  %v5323_v31 = vpack.i.bf16 %v6355_v16, %v6352_v14 }
 0x113   :  { %5319 = vrot.lane.b32.xlu0 %v5318_v8, %s5955_s12  ;;  %4697 = vmatmul.msk.bf16.gmra.mxu0 %vm622_vm7, %v571_v10 }
 0x114   :  { %5324 = vrot.lane.b32.xlu1 %v5323_v31, %s5956_s17 }
 0x115   :  { %v5290_v17 = vpop.permute.xlu0 %5289  ;;  %v5310_v48 = vpop.permute.xlu1 %5309 }
 0x116   :  { %v5292_v45 = vunpack.i.h.bf16 %v5290_v17  ;;  %v5291_v20 = vunpack.i.l.bf16 %v5290_v17  ;;  %v5312_v49 = vunpack.i.h.bf16 %v5310_v48 }
 0x118   :  { %v404_v24 = vsel %vm390_vm3, %v6202_v47, %v5292_v45  ;;  %v403_v32 = vsel %vm390_vm3, %v6197_v44, %v5291_v20  ;;  %v541_v44 = vsel %vm536_vm5, %v6177_v37, %v5281_v4  ;;  %v542_v47 = vsel %vm536_vm5, %v6166_v26, %v5282_v21 }
 0x119   :  { %v6371_v35 = vsel %vm408_vm4, %v403_v32, %v5296_v22  ;;  %v6374_v30 = vsel %vm408_vm4, %v404_v24, %v5297_v25  ;;  %v558_v28 = vsel %vm553_vm6, %v541_v44, %v5286_v29  ;;  %v559_v41 = vsel %vm553_vm6, %v542_v47, %v5287_v40 }
 0x11a   :  { %v5328_v36 = vpack.i.bf16 %v6371_v35, %v6355_v16  ;;  %v5333_v39 = vpack.i.bf16 %v6374_v30, %v6371_v35  ;;  %v572_v42 = vpack.c.bf16 %v559_v41, %v558_v28  ;;  %v5311_v37 = vunpack.i.l.bf16 %v5310_v48 }
 0x11b   :  { %371 = vrot.lane.b32.xlu0 %v338_v33, %s5954_s20  ;;  %v406_v26 = vsel %vm390_vm3, %v6237_v19, %v5312_v49  ;;  %s5958_s20 = smov 64  }
 0x11c   :  { %5329 = vrot.lane.b32.xlu1 %v5328_v36, %s5955_s12  ;;  %5334 = vrot.lane.b32.xlu2 %v5333_v39, %s5956_s17  ;;  %v405_v50 = vsel %vm390_vm3, %v6234_v18, %v5311_v37 }
 0x123   :  { %4698 = vmatmul.msk.bf16.gmra.mxu0 %vm622_vm7, %v572_v42 }
 0x146   :  { %v5300_v43 = vpop.permute.xlu2 %5299 }
 0x147   :  { %v5302_v18 = vunpack.i.h.bf16 %v5300_v43  ;;  %v5301_v19 = vunpack.i.l.bf16 %v5300_v43 }
 0x149   :  { %v544_v62 = vsel %vm536_vm5, %v6247_v23, %v5302_v18  ;;  %v543_v2 = vsel %vm536_vm5, %v6194_v9, %v5301_v19 }
 0x14e   :  { %v5315_v51 = vpop.permute.xlu2 %5314 }
 0x14f   :  { %v5317_v52 = vunpack.i.h.bf16 %v5315_v51  ;;  %v5316_v63 = vunpack.i.l.bf16 %v5315_v51 }
 0x151   :  { %v6395_v53 = vsel %vm408_vm4, %v405_v50, %v5316_v63  ;;  %v6398_v54 = vsel %vm408_vm4, %v406_v26, %v5317_v52 }
 0x152   :  { %v5338_v55 = vpack.i.bf16 %v6395_v53, %v6374_v30  ;;  %v5343_v56 = vpack.i.bf16 %v6398_v54, %v6395_v53 }
 0x154   :  { %5339 = vrot.lane.b32.xlu0 %v5338_v55, %s5955_s12  ;;  %5344 = vrot.lane.b32.xlu1 %v5343_v56, %s5956_s17 }
 0x156   :  { %v269_v25 = vpop.permute.xlu2 %268 }
 0x157   :  { %v407_v21 = vsel %vm390_vm3, %v6321_v27, %v269_v25 }
 0x15e   :  { %v6406_v57 = vpop.permute.xlu0 %5304 }
 0x15f   :  { %v5307_v59 = vunpack.i.h.bf16 %v6406_v57  ;;  %v5306_v61 = vunpack.i.l.bf16 %v6406_v57 }
 0x161   :  { %v560_v58 = vsel %vm553_vm6, %v543_v2, %v5306_v61  ;;  %v561_v6 = vsel %vm553_vm6, %v544_v62, %v5307_v59 }
 0x162   :  { %v573_v7 = vpack.c.bf16 %v561_v6, %v560_v58 }
 0x164   :  { %4699 = vmatmul.msk.bf16.gmra.mxu0 %vm622_vm7, %v573_v7 }
 0x176   :  { %v5335_v18 = vpop.permute.xlu2 %5334 }
 0x177   :  { %v5337_v7 = vunpack.i.h.bf16 %v5335_v18 }
 0x180   :  { %v659_v1 = vpop.f32.mrf.mxu0 }
 0x181   :  { %v660_v23 = vadd.f32 %v6422_v46, %v659_v1  ;;  %v5336_v1 = vunpack.i.l.bf16 %v5335_v18 }
 0x183   :  { %v699_v38 = vmax.f32 %v660_v23, 0.0 }
 0x185   :  { %v5320_v8 = vpop.permute.xlu0 %5319  ;;  %v767_v60 = vrot.slane %v699_v38, 7 }
 0x186   :  { %v5322_v9 = vunpack.i.h.bf16 %v5320_v8  ;;  %v5321_v10 = vunpack.i.l.bf16 %v5320_v8  ;;  %v5325_v31 = vpop.permute.xlu1 %5324 }
 0x187   :  { %v5327_v11 = vunpack.i.h.bf16 %v5325_v31  ;;  %v5326_v13 = vunpack.i.l.bf16 %v5325_v31  ;;  %v6435_v32 = vsel %vm115_vm0, 0.0, %v767_v60  ;;  %v815_v33 = vsel %vm115_vm0, %v767_v60, 0.0 }
 0x188   :  { %v661_v17 = vpop.f32.mrf.mxu0  ;;  %v546_v22 = vsel %vm536_vm5, %v6349_v5, %v5322_v9  ;;  %v545_v45 = vsel %vm536_vm5, %v6303_v15, %v5321_v10  ;;  %v863_v39 = vrot.slane %v6435_v32, 1  ;;  %v864_v44 = vrot.slane %v815_v33, 1 }
 0x189   :  { %v662_v20 = vadd.f32 %v6422_v46, %v661_v17  ;;  %v562_v4 = vsel %vm553_vm6, %v545_v45, %v5326_v13  ;;  %v563_v24 = vsel %vm553_vm6, %v546_v22, %v5327_v11  ;;  %v962_v40 = vrot.slane %v6435_v32, 2 }
 0x18a   :  { %v574_v36 = vpack.c.bf16 %v563_v24, %v562_v4  ;;  %v963_v29 = vrot.slane %v815_v33, 2  ;;  %v865_v63 = vsel %vm184_vm1, %v863_v39, %v864_v44 }
 0x18b   :  { %v700_v34 = vmax.f32 %v662_v20, 0.0 }
 0x18c   :  { %4700 = vmatmul.msk.bf16.gmra.mxu0 %vm622_vm7, %v574_v36  ;;  %v964_v62 = vsel %vm287_vm2, %v962_v40, %v963_v29 }
 0x18d   :  { %v768_v5 = vrot.slane %v700_v34, 7  ;;  %v372_v15 = vpop.permute.xlu0 %371 }
 0x18e   :  { %v5330_v47 = vpop.permute.xlu1 %5329  ;;  %v425_v27 = vsel %vm408_vm4, %v407_v21, %v372_v15 }
 0x18f   :  { %v6443_v28 = vsel %vm115_vm0, 0.0, %v768_v5  ;;  %v816_v41 = vsel %vm115_vm0, %v768_v5, 0.0  ;;  %519 = vrot.lane.b32.xlu0 %v425_v27, %s5956_s17  ;;  %v5332_v26 = vunpack.i.h.bf16 %v5330_v47  ;;  %v5331_v50 = vunpack.i.l.bf16 %v5330_v47 }
 0x190   :  { %v866_v42 = vrot.slane %v6443_v28, 1  ;;  %v867_v43 = vrot.slane %v816_v41, 1  ;;  %v965_v48 = vrot.slane %v6443_v28, 2  ;;  %v966_v49 = vrot.slane %v816_v41, 2  ;;  %v664_v37 = vpop.f32.mrf.mxu0 }
 0x191   :  { %v5348_v51 = vpack.i.bf16 %v425_v27, %v6398_v54  ;;  %v665_v52 = vadd.f32 %v6422_v46, %v664_v37  ;;  %v548_v2 = vsel %vm536_vm5, %v6355_v16, %v5332_v26  ;;  %v547_v58 = vsel %vm536_vm5, %v6352_v14, %v5331_v50 }
 0x192   :  { %v868_v55 = vsel %vm184_vm1, %v866_v42, %v867_v43  ;;  %v967_v56 = vsel %vm287_vm2, %v965_v48, %v966_v49  ;;  %v564_v8 = vsel %vm553_vm6, %v547_v58, %v5336_v1  ;;  %v565_v9 = vsel %vm553_vm6, %v548_v2, %v5337_v7 }
 0x193   :  { %v701_v19 = vmax.f32 %v665_v52, 0.0  ;;  %5349 = vrot.lane.b32.xlu2 %v5348_v51, %s5955_s12  ;;  %v5353_v61 = vpack.i.bf16 %v868_v55, %v865_v63  ;;  %v5363_v6 = vpack.i.bf16 %v967_v56, %v964_v62  ;;  %v575_v60 = vpack.c.bf16 %v565_v9, %v564_v8  ;;  %s5959_s12 = smov 96  }
 0x195   :  { %5354 = vrot.lane.b32.xlu1 %v5353_v61, %s5957_s2  ;;  %v769_v23 = vrot.slane %v701_v19, 7 }
 0x197   :  { %5364 = vrot.lane.b32.xlu0 %v5363_v6, %s5958_s20  ;;  %v6466_v10 = vsel %vm115_vm0, 0.0, %v769_v23  ;;  %v817_v14 = vsel %vm115_vm0, %v769_v23, 0.0 }
 0x198   :  { %v666_v38 = vpop.f32.mrf.mxu0  ;;  %v869_v13 = vrot.slane %v6466_v10, 1  ;;  %v870_v17 = vrot.slane %v817_v14, 1  ;;  %v968_v25 = vrot.slane %v6466_v10, 2  ;;  %v969_v22 = vrot.slane %v817_v14, 2 }
 0x199   :  { %v667_v16 = vadd.f32 %v6422_v46, %v666_v38 }
 0x19a   :  { %v871_v5 = vsel %vm184_vm1, %v869_v13, %v870_v17  ;;  %v970_v39 = vsel %vm287_vm2, %v968_v25, %v969_v22 }
 0x19b   :  { %v702_v31 = vmax.f32 %v667_v16, 0.0 }
 0x19c   :  { %4701 = vmatmul.msk.bf16.gmra.mxu0 %vm622_vm7, %v575_v60 }
 0x19d   :  { %v770_v11 = vrot.slane %v702_v31, 7 }
 0x19f   :  { %v6473_v45 = vsel %vm115_vm0, 0.0, %v770_v11  ;;  %v818_v20 = vsel %vm115_vm0, %v770_v11, 0.0 }
 0x1a0   :  { %v872_v21 = vrot.slane %v6473_v45, 1  ;;  %v873_v4 = vrot.slane %v818_v20, 1  ;;  %v971_v24 = vrot.slane %v6473_v45, 2  ;;  %v972_v33 = vrot.slane %v818_v20, 2  ;;  %v669_v34 = vpop.f32.mrf.mxu0 }
 0x1a1   :  { %v670_v36 = vadd.f32 %v6422_v46, %v669_v34 }
 0x1a2   :  { %v874_v15 = vsel %vm184_vm1, %v872_v21, %v873_v4  ;;  %v973_v44 = vsel %vm287_vm2, %v971_v24, %v972_v33 }
 0x1a3   :  { %v703_v47 = vmax.f32 %v670_v36, 0.0  ;;  %v5358_v27 = vpack.i.bf16 %v874_v15, %v871_v5  ;;  %v5368_v40 = vpack.i.bf16 %v973_v44, %v970_v39 }
 0x1a5   :  { %5359 = vrot.lane.b32.xlu2 %v5358_v27, %s5957_s2  ;;  %5369 = vrot.lane.b32.xlu1 %v5368_v40, %s5958_s20  ;;  %v771_v29 = vrot.slane %v703_v47, 7 }
 0x1a7   :  { %v6487_v43 = vsel %vm115_vm0, 0.0, %v771_v29  ;;  %v819_v48 = vsel %vm115_vm0, %v771_v29, 0.0 }
 0x1a8   :  { %v671_v41 = vpop.f32.mrf.mxu0  ;;  %v875_v26 = vrot.slane %v6487_v43, 1  ;;  %v876_v50 = vrot.slane %v819_v48, 1  ;;  %v974_v51 = vrot.slane %v6487_v43, 2  ;;  %v975_v52 = vrot.slane %v819_v48, 2 }
 0x1a9   :  { %v672_v42 = vadd.f32 %v6422_v46, %v671_v41 }
 0x1aa   :  { %v877_v62 = vsel %vm184_vm1, %v875_v26, %v876_v50  ;;  %v976_v58 = vsel %vm287_vm2, %v974_v51, %v975_v52 }
 0x1ab   :  { %v704_v49 = vmax.f32 %v672_v42, 0.0 }
 0x1ad   :  { %v772_v37 = vrot.slane %v704_v49, 7 }
 0x1af   :  { %v6493_v63 = vsel %vm115_vm0, 0.0, %v772_v37  ;;  %v820_v55 = vsel %vm115_vm0, %v772_v37, 0.0 }
 0x1b0   :  { %v878_v56 = vrot.slane %v6493_v63, 1  ;;  %v879_v18 = vrot.slane %v820_v55, 1  ;;  %v977_v19 = vrot.slane %v6493_v63, 2  ;;  %v978_v61 = vrot.slane %v820_v55, 2 }
 0x1b2   :  { %v880_v2 = vsel %vm184_vm1, %v878_v56, %v879_v18  ;;  %v979_v6 = vsel %vm287_vm2, %v977_v19, %v978_v61 }
 0x1b3   :  { %v5373_v7 = vpack.i.bf16 %v880_v2, %v877_v62  ;;  %v5378_v1 = vpack.i.bf16 %v979_v6, %v976_v58 }
 0x1b5   :  { %5374 = vrot.lane.b32.xlu2 %v5373_v7, %s5957_s2  ;;  %5379 = vrot.lane.b32.xlu0 %v5378_v1, %s5958_s20 }
 0x1c6   :  { %v5340_v23 = vpop.permute.xlu0 %5339  ;;  %v5345_v38 = vpop.permute.xlu1 %5344 }
 0x1c7   :  { %v5342_v8 = vunpack.i.h.bf16 %v5340_v23  ;;  %v5341_v9 = vunpack.i.l.bf16 %v5340_v23  ;;  %v5347_v16 = vunpack.i.h.bf16 %v5345_v38  ;;  %v5346_v14 = vunpack.i.l.bf16 %v5345_v38 }
 0x1c9   :  { %v550_v31 = vsel %vm536_vm5, %v6374_v30, %v5342_v8  ;;  %v549_v60 = vsel %vm536_vm5, %v6371_v35, %v5341_v9 }
 0x1ca   :  { %v566_v11 = vsel %vm553_vm6, %v549_v60, %v5346_v14  ;;  %v567_v13 = vsel %vm553_vm6, %v550_v31, %v5347_v16 }
 0x1cb   :  { %v576_v17 = vpack.c.bf16 %v567_v13, %v566_v11 }
 0x1cd   :  { %4702 = vmatmul.msk.bf16.vlgmr.msra.gmra.mxu1 %vm622_vm7, %v576_v17 }
 0x1e1   :  { %v674_v25 = vpop.f32.mrf.mxu0 }
 0x1e2   :  { %v675_v22 = vadd.f32 %v6422_v46, %v674_v25 }
 0x1e4   :  { %v705_v20 = vmax.f32 %v675_v22, 0.0 }
 0x1e6   :  { %v773_v21 = vrot.slane %v705_v20, 7 }
 0x1e8   :  { %v6513_v4 = vsel %vm115_vm0, 0.0, %v773_v21  ;;  %v821_v30 = vsel %vm115_vm0, %v773_v21, 0.0 }
 0x1e9   :  { %v881_v24 = vrot.slane %v6513_v4, 1  ;;  %v882_v35 = vrot.slane %v821_v30, 1  ;;  %v676_v15 = vpop.f32.mrf.mxu0  ;;  %v980_v48 = vrot.slane %v6513_v4, 2 }
 0x1ea   :  { %v677_v47 = vadd.f32 %v6422_v46, %v676_v15 }
 0x1eb   :  { %v883_v33 = vsel %vm184_vm1, %v881_v24, %v882_v35 }
 0x1ec   :  { %v5383_v34 = vpack.i.bf16 %v6081_v0, %v883_v33  ;;  %v706_v42 = vmax.f32 %v677_v47, 0.0 }
 0x1ed   :  { %v5350_v36 = vpop.permute.xlu2 %5349 }
 0x1ee   :  { %5384 = vrot.lane.b32.xlu1 %v5383_v34, %s5957_s2  ;;  %v5352_v5 = vunpack.i.h.bf16 %v5350_v36  ;;  %v5351_v39 = vunpack.i.l.bf16 %v5350_v36  ;;  %v774_v37 = vrot.slane %v706_v42, 7 }
 0x1f0   :  { %v552_v44 = vsel %vm536_vm5, %v6398_v54, %v5352_v5  ;;  %v551_v40 = vsel %vm536_vm5, %v6395_v53, %v5351_v39  ;;  %v981_v54 = vrot.slane %v821_v30, 2  ;;  %v6537_v18 = vsel %vm115_vm0, 0.0, %v774_v37 }
 0x1f1   :  { %v569_v29 = vsel %vm553_vm6, %v552_v44, %v5307_v59  ;;  %v884_v7 = vrot.slane %v6537_v18, 1  ;;  %v983_v20 = vrot.slane %v6537_v18, 2 }
 0x1f2   :  { %v982_v19 = vsel %vm287_vm2, %v980_v48, %v981_v54 }
 0x1ff   :  { %v5360_v14 = vpop.permute.xlu2 %5359 }
 0x200   :  { %v5362_v25 = vunpack.i.h.bf16 %v5360_v14  ;;  %v5361_v22 = vunpack.i.l.bf16 %v5360_v14 }
 0x201   :  { %v520_v27 = vpop.permute.xlu0 %519 }
 0x202   :  { %v568_v0 = vsel %vm553_vm6, %v551_v40, %v520_v27  ;;  %v1066_v34 = vsel %vm1061_vm8, %v6473_v45, %v5362_v25  ;;  %v1065_v36 = vsel %vm1061_vm8, %v6466_v10, %v5361_v22 }
 0x203   :  { %v577_v41 = vpack.c.bf16 %v569_v29, %v568_v0 }
 0x205   :  { %4703 = vmatmul.msk.bf16.gmra.mxu1 %vm622_vm7, %v577_v41 }
 0x207   :  { %v5355_v49 = vpop.permute.xlu1 %5354 }
 0x208   :  { %v5357_v26 = vunpack.i.h.bf16 %v5355_v49  ;;  %v5356_v50 = vunpack.i.l.bf16 %v5355_v49 }
 0x209   :  { %v5365_v51 = vpop.permute.xlu0 %5364  ;;  %v679_v59 = vpop.f32.mrf.mxu0 }
 0x20a   :  { %v1064_v53 = vsel %vm1061_vm8, %v6443_v28, %v5357_v26  ;;  %v1063_v57 = vsel %vm1061_vm8, %v6435_v32, %v5356_v50  ;;  %v5367_v52 = vunpack.i.h.bf16 %v5365_v51  ;;  %v5366_v55 = vunpack.i.l.bf16 %v5365_v51 }
 0x20b   :  { %v680_v56 = vadd.f32 %v6422_v46, %v679_v59  ;;  %v822_v28 = vsel %vm115_vm0, %v774_v37, 0.0 }
 0x20c   :  { %v6541_v61 = vsel %vm1079_vm9, %v1064_v53, %v5367_v52  ;;  %v6544_v62 = vsel %vm1079_vm9, %v1063_v57, %v5366_v55  ;;  %v885_v1 = vrot.slane %v822_v28, 1  ;;  %v984_v21 = vrot.slane %v822_v28, 2 }
 0x20d   :  { %v707_v2 = vmax.f32 %v680_v56, 0.0  ;;  %v5388_v32 = vpack.i.bf16 %v6541_v61, %v982_v19  ;;  %v5393_v58 = vpack.i.bf16 %v6541_v61, %v6544_v62 }
 0x20e   :  { %v886_v60 = vsel %vm184_vm1, %v884_v7, %v885_v1  ;;  %v985_v44 = vsel %vm287_vm2, %v983_v20, %v984_v21 }
 0x20f   :  { %v775_v6 = vrot.slane %v707_v2, 7  ;;  %5389 = vrot.lane.b32.xlu2 %v5388_v32, %s5958_s20  ;;  %5394 = vrot.lane.b32.xlu0 %v5393_v58, %s5959_s12  ;;  %v5375_v37 = vpop.permute.xlu2 %5374 }
 0x210   :  { %v5376_v52 = vunpack.i.l.bf16 %v5375_v37 }
 0x211   :  { %v6554_v23 = vsel %vm115_vm0, 0.0, %v775_v6  ;;  %v823_v38 = vsel %vm115_vm0, %v775_v6, 0.0  ;;  %v681_v16 = vpop.f32.mrf.mxu0 }
 0x212   :  { %v887_v8 = vrot.slane %v6554_v23, 1  ;;  %v888_v9 = vrot.slane %v823_v38, 1  ;;  %v682_v31 = vadd.f32 %v6422_v46, %v681_v16  ;;  %v986_v55 = vrot.slane %v6554_v23, 2 }
 0x213   :  { %v987_v56 = vrot.slane %v823_v38, 2  ;;  %v1067_v6 = vsel %vm1061_vm8, %v6487_v43, %v5376_v52  ;;  %v5377_v38 = vunpack.i.h.bf16 %v5375_v37  ;;  %v5111_v52 = vld [vmem:[%s9018_s3 + $0x20] sm:$0xff] }
 0x214   :  { %v889_v11 = vsel %vm184_vm1, %v887_v8, %v888_v9  ;;  %v708_v13 = vmax.f32 %v682_v31, 0.0 }
 0x215   :  { %v5403_v17 = vpack.i.bf16 %v889_v11, %v886_v60  ;;  %v988_v1 = vsel %vm287_vm2, %v986_v55, %v987_v56  ;;  %v1068_v31 = vsel %vm1061_vm8, %v6493_v63, %v5377_v38  ;;  %v5118_v56 = vld [vmem:[%s9018_s3 + $0x58] sm:$0xff]  ;;  %v5116_v38 = vld [vmem:[%s9018_s3 + $0x48] sm:$0xff] }
 0x216   :  { %v776_v33 = vrot.slane %v708_v13, 7 }
 0x217   :  { %v5370_v30 = vpop.permute.xlu1 %5369  ;;  %5404 = vrot.lane.b32.xlu2 %v5403_v17, %s5957_s2 }
 0x218   :  { %v5372_v24 = vunpack.i.h.bf16 %v5370_v30  ;;  %v5371_v35 = vunpack.i.l.bf16 %v5370_v30  ;;  %v6579_v45 = vsel %vm115_vm0, 0.0, %v776_v33  ;;  %v824_v10 = vsel %vm115_vm0, %v776_v33, 0.0 }
 0x219   :  { %v684_v5 = vpop.f32.mrf.mxu0  ;;  %v890_v41 = vrot.slane %v6579_v45, 1  ;;  %v891_v42 = vrot.slane %v824_v10, 1  ;;  %v989_v19 = vrot.slane %v6579_v45, 2  ;;  %v990_v28 = vrot.slane %v824_v10, 2 }
 0x21a   :  { %v685_v15 = vadd.f32 %v6422_v46, %v684_v5  ;;  %v6569_v39 = vsel %vm1079_vm9, %v1065_v36, %v5371_v35  ;;  %v6573_v47 = vsel %vm1079_vm9, %v1066_v34, %v5372_v24 }
 0x21b   :  { %v5398_v27 = vpack.i.bf16 %v6085_v3, %v6569_v39  ;;  %v5408_v40 = vpack.i.bf16 %v6573_v47, %v985_v44  ;;  %v5413_v26 = vpack.i.bf16 %v6573_v47, %v6569_v39  ;;  %v892_v50 = vsel %vm184_vm1, %v890_v41, %v891_v42 }
 0x21c   :  { %v709_v29 = vmax.f32 %v685_v15, 0.0  ;;  %v991_v7 = vsel %vm287_vm2, %v989_v19, %v990_v28  ;;  %v5110_v19 = vld [vmem:[%s9018_s3 + $0x18] sm:$0xff] }
 0x21d   :  { %5399 = vrot.lane.b32.xlu1 %v5398_v27, %s5958_s20  ;;  %5409 = vrot.lane.b32.xlu0 %v5408_v40, %s5958_s20 }
 0x21e   :  { %v777_v0 = vrot.slane %v709_v29, 7 }
 0x220   :  { %v6586_v48 = vsel %vm115_vm0, 0.0, %v777_v0  ;;  %v825_v3 = vsel %vm115_vm0, %v777_v0, 0.0 }
 0x221   :  { %v893_v49 = vrot.slane %v6586_v48, 1  ;;  %v894_v54 = vrot.slane %v825_v3, 1  ;;  %v992_v53 = vrot.slane %v6586_v48, 2  ;;  %v993_v57 = vrot.slane %v825_v3, 2  ;;  %v686_v11 = vpop.f32.mrf.mxu0  ;;  %v5122_v3 = vld [vmem:[%s9018_s3 + $0x78] sm:$0xff] }
 0x222   :  { %v687_v13 = vadd.f32 %v6422_v46, %v686_v11  ;;  %1445 = vmatpush.bf16.msra.mxu2 %v5122_v3 }
 0x223   :  { %v895_v51 = vsel %vm184_vm1, %v893_v49, %v894_v54  ;;  %v994_v58 = vsel %vm287_vm2, %v992_v53, %v993_v57  ;;  %v5114_v49 = vld [vmem:[%s9018_s3 + $0x38] sm:$0xff]  ;;  %v5112_v53 = vld [vmem:[%s9018_s3 + $0x28] sm:$0xff]  ;;  %v5119_v57 = vld [vmem:[%s9018_s3 + $0x60] sm:$0xff] }
 0x224   :  { %v5423_v59 = vpack.i.bf16 %v895_v51, %v892_v50  ;;  %v5428_v9 = vpack.i.bf16 %v994_v58, %v991_v7  ;;  %v710_v17 = vmax.f32 %v687_v13, 0.0  ;;  %1396 = vmatpush.bf16.msrb.mxu1 %v5114_v49  ;;  %v5113_v50 = vld [vmem:[%s9018_s3 + $0x30] sm:$0xff]  ;;  %v5120_v51 = vld [vmem:[%s9018_s3 + $0x68] sm:$0xff] }
 0x225   :  { %5414 = vrot.lane.b32.xlu1 %v5413_v26, %s5959_s12  ;;  %v5121_v26 = vld [vmem:[%s9018_s3 + $0x70] sm:$0xff] }
 0x226   :  { %5424 = vrot.lane.b32.xlu0 %v5423_v59, %s5957_s2  ;;  %v778_v25 = vrot.slane %v710_v17, 7  ;;  %1446 = vmatpush.bf16.msra.mxu2 %v5121_v26  ;;  %v5117_v58 = vld [vmem:[%s9018_s3 + $0x50] sm:$0xff] }
 0x227   :  { %v5380_v2 = vpop.permute.xlu0 %5379  ;;  %v5109_v7 = vld [vmem:[%s9018_s3 + $0x10] sm:$0xff] }
 0x228   :  { %v5381_v32 = vunpack.i.l.bf16 %v5380_v2  ;;  %v5382_v14 = vunpack.i.h.bf16 %v5380_v2  ;;  %v6621_v21 = vsel %vm115_vm0, 0.0, %v778_v25  ;;  %v826_v63 = vsel %vm115_vm0, %v778_v25, 0.0  ;;  %1397 = vmatpush.bf16.msrb.mxu1 %v5113_v50 }
 0x229   :  { %v896_v35 = vrot.slane %v6621_v21, 1  ;;  %v897_v33 = vrot.slane %v826_v63, 1  ;;  %v995_v34 = vrot.slane %v6621_v21, 2  ;;  %v996_v36 = vrot.slane %v826_v63, 2 }
 0x22a   :  { %v6605_v8 = vsel %vm1079_vm9, %v1067_v6, %v5381_v32  ;;  %v6613_v43 = vsel %vm1079_vm9, %v1068_v31, %v5382_v14  ;;  %1447 = vmatpush.bf16.msra.mxu2 %v5120_v51  ;;  %v5115_v14 = vld [vmem:[%s9018_s3 + $0x40] sm:$0xff] }
 0x22b   :  { %v5418_v16 = vpack.i.bf16 %v988_v1, %v6605_v8  ;;  %v5433_v60 = vpack.i.bf16 %v6613_v43, %v6605_v8  ;;  %v898_v29 = vsel %vm184_vm1, %v896_v35, %v897_v33  ;;  %v997_v41 = vsel %vm287_vm2, %v995_v34, %v996_v36  ;;  %v5107_v31 = vld [vmem:[%s9018_s3] sm:$0xff] }
 0x22c   :  { %1398 = vmatpush.bf16.msrb.mxu1 %v5112_v53 }
 0x22d   :  { %5429 = vrot.lane.b32.xlu1 %v5428_v9, %s5958_s20  ;;  %5419 = vrot.lane.b32.xlu2 %v5418_v16, %s5958_s20  ;;  %v5108_v9 = vld [vmem:[%s9018_s3 + $0x8] sm:$0xff]  ;;  %v5123_v16 = vld [vmem:[%s9018_s3 + $0x80] sm:$0xff] }
 0x22e   :  { %1448 = vmatpush.bf16.msra.mxu2 %v5119_v57 }
 0x230   :  { %1399 = vmatpush.bf16.msrb.mxu1 %v5111_v52 }
 0x232   :  { %1449 = vmatpush.bf16.msra.mxu2 %v5118_v56 }
 0x234   :  { %1400 = vmatpush.bf16.msrb.mxu1 %v5110_v19 }
 0x235   :  { %5434 = vrot.lane.b32.xlu2 %v5433_v60, %s5959_s12 }
 0x236   :  { %1450 = vmatpush.bf16.msra.mxu2 %v5117_v58 }
 0x238   :  { %1401 = vmatpush.bf16.msrb.mxu1 %v5109_v7 }
 0x23a   :  { %1451 = vmatpush.bf16.msra.mxu2 %v5116_v38 }
 0x23c   :  { %1402 = vmatpush.bf16.msrb.mxu1 %v5108_v9 }
 0x23e   :  { %1452 = vmatpush.bf16.msra.mxu2 %v5115_v14 }
 0x240   :  { %1403 = vmatpush.bf16.msrb.mxu1 %v5107_v31 }
 0x24a   :  { %v689_v22 = vpop.f32.mrf.mxu1 }
 0x24b   :  { %v690_v20 = vadd.f32 %v6422_v46, %v689_v22 }
 0x24d   :  { %v711_v30 = vmax.f32 %v690_v20, 0.0 }
 0x24f   :  { %v779_v24 = vrot.slane %v711_v30, 7 }
 0x251   :  { %v6627_v5 = vsel %vm115_vm0, 0.0, %v779_v24  ;;  %v827_v15 = vsel %vm115_vm0, %v779_v24, 0.0 }
 0x252   :  { %v899_v44 = vrot.slane %v6627_v5, 1  ;;  %v900_v27 = vrot.slane %v827_v15, 1  ;;  %v998_v40 = vrot.slane %v6627_v5, 2  ;;  %v999_v10 = vrot.slane %v827_v15, 2  ;;  %v691_v60 = vpop.f32.mrf.mxu1 }
 0x253   :  { %v692_v11 = vadd.f32 %v6422_v46, %v691_v60 }
 0x254   :  { %v901_v0 = vsel %vm184_vm1, %v899_v44, %v900_v27  ;;  %v1000_v42 = vsel %vm287_vm2, %v998_v40, %v999_v10 }
 0x255   :  { %v5443_v54 = vpack.i.bf16 %v901_v0, %v898_v29  ;;  %v5448_v37 = vpack.i.bf16 %v1000_v42, %v997_v41  ;;  %v712_v13 = vmax.f32 %v692_v11, 0.0 }
 0x257   :  { %5444 = vrot.lane.b32.xlu1 %v5443_v54, %s5957_s2  ;;  %5449 = vrot.lane.b32.xlu2 %v5448_v37, %s5958_s20  ;;  %v780_v17 = vrot.slane %v712_v13, 7 }
 0x259   :  { %v6709_v20 = vsel %vm115_vm0, 0.0, %v780_v17  ;;  %v6712_v63 = vsel %vm115_vm0, %v780_v17, 0.0 }
 0x25a   :  { %v902_v35 = vrot.slane %v6709_v20, 1  ;;  %v903_v33 = vrot.slane %v6712_v63, 1  ;;  %v1002_v14 = vrot.slane %v6712_v63, 2 }
 0x25c   :  { %v904_v10 = vsel %vm184_vm1, %v902_v35, %v903_v33 }
 0x260   :  { %v6659_v59 = vpop.permute.xlu1 %5384 }
 0x261   :  { %v5386_v55 = vunpack.i.l.bf16 %v6659_v59  ;;  %v5387_v41 = vunpack.i.h.bf16 %v6659_v59 }
 0x263   :  { %v1069_v32 = vsel %vm1061_vm8, %v6513_v4, %v5386_v55  ;;  %v5124_v4 = vld [vmem:[%s9018_s3 + $0x88] sm:$0xff]  ;;  %v1062_v52 = vsel %vm1061_vm8, %v6026_v12, %v5387_v41 }
 0x264   :  { %1500 = vmatpush.bf16.msrb.mxu0 %v5124_v4  ;;  %5186 = vmatpush.bf16.msra.mxu3 %v5124_v4 }
 0x268   :  { %1501 = vmatpush.bf16.msrb.mxu0 %v5123_v16  ;;  %5187 = vmatpush.bf16.msra.mxu3 %v5123_v16  ;;  %v1001_v16 = vrot.slane %v6709_v20, 2 }
 0x269   :  { %v6671_v28 = vpop.permute.xlu2 %5389 }
 0x26a   :  { %v5391_v2 = vunpack.i.l.bf16 %v6671_v28  ;;  %v5392_v26 = vunpack.i.h.bf16 %v6671_v28  ;;  %v1003_v35 = vsel %vm287_vm2, %v1001_v16, %v1002_v14 }
 0x26c   :  { %v6680_v6 = vsel %vm1079_vm9, %v1069_v32, %v5391_v2 }
 0x26d   :  { %v5438_v1 = vpack.i.bf16 %v6680_v6, %v6613_v43 }
 0x26f   :  { %5439 = vrot.lane.b32.xlu0 %v5438_v1, %s5958_s20 }
 0x271   :  { %v5405_v40 = vpop.permute.xlu2 %5404 }
 0x272   :  { %v5406_v3 = vunpack.i.l.bf16 %v5405_v40  ;;  %v5407_v11 = vunpack.i.h.bf16 %v5405_v40 }
 0x274   :  { %v1070_v59 = vsel %vm1061_vm8, %v6537_v18, %v5406_v3 }
 0x281   :  { %v5395_v34 = vpop.permute.xlu0 %5394 }
 0x282   :  { %v694_v25 = vpop.f32.mrf.mxu1  ;;  %v5397_v49 = vunpack.i.h.bf16 %v5395_v34  ;;  %v5396_v54 = vunpack.i.l.bf16 %v5395_v34 }
 0x283   :  { %v695_v22 = vadd.f32 %v6422_v46, %v694_v25 }
 0x284   :  { %v1224_v2 = vsel %vm1079_vm9, %v5396_v54, %v5392_v26  ;;  %v1209_v32 = vsel %vm1207_vm10, %v6544_v62, %v5397_v49 }
 0x285   :  { %v713_v30 = vmax.f32 %v695_v22, 0.0 }
 0x287   :  { %v781_v24 = vrot.slane %v713_v30, 7  ;;  %v5420_v31 = vpop.permute.xlu2 %5419 }
 0x288   :  { %v5422_v25 = vunpack.i.h.bf16 %v5420_v31  ;;  %v5421_v63 = vunpack.i.l.bf16 %v5420_v31 }
 0x289   :  { %v6717_v36 = vsel %vm115_vm0, 0.0, %v781_v24  ;;  %v829_v15 = vsel %vm115_vm0, %v781_v24, 0.0 }
 0x28a   :  { %v905_v44 = vrot.slane %v6717_v36, 1  ;;  %v906_v27 = vrot.slane %v829_v15, 1  ;;  %v696_v42 = vpop.f32.mrf.mxu1  ;;  %v1004_v38 = vrot.slane %v6717_v36, 2  ;;  %v1005_v9 = vrot.slane %v829_v15, 2 }
 0x28b   :  { %v697_v50 = vadd.f32 %v6422_v46, %v696_v42 }
 0x28c   :  { %v907_v29 = vsel %vm184_vm1, %v905_v44, %v906_v27  ;;  %v1006_v17 = vsel %vm287_vm2, %v1004_v38, %v1005_v9  ;;  %v1071_v44 = vsel %vm1061_vm8, %v6554_v23, %v5407_v11 }
 0x28d   :  { %v5463_v0 = vpack.i.bf16 %v907_v29, %v904_v10  ;;  %v714_v58 = vmax.f32 %v697_v50, 0.0  ;;  %v5468_v15 = vpack.i.bf16 %v1006_v17, %v1003_v35 }
 0x28f   :  { %5464 = vrot.lane.b32.xlu2 %v5463_v0, %s5957_s2  ;;  %v5400_v37 = vpop.permute.xlu1 %5399  ;;  %v5410_v57 = vpop.permute.xlu0 %5409  ;;  %v782_v60 = vrot.slane %v714_v58, 7  ;;  %v6759_v0 = vsel %vm1079_vm9, %v1071_v44, %v5422_v25 }
 0x290   :  { %v5402_v51 = vunpack.i.h.bf16 %v5400_v37  ;;  %v5401_v53 = vunpack.i.l.bf16 %v5400_v37  ;;  %v5411_v19 = vunpack.i.l.bf16 %v5410_v57  ;;  %v5412_v27 = vunpack.i.h.bf16 %v5410_v57 }
 0x291   :  { %v830_v22 = vsel %vm115_vm0, %v782_v60, 0.0  ;;  %v6755_v40 = vsel %vm115_vm0, 0.0, %v782_v60 }
 0x292   :  { %v6732_v55 = vsel %vm1079_vm9, %v1062_v52, %v5402_v51  ;;  %v1242_v56 = vpack.c.bf16 %v5401_v53, %v5392_v26  ;;  %v1225_v28 = vsel %vm1079_vm9, %v5397_v49, %v5401_v53  ;;  %v1088_v12 = vsel %vm1079_vm9, %v1070_v59, %v5411_v19  ;;  %v5435_v19 = vpop.permute.xlu2 %5434 }
 0x293   :  { %v1208_v46 = vsel %vm1207_vm10, %v6732_v55, %v5396_v54  ;;  %v1241_v18 = vpack.c.bf16 %v1225_v28, %v1224_v2  ;;  %v5458_v1 = vpack.i.bf16 %v6732_v55, %v1088_v12  ;;  %v5453_v4 = vpack.i.bf16 %v1088_v12, %v6680_v6 }
 0x294   :  { %4776 = vmatmul.msk.bf16.vlgmr.msrb.gmra.mxu0 %vm1061_vm8, %v1242_v56  ;;  %v1240_v7 = vpack.c.bf16 %v1209_v32, %v1208_v46  ;;  %v909_v10 = vrot.slane %v830_v22, 1  ;;  %v1245_v50 = vpack.c.bf16 %v5421_v63, %v5412_v27  ;;  %v908_v57 = vrot.slane %v6755_v40, 1 }
 0x295   :  { %1453 = vmatmul.bf16.vlgmr.msra.gmra.mxu2 %v1241_v18  ;;  %5459 = vrot.lane.b32.xlu1 %v5458_v1, %s5958_s20  ;;  %v1008_v59 = vrot.slane %v830_v22, 2  ;;  %v1007_v56 = vrot.slane %v6755_v40, 2  ;;  %v5437_v28 = vunpack.i.h.bf16 %v5435_v19  ;;  %v5436_v46 = vunpack.i.l.bf16 %v5435_v19 }
 0x296   :  { %1404 = vmatmul.bf16.vlgmr.msrb.gmra.mxu1 %v1240_v7  ;;  %5454 = vrot.lane.b32.xlu0 %v5453_v4, %s5959_s12 }
 0x297   :  { %v5415_v62 = vpop.permute.xlu1 %5414  ;;  %v1009_v2 = vsel %vm287_vm2, %v1007_v56, %v1008_v59  ;;  %v1212_v32 = vsel %vm1207_vm10, %v6573_v47, %v5436_v46  ;;  %v1213_v58 = vsel %vm1207_vm10, %v6605_v8, %v5437_v28 }
 0x298   :  { %v5425_v13 = vpop.permute.xlu0 %5424  ;;  %v5417_v30 = vunpack.i.h.bf16 %v5415_v62  ;;  %v5416_v24 = vunpack.i.l.bf16 %v5415_v62  ;;  %v1246_v12 = vpack.c.bf16 %v1213_v58, %v1212_v32 }
 0x299   :  { %v5427_v33 = vunpack.i.h.bf16 %v5425_v13  ;;  %v5426_v34 = vunpack.i.l.bf16 %v5425_v13 }
 0x29a   :  { %v1226_v3 = vsel %vm1079_vm9, %v5416_v24, %v5412_v27  ;;  %v1227_v49 = vsel %vm1079_vm9, %v5417_v30, %v5421_v63  ;;  %v1210_v37 = vsel %vm1207_vm10, %v6541_v61, %v5416_v24  ;;  %v1211_v26 = vsel %vm1207_vm10, %v6569_v39, %v5417_v30 }
 0x29b   :  { %v1073_v23 = vsel %vm1061_vm8, %v6586_v48, %v5427_v33  ;;  %v1072_v54 = vsel %vm1061_vm8, %v6579_v45, %v5426_v34  ;;  %v1244_v61 = vpack.c.bf16 %v1227_v49, %v1226_v3  ;;  %v1243_v52 = vpack.c.bf16 %v1211_v26, %v1210_v37 }
 0x29c   :  { %v910_v39 = vsel %vm184_vm1, %v908_v57, %v909_v10 }
 0x29e   :  { %5469 = vrot.lane.b32.xlu0 %v5468_v15, %s5958_s20 }
 0x29f   :  { %v5430_v29 = vpop.permute.xlu1 %5429 }
 0x2a0   :  { %v5432_v41 = vunpack.i.h.bf16 %v5430_v29  ;;  %v5431_v42 = vunpack.i.l.bf16 %v5430_v29 }
 0x2a2   :  { %v6772_v51 = vsel %vm1079_vm9, %v1072_v54, %v5431_v42  ;;  %v6775_v53 = vsel %vm1079_vm9, %v1073_v23, %v5432_v41 }
 0x2a3   :  { %v5478_v48 = vpack.i.bf16 %v6775_v53, %v6772_v51  ;;  %v5473_v45 = vpack.i.bf16 %v6772_v51, %v6759_v0 }
 0x2a4   :  { %4777 = vmatmul.msk.bf16.gmra.mxu0 %vm1061_vm8, %v1245_v50 }
 0x2a5   :  { %5479 = vrot.lane.b32.xlu2 %v5478_v48, %s5958_s20  ;;  %5474 = vrot.lane.b32.xlu1 %v5473_v45, %s5959_s12 }
 0x2a6   :  { %1458 = vmatmul.bf16.gmra.mxu2 %v1244_v61  ;;  %1409 = vmatmul.bf16.gmra.mxu1 %v1243_v52 }
 0x2a7   :  { %943 = vrot.lane.b32.xlu0 %v910_v39, %s5957_s2 }
 0x2ad   :  { %1042 = vrot.lane.b32.xlu1 %v1009_v2, %s5958_s20 }
 0x2b1   :  { %v5450_v18 = vpop.permute.xlu2 %5449 }
 0x2b2   :  { %v5452_v38 = vunpack.i.h.bf16 %v5450_v18  ;;  %v5451_v9 = vunpack.i.l.bf16 %v5450_v18 }
 0x2b6   :  { %1414 = vmatmul.bf16.gmra.mxu1 %v1246_v12 }
 0x2c9   :  { %v5445_v7 = vpop.permute.xlu1 %5444 }
 0x2ca   :  { %v5447_v1 = vunpack.i.h.bf16 %v5445_v7  ;;  %v5446_v4 = vunpack.i.l.bf16 %v5445_v7 }
 0x2cc   :  { %v1075_v62 = vsel %vm1061_vm8, %v6627_v5, %v5447_v1  ;;  %v1074_v16 = vsel %vm1061_vm8, %v6621_v21, %v5446_v4 }
 0x2cd   :  { %v6799_v14 = vsel %vm1079_vm9, %v1074_v16, %v5451_v9  ;;  %v6802_v47 = vsel %vm1079_vm9, %v1075_v62, %v5452_v38 }
 0x2ce   :  { %v5483_v8 = vpack.i.bf16 %v6799_v14, %v6775_v53  ;;  %v5488_v31 = vpack.i.bf16 %v6802_v47, %v6799_v14 }
 0x2d0   :  { %5484 = vrot.lane.b32.xlu2 %v5483_v8, %s5959_s12  ;;  %5489 = vrot.lane.b32.xlu0 %v5488_v31, %s5958_s20 }
 0x2e1   :  { %v5440_v5 = vpop.permute.xlu0 %5439 }
 0x2e2   :  { %v5442_v60 = vunpack.i.h.bf16 %v5440_v5  ;;  %v5441_v11 = vunpack.i.l.bf16 %v5440_v5 }
 0x2e4   :  { %v1248_v21 = vpack.c.bf16 %v5442_v60, %v5441_v11  ;;  %v1228_v13 = vsel %vm1079_vm9, %v5436_v46, %v5441_v11  ;;  %v1229_v17 = vsel %vm1079_vm9, %v5437_v28, %v5442_v60 }
 0x2e5   :  { %v1247_v25 = vpack.c.bf16 %v1229_v17, %v1228_v13 }
 0x2e6   :  { %4778 = vmatmul.msk.bf16.gmra.mxu0 %vm1061_vm8, %v1248_v21 }
 0x2e7   :  { %1463 = vmatmul.bf16.gmra.mxu2 %v1247_v25 }
 0x2e9   :  { %v5465_v22 = vpop.permute.xlu2 %5464 }
 0x2ea   :  { %v5467_v37 = vunpack.i.h.bf16 %v5465_v22  ;;  %v5466_v26 = vunpack.i.l.bf16 %v5465_v22 }
 0x2ff   :  { %v5480_v30 = vpop.permute.xlu2 %5479 }
 0x300   :  { %v5482_v24 = vunpack.i.h.bf16 %v5480_v30  ;;  %v5481_v35 = vunpack.i.l.bf16 %v5480_v30 }
 0x302   :  { %v1254_v33 = vpack.c.bf16 %v5482_v24, %v5481_v35 }
 0x304   :  { %4780 = vmatmul.msk.bf16.vlgmr.msra.gmra.mxu3 %vm1061_vm8, %v1254_v33 }
 0x307   :  { %v5460_v34 = vpop.permute.xlu1 %5459 }
 0x308   :  { %v5455_v15 = vpop.permute.xlu0 %5454  ;;  %v6814_v44 = vunpack.i.h.bf16 %v5460_v34  ;;  %v5461_v63 = vunpack.i.l.bf16 %v5460_v34 }
 0x309   :  { %v5457_v27 = vunpack.i.h.bf16 %v5455_v15  ;;  %v5456_v10 = vunpack.i.l.bf16 %v5455_v15 }
 0x30a   :  { %v1251_v29 = vpack.c.bf16 %v6814_v44, %v5461_v63 }
 0x30b   :  { %v1214_v41 = vsel %vm1207_vm10, %v6613_v43, %v5456_v10  ;;  %v1215_v42 = vsel %vm1207_vm10, %v6680_v6, %v5457_v27  ;;  %v1230_v3 = vsel %vm1079_vm9, %v5456_v10, %v5461_v63  ;;  %v1231_v23 = vsel %vm1079_vm9, %v5457_v27, %v6814_v44 }
 0x30c   :  { %v1249_v49 = vpack.c.bf16 %v1215_v42, %v1214_v41  ;;  %4779 = vmatmul.msk.bf16.gmra.mxu0 %vm1061_vm8, %v1251_v29  ;;  %v1250_v54 = vpack.c.bf16 %v1231_v23, %v1230_v3  ;;  %v1077_v43 = vsel %vm1061_vm8, %v6717_v36, %v5467_v37  ;;  %v1076_v6 = vsel %vm1061_vm8, %v6709_v20, %v5466_v26 }
 0x30e   :  { %1419 = vmatmul.bf16.gmra.mxu1 %v1249_v49  ;;  %1468 = vmatmul.bf16.gmra.mxu2 %v1250_v54 }
 0x310   :  { %v5470_v50 = vpop.permute.xlu0 %5469 }
 0x311   :  { %v5472_v57 = vunpack.i.h.bf16 %v5470_v50  ;;  %v5471_v48 = vunpack.i.l.bf16 %v5470_v50 }
 0x313   :  { %v1405_v45 = vpop.f32.mrf.mxu1  ;;  %v6830_v61 = vsel %vm1079_vm9, %v1076_v6, %v5471_v48  ;;  %v6833_v52 = vsel %vm1079_vm9, %v1077_v43, %v5472_v57 }
 0x314   :  { %v5498_v39 = vpack.i.bf16 %v6833_v52, %v6830_v61  ;;  %v5493_v59 = vpack.i.bf16 %v6830_v61, %v6802_v47 }
 0x316   :  { %5499 = vrot.lane.b32.xlu2 %v5498_v39, %s5958_s20  ;;  %5494 = vrot.lane.b32.xlu1 %v5493_v59, %s5959_s12 }
 0x317   :  { %v5475_v36 = vpop.permute.xlu1 %5474 }
 0x318   :  { %v5477_v56 = vunpack.i.h.bf16 %v5475_v36  ;;  %v5476_v20 = vunpack.i.l.bf16 %v5475_v36  ;;  %v1454_v19 = vpop.f32.mrf.mxu2 }
 0x319   :  { %v6841_v2 = vadd.f32 %v1454_v19, %v1405_v45  ;;  %v944_v18 = vpop.permute.xlu0 %943 }
 0x31a   :  { %v1216_v28 = vsel %vm1207_vm10, %v6732_v55, %v5476_v20  ;;  %v1217_v46 = vsel %vm1207_vm10, %v6759_v0, %v5477_v56  ;;  %v1232_v58 = vsel %vm1079_vm9, %v5476_v20, %v5481_v35  ;;  %v1233_v12 = vsel %vm1079_vm9, %v5477_v56, %v5482_v24 }
 0x31b   :  { %v1252_v32 = vpack.c.bf16 %v1217_v46, %v1216_v28  ;;  %v1253_v7 = vpack.c.bf16 %v1233_v12, %v1232_v58  ;;  %v6849_v1 = vpop.f32.mrf.mxu1  ;;  %v1078_v4 = vsel %vm1061_vm8, %v6755_v40, %v944_v18  ;;  %v1503_v46 = vpop.f32.mrf.mxu0 }
 0x31e   :  { %1424 = vmatmul.bf16.gmra.mxu1 %v1252_v32  ;;  %1473 = vmatmul.bf16.gmra.mxu2 %v1253_v7 }
 0x31f   :  { %v1043_v38 = vpop.permute.xlu1 %1042 }
 0x320   :  { %v1096_v9 = vsel %vm1079_vm9, %v1078_v4, %v1043_v38  ;;  %v6854_v62 = vpop.f32.mrf.mxu2 }
 0x321   :  { %v5503_v0 = vpack.i.bf16 %v1096_v9, %v6833_v52  ;;  %1190 = vrot.lane.b32.xlu1 %v1096_v9, %s5958_s20 }
 0x323   :  { %5504 = vrot.lane.b32.xlu0 %v5503_v0, %s5959_s12  ;;  %v1410_v16 = vpop.f32.mrf.mxu1  ;;  %v1505_v12 = vpop.f32.mrf.mxu0 }
 0x329   :  { %v1459_v8 = vpop.f32.mrf.mxu2 }
 0x32a   :  { %v5485_v31 = vpop.permute.xlu2 %5484  ;;  %v6859_v5 = vadd.f32 %v1459_v8, %v1410_v16 }
 0x32b   :  { %v5487_v60 = vunpack.i.h.bf16 %v5485_v31  ;;  %v5486_v40 = vunpack.i.l.bf16 %v5485_v31  ;;  %v1412_v34 = vpop.f32.mrf.mxu1  ;;  %v1508_v7 = vpop.f32.mrf.mxu0 }
 0x32d   :  { %v1218_v11 = vsel %vm1207_vm10, %v6772_v51, %v5486_v40  ;;  %v1219_v21 = vsel %vm1207_vm10, %v6775_v53, %v5487_v60 }
 0x32e   :  { %v1255_v13 = vpack.c.bf16 %v1219_v21, %v1218_v11 }
 0x330   :  { %1429 = vmatmul.bf16.gmra.mxu1 %v1255_v13 }
 0x331   :  { %v1461_v15 = vpop.f32.mrf.mxu2 }
 0x333   :  { %v1415_v51 = vpop.f32.mrf.mxu1  ;;  %v1510_v9 = vpop.f32.mrf.mxu0 }
 0x33b   :  { %v1417_v19 = vpop.f32.mrf.mxu1 }
 0x342   :  { %v5490_v17 = vpop.permute.xlu0 %5489 }
 0x343   :  { %v5492_v25 = vunpack.i.h.bf16 %v5490_v17  ;;  %v5491_v22 = vunpack.i.l.bf16 %v5490_v17  ;;  %v1457_v17 = vadd.f32 %v6854_v62, %v6849_v1 }
 0x345   :  { %v1257_v30 = vpack.c.bf16 %v5492_v25, %v5491_v22  ;;  %v1234_v24 = vsel %vm1079_vm9, %v5486_v40, %v5491_v22  ;;  %v1235_v35 = vsel %vm1079_vm9, %v5487_v60, %v5492_v25  ;;  %v6892_v22 = vadd.f32 %v1505_v12, %v1457_v17 }
 0x346   :  { %v1256_v33 = vpack.c.bf16 %v1235_v35, %v1234_v24  ;;  %v1462_v24 = vadd.f32 %v1461_v15, %v1412_v34  ;;  %v6895_v35 = vadd.f32 %v1503_v46, %v6841_v2 }
 0x347   :  { %4781 = vmatmul.msk.bf16.gmra.mxu3 %vm1061_vm8, %v1257_v30  ;;  %v1546_v2 = vsel %vm1061_vm8, %v6892_v22, 0.0 }
 0x348   :  { %1478 = vmatmul.bf16.gmra.mxu2 %v1256_v33  ;;  %v1582_v62 = vmul.f32 %v6895_v35, %v6895_v35  ;;  %v1545_v15 = vsel %vm1061_vm8, %v6895_v35, 0.0 }
 0x363   :  { %v1513_v31 = vpop.f32.mrf.mxu0 }
 0x36a   :  { %v1464_v63 = vpop.f32.mrf.mxu2 }
 0x36b   :  { %v6868_v27 = vadd.f32 %v1464_v63, %v1415_v51  ;;  %v1515_v21 = vpop.f32.mrf.mxu0  ;;  %v6898_v63 = vadd.f32 %v1508_v7, %v6859_v5 }
 0x36d   :  { %v1584_v34 = vmul.f32 %v6898_v63, %v6898_v63  ;;  %v6913_v5 = vadd.f32 %v1513_v31, %v6868_v27 }
 0x370   :  { %v5500_v53 = vpop.permute.xlu2 %5499 }
 0x371   :  { %v5502_v10 = vunpack.i.h.bf16 %v5500_v53  ;;  %v5501_v29 = vunpack.i.l.bf16 %v5500_v53  ;;  %v1583_v53 = vmul.f32 %v6892_v22, %v6892_v22 }
 0x372   :  { %v1466_v28 = vpop.f32.mrf.mxu2 }
 0x373   :  { %v1260_v41 = vpack.c.bf16 %v5502_v10, %v5501_v29  ;;  %v1467_v1 = vadd.f32 %v1466_v28, %v1417_v19 }
 0x375   :  { %4782 = vmatmul.msk.bf16.gmra.mxu3 %vm1061_vm8, %v1260_v41 }
 0x388   :  { %v5495_v42 = vpop.permute.xlu1 %5494 }
 0x389   :  { %v5497_v3 = vunpack.i.h.bf16 %v5495_v42  ;;  %v5496_v49 = vunpack.i.l.bf16 %v5495_v42  ;;  %v1518_v33 = vpop.f32.mrf.mxu0  ;;  %v1599_v42 = vsel %vm1061_vm8, %v1583_v53, 0.0 }
 0x38b   :  { %v1220_v23 = vsel %vm1207_vm10, %v6799_v14, %v5496_v49  ;;  %v1221_v54 = vsel %vm1207_vm10, %v6802_v47, %v5497_v3  ;;  %v1236_v37 = vsel %vm1079_vm9, %v5496_v49, %v5501_v29  ;;  %v1237_v26 = vsel %vm1079_vm9, %v5497_v3, %v5502_v10  ;;  %v1420_v32 = vpop.f32.mrf.mxu1 }
 0x38c   :  { %v1258_v50 = vpack.c.bf16 %v1221_v54, %v1220_v23  ;;  %v1259_v57 = vpack.c.bf16 %v1237_v26, %v1236_v37  ;;  %v6902_v10 = vadd.f32 %v1510_v9, %v1462_v24  ;;  %v1548_v49 = vsel %vm1061_vm8, %v6898_v63, 0.0 }
 0x38d   :  { %v6922_v54 = vadd.f32 %v1515_v21, %v1467_v1  ;;  %v1598_v26 = vsel %vm1061_vm8, %v1582_v62, 0.0 }
 0x38e   :  { %1434 = vmatmul.bf16.gmra.mxu1 %v1258_v50  ;;  %1483 = vmatmul.bf16.gmra.mxu2 %v1259_v57  ;;  %v1585_v23 = vmul.f32 %v6902_v10, %v6902_v10  ;;  %v1547_v50 = vadd.f32 %v1546_v2, %v1545_v15  ;;  %v1601_v57 = vsel %vm1061_vm8, %v1584_v34, 0.0 }
 0x38f   :  { %v1554_v12 = vsel %vm1061_vm8, %v6922_v54, 0.0 }
 0x391   :  { %v1469_v58 = vpop.f32.mrf.mxu2 }
 0x392   :  { %v1470_v29 = vadd.f32 %v1469_v58, %v1420_v32 }
 0x393   :  { %v1191_v48 = vpop.permute.xlu1 %1190  ;;  %v1422_v18 = vpop.f32.mrf.mxu1 }
 0x394   :  { %v1263_v43 = vpack.c.bf16 %v6814_v44, %v1191_v48  ;;  %v6925_v27 = vadd.f32 %v1518_v33, %v1470_v29 }
 0x395   :  { %v5505_v6 = vpop.permute.xlu0 %5504 }
 0x396   :  { %v5507_v45 = vunpack.i.h.bf16 %v5505_v6  ;;  %v5506_v39 = vunpack.i.l.bf16 %v5505_v6  ;;  %4783 = vmatmul.msk.bf16.gmra.mxu3 %vm1061_vm8, %v1263_v43  ;;  %v1586_v43 = vmul.f32 %v6913_v5, %v6913_v5  ;;  %v1588_v32 = vmul.f32 %v6925_v27, %v6925_v27 }
 0x397   :  { %v1556_v31 = vsel %vm1061_vm8, %v6925_v27, 0.0 }
 0x398   :  { %v1222_v14 = vsel %vm1207_vm10, %v6830_v61, %v5506_v39  ;;  %v1223_v47 = vsel %vm1207_vm10, %v6833_v52, %v5507_v45  ;;  %v1238_v59 = vsel %vm1079_vm9, %v5506_v39, %v1191_v48  ;;  %v1239_v36 = vsel %vm1079_vm9, %v5507_v45, %v6814_v44  ;;  %v1523_v52 = vpop.f32.mrf.mxu3 }
 0x399   :  { %v1261_v56 = vpack.c.bf16 %v1223_v47, %v1222_v14  ;;  %v1262_v20 = vpack.c.bf16 %v1239_v36, %v1238_v59  ;;  %v1471_v61 = vpop.f32.mrf.mxu2  ;;  %v1550_v48 = vsel %vm1061_vm8, %v6902_v10, 0.0  ;;  %v1600_v45 = vadd.f32 %v1599_v42, %v1598_v26  ;;  %v1520_v14 = vpop.f32.mrf.mxu0 }
 0x39a   :  { %v1472_v37 = vadd.f32 %v1471_v61, %v1422_v18  ;;  %v1549_v39 = vadd.f32 %v1548_v49, %v1547_v50  ;;  %v1603_v36 = vsel %vm1061_vm8, %v1585_v23, 0.0  ;;  %v1605_v58 = vsel %vm1061_vm8, %v1586_v43, 0.0 }
 0x39b   :  { %v1425_v4 = vpop.f32.mrf.mxu1  ;;  %v1602_v28 = vadd.f32 %v1601_v57, %v1600_v45 }
 0x39c   :  { %v6937_v19 = vadd.f32 %v1520_v14, %v1472_v37  ;;  %v1551_v46 = vadd.f32 %v1550_v48, %v1549_v39 }
 0x39d   :  { %v1604_v7 = vadd.f32 %v1603_v36, %v1602_v28 }
 0x39e   :  { %1439 = vmatmul.bf16.gmra.mxu1 %v1261_v56  ;;  %1488 = vmatmul.bf16.gmra.mxu2 %v1262_v20  ;;  %v1552_v56 = vsel %vm1061_vm8, %v6913_v5, 0.0  ;;  %v1587_v20 = vmul.f32 %v6922_v54, %v6922_v54  ;;  %v1589_v21 = vmul.f32 %v6937_v19, %v6937_v19 }
 0x39f   :  { %v1606_v24 = vadd.f32 %v1605_v58, %v1604_v7 }
 0x3a0   :  { %v1525_v16 = vpop.f32.mrf.mxu3 }
 0x3a1   :  { %v1474_v38 = vpop.f32.mrf.mxu2 }
 0x3a2   :  { %v1475_v6 = vadd.f32 %v1474_v38, %v1425_v4  ;;  %v1553_v4 = vadd.f32 %v1552_v56, %v1551_v46 }
 0x3a3   :  { %v1427_v0 = vpop.f32.mrf.mxu1 }
 0x3a4   :  { %v6944_v18 = vadd.f32 %v1523_v52, %v1475_v6  ;;  %v1555_v33 = vadd.f32 %v1554_v12, %v1553_v4  ;;  %v1609_v52 = vsel %vm1061_vm8, %v1588_v32, 0.0 }
 0x3a6   :  { %v1557_v62 = vadd.f32 %v1556_v31, %v1555_v33 }
 0x3a9   :  { %v1476_v8 = vpop.f32.mrf.mxu2 }
 0x3aa   :  { %v1477_v47 = vadd.f32 %v1476_v8, %v1427_v0  ;;  %v1607_v8 = vsel %vm1061_vm8, %v1587_v20, 0.0 }
 0x3ab   :  { %v1608_v1 = vadd.f32 %v1607_v8, %v1606_v24 }
 0x3ac   :  { %v6946_v38 = vadd.f32 %v1525_v16, %v1477_v47  ;;  %v1590_v16 = vmul.f32 %v6944_v18, %v6944_v18 }
 0x3ad   :  { %v1430_v60 = vpop.f32.mrf.mxu1  ;;  %v1610_v15 = vadd.f32 %v1609_v52, %v1608_v1 }
 0x3ae   :  { %v1591_v29 = vmul.f32 %v6946_v38, %v6946_v38 }
 0x3b5   :  { %v1432_v13 = vpop.f32.mrf.mxu1 }
 0x3ca   :  { %v6886_v40 = vpop.f32.mrf.mxu3 }
 0x3cb   :  { %v1479_v11 = vpop.f32.mrf.mxu2 }
 0x3cc   :  { %v1480_v61 = vadd.f32 %v1479_v11, %v1430_v60  ;;  %v1558_v60 = vsel %vm1061_vm8, %v6937_v19, 0.0 }
 0x3cd   :  { %v1559_v42 = vadd.f32 %v1558_v60, %v1557_v62 }
 0x3ce   :  { %v6959_v11 = vadd.f32 %v6886_v40, %v1480_v61  ;;  %v1613_v40 = vsel %vm1061_vm8, %v1590_v16, 0.0 }
 0x3d0   :  { %v1564_v48 = vsel %vm1061_vm8, %v6959_v11, 0.0 }
 0x3d2   :  { %v6890_v25 = vpop.f32.mrf.mxu3 }
 0x3d3   :  { %v1481_v30 = vpop.f32.mrf.mxu2 }
 0x3d4   :  { %v1482_v17 = vadd.f32 %v1481_v30, %v1432_v13  ;;  %v1611_v13 = vsel %vm1061_vm8, %v1589_v21, 0.0  ;;  %v1560_v30 = vsel %vm1061_vm8, %v6944_v18, 0.0 }
 0x3d5   :  { %v1612_v37 = vadd.f32 %v1611_v13, %v1610_v15  ;;  %v1561_v26 = vadd.f32 %v1560_v30, %v1559_v42 }
 0x3d6   :  { %v6967_v2 = vadd.f32 %v6890_v25, %v1482_v17  ;;  %v1615_v25 = vsel %vm1061_vm8, %v1591_v29, 0.0 }
 0x3d7   :  { %v1614_v39 = vadd.f32 %v1613_v40, %v1612_v37 }
 0x3d8   :  { %v1593_v43 = vmul.f32 %v6967_v2, %v6967_v2  ;;  %v1566_v47 = vsel %vm1061_vm8, %v6967_v2, 0.0 }
 0x3d9   :  { %v1616_v56 = vadd.f32 %v1615_v25, %v1614_v39 }
 0x3da   :  { %v1619_v28 = vsel %vm1061_vm8, %v1593_v43, 0.0 }
 0x3f8   :  { %v6906_v41 = vpop.f32.mrf.mxu3 }
 0x400   :  { %v1535_v9 = vpop.f32.mrf.mxu3 }
 0x40b   :  { %v1435_v51 = vpop.f32.mrf.mxu1 }
 0x411   :  { %v1484_v3 = vpop.f32.mrf.mxu2 }
 0x412   :  { %v1485_v53 = vadd.f32 %v1484_v3, %v1435_v51  ;;  %v1562_v51 = vsel %vm1061_vm8, %v6946_v38, 0.0  ;;  %v1592_v3 = vmul.f32 %v6959_v11, %v6959_v11 }
 0x413   :  { %v1437_v59 = vpop.f32.mrf.mxu1  ;;  %v1563_v14 = vadd.f32 %v1562_v51, %v1561_v26 }
 0x414   :  { %v6975_v23 = vadd.f32 %v6906_v41, %v1485_v53  ;;  %v1617_v41 = vsel %vm1061_vm8, %v1592_v3, 0.0 }
 0x415   :  { %v1565_v20 = vadd.f32 %v1564_v48, %v1563_v14  ;;  %v1618_v58 = vadd.f32 %v1617_v41, %v1616_v56 }
 0x416   :  { %v1568_v46 = vsel %vm1061_vm8, %v6975_v23, 0.0 }
 0x417   :  { %v1567_v12 = vadd.f32 %v1566_v47, %v1565_v20 }
 0x419   :  { %v1486_v0 = vpop.f32.mrf.mxu2  ;;  %v1538_v50 = vpop.f32.mrf.mxu3 }
 0x41a   :  { %v1487_v34 = vadd.f32 %v1486_v0, %v1437_v59  ;;  %v1594_v59 = vmul.f32 %v6975_v23, %v6975_v23  ;;  %v1569_v0 = vadd.f32 %v1568_v46, %v1567_v12  ;;  %v1543_v12 = vld [vmem:[%s9019_s4] sm:$0x1] }
 0x41b   :  { %v1440_v49 = vpop.f32.mrf.mxu1 }
 0x41c   :  { %v6982_v6 = vadd.f32 %v1535_v9, %v1487_v34  ;;  %v1621_v61 = vsel %vm1061_vm8, %v1594_v59, 0.0  ;;  %v1620_v9 = vadd.f32 %v1619_v28, %v1618_v58 }
 0x41e   :  { %v1595_v32 = vmul.f32 %v6982_v6, %v6982_v6  ;;  %v1570_v7 = vsel %vm1061_vm8, %v6982_v6, 0.0  ;;  %v1622_v33 = vadd.f32 %v1621_v61, %v1620_v9  ;;  %v1544_v9 = vld [vmem:[%s9020_s5] sm:$0x1] }
 0x41f   :  { %v1571_v52 = vadd.f32 %v1570_v7, %v1569_v0 }
 0x420   :  { %v1623_v21 = vsel %vm1061_vm8, %v1595_v32, 0.0 }
 0x421   :  { %v1489_v57 = vpop.f32.mrf.mxu2  ;;  %v1540_v60 = vpop.f32.mrf.mxu3  ;;  %v1624_v1 = vadd.f32 %v1623_v21, %v1622_v33 }
 0x422   :  { %v1490_v45 = vadd.f32 %v1489_v57, %v1440_v49 }
 0x423   :  { %v1442_v8 = vpop.f32.mrf.mxu1 }
 0x424   :  { %v6989_v36 = vadd.f32 %v1538_v50, %v1490_v45 }
 0x426   :  { %v1596_v4 = vmul.f32 %v6989_v36, %v6989_v36  ;;  %v1572_v17 = vsel %vm1061_vm8, %v6989_v36, 0.0 }
 0x427   :  { %v1573_v62 = vadd.f32 %v1572_v17, %v1571_v52 }
 0x428   :  { %v1625_v16 = vsel %vm1061_vm8, %v1596_v4, 0.0 }
 0x429   :  { %v1491_v31 = vpop.f32.mrf.mxu2  ;;  %v1626_v30 = vadd.f32 %v1625_v16, %v1624_v1 }
 0x42a   :  { %v1492_v24 = vadd.f32 %v1491_v31, %v1442_v8 }
 0x42c   :  { %v1541_v53 = vadd.f32 %v1540_v60, %v1492_v24 }
 0x42e   :  { %v1574_v29 = vsel %vm1061_vm8, %v1541_v53, 0.0  ;;  %v1597_v13 = vmul.f32 %v1541_v53, %v1541_v53 }
 0x42f   :  { %v1575_v34 = vadd.f32 %v1574_v29, %v1573_v62 }
 0x430   :  { %v1627_v15 = vsel %vm1061_vm8, %v1597_v13, 0.0 }
 0x431   :  { %v1576_v42 = vrot.slane %v1575_v34, 4  ;;  %v1628_v49 = vadd.f32 %v1627_v15, %v1626_v30 }
 0x433   :  { %v1577_v40 = vadd.f32 %v1576_v42, %v1575_v34  ;;  %v1629_v51 = vrot.slane %v1628_v49, 4 }
 0x435   :  { %v1578_v3 = vrot.slane %v1577_v40, 2  ;;  %v1630_v37 = vadd.f32 %v1629_v51, %v1628_v49 }
 0x437   :  { %v1579_v26 = vadd.f32 %v1578_v3, %v1577_v40  ;;  %v1631_v25 = vrot.slane %v1630_v37, 2 }
 0x439   :  { %v1580_v50 = vrot.slane %v1579_v26, 1  ;;  %v1632_v57 = vadd.f32 %v1631_v25, %v1630_v37 }
 0x43b   :  { %v1581_v48 = vadd.f32 %v1580_v50, %v1579_v26  ;;  %v1633_v43 = vrot.slane %v1632_v57, 1 }
 0x43d   :  { %v1634_v45 = vadd.f32 %v1633_v43, %v1632_v57  ;;  %v1635_v39 = vmul.f32 0.0078125, %v1581_v48 }
 0x43f   :  { %v1636_v14 = vmul.f32 0.0078125, %v1634_v45  ;;  %v1637_v41 = vmul.f32 %v1635_v39, %v1635_v39 }
 0x441   :  { %v1638_v47 = vsub.f32 %v1636_v14, %v1637_v41 }
 0x443   :  { %v1639_v59 = vmax.f32 %v1638_v47, 0.0 }
 0x445   :  { %v1640_v56 = vadd.f32 1e-05, %v1639_v59 }
 0x447   :  { %5944 = vrsqrt.f32 %v1640_v56  ;;  %vm1647_vm12 = vweird.f32 %v1640_v56 }
 0x44d   :  { %v5945_v20 = vpop.eup %5944 }
 0x44e   :  { %v1642_v28 = vmul.f32 %v5945_v20, %v1640_v56  ;;  %vm1648_vm11 = vweird.f32 %v5945_v20 }
 0x44f   :  { %vm1649_vm13 = vmor %vm1647_vm12, %vm1648_vm11 }
 0x450   :  { %v1643_v46 = vmul.f32 %v5945_v20, %v1642_v28 }
 0x452   :  { %v1644_v32 = vmul.f32 0.5, %v1643_v46 }
 0x454   :  { %v1645_v58 = vsub.f32 1.5, %v1644_v32 }
 0x456   :  { %v1646_v61 = vmul.f32 %v5945_v20, %v1645_v58 }
 0x458   :  { %v1650_v7 = vsel %vm1649_vm13, %v5945_v20, %v1646_v61 }
 0x459   :  { %v1651_v4 = vmul.f32 %v1650_v7, %v1543_v12 }
 0x45b   :  { %v1652_v0 = vmul.f32 %v1651_v4, %v1635_v39  ;;  %v7013_v8 = vperm.slane %v1651_v4, 0 }
 0x45d   :  { %v1653_v31 = vsub.f32 %v1544_v9, %v1652_v0  ;;  %v7016_v21 = vmul.f32 %v7013_v8, %v1541_v53  ;;  %v1659_v17 = vmul.f32 %v7013_v8, %v6898_v63  ;;  %v1660_v33 = vmul.f32 %v7013_v8, %v6902_v10 }
 0x45e   :  { %v1657_v52 = vmul.f32 %v7013_v8, %v6895_v35  ;;  %v1658_v60 = vmul.f32 %v7013_v8, %v6892_v22  ;;  %v1661_v16 = vmul.f32 %v7013_v8, %v6913_v5  ;;  %v1662_v53 = vmul.f32 %v7013_v8, %v6922_v54 }
 0x45f   :  { %v7020_v24 = vperm.slane %v1653_v31, 0  ;;  %v1663_v63 = vmul.f32 %v7013_v8, %v6925_v27  ;;  %v1664_v1 = vmul.f32 %v7013_v8, %v6937_v19 }
 0x461   :  { %v1678_v10 = vadd.f32 %v7020_v24, %v1659_v17  ;;  %v1679_v62 = vadd.f32 %v7020_v24, %v1660_v33  ;;  %v1676_v35 = vadd.f32 %v7020_v24, %v1657_v52  ;;  %v1677_v22 = vadd.f32 %v7020_v24, %v1658_v60 }
 0x462   :  { %v1680_v29 = vadd.f32 %v7020_v24, %v1661_v16  ;;  %v1681_v5 = vadd.f32 %v7020_v24, %v1662_v53  ;;  %v1682_v54 = vadd.f32 %v7020_v24, %v1663_v63  ;;  %v1683_v13 = vadd.f32 %v7020_v24, %v1664_v1 }
 0x463   :  { %v1694_v27 = vmax.f32 %v1678_v10, 0.0  ;;  %v1695_v30 = vmax.f32 %v1679_v62, 0.0  ;;  %v1692_v34 = vmax.f32 %v1676_v35, 0.0  ;;  %v1693_v19 = vmax.f32 %v1677_v22, 0.0 }
 0x464   :  { %v1696_v15 = vmax.f32 %v1680_v29, 0.0  ;;  %v1697_v42 = vmax.f32 %v1681_v5, 0.0  ;;  %v1698_v49 = vmax.f32 %v1682_v54, 0.0  ;;  %v1699_v40 = vmax.f32 %v1683_v13, 0.0 }
 0x465   :  { %v1762_v51 = vrot.slane %v1694_v27, 7  ;;  %v1763_v3 = vrot.slane %v1695_v30, 7  ;;  %v1760_v37 = vrot.slane %v1692_v34, 7  ;;  %v1761_v26 = vrot.slane %v1693_v19, 7 }
 0x466   :  { %v1764_v25 = vrot.slane %v1696_v15, 7  ;;  %v1765_v50 = vrot.slane %v1697_v42, 7  ;;  %v1766_v57 = vrot.slane %v1698_v49, 7  ;;  %v1767_v48 = vrot.slane %v1699_v40, 7 }
 0x467   :  { %v7045_v43 = vsel %vm115_vm0, 0.0, %v1762_v51  ;;  %v7048_v45 = vsel %vm115_vm0, 0.0, %v1763_v3  ;;  %v1810_v39 = vsel %vm115_vm0, %v1762_v51, 0.0  ;;  %v1811_v14 = vsel %vm115_vm0, %v1763_v3, 0.0 }
 0x468   :  { %v1862_v41 = vrot.slane %v7045_v43, 1  ;;  %v1863_v47 = vrot.slane %v1810_v39, 1  ;;  %v1865_v59 = vrot.slane %v7048_v45, 1  ;;  %v1866_v56 = vrot.slane %v1811_v14, 1 }
 0x469   :  { %v7055_v20 = vsel %vm115_vm0, 0.0, %v1760_v37  ;;  %v7058_v28 = vsel %vm115_vm0, 0.0, %v1761_v26  ;;  %v1808_v46 = vsel %vm115_vm0, %v1760_v37, 0.0  ;;  %v1809_v32 = vsel %vm115_vm0, %v1761_v26, 0.0 }
 0x46a   :  { %v1864_v58 = vsel %vm184_vm1, %v1862_v41, %v1863_v47  ;;  %v1867_v12 = vsel %vm184_vm1, %v1865_v59, %v1866_v56  ;;  %v1952_v61 = vrot.slane %v7055_v20, 2  ;;  %v1953_v7 = vrot.slane %v1808_v46, 2 }
 0x46b   :  { %v5518_v4 = vpack.i.bf16 %v1867_v12, %v1864_v58  ;;  %v1955_v9 = vrot.slane %v7058_v28, 2  ;;  %v1956_v0 = vrot.slane %v1809_v32, 2  ;;  %v1856_v31 = vrot.slane %v7055_v20, 1 }
 0x46c   :  { %v1954_v17 = vsel %vm287_vm2, %v1952_v61, %v1953_v7  ;;  %v1857_v33 = vrot.slane %v1808_v46, 1  ;;  %v1859_v52 = vrot.slane %v7058_v28, 1  ;;  %v1860_v60 = vrot.slane %v1809_v32, 1 }
 0x46d   :  { %5519 = vrot.lane.b32.xlu1 %v5518_v4, %s5957_s2  ;;  %v1957_v16 = vsel %vm287_vm2, %v1955_v9, %v1956_v0  ;;  %v7072_v53 = vsel %vm115_vm0, 0.0, %v1764_v25  ;;  %v7075_v63 = vsel %vm115_vm0, 0.0, %v1765_v50  ;;  %v1812_v1 = vsel %vm115_vm0, %v1764_v25, 0.0 }
 0x46e   :  { %v5513_v10 = vpack.i.bf16 %v1957_v16, %v1954_v17  ;;  %v1858_v62 = vsel %vm184_vm1, %v1856_v31, %v1857_v33  ;;  %v1861_v35 = vsel %vm184_vm1, %v1859_v52, %v1860_v60  ;;  %v1813_v22 = vsel %vm115_vm0, %v1765_v50, 0.0 }
 0x46f   :  { %v5508_v29 = vpack.i.bf16 %v1861_v35, %v1858_v62  ;;  %v1964_v5 = vrot.slane %v7072_v53, 2  ;;  %v1965_v54 = vrot.slane %v1812_v1, 2  ;;  %v1967_v13 = vrot.slane %v7075_v63, 2 }
 0x470   :  { %5514 = vrot.lane.b32.xlu0 %v5513_v10, %s5958_s20  ;;  %v1968_v27 = vrot.slane %v1813_v22, 2  ;;  %v1868_v30 = vrot.slane %v7072_v53, 1  ;;  %v1869_v34 = vrot.slane %v1812_v1, 1  ;;  %v1871_v19 = vrot.slane %v7075_v63, 1 }
 0x471   :  { %5509 = vrot.lane.b32.xlu2 %v5508_v29, %s5957_s2  ;;  %v1966_v15 = vsel %vm287_vm2, %v1964_v5, %v1965_v54  ;;  %v1872_v42 = vrot.slane %v1813_v22, 1  ;;  %v1958_v49 = vrot.slane %v7045_v43, 2  ;;  %v1959_v40 = vrot.slane %v1810_v39, 2 }
 0x472   :  { %v1969_v51 = vsel %vm287_vm2, %v1967_v13, %v1968_v27  ;;  %v1961_v3 = vrot.slane %v7048_v45, 2  ;;  %v1962_v37 = vrot.slane %v1811_v14, 2  ;;  %v1665_v26 = vmul.f32 %v7013_v8, %v6944_v18 }
 0x473   :  { %v5533_v25 = vpack.i.bf16 %v1969_v51, %v1966_v15  ;;  %v1870_v50 = vsel %vm184_vm1, %v1868_v30, %v1869_v34  ;;  %v1873_v41 = vsel %vm184_vm1, %v1871_v19, %v1872_v42  ;;  %v7096_v47 = vsel %vm115_vm0, 0.0, %v1766_v57 }
 0x474   :  { %v1960_v59 = vsel %vm287_vm2, %v1958_v49, %v1959_v40  ;;  %v1963_v39 = vsel %vm287_vm2, %v1961_v3, %v1962_v37  ;;  %v7101_v56 = vsel %vm115_vm0, 0.0, %v1767_v48  ;;  %v7104_v14 = vsel %vm115_vm0, %v1766_v57, 0.0 }
 0x475   :  { %5534 = vrot.lane.b32.xlu1 %v5533_v25, %s5958_s20  ;;  %v7108_v18 = vsel %vm115_vm0, %v1767_v48, 0.0  ;;  %v1874_v46 = vrot.slane %v7096_v47, 1  ;;  %v1875_v32 = vrot.slane %v7104_v14, 1  ;;  %v1666_v58 = vmul.f32 %v7013_v8, %v6946_v38 }
 0x476   :  { %v5528_v12 = vpack.i.bf16 %v1873_v41, %v1870_v50  ;;  %v1877_v61 = vrot.slane %v7101_v56, 1  ;;  %v1878_v7 = vrot.slane %v7108_v18, 1  ;;  %v1667_v57 = vmul.f32 %v7013_v8, %v6959_v11 }
 0x477   :  { %v5523_v4 = vpack.i.bf16 %v1963_v39, %v1960_v59  ;;  %v1684_v9 = vadd.f32 %v7020_v24, %v1665_v26  ;;  %v1668_v48 = vmul.f32 %v7013_v8, %v6967_v2  ;;  %v1685_v0 = vadd.f32 %v7020_v24, %v1666_v58 }
 0x478   :  { %5529 = vrot.lane.b32.xlu0 %v5528_v12, %s5957_s2  ;;  %v1686_v38 = vadd.f32 %v7020_v24, %v1667_v57  ;;  %v1669_v31 = vmul.f32 %v7013_v8, %v6975_v23  ;;  %v1876_v17 = vsel %vm184_vm1, %v1874_v46, %v1875_v32  ;;  %v1879_v11 = vsel %vm184_vm1, %v1877_v61, %v1878_v7 }
 0x479   :  { %5524 = vrot.lane.b32.xlu2 %v5523_v4, %s5958_s20  ;;  %v1700_v33 = vmax.f32 %v1684_v9, 0.0  ;;  %v1687_v52 = vadd.f32 %v7020_v24, %v1668_v48  ;;  %v1701_v60 = vmax.f32 %v1685_v0, 0.0  ;;  %v1670_v16 = vmul.f32 %v7013_v8, %v6982_v6 }
 0x47a   :  { %v1702_v2 = vmax.f32 %v1686_v38, 0.0  ;;  %v1688_v1 = vadd.f32 %v7020_v24, %v1669_v31  ;;  %v1671_v23 = vmul.f32 %v7013_v8, %v6989_v36  ;;  %v7137_v35 = vadd.f32 %v7020_v24, %v7016_v21 }
 0x47b   :  { %v1768_v10 = vrot.slane %v1700_v33, 7  ;;  %v1703_v62 = vmax.f32 %v1687_v52, 0.0  ;;  %v5538_v22 = vpack.i.bf16 %v1879_v11, %v1876_v17  ;;  %v1769_v29 = vrot.slane %v1701_v60, 7 }
 0x47c   :  { %v1770_v5 = vrot.slane %v1702_v2, 7  ;;  %v1689_v54 = vadd.f32 %v7020_v24, %v1670_v16  ;;  %v1690_v30 = vadd.f32 %v7020_v24, %v1671_v23  ;;  %v1704_v50 = vmax.f32 %v1688_v1, 0.0 }
 0x47d   :  { %v7141_v13 = vsel %vm115_vm0, 0.0, %v1768_v10  ;;  %v1816_v6 = vsel %vm115_vm0, %v1768_v10, 0.0  ;;  %v1771_v27 = vrot.slane %v1703_v62, 7  ;;  %v7146_v34 = vsel %vm115_vm0, 0.0, %v1769_v29 }
 0x47e   :  { %v1817_v36 = vsel %vm115_vm0, %v1769_v29, 0.0  ;;  %v1880_v8 = vrot.slane %v7141_v13, 1  ;;  %v1881_v21 = vrot.slane %v1816_v6, 1  ;;  %v1883_v19 = vrot.slane %v7146_v34, 1 }
 0x47f   :  { %v1884_v15 = vrot.slane %v1817_v36, 1  ;;  %v1976_v42 = vrot.slane %v7141_v13, 2  ;;  %v1977_v49 = vrot.slane %v1816_v6, 2  ;;  %v1979_v51 = vrot.slane %v7146_v34, 2 }
 0x480   :  { %v7153_v40 = vsel %vm184_vm1, %v1880_v8, %v1881_v21  ;;  %v1980_v24 = vrot.slane %v1817_v36, 2  ;;  %v7157_v3 = vsel %vm115_vm0, 0.0, %v1770_v5  ;;  %v7167_v25 = vsel %vm115_vm0, %v1770_v5, 0.0 }
 0x481   :  { %5539 = vrot.lane.b32.xlu2 %v5538_v22, %s5957_s2  ;;  %v7161_v37 = vsel %vm184_vm1, %v1883_v19, %v1884_v15  ;;  %v7164_v26 = vsel %vm287_vm2, %v1976_v42, %v1977_v49  ;;  %v7175_v39 = vsel %vm115_vm0, 0.0, %v1771_v27  ;;  %v7180_v32 = vsel %vm115_vm0, %v1771_v27, 0.0 }
 0x482   :  { %v5558_v41 = vpack.i.bf16 %v7161_v37, %v7153_v40  ;;  %v7172_v59 = vsel %vm287_vm2, %v1979_v51, %v1980_v24  ;;  %v1886_v58 = vrot.slane %v7157_v3, 1  ;;  %v1887_v12 = vrot.slane %v7167_v25, 1 }
 0x483   :  { %v5568_v46 = vpack.i.bf16 %v7172_v59, %v7164_v26  ;;  %v1889_v61 = vrot.slane %v7175_v39, 1  ;;  %v1890_v7 = vrot.slane %v7180_v32, 1  ;;  %v1705_v57 = vmax.f32 %v1689_v54, 0.0  ;;  %v5131_v26 = vld [vmem:[%s9021_s6 + $0x30] sm:$0xff]  ;;  %v5130_v59 = vld [vmem:[%s9021_s6 + $0x28] sm:$0xff] }
 0x484   :  { %v7187_v4 = vsel %vm184_vm1, %v1886_v58, %v1887_v12  ;;  %v1772_v9 = vrot.slane %v1704_v50, 7  ;;  %v1706_v48 = vmax.f32 %v1690_v30, 0.0  ;;  %v1973_v49 = vrot.slane %v7101_v56, 2 }
 0x485   :  { %v7190_v0 = vsel %vm184_vm1, %v1889_v61, %v1890_v7  ;;  %v1773_v38 = vrot.slane %v1705_v57, 7  ;;  %v1974_v51 = vrot.slane %v7108_v18, 2  ;;  %v1970_v61 = vrot.slane %v7096_v47, 2 }
 0x486   :  { %v5578_v31 = vpack.i.bf16 %v7190_v0, %v7187_v4  ;;  %v7195_v17 = vsel %vm115_vm0, 0.0, %v1772_v9  ;;  %v7198_v11 = vsel %vm115_vm0, %v1772_v9, 0.0  ;;  %v1774_v33 = vrot.slane %v1706_v48, 7  ;;  %v5129_v4 = vld [vmem:[%s9021_s6 + $0x20] sm:$0xff] }
 0x487   :  { %v7201_v52 = vsel %vm115_vm0, 0.0, %v1773_v38  ;;  %v1821_v60 = vsel %vm115_vm0, %v1773_v38, 0.0  ;;  %v1892_v2 = vrot.slane %v7195_v17, 1  ;;  %v1893_v16 = vrot.slane %v7198_v11, 1  ;;  %v5137_v0 = vld [vmem:[%s9021_s6 + $0x60] sm:$0xff] }
 0x488   :  { %v1895_v1 = vrot.slane %v7201_v52, 1  ;;  %v1896_v10 = vrot.slane %v1821_v60, 1  ;;  %v7208_v62 = vsel %vm115_vm0, 0.0, %v1774_v33  ;;  %v7211_v23 = vsel %vm115_vm0, %v1774_v33, 0.0 }
 0x489   :  { %v7214_v22 = vsel %vm184_vm1, %v1892_v2, %v1893_v16  ;;  %v1991_v29 = vrot.slane %v7201_v52, 2  ;;  %v1992_v5 = vrot.slane %v1821_v60, 2  ;;  %v1994_v54 = vrot.slane %v7208_v62, 2 }
 0x48a   :  { %v7219_v6 = vsel %vm184_vm1, %v1895_v1, %v1896_v10  ;;  %v1995_v27 = vrot.slane %v7211_v23, 2  ;;  %v1971_v7 = vrot.slane %v7104_v14, 2  ;;  %v1975_v33 = vsel %vm287_vm2, %v1973_v49, %v1974_v51 }
 0x48b   :  { %v5598_v30 = vpack.i.bf16 %v7219_v6, %v7214_v22  ;;  %v7225_v36 = vsel %vm287_vm2, %v1991_v29, %v1992_v5  ;;  %v5136_v22 = vld [vmem:[%s9021_s6 + $0x58] sm:$0xff]  ;;  %v5127_v6 = vld [vmem:[%s9021_s6 + $0x10] sm:$0xff] }
 0x48c   :  { %v7228_v8 = vsel %vm287_vm2, %v1994_v54, %v1995_v27  ;;  %v1972_v1 = vsel %vm287_vm2, %v1970_v61, %v1971_v7  ;;  %v1982_v61 = vrot.slane %v7157_v3, 2  ;;  %v5126_v7 = vld [vmem:[%s9021_s6 + $0x8] sm:$0xff] }
 0x48d   :  { %v5613_v21 = vpack.i.bf16 %v7228_v8, %v7225_v36 }
 0x4cb   :  { %v5510_v19 = vpop.permute.xlu2 %5509 }
 0x4cc   :  { %v5512_v24 = vunpack.i.h.bf16 %v5510_v19  ;;  %v5511_v50 = vunpack.i.l.bf16 %v5510_v19 }
 0x4ce   :  { %v2049_v18 = vsel %vm1061_vm8, %v7058_v28, %v5512_v24  ;;  %v2048_v2 = vsel %vm1061_vm8, %v7055_v20, %v5511_v50  ;;  %v5132_v20 = vld [vmem:[%s9021_s6 + $0x38] sm:$0xff] }
 0x4cf   :  { %v5140_v28 = vld [vmem:[%s9021_s6 + $0x78] sm:$0xff]  ;;  %2374 = vmatpush.bf16.msrb.mxu3 %v5132_v20 }
 0x4d0   :  { %2423 = vmatpush.bf16.msra.mxu0 %v5140_v28 }
 0x4d3   :  { %v5525_v15 = vpop.permute.xlu2 %5524  ;;  %2375 = vmatpush.bf16.msrb.mxu3 %v5131_v26 }
 0x4d4   :  { %v5526_v12 = vunpack.i.l.bf16 %v5525_v15  ;;  %v5527_v36 = vunpack.i.h.bf16 %v5525_v15 }
 0x4d7   :  { %2376 = vmatpush.bf16.msrb.mxu3 %v5130_v59 }
 0x4db   :  { %2377 = vmatpush.bf16.msrb.mxu3 %v5129_v4 }
 0x4df   :  { %v5520_v42 = vpop.permute.xlu1 %5519 }
 0x4e0   :  { %v5521_v58 = vunpack.i.l.bf16 %v5520_v42  ;;  %v5522_v16 = vunpack.i.h.bf16 %v5520_v42 }
 0x4e2   :  { %v2050_v57 = vsel %vm1061_vm8, %v7045_v43, %v5521_v58  ;;  %v5515_v9 = vpop.permute.xlu0 %5514  ;;  %v2051_v27 = vsel %vm1061_vm8, %v7048_v45, %v5522_v16  ;;  %v1989_v16 = vrot.slane %v7198_v11, 2  ;;  %v1899_v11 = vrot.slane %v7211_v23, 1 }
 0x4e3   :  { %v5517_v48 = vunpack.i.h.bf16 %v5515_v9  ;;  %v5516_v38 = vunpack.i.l.bf16 %v5515_v9  ;;  %v7240_v60 = vsel %vm1079_vm9, %v2050_v57, %v5526_v12  ;;  %v7269_v51 = vsel %vm1079_vm9, %v2051_v27, %v5527_v36  ;;  %v5134_v57 = vld [vmem:[%s9021_s6 + $0x48] sm:$0xff]  ;;  %v5540_v9 = vpop.permute.xlu2 %5539 }
 0x4e4   :  { %v5553_v14 = vpack.i.bf16 %v1975_v33, %v7240_v60  ;;  %v5563_v58 = vpack.i.bf16 %v7269_v51, %v7240_v60  ;;  %v5125_v33 = vld [vmem:[%s9021_s6] sm:$0xff]  ;;  %v1898_v27 = vrot.slane %v7208_v62, 1  ;;  %v5541_v23 = vunpack.i.l.bf16 %v5540_v9 }
 0x4e5   :  { %v7249_v43 = vsel %vm1079_vm9, %v2049_v18, %v5517_v48  ;;  %v7252_v10 = vsel %vm1079_vm9, %v2048_v2, %v5516_v38  ;;  %v5542_v48 = vunpack.i.h.bf16 %v5540_v9  ;;  %v5141_v38 = vld [vmem:[%s9021_s6 + $0x80] sm:$0xff]  ;;  %v1988_v2 = vrot.slane %v7195_v17, 2 }
 0x4e6   :  { %v5543_v29 = vpack.i.bf16 %v7249_v43, %v1972_v1  ;;  %v5548_v5 = vpack.i.bf16 %v7249_v43, %v7252_v10  ;;  %5554 = vrot.lane.b32.xlu2 %v5553_v14, %s5958_s20  ;;  %v5133_v18 = vld [vmem:[%s9021_s6 + $0x40] sm:$0xff] }
 0x4e7   :  { %v5535_v54 = vpop.permute.xlu1 %5534 }
 0x4e8   :  { %5544 = vrot.lane.b32.xlu0 %v5543_v29, %s5958_s20  ;;  %5549 = vrot.lane.b32.xlu1 %v5548_v5, %s5959_s12  ;;  %v5536_v8 = vunpack.i.l.bf16 %v5535_v54  ;;  %v5537_v24 = vunpack.i.h.bf16 %v5535_v54  ;;  %v2055_v29 = vsel %vm1061_vm8, %v7101_v56, %v5542_v48  ;;  %v1990_v5 = vsel %vm287_vm2, %v1988_v2, %v1989_v16 }
 0x4e9   :  { %v1707_v54 = vmax.f32 %v7137_v35, 0.0 }
 0x4ea   :  { %v5530_v19 = vpop.permute.xlu0 %5529 }
 0x4eb   :  { %v5532_v42 = vunpack.i.h.bf16 %v5530_v19  ;;  %v5531_v49 = vunpack.i.l.bf16 %v5530_v19  ;;  %v1775_v36 = vrot.slane %v1707_v54, 7 }
 0x4ed   :  { %v2052_v50 = vsel %vm1061_vm8, %v7072_v53, %v5531_v49  ;;  %v2053_v45 = vsel %vm1061_vm8, %v7075_v63, %v5532_v42  ;;  %v1983_v53 = vrot.slane %v7167_v25, 2  ;;  %v7373_v56 = vsel %vm115_vm0, 0.0, %v1775_v36 }
 0x4ee   :  { %5559 = vrot.lane.b32.xlu2 %v5558_v41, %s5957_s2  ;;  %v7282_v15 = vsel %vm1079_vm9, %v2052_v50, %v5536_v8  ;;  %v7291_v63 = vsel %vm1079_vm9, %v2053_v45, %v5537_v24  ;;  %v5139_v41 = vld [vmem:[%s9021_s6 + $0x70] sm:$0xff]  ;;  %v1900_v8 = vsel %vm184_vm1, %v1898_v27, %v1899_v11  ;;  %v7376_v19 = vsel %vm115_vm0, %v1775_v36, 0.0 }
 0x4ef   :  { %v5573_v12 = vpack.i.bf16 %v7282_v15, %v7269_v51  ;;  %v1984_v40 = vsel %vm287_vm2, %v1982_v61, %v1983_v53  ;;  %v5588_v25 = vpack.i.bf16 %v7291_v63, %v7282_v15  ;;  %2424 = vmatpush.bf16.msra.mxu0 %v5139_v41  ;;  %v1901_v42 = vrot.slane %v7373_v56, 1 }
 0x4f0   :  { %5564 = vrot.lane.b32.xlu0 %v5563_v58, %s5959_s12  ;;  %v5583_v37 = vpack.i.bf16 %v7291_v63, %v1984_v40  ;;  %v1902_v49 = vrot.slane %v7376_v19, 1  ;;  %v1985_v24 = vrot.slane %v7175_v39, 2  ;;  %v1986_v50 = vrot.slane %v7180_v32, 2 }
 0x4f1   :  { %5574 = vrot.lane.b32.xlu1 %v5573_v12, %s5958_s20 }
 0x4f2   :  { %v1903_v35 = vsel %vm184_vm1, %v1901_v42, %v1902_v49  ;;  %v1987_v26 = vsel %vm287_vm2, %v1985_v24, %v1986_v50  ;;  %v1997_v24 = vrot.slane %v7373_v56, 2  ;;  %v1998_v50 = vrot.slane %v7376_v19, 2 }
 0x4f6   :  { %5584 = vrot.lane.b32.xlu2 %v5583_v37, %s5958_s20 }
 0x4f8   :  { %5569 = vrot.lane.b32.xlu0 %v5568_v46, %s5958_s20  ;;  %v5138_v46 = vld [vmem:[%s9021_s6 + $0x68] sm:$0xff] }
 0x4f9   :  { %5579 = vrot.lane.b32.xlu1 %v5578_v31, %s5957_s2  ;;  %2425 = vmatpush.bf16.msra.mxu0 %v5138_v46  ;;  %v5128_v31 = vld [vmem:[%s9021_s6 + $0x18] sm:$0xff] }
 0x4fa   :  { %2378 = vmatpush.bf16.msrb.mxu3 %v5128_v31 }
 0x4fd   :  { %2426 = vmatpush.bf16.msra.mxu0 %v5137_v0 }
 0x4fe   :  { %5599 = vrot.lane.b32.xlu2 %v5598_v30, %s5957_s2  ;;  %v5135_v30 = vld [vmem:[%s9021_s6 + $0x50] sm:$0xff]  ;;  %2379 = vmatpush.bf16.msrb.mxu3 %v5127_v6 }
 0x500   :  { %5589 = vrot.lane.b32.xlu0 %v5588_v25, %s5959_s12  ;;  %v2054_v25 = vsel %vm1061_vm8, %v7096_v47, %v5541_v23 }
 0x501   :  { %2427 = vmatpush.bf16.msra.mxu0 %v5136_v22 }
 0x502   :  { %2380 = vmatpush.bf16.msrb.mxu3 %v5126_v7 }
 0x505   :  { %2428 = vmatpush.bf16.msra.mxu0 %v5135_v30 }
 0x506   :  { %5614 = vrot.lane.b32.xlu2 %v5613_v21, %s5958_s20  ;;  %v5142_v21 = vld [vmem:[%s9021_s6 + $0x88] sm:$0xff]  ;;  %2381 = vmatpush.bf16.msrb.mxu3 %v5125_v33 }
 0x507   :  { %2478 = vmatpush.bf16.msra.mxu1 %v5142_v21 }
 0x509   :  { %2429 = vmatpush.bf16.msra.mxu0 %v5134_v57 }
 0x50b   :  { %2479 = vmatpush.bf16.msra.mxu1 %v5141_v38 }
 0x50d   :  { %2430 = vmatpush.bf16.msra.mxu0 %v5133_v18 }
 0x540   :  { %v5555_v14 = vpop.permute.xlu2 %5554 }
 0x541   :  { %v5557_v1 = vunpack.i.h.bf16 %v5555_v14  ;;  %v5556_v45 = vunpack.i.l.bf16 %v5555_v14 }
 0x543   :  { %v2071_v20 = vsel %vm1079_vm9, %v2055_v29, %v5557_v1 }
 0x544   :  { %v5603_v28 = vpack.i.bf16 %v2071_v20, %v1990_v5 }
 0x546   :  { %5604 = vrot.lane.b32.xlu0 %v5603_v28, %s5958_s20 }
 0x548   :  { %v5560_v6 = vpop.permute.xlu2 %5559 }
 0x549   :  { %v5562_v7 = vunpack.i.h.bf16 %v5560_v6  ;;  %v5561_v18 = vunpack.i.l.bf16 %v5560_v6 }
 0x54e   :  { %1932 = vrot.lane.b32.xlu0 %v1900_v8, %s5957_s2 }
 0x550   :  { %v5585_v2 = vpop.permute.xlu2 %5584 }
 0x556   :  { %1934 = vrot.lane.b32.xlu0 %v1903_v35, %s5957_s2 }
 0x55a   :  { %v5545_v58 = vpop.permute.xlu0 %5544  ;;  %v5550_v12 = vpop.permute.xlu1 %5549 }
 0x55b   :  { %v5547_v61 = vunpack.i.h.bf16 %v5545_v58  ;;  %v5546_v53 = vunpack.i.l.bf16 %v5545_v58  ;;  %v5552_v40 = vunpack.i.h.bf16 %v5550_v12  ;;  %v5551_v37 = vunpack.i.l.bf16 %v5550_v12 }
 0x55c   :  { %v1999_v58 = vsel %vm287_vm2, %v1997_v24, %v1998_v50  ;;  %v5587_v12 = vunpack.i.h.bf16 %v5585_v2 }
 0x55d   :  { %v2220_v41 = vpack.c.bf16 %v5556_v45, %v5547_v61  ;;  %v2203_v59 = vsel %vm1079_vm9, %v5552_v40, %v5556_v45  ;;  %v2202_v46 = vsel %vm1079_vm9, %v5551_v37, %v5547_v61  ;;  %v7390_v4 = vsel %vm1079_vm9, %v2054_v25, %v5546_v53 }
 0x55e   :  { %v2219_v32 = vpack.c.bf16 %v2203_v59, %v2202_v46  ;;  %v5593_v0 = vpack.i.bf16 %v1987_v26, %v7390_v4  ;;  %v2186_v31 = vsel %vm1207_vm10, %v6732_v55, %v5551_v37  ;;  %v2187_v22 = vsel %vm1207_vm10, %v7252_v10, %v5552_v40  ;;  %v5600_v26 = vpop.permute.xlu2 %5599 }
 0x55f   :  { %4856 = vmatmul.msk.bf16.vlgmr.msra.gmra.mxu1 %vm1061_vm8, %v2220_v41  ;;  %v2218_v47 = vpack.c.bf16 %v2187_v22, %v2186_v31  ;;  %v5608_v57 = vpack.i.bf16 %v2071_v20, %v7390_v4  ;;  %v2057_v10 = vsel %vm1061_vm8, %v7146_v34, %v5562_v7  ;;  %v2056_v20 = vsel %vm1061_vm8, %v7141_v13, %v5561_v18 }
 0x560   :  { %5594 = vrot.lane.b32.xlu1 %v5593_v0, %s5958_s20  ;;  %2431 = vmatmul.bf16.vlgmr.msra.gmra.mxu0 %v2219_v32  ;;  %v5586_v34 = vunpack.i.l.bf16 %v5585_v2  ;;  %v5602_v19 = vunpack.i.h.bf16 %v5600_v26  ;;  %v5601_v59 = vunpack.i.l.bf16 %v5600_v26 }
 0x561   :  { %2382 = vmatmul.bf16.vlgmr.msrb.gmra.mxu3 %v2218_v47 }
 0x562   :  { %v5565_v30 = vpop.permute.xlu0 %5564  ;;  %v2061_v31 = vsel %vm1061_vm8, %v7201_v52, %v5602_v19  ;;  %v2060_v22 = vsel %vm1061_vm8, %v7195_v17, %v5601_v59 }
 0x563   :  { %v5575_v21 = vpop.permute.xlu1 %5574  ;;  %v5567_v9 = vunpack.i.h.bf16 %v5565_v30  ;;  %v5566_v48 = vunpack.i.l.bf16 %v5565_v30 }
 0x564   :  { %v5577_v38 = vunpack.i.h.bf16 %v5575_v21  ;;  %v5576_v33 = vunpack.i.l.bf16 %v5575_v21 }
 0x565   :  { %v2188_v27 = vsel %vm1207_vm10, %v7249_v43, %v5566_v48  ;;  %v2189_v11 = vsel %vm1207_vm10, %v7240_v60, %v5567_v9 }
 0x566   :  { %v2204_v5 = vsel %vm1079_vm9, %v5566_v48, %v5576_v33  ;;  %v2205_v28 = vsel %vm1079_vm9, %v5567_v9, %v5577_v38  ;;  %v2223_v36 = vpack.c.bf16 %v5577_v38, %v5576_v33  ;;  %v2221_v43 = vpack.c.bf16 %v2189_v11, %v2188_v27  ;;  %v5615_v41 = vpop.permute.xlu2 %5614 }
 0x567   :  { %v2222_v35 = vpack.c.bf16 %v2205_v28, %v2204_v5  ;;  %v5616_v46 = vunpack.i.l.bf16 %v5615_v41 }
 0x568   :  { %5609 = vrot.lane.b32.xlu1 %v5608_v57, %s5959_s12 }
 0x56a   :  { %v5570_v16 = vpop.permute.xlu0 %5569 }
 0x56b   :  { %v5572_v14 = vunpack.i.h.bf16 %v5570_v16  ;;  %v5571_v1 = vunpack.i.l.bf16 %v5570_v16  ;;  %v5580_v29 = vpop.permute.xlu1 %5579 }
 0x56c   :  { %v5581_v54 = vunpack.i.l.bf16 %v5580_v29  ;;  %v5582_v6 = vunpack.i.h.bf16 %v5580_v29 }
 0x56d   :  { %v7412_v8 = vsel %vm1079_vm9, %v2056_v20, %v5571_v1  ;;  %v7415_v42 = vsel %vm1079_vm9, %v2057_v10, %v5572_v14 }
 0x56e   :  { %v2058_v49 = vsel %vm1061_vm8, %v7157_v3, %v5581_v54  ;;  %v5618_v13 = vpack.i.bf16 %v7415_v42, %v7412_v8  ;;  %v2059_v52 = vsel %vm1061_vm8, %v7175_v39, %v5582_v6  ;;  %v5617_v39 = vunpack.i.h.bf16 %v5615_v41 }
 0x56f   :  { %4857 = vmatmul.msk.bf16.gmra.mxu1 %vm1061_vm8, %v2223_v36  ;;  %v7423_v60 = vsel %vm1079_vm9, %v2058_v49, %v5586_v34 }
 0x570   :  { %5619 = vrot.lane.b32.xlu1 %v5618_v13, %s5959_s12  ;;  %2436 = vmatmul.bf16.gmra.mxu0 %v2222_v35  ;;  %v5623_v23 = vpack.i.bf16 %v7423_v60, %v7415_v42 }
 0x571   :  { %2387 = vmatmul.bf16.gmra.mxu3 %v2221_v43 }
 0x572   :  { %5624 = vrot.lane.b32.xlu2 %v5623_v23, %s5958_s20  ;;  %v5590_v3 = vpop.permute.xlu0 %5589 }
 0x573   :  { %v5591_v45 = vunpack.i.l.bf16 %v5590_v3  ;;  %v5592_v61 = vunpack.i.h.bf16 %v5590_v3 }
 0x575   :  { %v2206_v53 = vsel %vm1079_vm9, %v5591_v45, %v5587_v12  ;;  %v2190_v40 = vsel %vm1207_vm10, %v7269_v51, %v5591_v45  ;;  %v2191_v37 = vsel %vm1207_vm10, %v7282_v15, %v5592_v61  ;;  %v7446_v15 = vsel %vm1079_vm9, %v2061_v31, %v5616_v46 }
 0x576   :  { %v2224_v25 = vpack.c.bf16 %v2191_v37, %v2190_v40 }
 0x578   :  { %2030 = vrot.lane.b32.xlu1 %v1999_v58, %s5958_s20 }
 0x581   :  { %2392 = vmatmul.bf16.gmra.mxu3 %v2224_v25 }
 0x5b8   :  { %v5605_v32 = vpop.permute.xlu0 %5604 }
 0x5b9   :  { %v5606_v0 = vunpack.i.l.bf16 %v5605_v32  ;;  %v5607_v54 = vunpack.i.h.bf16 %v5605_v32 }
 0x5bb   :  { %v7443_v51 = vsel %vm1079_vm9, %v2060_v22, %v5606_v0  ;;  %v2229_v49 = vpack.c.bf16 %v6814_v44, %v5607_v54 }
 0x5bc   :  { %v5638_v47 = vpack.i.bf16 %v7446_v15, %v7443_v51 }
 0x5be   :  { %5639 = vrot.lane.b32.xlu1 %v5638_v47, %s5959_s12 }
 0x5c0   :  { %v1933_v57 = vpop.permute.xlu0 %1932 }
 0x5c1   :  { %v2062_v10 = vsel %vm1061_vm8, %v7208_v62, %v1933_v57 }
 0x5c2   :  { %v7467_v16 = vsel %vm1079_vm9, %v2062_v10, %v5617_v39 }
 0x5c3   :  { %v5643_v62 = vpack.i.bf16 %v7467_v16, %v7446_v15 }
 0x5c8   :  { %v1935_v13 = vpop.permute.xlu0 %1934 }
 0x5c9   :  { %v2063_v24 = vsel %vm1061_vm8, %v7373_v56, %v1935_v13 }
 0x5cc   :  { %v5625_v56 = vpop.permute.xlu2 %5624 }
 0x5cd   :  { %v5627_v26 = vunpack.i.h.bf16 %v5625_v56  ;;  %v5626_v41 = vunpack.i.l.bf16 %v5625_v56 }
 0x5cf   :  { %v2232_v32 = vpack.c.bf16 %v5627_v26, %v5626_v41 }
 0x5d2   :  { %v5595_v30 = vpop.permute.xlu1 %5594 }
 0x5d3   :  { %v5597_v21 = vunpack.i.h.bf16 %v5595_v30  ;;  %v5596_v7 = vunpack.i.l.bf16 %v5595_v30 }
 0x5d5   :  { %v2226_v17 = vpack.c.bf16 %v5596_v7, %v5587_v12  ;;  %v7454_v9 = vsel %vm1079_vm9, %v2059_v52, %v5597_v21  ;;  %v2207_v48 = vsel %vm1079_vm9, %v5592_v61, %v5596_v7 }
 0x5d6   :  { %v5633_v38 = vpack.i.bf16 %v7443_v51, %v7454_v9  ;;  %v5628_v33 = vpack.i.bf16 %v7454_v9, %v7423_v60  ;;  %v2225_v18 = vpack.c.bf16 %v2207_v48, %v2206_v53 }
 0x5d7   :  { %4858 = vmatmul.msk.bf16.gmra.mxu1 %vm1061_vm8, %v2226_v17 }
 0x5d8   :  { %5634 = vrot.lane.b32.xlu0 %v5633_v38, %s5958_s20  ;;  %5629 = vrot.lane.b32.xlu2 %v5628_v33, %s5959_s12 }
 0x5d9   :  { %2441 = vmatmul.bf16.gmra.mxu0 %v2225_v18 }
 0x5da   :  { %v5610_v2 = vpop.permute.xlu1 %5609 }
 0x5db   :  { %v5612_v14 = vunpack.i.h.bf16 %v5610_v2  ;;  %v5611_v1 = vunpack.i.l.bf16 %v5610_v2 }
 0x5dc   :  { %v2481_v27 = vpop.f32.mrf.mxu1 }
 0x5dd   :  { %v2192_v29 = vsel %vm1207_vm10, %v7291_v63, %v5611_v1  ;;  %v2193_v5 = vsel %vm1207_vm10, %v7390_v4, %v5612_v14  ;;  %v2432_v20 = vpop.f32.mrf.mxu0  ;;  %v2208_v36 = vsel %vm1079_vm9, %v5611_v1, %v5607_v54  ;;  %v2209_v63 = vsel %vm1079_vm9, %v5612_v14, %v6814_v44 }
 0x5de   :  { %v2227_v28 = vpack.c.bf16 %v2193_v5, %v2192_v29  ;;  %v2228_v3 = vpack.c.bf16 %v2209_v63, %v2208_v36 }
 0x5e0   :  { %5644 = vrot.lane.b32.xlu2 %v5643_v62, %s5958_s20  ;;  %2397 = vmatmul.bf16.gmra.mxu3 %v2227_v28 }
 0x5e2   :  { %v5620_v11 = vpop.permute.xlu1 %5619 }
 0x5e3   :  { %v5622_v35 = vunpack.i.h.bf16 %v5620_v11  ;;  %v5621_v43 = vunpack.i.l.bf16 %v5620_v11 }
 0x5e4   :  { %v2383_v34 = vpop.f32.mrf.mxu3  ;;  %v7492_v53 = vpop.f32.mrf.mxu1 }
 0x5e5   :  { %v2433_v4 = vadd.f32 %v2432_v20, %v2383_v34  ;;  %v7485_v50 = vpop.f32.mrf.mxu0  ;;  %v2194_v12 = vsel %vm1207_vm10, %v6732_v55, %v5621_v43  ;;  %v2195_v61 = vsel %vm1207_vm10, %v7412_v8, %v5622_v35  ;;  %v2210_v46 = vsel %vm1079_vm9, %v5621_v43, %v5626_v41 }
 0x5e6   :  { %v2230_v25 = vpack.c.bf16 %v2195_v61, %v2194_v12  ;;  %v2211_v8 = vsel %vm1079_vm9, %v5622_v35, %v5627_v26 }
 0x5e7   :  { %v7480_v23 = vadd.f32 %v2481_v27, %v2433_v4  ;;  %4859 = vmatmul.msk.bf16.gmra.mxu1 %vm1061_vm8, %v2229_v49  ;;  %v2231_v47 = vpack.c.bf16 %v2211_v8, %v2210_v46 }
 0x5e9   :  { %2446 = vmatmul.bf16.gmra.mxu0 %v2228_v3 }
 0x5ea   :  { %v2031_v45 = vpop.permute.xlu1 %2030 }
 0x5eb   :  { %v2079_v58 = vsel %vm1079_vm9, %v2063_v24, %v2031_v45 }
 0x5ec   :  { %v7494_v40 = vpop.f32.mrf.mxu3  ;;  %2170 = vrot.lane.b32.xlu1 %v2079_v58, %s5958_s20  ;;  %v5648_v37 = vpack.i.bf16 %v2079_v58, %v7467_v16  ;;  %v2486_v31 = vpop.f32.mrf.mxu1 }
 0x5ed   :  { %v2437_v19 = vpop.f32.mrf.mxu0 }
 0x5ee   :  { %5649 = vrot.lane.b32.xlu0 %v5648_v37, %s5959_s12 }
 0x5f0   :  { %2402 = vmatmul.bf16.gmra.mxu3 %v2230_v25 }
 0x5f4   :  { %v2388_v59 = vpop.f32.mrf.mxu3  ;;  %v2488_v28 = vpop.f32.mrf.mxu1 }
 0x5f5   :  { %v2438_v0 = vadd.f32 %v2437_v19, %v2388_v59  ;;  %v2439_v5 = vpop.f32.mrf.mxu0 }
 0x5f7   :  { %v7501_v22 = vadd.f32 %v2486_v31, %v2438_v0  ;;  %4860 = vmatmul.msk.bf16.gmra.mxu1 %vm1061_vm8, %v2232_v32 }
 0x5f9   :  { %2451 = vmatmul.bf16.gmra.mxu0 %v2231_v47 }
 0x630   :  { %v5640_v17 = vpop.permute.xlu1 %5639 }
 0x631   :  { %v5642_v48 = vunpack.i.h.bf16 %v5640_v17  ;;  %v5641_v38 = vunpack.i.l.bf16 %v5640_v17 }
 0x632   :  { %v5630_v6 = vpop.permute.xlu2 %5629 }
 0x633   :  { %v5632_v30 = vunpack.i.h.bf16 %v5630_v6  ;;  %v5631_v21 = vunpack.i.l.bf16 %v5630_v6  ;;  %v2198_v33 = vsel %vm1207_vm10, %v7454_v9, %v5641_v38  ;;  %v2199_v18 = vsel %vm1207_vm10, %v7443_v51, %v5642_v48 }
 0x634   :  { %v2236_v10 = vpack.c.bf16 %v2199_v18, %v2198_v33 }
 0x635   :  { %v2196_v7 = vsel %vm1207_vm10, %v7415_v42, %v5631_v21  ;;  %v2197_v52 = vsel %vm1207_vm10, %v7423_v60, %v5632_v30  ;;  %v2390_v42 = vpop.f32.mrf.mxu3 }
 0x636   :  { %v2233_v57 = vpack.c.bf16 %v2197_v52, %v2196_v7 }
 0x638   :  { %2407 = vmatmul.bf16.gmra.mxu3 %v2233_v57 }
 0x63a   :  { %v5645_v9 = vpop.permute.xlu2 %5644 }
 0x63b   :  { %v5647_v54 = vunpack.i.h.bf16 %v5645_v9  ;;  %v5646_v27 = vunpack.i.l.bf16 %v5645_v9 }
 0x63d   :  { %v2393_v20 = vpop.f32.mrf.mxu3  ;;  %v2214_v63 = vsel %vm1079_vm9, %v5641_v38, %v5646_v27  ;;  %v2215_v49 = vsel %vm1079_vm9, %v5642_v48, %v5647_v54  ;;  %v2238_v4 = vpack.c.bf16 %v5647_v54, %v5646_v27  ;;  %v2435_v48 = vadd.f32 %v7485_v50, %v7494_v40 }
 0x63e   :  { %v2237_v13 = vpack.c.bf16 %v2215_v49, %v2214_v63 }
 0x63f   :  { %v7534_v33 = vadd.f32 %v7492_v53, %v2435_v48  ;;  %v2562_v53 = vmul.f32 %v7501_v22, %v7501_v22 }
 0x641   :  { %v2524_v50 = vsel %vm1061_vm8, %v7534_v33, 0.0 }
 0x645   :  { %v2395_v26 = vpop.f32.mrf.mxu3 }
 0x648   :  { %2412 = vmatmul.bf16.gmra.mxu3 %v2236_v10  ;;  %v2440_v10 = vadd.f32 %v2439_v5, %v2390_v42  ;;  %v2523_v42 = vsel %vm1061_vm8, %v7480_v23, 0.0 }
 0x649   :  { %v2525_v27 = vadd.f32 %v2524_v50, %v2523_v42 }
 0x64a   :  { %v5635_v39 = vpop.permute.xlu0 %5634 }
 0x64b   :  { %v5637_v2 = vunpack.i.h.bf16 %v5635_v39  ;;  %v5636_v14 = vunpack.i.l.bf16 %v5635_v39  ;;  %v2561_v39 = vmul.f32 %v7534_v33, %v7534_v33 }
 0x64d   :  { %v2235_v1 = vpack.c.bf16 %v5637_v2, %v5636_v14  ;;  %v2212_v60 = vsel %vm1079_vm9, %v5631_v21, %v5636_v14  ;;  %v2213_v29 = vsel %vm1079_vm9, %v5632_v30, %v5637_v2  ;;  %v7538_v14 = vadd.f32 %v2488_v28, %v2440_v10 }
 0x64e   :  { %v2234_v62 = vpack.c.bf16 %v2213_v29, %v2212_v60  ;;  %v2560_v60 = vmul.f32 %v7480_v23, %v7480_v23  ;;  %v2577_v5 = vsel %vm1061_vm8, %v2561_v39, 0.0  ;;  %v2526_v28 = vsel %vm1061_vm8, %v7501_v22, 0.0 }
 0x64f   :  { %4861 = vmatmul.msk.bf16.gmra.mxu1 %vm1061_vm8, %v2235_v1  ;;  %v2563_v9 = vmul.f32 %v7538_v14, %v7538_v14  ;;  %v2528_v63 = vsel %vm1061_vm8, %v7538_v14, 0.0 }
 0x650   :  { %2456 = vmatmul.bf16.gmra.mxu0 %v2234_v62  ;;  %v2576_v54 = vsel %vm1061_vm8, %v2560_v60, 0.0 }
 0x654   :  { %v2491_v34 = vpop.f32.mrf.mxu1 }
 0x656   :  { %v2442_v51 = vpop.f32.mrf.mxu0 }
 0x657   :  { %v2443_v11 = vadd.f32 %v2442_v51, %v2393_v20 }
 0x659   :  { %v7515_v36 = vadd.f32 %v2491_v34, %v2443_v11  ;;  %v2579_v34 = vsel %vm1061_vm8, %v2562_v53, 0.0 }
 0x65b   :  { %v2564_v49 = vmul.f32 %v7515_v36, %v7515_v36 }
 0x65c   :  { %v2493_v41 = vpop.f32.mrf.mxu1 }
 0x65e   :  { %v2171_v12 = vpop.permute.xlu1 %2170 }
 0x65f   :  { %4862 = vmatmul.msk.bf16.gmra.mxu1 %vm1061_vm8, %v2238_v4  ;;  %v2241_v56 = vpack.c.bf16 %v6814_v44, %v2171_v12 }
 0x660   :  { %v5650_v35 = vpop.permute.xlu0 %5649  ;;  %2461 = vmatmul.bf16.gmra.mxu0 %v2237_v13  ;;  %v2578_v13 = vadd.f32 %v2577_v5, %v2576_v54 }
 0x661   :  { %v5652_v43 = vunpack.i.h.bf16 %v5650_v35  ;;  %v5651_v3 = vunpack.i.l.bf16 %v5650_v35  ;;  %v2527_v35 = vadd.f32 %v2526_v28, %v2525_v27 }
 0x663   :  { %v2200_v24 = vsel %vm1207_vm10, %v7446_v15, %v5651_v3  ;;  %v2201_v45 = vsel %vm1207_vm10, %v7467_v16, %v5652_v43  ;;  %v2216_v61 = vsel %vm1079_vm9, %v5651_v3, %v2171_v12  ;;  %v2217_v37 = vsel %vm1079_vm9, %v5652_v43, %v6814_v44  ;;  %v2444_v15 = vpop.f32.mrf.mxu0  ;;  %v2398_v19 = vpop.f32.mrf.mxu3 }
 0x664   :  { %v2239_v58 = vpack.c.bf16 %v2201_v45, %v2200_v24  ;;  %v2240_v25 = vpack.c.bf16 %v2217_v37, %v2216_v61  ;;  %v2496_v59 = vpop.f32.mrf.mxu1  ;;  %v2445_v1 = vadd.f32 %v2444_v15, %v2395_v26  ;;  %v2581_v3 = vsel %vm1061_vm8, %v2563_v9, 0.0 }
 0x665   :  { %v2530_v24 = vsel %vm1061_vm8, %v7515_v36, 0.0  ;;  %v2580_v12 = vadd.f32 %v2579_v34, %v2578_v13  ;;  %v2529_v61 = vadd.f32 %v2528_v63, %v2527_v35 }
 0x666   :  { %2417 = vmatmul.bf16.gmra.mxu3 %v2239_v58  ;;  %v7553_v20 = vadd.f32 %v2493_v41, %v2445_v1 }
 0x668   :  { %v2565_v45 = vmul.f32 %v7553_v20, %v7553_v20  ;;  %v2532_v26 = vsel %vm1061_vm8, %v7553_v20, 0.0 }
 0x66b   :  { %v2447_v16 = vpop.f32.mrf.mxu0  ;;  %v2400_v46 = vpop.f32.mrf.mxu3 }
 0x66c   :  { %v2498_v8 = vpop.f32.mrf.mxu1  ;;  %v2448_v29 = vadd.f32 %v2447_v16, %v2398_v19  ;;  %v2531_v16 = vadd.f32 %v2530_v24, %v2529_v61 }
 0x66e   :  { %v7556_v11 = vadd.f32 %v2496_v59, %v2448_v29  ;;  %v2582_v59 = vadd.f32 %v2581_v3, %v2580_v12  ;;  %v2533_v48 = vadd.f32 %v2532_v26, %v2531_v16 }
 0x66f   :  { %4863 = vmatmul.msk.bf16.gmra.mxu1 %vm1061_vm8, %v2241_v56 }
 0x670   :  { %2466 = vmatmul.bf16.gmra.mxu0 %v2240_v25  ;;  %v2566_v37 = vmul.f32 %v7556_v11, %v7556_v11  ;;  %v2583_v25 = vsel %vm1061_vm8, %v2564_v49, 0.0 }
 0x673   :  { %v2449_v32 = vpop.f32.mrf.mxu0  ;;  %v2403_v0 = vpop.f32.mrf.mxu3 }
 0x674   :  { %v2501_v31 = vpop.f32.mrf.mxu1  ;;  %v2450_v51 = vadd.f32 %v2449_v32, %v2400_v46  ;;  %v2585_v32 = vsel %vm1061_vm8, %v2565_v45, 0.0 }
 0x676   :  { %v7568_v58 = vadd.f32 %v2498_v8, %v2450_v51 }
 0x67b   :  { %v2452_v47 = vpop.f32.mrf.mxu0  ;;  %v2405_v6 = vpop.f32.mrf.mxu3 }
 0x67c   :  { %v2503_v30 = vpop.f32.mrf.mxu1  ;;  %v2453_v4 = vadd.f32 %v2452_v47, %v2403_v0  ;;  %v2534_v0 = vsel %vm1061_vm8, %v7556_v11, 0.0  ;;  %v2567_v47 = vmul.f32 %v7568_v58, %v7568_v58 }
 0x67d   :  { %v2535_v1 = vadd.f32 %v2534_v0, %v2533_v48 }
 0x67e   :  { %v7575_v41 = vadd.f32 %v2501_v31, %v2453_v4  ;;  %v2587_v31 = vsel %vm1061_vm8, %v2566_v37, 0.0 }
 0x683   :  { %v2454_v21 = vpop.f32.mrf.mxu0 }
 0x684   :  { %v2455_v43 = vadd.f32 %v2454_v21, %v2405_v6  ;;  %v2584_v21 = vadd.f32 %v2583_v25, %v2582_v59 }
 0x686   :  { %v7577_v46 = vadd.f32 %v2503_v30, %v2455_v43  ;;  %v2568_v30 = vmul.f32 %v7575_v41, %v7575_v41  ;;  %v2586_v39 = vadd.f32 %v2585_v32, %v2584_v21 }
 0x688   :  { %v2569_v60 = vmul.f32 %v7577_v46, %v7577_v46  ;;  %v2588_v53 = vadd.f32 %v2587_v31, %v2586_v39 }
 0x68a   :  { %v2593_v54 = vsel %vm1061_vm8, %v2569_v60, 0.0 }
 0x6bb   :  { %v2408_v7 = vpop.f32.mrf.mxu3 }
 0x6c3   :  { %v2410_v17 = vpop.f32.mrf.mxu3 }
 0x6cb   :  { %v2413_v2 = vpop.f32.mrf.mxu3 }
 0x6cc   :  { %v2506_v52 = vpop.f32.mrf.mxu1 }
 0x6cd   :  { %v2457_v57 = vpop.f32.mrf.mxu0 }
 0x6ce   :  { %v2458_v15 = vadd.f32 %v2457_v57, %v2408_v7  ;;  %v2536_v7 = vsel %vm1061_vm8, %v7568_v58, 0.0 }
 0x6cf   :  { %v2537_v42 = vadd.f32 %v2536_v7, %v2535_v1 }
 0x6d0   :  { %v7589_v57 = vadd.f32 %v2506_v52, %v2458_v15  ;;  %v2591_v52 = vsel %vm1061_vm8, %v2568_v30, 0.0 }
 0x6d2   :  { %v2542_v34 = vsel %vm1061_vm8, %v7589_v57, 0.0 }
 0x6d3   :  { %v2415_v56 = vpop.f32.mrf.mxu3 }
 0x6d4   :  { %v7531_v38 = vpop.f32.mrf.mxu1 }
 0x6d5   :  { %v2459_v18 = vpop.f32.mrf.mxu0 }
 0x6d6   :  { %v2460_v6 = vadd.f32 %v2459_v18, %v2410_v17  ;;  %v2589_v17 = vsel %vm1061_vm8, %v2567_v47, 0.0  ;;  %v2538_v18 = vsel %vm1061_vm8, %v7575_v41, 0.0 }
 0x6d7   :  { %v2590_v9 = vadd.f32 %v2589_v17, %v2588_v53  ;;  %v2539_v51 = vadd.f32 %v2538_v18, %v2537_v42 }
 0x6d8   :  { %v7597_v29 = vadd.f32 %v7531_v38, %v2460_v6 }
 0x6d9   :  { %v2592_v13 = vadd.f32 %v2591_v52, %v2590_v9 }
 0x6da   :  { %v2571_v63 = vmul.f32 %v7597_v29, %v7597_v29  ;;  %v2544_v43 = vsel %vm1061_vm8, %v7597_v29, 0.0 }
 0x6db   :  { %v2594_v45 = vadd.f32 %v2593_v54, %v2592_v13 }
 0x6dc   :  { %v2511_v40 = vpop.f32.mrf.mxu1  ;;  %v2597_v61 = vsel %vm1061_vm8, %v2571_v63, 0.0 }
 0x6dd   :  { %v2462_v62 = vpop.f32.mrf.mxu0 }
 0x6de   :  { %v2463_v10 = vadd.f32 %v2462_v62, %v2413_v2  ;;  %v2540_v2 = vsel %vm1061_vm8, %v7577_v46, 0.0  ;;  %v2570_v62 = vmul.f32 %v7589_v57, %v7589_v57 }
 0x6df   :  { %v2541_v35 = vadd.f32 %v2540_v2, %v2539_v51 }
 0x6e0   :  { %v7604_v28 = vadd.f32 %v2511_v40, %v2463_v10  ;;  %v2595_v40 = vsel %vm1061_vm8, %v2570_v62, 0.0 }
 0x6e1   :  { %v2543_v12 = vadd.f32 %v2542_v34, %v2541_v35  ;;  %v2596_v25 = vadd.f32 %v2595_v40, %v2594_v45 }
 0x6e2   :  { %v2572_v3 = vmul.f32 %v7604_v28, %v7604_v28  ;;  %v2546_v37 = vsel %vm1061_vm8, %v7604_v28, 0.0 }
 0x6e3   :  { %v2545_v26 = vadd.f32 %v2544_v43, %v2543_v12  ;;  %v2598_v16 = vadd.f32 %v2597_v61, %v2596_v25 }
 0x6e4   :  { %v2513_v19 = vpop.f32.mrf.mxu1  ;;  %v2599_v15 = vsel %vm1061_vm8, %v2572_v3, 0.0 }
 0x6e5   :  { %v2464_v8 = vpop.f32.mrf.mxu0  ;;  %v2600_v48 = vadd.f32 %v2599_v15, %v2598_v16  ;;  %v2522_v16 = vld [vmem:[%s9023_s8] sm:$0x1] }
 0x6e6   :  { %v2465_v50 = vadd.f32 %v2464_v8, %v2415_v56  ;;  %v2547_v8 = vadd.f32 %v2546_v37, %v2545_v26  ;;  %v2521_v26 = vld [vmem:[%s9022_s7] sm:$0x1] }
 0x6e8   :  { %v7611_v49 = vadd.f32 %v2513_v19, %v2465_v50 }
 0x6e9   :  { %v2418_v5 = vpop.f32.mrf.mxu3 }
 0x6ea   :  { %v2573_v56 = vmul.f32 %v7611_v49, %v7611_v49  ;;  %v2548_v19 = vsel %vm1061_vm8, %v7611_v49, 0.0 }
 0x6eb   :  { %v2549_v31 = vadd.f32 %v2548_v19, %v2547_v8 }
 0x6ec   :  { %v2516_v38 = vpop.f32.mrf.mxu1  ;;  %v2601_v47 = vsel %vm1061_vm8, %v2573_v56, 0.0 }
 0x6ed   :  { %v2467_v27 = vpop.f32.mrf.mxu0  ;;  %v2602_v39 = vadd.f32 %v2601_v47, %v2600_v48 }
 0x6ee   :  { %v2468_v4 = vadd.f32 %v2467_v27, %v2418_v5 }
 0x6f0   :  { %v7618_v24 = vadd.f32 %v2516_v38, %v2468_v4 }
 0x6f1   :  { %v2420_v32 = vpop.f32.mrf.mxu3 }
 0x6f2   :  { %v2574_v59 = vmul.f32 %v7618_v24, %v7618_v24  ;;  %v2550_v6 = vsel %vm1061_vm8, %v7618_v24, 0.0 }
 0x6f3   :  { %v2551_v1 = vadd.f32 %v2550_v6, %v2549_v31 }
 0x6f4   :  { %v2518_v7 = vpop.f32.mrf.mxu1  ;;  %v2603_v30 = vsel %vm1061_vm8, %v2574_v59, 0.0 }
 0x6f5   :  { %v2469_v0 = vpop.f32.mrf.mxu0  ;;  %v2604_v18 = vadd.f32 %v2603_v30, %v2602_v39 }
 0x6f6   :  { %v2470_v21 = vadd.f32 %v2469_v0, %v2420_v32 }
 0x6f8   :  { %v2519_v10 = vadd.f32 %v2518_v7, %v2470_v21 }
 0x6fa   :  { %v2552_v60 = vsel %vm1061_vm8, %v2519_v10, 0.0  ;;  %v2575_v17 = vmul.f32 %v2519_v10, %v2519_v10 }
 0x6fb   :  { %v2553_v50 = vadd.f32 %v2552_v60, %v2551_v1 }
 0x6fc   :  { %v2605_v53 = vsel %vm1061_vm8, %v2575_v17, 0.0 }
 0x6fd   :  { %v2554_v42 = vrot.slane %v2553_v50, 4  ;;  %v2606_v5 = vadd.f32 %v2605_v53, %v2604_v18 }
 0x6ff   :  { %v2555_v52 = vadd.f32 %v2554_v42, %v2553_v50  ;;  %v2607_v2 = vrot.slane %v2606_v5, 4 }
 0x701   :  { %v2556_v62 = vrot.slane %v2555_v52, 2  ;;  %v2608_v9 = vadd.f32 %v2607_v2, %v2606_v5 }
 0x703   :  { %v2557_v51 = vadd.f32 %v2556_v62, %v2555_v52  ;;  %v2609_v54 = vrot.slane %v2608_v9, 2 }
 0x705   :  { %v2558_v38 = vrot.slane %v2557_v51, 1  ;;  %v2610_v27 = vadd.f32 %v2609_v54, %v2608_v9 }
 0x707   :  { %v2559_v34 = vadd.f32 %v2558_v38, %v2557_v51  ;;  %v2611_v63 = vrot.slane %v2610_v27, 1 }
 0x709   :  { %v2612_v4 = vadd.f32 %v2611_v63, %v2610_v27  ;;  %v2613_v13 = vmul.f32 0.0078125, %v2559_v34 }
 0x70b   :  { %v2614_v35 = vmul.f32 0.0078125, %v2612_v4  ;;  %v2615_v40 = vmul.f32 %v2613_v13, %v2613_v13 }
 0x70d   :  { %v2616_v43 = vsub.f32 %v2614_v35, %v2615_v40 }
 0x70f   :  { %v2617_v3 = vmax.f32 %v2616_v43, 0.0 }
 0x711   :  { %v2618_v45 = vadd.f32 1e-05, %v2617_v3 }
 0x713   :  { %5946 = vrsqrt.f32 %v2618_v45  ;;  %vm2625_vm15 = vweird.f32 %v2618_v45 }
 0x719   :  { %v5947_v12 = vpop.eup %5946 }
 0x71a   :  { %v2620_v61 = vmul.f32 %v5947_v12, %v2618_v45  ;;  %vm2626_vm14 = vweird.f32 %v5947_v12 }
 0x71b   :  { %vm2627_vm3 = vmor %vm2625_vm15, %vm2626_vm14 }
 0x71c   :  { %v2621_v37 = vmul.f32 %v5947_v12, %v2620_v61 }
 0x71e   :  { %v2622_v56 = vmul.f32 0.5, %v2621_v37 }
 0x720   :  { %v2623_v25 = vsub.f32 1.5, %v2622_v56 }
 0x722   :  { %v2624_v15 = vmul.f32 %v5947_v12, %v2623_v25 }
 0x724   :  { %v2628_v19 = vsel %vm2627_vm3, %v5947_v12, %v2624_v15 }
 0x725   :  { %v2629_v59 = vmul.f32 %v2628_v19, %v2521_v26 }
 0x727   :  { %v2630_v8 = vmul.f32 %v2629_v59, %v2613_v13  ;;  %v7642_v32 = vperm.slane %v2629_v59, 0 }
 0x729   :  { %v2631_v0 = vsub.f32 %v2522_v16, %v2630_v8  ;;  %v2650_v47 = vmul.f32 %v7642_v32, %v2519_v10  ;;  %v2637_v6 = vmul.f32 %v7642_v32, %v7501_v22  ;;  %v2638_v48 = vmul.f32 %v7642_v32, %v7538_v14 }
 0x72a   :  { %v2635_v31 = vmul.f32 %v7642_v32, %v7480_v23  ;;  %v2636_v7 = vmul.f32 %v7642_v32, %v7534_v33  ;;  %v2639_v30 = vmul.f32 %v7642_v32, %v7515_v36  ;;  %v2640_v10 = vmul.f32 %v7642_v32, %v7553_v20 }
 0x72b   :  { %v7647_v21 = vperm.slane %v2631_v0, 0  ;;  %v2641_v22 = vmul.f32 %v7642_v32, %v7556_v11  ;;  %v2642_v39 = vmul.f32 %v7642_v32, %v7568_v58 }
 0x72d   :  { %v7664_v14 = vadd.f32 %v7647_v21, %v2650_v47  ;;  %v2656_v23 = vadd.f32 %v7647_v21, %v2637_v6  ;;  %v2657_v1 = vadd.f32 %v7647_v21, %v2638_v48  ;;  %v2654_v33 = vadd.f32 %v7647_v21, %v2635_v31 }
 0x72e   :  { %v2655_v36 = vadd.f32 %v7647_v21, %v2636_v7  ;;  %v2658_v60 = vadd.f32 %v7647_v21, %v2639_v30  ;;  %v2659_v20 = vadd.f32 %v7647_v21, %v2640_v10  ;;  %v7673_v11 = vadd.f32 %v7647_v21, %v2641_v22 }
 0x72f   :  { %v2672_v17 = vmax.f32 %v2656_v23, 0.0  ;;  %v2673_v58 = vmax.f32 %v2657_v1, 0.0  ;;  %v2670_v18 = vmax.f32 %v2654_v33, 0.0  ;;  %v7676_v5 = vadd.f32 %v7647_v21, %v2642_v39 }
 0x730   :  { %v2671_v50 = vmax.f32 %v2655_v36, 0.0  ;;  %v2674_v53 = vmax.f32 %v2658_v60, 0.0  ;;  %v2675_v42 = vmax.f32 %v2659_v20, 0.0  ;;  %v2676_v9 = vmax.f32 %v7673_v11, 0.0 }
 0x731   :  { %v2741_v52 = vrot.slane %v2672_v17, 7  ;;  %v2742_v2 = vrot.slane %v2673_v58, 7  ;;  %v2739_v62 = vrot.slane %v2670_v18, 7  ;;  %v2677_v27 = vmax.f32 %v7676_v5, 0.0 }
 0x732   :  { %v2740_v51 = vrot.slane %v2671_v50, 7  ;;  %v2743_v54 = vrot.slane %v2674_v53, 7  ;;  %v2744_v38 = vrot.slane %v2675_v42, 7 }
 0x733   :  { %v7681_v34 = vsel %vm115_vm0, 0.0, %v2741_v52  ;;  %v7684_v63 = vsel %vm115_vm0, 0.0, %v2742_v2  ;;  %v2789_v4 = vsel %vm115_vm0, %v2741_v52, 0.0  ;;  %v2790_v13 = vsel %vm115_vm0, %v2742_v2, 0.0 }
 0x734   :  { %v2841_v35 = vrot.slane %v7681_v34, 1  ;;  %v2842_v40 = vrot.slane %v2789_v4, 1  ;;  %v2844_v43 = vrot.slane %v7684_v63, 1  ;;  %v2845_v3 = vrot.slane %v2790_v13, 1 }
 0x735   :  { %v7691_v45 = vsel %vm115_vm0, 0.0, %v2739_v62  ;;  %v7694_v12 = vsel %vm115_vm0, 0.0, %v2740_v51  ;;  %v2787_v61 = vsel %vm115_vm0, %v2739_v62, 0.0  ;;  %v2788_v37 = vsel %vm115_vm0, %v2740_v51, 0.0 }
 0x736   :  { %v2843_v56 = vsel %vm184_vm1, %v2841_v35, %v2842_v40  ;;  %v2846_v25 = vsel %vm184_vm1, %v2844_v43, %v2845_v3  ;;  %v2931_v26 = vrot.slane %v7691_v45, 2  ;;  %v2932_v15 = vrot.slane %v2787_v61, 2 }
 0x737   :  { %v5658_v19 = vpack.i.bf16 %v2846_v25, %v2843_v56  ;;  %v2934_v59 = vrot.slane %v7694_v12, 2  ;;  %v2935_v16 = vrot.slane %v2788_v37, 2  ;;  %v2835_v8 = vrot.slane %v7691_v45, 1 }
 0x738   :  { %v2933_v0 = vsel %vm287_vm2, %v2931_v26, %v2932_v15  ;;  %v2836_v47 = vrot.slane %v2787_v61, 1  ;;  %v2838_v6 = vrot.slane %v7694_v12, 1  ;;  %v2839_v48 = vrot.slane %v2788_v37, 1 }
 0x739   :  { %5659 = vrot.lane.b32.xlu0 %v5658_v19, %s5957_s2  ;;  %v2936_v31 = vsel %vm287_vm2, %v2934_v59, %v2935_v16  ;;  %v7708_v7 = vsel %vm115_vm0, 0.0, %v2743_v54  ;;  %v7711_v30 = vsel %vm115_vm0, 0.0, %v2744_v38  ;;  %v2791_v10 = vsel %vm115_vm0, %v2743_v54, 0.0 }
 0x73a   :  { %v5663_v22 = vpack.i.bf16 %v2936_v31, %v2933_v0  ;;  %v2837_v39 = vsel %vm184_vm1, %v2835_v8, %v2836_v47  ;;  %v2840_v23 = vsel %vm184_vm1, %v2838_v6, %v2839_v48  ;;  %v2792_v1 = vsel %vm115_vm0, %v2744_v38, 0.0 }
 0x73b   :  { %v5653_v33 = vpack.i.bf16 %v2840_v23, %v2837_v39  ;;  %v2847_v36 = vrot.slane %v7708_v7, 1  ;;  %v2848_v60 = vrot.slane %v2791_v10, 1  ;;  %v2850_v20 = vrot.slane %v7711_v30, 1 }
 0x73c   :  { %5664 = vrot.lane.b32.xlu1 %v5663_v22, %s5958_s20  ;;  %v2851_v11 = vrot.slane %v2792_v1, 1  ;;  %v2943_v17 = vrot.slane %v7708_v7, 2  ;;  %v2944_v58 = vrot.slane %v2791_v10, 2  ;;  %v2946_v18 = vrot.slane %v7711_v30, 2 }
 0x73d   :  { %5654 = vrot.lane.b32.xlu2 %v5653_v33, %s5957_s2  ;;  %v2849_v50 = vsel %vm184_vm1, %v2847_v36, %v2848_v60  ;;  %v2947_v53 = vrot.slane %v2792_v1, 2  ;;  %v2937_v42 = vrot.slane %v7681_v34, 2  ;;  %v2938_v5 = vrot.slane %v2789_v4, 2 }
 0x73e   :  { %v2852_v52 = vsel %vm184_vm1, %v2850_v20, %v2851_v11  ;;  %v2945_v2 = vsel %vm287_vm2, %v2943_v17, %v2944_v58  ;;  %v2940_v62 = vrot.slane %v7684_v63, 2  ;;  %v2941_v51 = vrot.slane %v2790_v13, 2 }
 0x73f   :  { %v5673_v54 = vpack.i.bf16 %v2852_v52, %v2849_v50  ;;  %v2948_v38 = vsel %vm287_vm2, %v2946_v18, %v2947_v53  ;;  %v2745_v35 = vrot.slane %v2676_v9, 7  ;;  %v2939_v40 = vsel %vm287_vm2, %v2937_v42, %v2938_v5 }
 0x740   :  { %v2942_v43 = vsel %vm287_vm2, %v2940_v62, %v2941_v51  ;;  %v2746_v3 = vrot.slane %v2677_v27, 7  ;;  %v5678_v61 = vpack.i.bf16 %v2948_v38, %v2945_v2  ;;  %v2643_v13 = vmul.f32 %v7642_v32, %v7575_v41 }
 0x741   :  { %5674 = vrot.lane.b32.xlu0 %v5673_v54, %s5957_s2  ;;  %v7733_v4 = vsel %vm115_vm0, 0.0, %v2745_v35  ;;  %v7736_v37 = vsel %vm115_vm0, %v2745_v35, 0.0  ;;  %v5668_v26 = vpack.i.bf16 %v2942_v43, %v2939_v40  ;;  %v2644_v59 = vmul.f32 %v7642_v32, %v7577_v46 }
 0x742   :  { %v7741_v56 = vsel %vm115_vm0, 0.0, %v2746_v3  ;;  %v7744_v9 = vsel %vm115_vm0, %v2746_v3, 0.0  ;;  %v2853_v27 = vrot.slane %v7733_v4, 1  ;;  %v2854_v25 = vrot.slane %v7736_v37, 1 }
 0x743   :  { %v2856_v15 = vrot.slane %v7741_v56, 1  ;;  %v2857_v19 = vrot.slane %v7744_v9, 1  ;;  %v2662_v41 = vadd.f32 %v7647_v21, %v2643_v13  ;;  %v2663_v0 = vadd.f32 %v7647_v21, %v2644_v59 }
 0x744   :  { %5679 = vrot.lane.b32.xlu1 %v5678_v61, %s5958_s20  ;;  %v2855_v16 = vsel %vm184_vm1, %v2853_v27, %v2854_v25  ;;  %v2645_v47 = vmul.f32 %v7642_v32, %v7589_v57  ;;  %v2646_v48 = vmul.f32 %v7642_v32, %v7597_v29  ;;  %v2647_v10 = vmul.f32 %v7642_v32, %v7604_v28 }
 0x745   :  { %5669 = vrot.lane.b32.xlu2 %v5668_v26, %s5958_s20  ;;  %v2858_v8 = vsel %vm184_vm1, %v2856_v15, %v2857_v19  ;;  %v2678_v6 = vmax.f32 %v2662_v41, 0.0  ;;  %v2679_v46 = vmax.f32 %v2663_v0, 0.0  ;;  %v2648_v22 = vmul.f32 %v7642_v32, %v7611_v49 }
 0x746   :  { %v2664_v31 = vadd.f32 %v7647_v21, %v2645_v47  ;;  %v5683_v39 = vpack.i.bf16 %v2858_v8, %v2855_v16  ;;  %v2665_v1 = vadd.f32 %v7647_v21, %v2646_v48  ;;  %v2649_v57 = vmul.f32 %v7642_v32, %v7618_v24 }
 0x747   :  { %v2747_v23 = vrot.slane %v2678_v6, 7  ;;  %v2748_v33 = vrot.slane %v2679_v46, 7  ;;  %v2666_v29 = vadd.f32 %v7647_v21, %v2647_v10  ;;  %v2667_v60 = vadd.f32 %v7647_v21, %v2648_v22 }
 0x748   :  { %v2680_v36 = vmax.f32 %v2664_v31, 0.0  ;;  %v2681_v11 = vmax.f32 %v2665_v1, 0.0  ;;  %v2668_v49 = vadd.f32 %v7647_v21, %v2649_v57 }
 0x749   :  { %v7773_v20 = vsel %vm115_vm0, 0.0, %v2747_v23  ;;  %v2795_v28 = vsel %vm115_vm0, %v2747_v23, 0.0  ;;  %v7778_v17 = vsel %vm115_vm0, 0.0, %v2748_v33  ;;  %v2796_v58 = vsel %vm115_vm0, %v2748_v33, 0.0 }
 0x74a   :  { %v2859_v24 = vrot.slane %v7773_v20, 1  ;;  %v2860_v32 = vrot.slane %v2795_v28, 1  ;;  %v2862_v18 = vrot.slane %v7778_v17, 1  ;;  %v2863_v50 = vrot.slane %v2796_v58, 1 }
 0x74b   :  { %v2749_v53 = vrot.slane %v2680_v36, 7  ;;  %v2750_v42 = vrot.slane %v2681_v11, 7  ;;  %v2955_v21 = vrot.slane %v7773_v20, 2  ;;  %v2956_v52 = vrot.slane %v2795_v28, 2 }
 0x74c   :  { %v7785_v5 = vsel %vm184_vm1, %v2859_v24, %v2860_v32  ;;  %v2958_v2 = vrot.slane %v7778_v17, 2  ;;  %v7790_v62 = vsel %vm184_vm1, %v2862_v18, %v2863_v50  ;;  %v2959_v26 = vrot.slane %v2796_v58, 2 }
 0x74d   :  { %5684 = vrot.lane.b32.xlu2 %v5683_v39, %s5957_s2  ;;  %v7793_v51 = vsel %vm115_vm0, 0.0, %v2749_v53  ;;  %v7796_v54 = vsel %vm115_vm0, 0.0, %v2750_v42  ;;  %v7799_v38 = vsel %vm115_vm0, %v2749_v53, 0.0  ;;  %v5703_v35 = vpack.i.bf16 %v7790_v62, %v7785_v5 }
 0x74e   :  { %v7804_v40 = vsel %vm115_vm0, %v2750_v42, 0.0  ;;  %v2865_v43 = vrot.slane %v7793_v51, 1  ;;  %v2866_v3 = vrot.slane %v7799_v38, 1  ;;  %v2868_v61 = vrot.slane %v7796_v54, 1 }
 0x74f   :  { %v2869_v13 = vrot.slane %v7804_v40, 1  ;;  %v7814_v25 = vsel %vm287_vm2, %v2955_v21, %v2956_v52  ;;  %v2682_v15 = vmax.f32 %v2666_v29, 0.0  ;;  %v2683_v59 = vmax.f32 %v2667_v60, 0.0 }
 0x750   :  { %v7811_v27 = vsel %vm184_vm1, %v2865_v43, %v2866_v3  ;;  %v2684_v41 = vmax.f32 %v2668_v49, 0.0  ;;  %v7822_v8 = vsel %vm287_vm2, %v2958_v2, %v2959_v26  ;;  %v2952_v52 = vrot.slane %v7741_v56, 2 }
 0x751   :  { %v7817_v19 = vsel %vm184_vm1, %v2868_v61, %v2869_v13  ;;  %v2751_v0 = vrot.slane %v2682_v15, 7  ;;  %v5723_v47 = vpack.i.bf16 %v7822_v8, %v7814_v25  ;;  %v2752_v6 = vrot.slane %v2683_v59, 7  ;;  %v5157_v25 = vld [vmem:[%s9018_s3 + $0x100] sm:$0xff]  ;;  %v5147_v8 = vld [vmem:[%s9018_s3 + $0xb0] sm:$0xff] }
 0x752   :  { %v5713_v16 = vpack.i.bf16 %v7817_v19, %v7811_v27  ;;  %v2753_v48 = vrot.slane %v2684_v41, 7  ;;  %v2953_v2 = vrot.slane %v7744_v9, 2  ;;  %v2949_v26 = vrot.slane %v7733_v4, 2  ;;  %v5149_v27 = vld [vmem:[%s9018_s3 + $0xc0] sm:$0xff]  ;;  %v5148_v19 = vld [vmem:[%s9018_s3 + $0xb8] sm:$0xff] }
 0x753   :  { %v7827_v46 = vsel %vm115_vm0, 0.0, %v2751_v0  ;;  %v7830_v31 = vsel %vm115_vm0, %v2751_v0, 0.0  ;;  %v7833_v10 = vsel %vm115_vm0, 0.0, %v2752_v6  ;;  %v2800_v22 = vsel %vm115_vm0, %v2752_v6, 0.0 }
 0x754   :  { %v2871_v39 = vrot.slane %v7827_v46, 1  ;;  %v2872_v23 = vrot.slane %v7830_v31, 1  ;;  %v2874_v1 = vrot.slane %v7833_v10, 1  ;;  %v2875_v57 = vrot.slane %v2800_v22, 1 }
 0x755   :  { %v7840_v33 = vsel %vm115_vm0, 0.0, %v2753_v48  ;;  %v7843_v36 = vsel %vm115_vm0, %v2753_v48, 0.0  ;;  %v2970_v11 = vrot.slane %v7833_v10, 2  ;;  %v2971_v58 = vrot.slane %v2800_v22, 2 }
 0x756   :  { %v7846_v29 = vsel %vm184_vm1, %v2871_v39, %v2872_v23  ;;  %v2974_v60 = vrot.slane %v7843_v36, 2  ;;  %v7850_v28 = vsel %vm184_vm1, %v2874_v1, %v2875_v57  ;;  %v2973_v24 = vrot.slane %v7840_v33, 2 }
 0x757   :  { %v5743_v49 = vpack.i.bf16 %v7850_v28, %v7846_v29  ;;  %v7857_v32 = vsel %vm287_vm2, %v2970_v11, %v2971_v58  ;;  %v2950_v15 = vrot.slane %v7736_v37, 2  ;;  %v2954_v48 = vsel %vm287_vm2, %v2952_v52, %v2953_v2  ;;  %v5154_v29 = vld [vmem:[%s9018_s3 + $0xe8] sm:$0xff]  ;;  %v5145_v28 = vld [vmem:[%s9018_s3 + $0xa0] sm:$0xff] }
 0x758   :  { %v7860_v18 = vsel %vm287_vm2, %v2973_v24, %v2974_v60  ;;  %v2877_v62 = vrot.slane %v7840_v33, 1 }
 0x759   :  { %v5758_v50 = vpack.i.bf16 %v7860_v18, %v7857_v32  ;;  %v2951_v1 = vsel %vm287_vm2, %v2949_v26, %v2950_v15  ;;  %v2961_v15 = vrot.slane %v7793_v51, 2  ;;  %v2965_v32 = vrot.slane %v7804_v40, 2 }
 0x797   :  { %v5655_v53 = vpop.permute.xlu2 %5654 }
 0x798   :  { %v5657_v43 = vunpack.i.h.bf16 %v5655_v53  ;;  %v5656_v3 = vunpack.i.l.bf16 %v5655_v53 }
 0x79a   :  { %v3028_v9 = vsel %vm1061_vm8, %v7694_v12, %v5657_v43  ;;  %v3027_v39 = vsel %vm1061_vm8, %v7691_v45, %v5656_v3  ;;  %v5150_v45 = vld [vmem:[%s9018_s3 + $0xc8] sm:$0xff] }
 0x79b   :  { %v5158_v12 = vld [vmem:[%s9018_s3 + $0x108] sm:$0xff]  ;;  %3353 = vmatpush.bf16.msrb.mxu2 %v5150_v45  ;;  %v2968_v45 = vrot.slane %v7830_v31, 2 }
 0x79c   :  { %3402 = vmatpush.bf16.msra.mxu3 %v5158_v12 }
 0x79f   :  { %v5670_v42 = vpop.permute.xlu2 %5669  ;;  %3354 = vmatpush.bf16.msrb.mxu2 %v5149_v27 }
 0x7a0   :  { %v5671_v13 = vunpack.i.l.bf16 %v5670_v42  ;;  %3403 = vmatpush.bf16.msra.mxu3 %v5157_v25 }
 0x7a3   :  { %3355 = vmatpush.bf16.msrb.mxu2 %v5148_v19 }
 0x7a7   :  { %3356 = vmatpush.bf16.msrb.mxu2 %v5147_v8 }
 0x7ab   :  { %v5660_v21 = vpop.permute.xlu0 %5659 }
 0x7ac   :  { %v5661_v61 = vunpack.i.l.bf16 %v5660_v21  ;;  %v5662_v23 = vunpack.i.h.bf16 %v5660_v21  ;;  %v5672_v21 = vunpack.i.h.bf16 %v5670_v42 }
 0x7ae   :  { %v3029_v59 = vsel %vm1061_vm8, %v7681_v34, %v5661_v61  ;;  %v5665_v41 = vpop.permute.xlu1 %5664  ;;  %v3030_v24 = vsel %vm1061_vm8, %v7684_v63, %v5662_v23 }
 0x7af   :  { %v5667_v0 = vunpack.i.h.bf16 %v5665_v41  ;;  %v5666_v6 = vunpack.i.l.bf16 %v5665_v41  ;;  %v7872_v22 = vsel %vm1079_vm9, %v3029_v59, %v5671_v13  ;;  %v7903_v61 = vsel %vm1079_vm9, %v3030_v24, %v5672_v21 }
 0x7b0   :  { %v5698_v37 = vpack.i.bf16 %v2954_v48, %v7872_v22  ;;  %v5708_v42 = vpack.i.bf16 %v7903_v61, %v7872_v22  ;;  %v2962_v59 = vrot.slane %v7799_v38, 2  ;;  %v2878_v38 = vrot.slane %v7843_v36, 1  ;;  %v5146_v36 = vld [vmem:[%s9018_s3 + $0xa8] sm:$0xff]  ;;  %v5144_v48 = vld [vmem:[%s9018_s3 + $0x98] sm:$0xff] }
 0x7b1   :  { %v7881_v34 = vsel %vm1079_vm9, %v3028_v9, %v5667_v0  ;;  %v7884_v57 = vsel %vm1079_vm9, %v3027_v39, %v5666_v6  ;;  %3357 = vmatpush.bf16.msrb.mxu2 %v5146_v36  ;;  %v5160_v6 = vld [vmem:[%s9018_s3 + $0x118] sm:$0xff]  ;;  %v5685_v39 = vpop.permute.xlu2 %5684 }
 0x7b2   :  { %v5688_v60 = vpack.i.bf16 %v7881_v34, %v2951_v1  ;;  %v5693_v11 = vpack.i.bf16 %v7881_v34, %v7884_v57  ;;  %5699 = vrot.lane.b32.xlu2 %v5698_v37, %s5958_s20  ;;  %v2963_v41 = vsel %vm287_vm2, %v2961_v15, %v2962_v59  ;;  %3457 = vmatpush.bf16.msrb.mxu0 %v5160_v6  ;;  %v5152_v9 = vld [vmem:[%s9018_s3 + $0xd8] sm:$0xff]  ;;  %v5687_v23 = vunpack.i.h.bf16 %v5685_v39  ;;  %v5159_v37 = vld [vmem:[%s9018_s3 + $0x110] sm:$0xff] }
 0x7b3   :  { %v5675_v58 = vpop.permute.xlu0 %5674  ;;  %v5143_v1 = vld [vmem:[%s9018_s3 + $0x90] sm:$0xff] }
 0x7b4   :  { %5689 = vrot.lane.b32.xlu0 %v5688_v60, %s5958_s20  ;;  %5694 = vrot.lane.b32.xlu1 %v5693_v11, %s5959_s12  ;;  %v5676_v53 = vunpack.i.l.bf16 %v5675_v58  ;;  %v5677_v52 = vunpack.i.h.bf16 %v5675_v58  ;;  %v5151_v60 = vld [vmem:[%s9018_s3 + $0xd0] sm:$0xff]  ;;  %v2967_v11 = vrot.slane %v7827_v46, 2  ;;  %v3034_v24 = vsel %vm1061_vm8, %v7741_v56, %v5687_v23 }
 0x7b5   :  { %3358 = vmatpush.bf16.msrb.mxu2 %v5145_v28 }
 0x7b6   :  { %v3031_v2 = vsel %vm1061_vm8, %v7708_v7, %v5676_v53  ;;  %v5680_v43 = vpop.permute.xlu1 %5679  ;;  %v3032_v26 = vsel %vm1061_vm8, %v7711_v30, %v5677_v52  ;;  %3458 = vmatpush.bf16.msrb.mxu0 %v5159_v37  ;;  %v2969_v53 = vsel %vm287_vm2, %v2967_v11, %v2968_v45 }
 0x7b7   :  { %v5681_v3 = vunpack.i.l.bf16 %v5680_v43  ;;  %v5682_v13 = vunpack.i.h.bf16 %v5680_v43 }
 0x7b9   :  { %v7906_v63 = vsel %vm1079_vm9, %v3031_v2, %v5681_v3  ;;  %v7923_v30 = vsel %vm1079_vm9, %v3032_v26, %v5682_v13  ;;  %3359 = vmatpush.bf16.msrb.mxu2 %v5144_v48  ;;  %v2685_v2 = vmax.f32 %v7664_v14, 0.0  ;;  %v5686_v26 = vunpack.i.l.bf16 %v5685_v39 }
 0x7ba   :  { %5704 = vrot.lane.b32.xlu2 %v5703_v35, %s5957_s2  ;;  %v5718_v7 = vpack.i.bf16 %v7906_v63, %v7903_v61  ;;  %v5728_v0 = vpack.i.bf16 %v7923_v30, %v2963_v41  ;;  %v5733_v5 = vpack.i.bf16 %v7923_v30, %v7906_v63  ;;  %v2879_v35 = vsel %vm184_vm1, %v2877_v62, %v2878_v38 }
 0x7bb   :  { %v2754_v43 = vrot.slane %v2685_v2, 7 }
 0x7bc   :  { %5709 = vrot.lane.b32.xlu0 %v5708_v42, %s5959_s12  ;;  %5719 = vrot.lane.b32.xlu1 %v5718_v7, %s5958_s20  ;;  %v2964_v42 = vrot.slane %v7796_v54, 2 }
 0x7bd   :  { %3360 = vmatpush.bf16.msrb.mxu2 %v5143_v1  ;;  %v8008_v31 = vsel %vm115_vm0, 0.0, %v2754_v43  ;;  %v8011_v56 = vsel %vm115_vm0, %v2754_v43, 0.0 }
 0x7be   :  { %v2880_v3 = vrot.slane %v8008_v31, 1  ;;  %v2881_v13 = vrot.slane %v8011_v56, 1  ;;  %v2966_v62 = vsel %vm287_vm2, %v2964_v42, %v2965_v32  ;;  %v2976_v42 = vrot.slane %v8008_v31, 2 }
 0x7bf   :  { %v2977_v32 = vrot.slane %v8011_v56, 2 }
 0x7c0   :  { %v2882_v14 = vsel %vm184_vm1, %v2880_v3, %v2881_v13 }
 0x7c2   :  { %5729 = vrot.lane.b32.xlu2 %v5728_v0, %s5958_s20 }
 0x7c4   :  { %5714 = vrot.lane.b32.xlu0 %v5713_v16, %s5957_s2  ;;  %5724 = vrot.lane.b32.xlu1 %v5723_v47, %s5958_s20  ;;  %v5156_v16 = vld [vmem:[%s9018_s3 + $0xf8] sm:$0xff]  ;;  %v5155_v47 = vld [vmem:[%s9018_s3 + $0xf0] sm:$0xff] }
 0x7c5   :  { %3404 = vmatpush.bf16.msra.mxu3 %v5156_v16 }
 0x7c9   :  { %3405 = vmatpush.bf16.msra.mxu3 %v5155_v47 }
 0x7ca   :  { %5744 = vrot.lane.b32.xlu2 %v5743_v49, %s5957_s2  ;;  %v5153_v49 = vld [vmem:[%s9018_s3 + $0xe0] sm:$0xff] }
 0x7cc   :  { %5734 = vrot.lane.b32.xlu0 %v5733_v5, %s5959_s12  ;;  %v3033_v5 = vsel %vm1061_vm8, %v7733_v4, %v5686_v26 }
 0x7cd   :  { %3406 = vmatpush.bf16.msra.mxu3 %v5154_v29 }
 0x7d1   :  { %3407 = vmatpush.bf16.msra.mxu3 %v5153_v49 }
 0x7d2   :  { %2911 = vrot.lane.b32.xlu2 %v2879_v35, %s5957_s2 }
 0x7d5   :  { %3408 = vmatpush.bf16.msra.mxu3 %v5152_v9 }
 0x7d9   :  { %3409 = vmatpush.bf16.msra.mxu3 %v5151_v60 }
 0x80c   :  { %v5700_v12 = vpop.permute.xlu2 %5699 }
 0x80d   :  { %v5702_v58 = vunpack.i.h.bf16 %v5700_v12  ;;  %v5701_v18 = vunpack.i.l.bf16 %v5700_v12 }
 0x80f   :  { %v3050_v21 = vsel %vm1079_vm9, %v3034_v24, %v5702_v58 }
 0x810   :  { %v5748_v52 = vpack.i.bf16 %v3050_v21, %v2969_v53 }
 0x812   :  { %5749 = vrot.lane.b32.xlu0 %v5748_v52, %s5958_s20 }
 0x814   :  { %v5705_v4 = vpop.permute.xlu2 %5704 }
 0x815   :  { %v5707_v28 = vunpack.i.h.bf16 %v5705_v4  ;;  %v5706_v23 = vunpack.i.l.bf16 %v5705_v4 }
 0x817   :  { %v3036_v37 = vsel %vm1061_vm8, %v7778_v17, %v5707_v28  ;;  %v3035_v53 = vsel %vm1061_vm8, %v7773_v20, %v5706_v23 }
 0x81a   :  { %5759 = vrot.lane.b32.xlu0 %v5758_v50, %s5958_s20 }
 0x822   :  { %2913 = vrot.lane.b32.xlu0 %v2882_v14, %s5957_s2 }
 0x826   :  { %v5690_v50 = vpop.permute.xlu0 %5689  ;;  %v5695_v7 = vpop.permute.xlu1 %5694 }
 0x827   :  { %v5692_v15 = vunpack.i.h.bf16 %v5690_v50  ;;  %v5691_v59 = vunpack.i.l.bf16 %v5690_v50  ;;  %v5697_v41 = vunpack.i.h.bf16 %v5695_v7  ;;  %v5696_v0 = vunpack.i.l.bf16 %v5695_v7 }
 0x828   :  { %v2978_v50 = vsel %vm287_vm2, %v2976_v42, %v2977_v32 }
 0x829   :  { %v3199_v38 = vpack.c.bf16 %v5701_v18, %v5692_v15  ;;  %v3182_v35 = vsel %vm1079_vm9, %v5697_v41, %v5701_v18  ;;  %v3181_v27 = vsel %vm1079_vm9, %v5696_v0, %v5692_v15  ;;  %v8025_v25 = vsel %vm1079_vm9, %v3033_v5, %v5691_v59 }
 0x82a   :  { %v3198_v40 = vpack.c.bf16 %v3182_v35, %v3181_v27  ;;  %v5738_v19 = vpack.i.bf16 %v2966_v62, %v8025_v25  ;;  %v3165_v16 = vsel %vm1207_vm10, %v6732_v55, %v5696_v0  ;;  %v3166_v8 = vsel %vm1207_vm10, %v7884_v57, %v5697_v41  ;;  %v5730_v57 = vpop.permute.xlu2 %5729 }
 0x82b   :  { %4972 = vmatmul.msk.bf16.vlgmr.msrb.gmra.mxu0 %vm1061_vm8, %v3199_v38  ;;  %v3197_v47 = vpack.c.bf16 %v3166_v8, %v3165_v16  ;;  %v5753_v48 = vpack.i.bf16 %v3050_v21, %v8025_v25  ;;  %v5731_v21 = vunpack.i.l.bf16 %v5730_v57  ;;  %v5732_v7 = vunpack.i.h.bf16 %v5730_v57 }
 0x82c   :  { %5739 = vrot.lane.b32.xlu1 %v5738_v19, %s5958_s20  ;;  %3410 = vmatmul.bf16.vlgmr.msra.gmra.mxu3 %v3198_v40 }
 0x82d   :  { %3361 = vmatmul.bf16.vlgmr.msrb.gmra.mxu2 %v3197_v47 }
 0x82e   :  { %v5710_v36 = vpop.permute.xlu0 %5709  ;;  %v5720_v29 = vpop.permute.xlu1 %5719 }
 0x82f   :  { %v5711_v49 = vunpack.i.l.bf16 %v5710_v36  ;;  %v5721_v6 = vunpack.i.l.bf16 %v5720_v29  ;;  %v5712_v9 = vunpack.i.h.bf16 %v5710_v36  ;;  %v5722_v39 = vunpack.i.h.bf16 %v5720_v29 }
 0x831   :  { %v3183_v11 = vsel %vm1079_vm9, %v5711_v49, %v5721_v6  ;;  %v3184_v24 = vsel %vm1079_vm9, %v5712_v9, %v5722_v39  ;;  %v3167_v52 = vsel %vm1207_vm10, %v7881_v34, %v5711_v49  ;;  %v3168_v2 = vsel %vm1207_vm10, %v7872_v22, %v5712_v9 }
 0x832   :  { %v3202_v17 = vpack.c.bf16 %v5722_v39, %v5721_v6  ;;  %v3201_v14 = vpack.c.bf16 %v3184_v24, %v3183_v11  ;;  %v3200_v22 = vpack.c.bf16 %v3168_v2, %v3167_v52  ;;  %v5745_v38 = vpop.permute.xlu2 %5744 }
 0x833   :  { %v5747_v56 = vunpack.i.h.bf16 %v5745_v38  ;;  %v5746_v35 = vunpack.i.l.bf16 %v5745_v38 }
 0x834   :  { %5754 = vrot.lane.b32.xlu1 %v5753_v48, %s5959_s12 }
 0x835   :  { %v3040_v16 = vsel %vm1061_vm8, %v7833_v10, %v5747_v56  ;;  %v3039_v8 = vsel %vm1061_vm8, %v7827_v46, %v5746_v35 }
 0x836   :  { %v5715_v1 = vpop.permute.xlu0 %5714  ;;  %v5725_v60 = vpop.permute.xlu1 %5724 }
 0x837   :  { %v5716_v45 = vunpack.i.l.bf16 %v5715_v1  ;;  %v5727_v12 = vunpack.i.h.bf16 %v5725_v60  ;;  %v5726_v58 = vunpack.i.l.bf16 %v5725_v60  ;;  %v5717_v47 = vunpack.i.h.bf16 %v5715_v1 }
 0x839   :  { %v3037_v43 = vsel %vm1061_vm8, %v7793_v51, %v5716_v45  ;;  %v8049_v3 = vsel %vm1079_vm9, %v3036_v37, %v5727_v12  ;;  %v8052_v13 = vsel %vm1079_vm9, %v3035_v53, %v5726_v58  ;;  %v3038_v10 = vsel %vm1061_vm8, %v7796_v54, %v5717_v47 }
 0x83a   :  { %v8055_v20 = vsel %vm1079_vm9, %v3037_v43, %v5731_v21  ;;  %v5763_v34 = vpack.i.bf16 %v8049_v3, %v8052_v13  ;;  %v2912_v23 = vpop.permute.xlu2 %2911 }
 0x83b   :  { %4973 = vmatmul.msk.bf16.gmra.mxu0 %vm1061_vm8, %v3202_v17  ;;  %v5768_v26 = vpack.i.bf16 %v8055_v20, %v8049_v3  ;;  %v3041_v54 = vsel %vm1061_vm8, %v7840_v33, %v2912_v23 }
 0x83c   :  { %3415 = vmatmul.bf16.gmra.mxu3 %v3201_v14  ;;  %5764 = vrot.lane.b32.xlu1 %v5763_v34, %s5959_s12 }
 0x83d   :  { %3366 = vmatmul.bf16.gmra.mxu2 %v3200_v22  ;;  %5769 = vrot.lane.b32.xlu2 %v5768_v26, %s5958_s20 }
 0x83e   :  { %v5735_v51 = vpop.permute.xlu0 %5734 }
 0x83f   :  { %v5736_v18 = vunpack.i.l.bf16 %v5735_v51  ;;  %v5737_v15 = vunpack.i.h.bf16 %v5735_v51 }
 0x841   :  { %v3185_v59 = vsel %vm1079_vm9, %v5736_v18, %v5732_v7  ;;  %v3169_v41 = vsel %vm1207_vm10, %v7903_v61, %v5736_v18  ;;  %v3170_v0 = vsel %vm1207_vm10, %v7906_v63, %v5737_v15 }
 0x842   :  { %v3203_v5 = vpack.c.bf16 %v3170_v0, %v3169_v41 }
 0x844   :  { %3009 = vrot.lane.b32.xlu1 %v2978_v50, %s5958_s20 }
 0x84d   :  { %3371 = vmatmul.bf16.gmra.mxu2 %v3203_v5 }
 0x884   :  { %v5750_v62 = vpop.permute.xlu0 %5749 }
 0x885   :  { %v5751_v27 = vunpack.i.l.bf16 %v5750_v62  ;;  %v5752_v33 = vunpack.i.h.bf16 %v5750_v62 }
 0x887   :  { %v8078_v61 = vsel %vm1079_vm9, %v3039_v8, %v5751_v27  ;;  %v3208_v43 = vpack.c.bf16 %v6814_v44, %v5752_v33 }
 0x88c   :  { %v5760_v40 = vpop.permute.xlu0 %5759 }
 0x88d   :  { %v5761_v19 = vunpack.i.l.bf16 %v5760_v40  ;;  %v5762_v57 = vunpack.i.h.bf16 %v5760_v40 }
 0x88f   :  { %v8081_v63 = vsel %vm1079_vm9, %v3040_v16, %v5761_v19  ;;  %v8102_v11 = vsel %vm1079_vm9, %v3041_v54, %v5762_v57 }
 0x890   :  { %v5783_v4 = vpack.i.bf16 %v8081_v63, %v8078_v61  ;;  %v5788_v58 = vpack.i.bf16 %v8102_v11, %v8081_v63 }
 0x892   :  { %5784 = vrot.lane.b32.xlu1 %v5783_v4, %s5959_s12 }
 0x894   :  { %v2914_v14 = vpop.permute.xlu0 %2913 }
 0x895   :  { %v3042_v42 = vsel %vm1061_vm8, %v8008_v31, %v2914_v14 }
 0x897   :  { %v5770_v31 = vpop.permute.xlu2 %5769 }
 0x898   :  { %v5772_v62 = vunpack.i.h.bf16 %v5770_v31  ;;  %v5771_v38 = vunpack.i.l.bf16 %v5770_v31 }
 0x89a   :  { %v3211_v40 = vpack.c.bf16 %v5772_v62, %v5771_v38 }
 0x89e   :  { %v5740_v36 = vpop.permute.xlu1 %5739 }
 0x89f   :  { %v5742_v29 = vunpack.i.h.bf16 %v5740_v36  ;;  %v5741_v28 = vunpack.i.l.bf16 %v5740_v36 }
 0x8a1   :  { %v3205_v49 = vpack.c.bf16 %v5741_v28, %v5732_v7  ;;  %v8089_v46 = vsel %vm1079_vm9, %v3038_v10, %v5742_v29  ;;  %v3186_v6 = vsel %vm1079_vm9, %v5737_v15, %v5741_v28 }
 0x8a2   :  { %v5778_v48 = vpack.i.bf16 %v8078_v61, %v8089_v46  ;;  %v5773_v9 = vpack.i.bf16 %v8089_v46, %v8055_v20  ;;  %v3204_v39 = vpack.c.bf16 %v3186_v6, %v3185_v59 }
 0x8a3   :  { %4974 = vmatmul.msk.bf16.gmra.mxu0 %vm1061_vm8, %v3205_v49 }
 0x8a4   :  { %5779 = vrot.lane.b32.xlu0 %v5778_v48, %s5958_s20  ;;  %5774 = vrot.lane.b32.xlu2 %v5773_v9, %s5959_s12 }
 0x8a5   :  { %3420 = vmatmul.bf16.gmra.mxu3 %v3204_v39 }
 0x8a6   :  { %v5755_v37 = vpop.permute.xlu1 %5754 }
 0x8a7   :  { %v5757_v1 = vunpack.i.h.bf16 %v5755_v37  ;;  %v5756_v60 = vunpack.i.l.bf16 %v5755_v37 }
 0x8a8   :  { %v3460_v53 = vpop.f32.mrf.mxu0 }
 0x8a9   :  { %v3171_v45 = vsel %vm1207_vm10, %v7923_v30, %v5756_v60  ;;  %v3172_v12 = vsel %vm1207_vm10, %v8025_v25, %v5757_v1  ;;  %v3187_v17 = vsel %vm1079_vm9, %v5756_v60, %v5752_v33  ;;  %v3188_v30 = vsel %vm1079_vm9, %v5757_v1, %v6814_v44 }
 0x8aa   :  { %v3206_v24 = vpack.c.bf16 %v3172_v12, %v3171_v45  ;;  %v3207_v51 = vpack.c.bf16 %v3188_v30, %v3187_v17 }
 0x8ac   :  { %5789 = vrot.lane.b32.xlu2 %v5788_v58, %s5958_s20  ;;  %3376 = vmatmul.bf16.gmra.mxu2 %v3206_v24 }
 0x8ae   :  { %v5765_v21 = vpop.permute.xlu1 %5764 }
 0x8af   :  { %v3411_v52 = vpop.f32.mrf.mxu3  ;;  %v5767_v34 = vunpack.i.h.bf16 %v5765_v21  ;;  %v5766_v22 = vunpack.i.l.bf16 %v5765_v21 }
 0x8b0   :  { %v3362_v2 = vpop.f32.mrf.mxu2  ;;  %v8127_v59 = vpop.f32.mrf.mxu0 }
 0x8b1   :  { %v3412_v25 = vadd.f32 %v3411_v52, %v3362_v2  ;;  %v3173_v7 = vsel %vm1207_vm10, %v6732_v55, %v5766_v22  ;;  %v3174_v15 = vsel %vm1207_vm10, %v8052_v13, %v5767_v34  ;;  %v3189_v27 = vsel %vm1079_vm9, %v5766_v22, %v5771_v38 }
 0x8b2   :  { %v3209_v5 = vpack.c.bf16 %v3174_v15, %v3173_v7  ;;  %v3190_v13 = vsel %vm1079_vm9, %v5767_v34, %v5772_v62 }
 0x8b3   :  { %v8115_v26 = vadd.f32 %v3460_v53, %v3412_v25  ;;  %4975 = vmatmul.msk.bf16.gmra.mxu0 %vm1061_vm8, %v3208_v43  ;;  %v3210_v4 = vpack.c.bf16 %v3190_v13, %v3189_v27 }
 0x8b5   :  { %3425 = vmatmul.bf16.gmra.mxu3 %v3207_v51 }
 0x8b6   :  { %v3010_v32 = vpop.permute.xlu1 %3009 }
 0x8b7   :  { %v8120_v18 = vpop.f32.mrf.mxu3  ;;  %v3058_v50 = vsel %vm1079_vm9, %v3042_v42, %v3010_v32 }
 0x8b8   :  { %v8129_v41 = vpop.f32.mrf.mxu2  ;;  %3149 = vrot.lane.b32.xlu1 %v3058_v50, %s5958_s20  ;;  %v5793_v0 = vpack.i.bf16 %v3058_v50, %v8102_v11  ;;  %v3465_v16 = vpop.f32.mrf.mxu0 }
 0x8ba   :  { %5794 = vrot.lane.b32.xlu0 %v5793_v0, %s5959_s12 }
 0x8bc   :  { %3381 = vmatmul.bf16.gmra.mxu2 %v3209_v5 }
 0x8bf   :  { %v3416_v56 = vpop.f32.mrf.mxu3 }
 0x8c0   :  { %v3367_v35 = vpop.f32.mrf.mxu2  ;;  %v3467_v24 = vpop.f32.mrf.mxu0 }
 0x8c1   :  { %v3417_v19 = vadd.f32 %v3416_v56, %v3367_v35 }
 0x8c3   :  { %v8136_v8 = vadd.f32 %v3465_v16, %v3417_v19  ;;  %4976 = vmatmul.msk.bf16.gmra.mxu0 %vm1061_vm8, %v3211_v40 }
 0x8c5   :  { %3430 = vmatmul.bf16.gmra.mxu3 %v3210_v4 }
 0x8c7   :  { %v3418_v58 = vpop.f32.mrf.mxu3 }
 0x8c8   :  { %v3369_v12 = vpop.f32.mrf.mxu2 }
 0x8d0   :  { %v3372_v52 = vpop.f32.mrf.mxu2 }
 0x8d8   :  { %v3374_v38 = vpop.f32.mrf.mxu2 }
 0x8fe   :  { %v5775_v47 = vpop.permute.xlu2 %5774 }
 0x8ff   :  { %v5777_v36 = vunpack.i.h.bf16 %v5775_v47  ;;  %v5776_v29 = vunpack.i.l.bf16 %v5775_v47 }
 0x901   :  { %v3175_v28 = vsel %vm1207_vm10, %v8049_v3, %v5776_v29  ;;  %v3176_v10 = vsel %vm1207_vm10, %v8055_v20, %v5777_v36 }
 0x902   :  { %v3212_v49 = vpack.c.bf16 %v3176_v10, %v3175_v28 }
 0x904   :  { %3386 = vmatmul.bf16.gmra.mxu2 %v3212_v49  ;;  %v5785_v6 = vpop.permute.xlu1 %5784 }
 0x905   :  { %v5787_v48 = vunpack.i.h.bf16 %v5785_v6  ;;  %v5786_v9 = vunpack.i.l.bf16 %v5785_v6 }
 0x907   :  { %v3177_v39 = vsel %vm1207_vm10, %v8089_v46, %v5786_v9  ;;  %v3178_v23 = vsel %vm1207_vm10, %v8078_v61, %v5787_v48  ;;  %v5790_v46 = vpop.permute.xlu2 %5789 }
 0x908   :  { %v3215_v57 = vpack.c.bf16 %v3178_v23, %v3177_v39  ;;  %v5792_v33 = vunpack.i.h.bf16 %v5790_v46  ;;  %v5791_v61 = vunpack.i.l.bf16 %v5790_v46  ;;  %v3507_v46 = vsel %vm1061_vm8, %v8136_v8, 0.0 }
 0x90a   :  { %v3193_v53 = vsel %vm1079_vm9, %v5786_v9, %v5791_v61  ;;  %v3194_v21 = vsel %vm1079_vm9, %v5787_v48, %v5792_v33  ;;  %v3217_v17 = vpack.c.bf16 %v5792_v33, %v5791_v61  ;;  %v3414_v9 = vadd.f32 %v8120_v18, %v8129_v41 }
 0x90b   :  { %v3216_v25 = vpack.c.bf16 %v3194_v21, %v3193_v53  ;;  %v3504_v41 = vsel %vm1061_vm8, %v8115_v26, 0.0 }
 0x90c   :  { %v8169_v39 = vadd.f32 %v8127_v59, %v3414_v9  ;;  %v3543_v59 = vmul.f32 %v8136_v8, %v8136_v8 }
 0x90e   :  { %v3505_v18 = vsel %vm1061_vm8, %v8169_v39, 0.0 }
 0x90f   :  { %v3506_v21 = vadd.f32 %v3505_v18, %v3504_v41 }
 0x914   :  { %3391 = vmatmul.bf16.gmra.mxu2 %v3215_v57  ;;  %v3419_v57 = vadd.f32 %v3418_v58, %v3369_v12 }
 0x916   :  { %v5780_v54 = vpop.permute.xlu0 %5779 }
 0x917   :  { %v5782_v37 = vunpack.i.h.bf16 %v5780_v54  ;;  %v5781_v1 = vunpack.i.l.bf16 %v5780_v54  ;;  %v3542_v54 = vmul.f32 %v8169_v39, %v8169_v39 }
 0x919   :  { %v3214_v3 = vpack.c.bf16 %v5782_v37, %v5781_v1  ;;  %v3191_v60 = vsel %vm1079_vm9, %v5776_v29, %v5781_v1  ;;  %v3192_v20 = vsel %vm1079_vm9, %v5777_v36, %v5782_v37  ;;  %v3558_v12 = vsel %vm1061_vm8, %v3542_v54, 0.0 }
 0x91a   :  { %v3213_v45 = vpack.c.bf16 %v3192_v20, %v3191_v60  ;;  %v3541_v20 = vmul.f32 %v8115_v26, %v8115_v26 }
 0x91b   :  { %4977 = vmatmul.msk.bf16.gmra.mxu0 %vm1061_vm8, %v3214_v3  ;;  %v8175_v3 = vadd.f32 %v3467_v24, %v3419_v57 }
 0x91c   :  { %3435 = vmatmul.bf16.gmra.mxu3 %v3213_v45  ;;  %v3557_v53 = vsel %vm1061_vm8, %v3541_v20, 0.0 }
 0x91d   :  { %v3544_v24 = vmul.f32 %v8175_v3, %v8175_v3 }
 0x920   :  { %v3470_v43 = vpop.f32.mrf.mxu0 }
 0x928   :  { %v3421_v2 = vpop.f32.mrf.mxu3  ;;  %v3472_v62 = vpop.f32.mrf.mxu0 }
 0x929   :  { %v3422_v30 = vadd.f32 %v3421_v2, %v3372_v52  ;;  %v3560_v2 = vsel %vm1061_vm8, %v3543_v59, 0.0 }
 0x92a   :  { %v3150_v7 = vpop.permute.xlu1 %3149 }
 0x92b   :  { %v8152_v14 = vadd.f32 %v3470_v43, %v3422_v30  ;;  %4978 = vmatmul.msk.bf16.gmra.mxu0 %vm1061_vm8, %v3217_v17  ;;  %v3220_v31 = vpack.c.bf16 %v6814_v44, %v3150_v7  ;;  %v3509_v17 = vsel %vm1061_vm8, %v8175_v3, 0.0 }
 0x92c   :  { %3440 = vmatmul.bf16.gmra.mxu3 %v3216_v25  ;;  %v5795_v34 = vpop.permute.xlu0 %5794  ;;  %v3559_v25 = vadd.f32 %v3558_v12, %v3557_v53 }
 0x92d   :  { %v5797_v22 = vunpack.i.h.bf16 %v5795_v34  ;;  %v5796_v51 = vunpack.i.l.bf16 %v5795_v34  ;;  %v3545_v30 = vmul.f32 %v8152_v14, %v8152_v14  ;;  %v3508_v34 = vadd.f32 %v3507_v46, %v3506_v21 }
 0x92f   :  { %v3179_v42 = vsel %vm1207_vm10, %v8081_v63, %v5796_v51  ;;  %v3180_v32 = vsel %vm1207_vm10, %v8102_v11, %v5797_v22  ;;  %v3195_v15 = vsel %vm1079_vm9, %v5796_v51, %v3150_v7  ;;  %v3196_v0 = vsel %vm1079_vm9, %v5797_v22, %v6814_v44  ;;  %v3377_v56 = vpop.f32.mrf.mxu2 }
 0x930   :  { %v3218_v50 = vpack.c.bf16 %v3180_v32, %v3179_v42  ;;  %v3219_v5 = vpack.c.bf16 %v3196_v0, %v3195_v15  ;;  %v3423_v63 = vpop.f32.mrf.mxu3  ;;  %v3475_v35 = vpop.f32.mrf.mxu0  ;;  %v3562_v51 = vsel %vm1061_vm8, %v3544_v24, 0.0  ;;  %v3511_v42 = vsel %vm1061_vm8, %v8152_v14, 0.0 }
 0x931   :  { %v3424_v60 = vadd.f32 %v3423_v63, %v3374_v38  ;;  %v3561_v7 = vadd.f32 %v3560_v2, %v3559_v25  ;;  %v3510_v15 = vadd.f32 %v3509_v17, %v3508_v34 }
 0x932   :  { %3396 = vmatmul.bf16.gmra.mxu2 %v3218_v50 }
 0x933   :  { %v8190_v33 = vadd.f32 %v3472_v62, %v3424_v60  ;;  %v3564_v62 = vsel %vm1061_vm8, %v3545_v30, 0.0 }
 0x935   :  { %v3546_v32 = vmul.f32 %v8190_v33, %v8190_v33  ;;  %v3513_v38 = vsel %vm1061_vm8, %v8190_v33, 0.0 }
 0x937   :  { %v3379_v27 = vpop.f32.mrf.mxu2 }
 0x938   :  { %v3426_v11 = vpop.f32.mrf.mxu3  ;;  %v3477_v13 = vpop.f32.mrf.mxu0 }
 0x939   :  { %v3427_v45 = vadd.f32 %v3426_v11, %v3377_v56  ;;  %v3512_v11 = vadd.f32 %v3511_v42, %v3510_v15 }
 0x93b   :  { %4979 = vmatmul.msk.bf16.gmra.mxu0 %vm1061_vm8, %v3220_v31  ;;  %v8193_v52 = vadd.f32 %v3475_v35, %v3427_v45  ;;  %v3563_v35 = vadd.f32 %v3562_v51, %v3561_v7  ;;  %v3514_v9 = vadd.f32 %v3513_v38, %v3512_v11 }
 0x93c   :  { %3445 = vmatmul.bf16.gmra.mxu3 %v3219_v5 }
 0x93d   :  { %v3547_v0 = vmul.f32 %v8193_v52, %v8193_v52 }
 0x93f   :  { %v3382_v19 = vpop.f32.mrf.mxu2 }
 0x940   :  { %v3428_v40 = vpop.f32.mrf.mxu3  ;;  %v3480_v16 = vpop.f32.mrf.mxu0 }
 0x941   :  { %v3429_v61 = vadd.f32 %v3428_v40, %v3379_v27  ;;  %v3566_v40 = vsel %vm1061_vm8, %v3546_v32, 0.0 }
 0x943   :  { %v8205_v50 = vadd.f32 %v3477_v13, %v3429_v61 }
 0x947   :  { %v3384_v47 = vpop.f32.mrf.mxu2 }
 0x948   :  { %v3431_v4 = vpop.f32.mrf.mxu3  ;;  %v3482_v36 = vpop.f32.mrf.mxu0 }
 0x949   :  { %v3432_v43 = vadd.f32 %v3431_v4, %v3382_v19  ;;  %v3515_v19 = vsel %vm1061_vm8, %v8193_v52, 0.0  ;;  %v3548_v4 = vmul.f32 %v8205_v50, %v8205_v50 }
 0x94a   :  { %v3516_v60 = vadd.f32 %v3515_v19, %v3514_v9 }
 0x94b   :  { %v8212_v63 = vadd.f32 %v3480_v16, %v3432_v43  ;;  %v3568_v16 = vsel %vm1061_vm8, %v3547_v0, 0.0 }
 0x950   :  { %v3433_v29 = vpop.f32.mrf.mxu3 }
 0x951   :  { %v3434_v22 = vadd.f32 %v3433_v29, %v3384_v47  ;;  %v3565_v29 = vadd.f32 %v3564_v62, %v3563_v35 }
 0x953   :  { %v8214_v27 = vadd.f32 %v3482_v36, %v3434_v22  ;;  %v3549_v36 = vmul.f32 %v8212_v63, %v8212_v63  ;;  %v3567_v54 = vadd.f32 %v3566_v40, %v3565_v29 }
 0x955   :  { %v3550_v20 = vmul.f32 %v8214_v27, %v8214_v27  ;;  %v3569_v59 = vadd.f32 %v3568_v16, %v3567_v54 }
 0x987   :  { %v3387_v28 = vpop.f32.mrf.mxu2 }
 0x98f   :  { %v3389_v6 = vpop.f32.mrf.mxu2 }
 0x997   :  { %v3392_v37 = vpop.f32.mrf.mxu2 }
 0x998   :  { %v3485_v10 = vpop.f32.mrf.mxu0 }
 0x99f   :  { %v3436_v49 = vpop.f32.mrf.mxu3  ;;  %v3394_v31 = vpop.f32.mrf.mxu2 }
 0x9a0   :  { %v8164_v48 = vpop.f32.mrf.mxu0  ;;  %v3437_v56 = vadd.f32 %v3436_v49, %v3387_v28  ;;  %v3517_v28 = vsel %vm1061_vm8, %v8205_v50, 0.0 }
 0x9a1   :  { %v3518_v41 = vadd.f32 %v3517_v28, %v3516_v60 }
 0x9a2   :  { %v8226_v49 = vadd.f32 %v3485_v10, %v3437_v56  ;;  %v3572_v10 = vsel %vm1061_vm8, %v3549_v36, 0.0 }
 0x9a4   :  { %v3523_v2 = vsel %vm1061_vm8, %v8226_v49, 0.0 }
 0x9a7   :  { %v3438_v23 = vpop.f32.mrf.mxu3 }
 0x9a8   :  { %v8173_v1 = vpop.f32.mrf.mxu0  ;;  %v3439_v47 = vadd.f32 %v3438_v23, %v3389_v6  ;;  %v3570_v6 = vsel %vm1061_vm8, %v3548_v4, 0.0  ;;  %v3519_v23 = vsel %vm1061_vm8, %v8212_v63, 0.0 }
 0x9a9   :  { %v3571_v24 = vadd.f32 %v3570_v6, %v3569_v59  ;;  %v3520_v61 = vadd.f32 %v3519_v23, %v3518_v41 }
 0x9aa   :  { %v8234_v45 = vadd.f32 %v8164_v48, %v3439_v47  ;;  %v3574_v48 = vsel %vm1061_vm8, %v3550_v20, 0.0 }
 0x9ab   :  { %v3573_v25 = vadd.f32 %v3572_v10, %v3571_v24 }
 0x9ac   :  { %v3552_v17 = vmul.f32 %v8234_v45, %v8234_v45  ;;  %v3525_v22 = vsel %vm1061_vm8, %v8234_v45, 0.0 }
 0x9ad   :  { %v3575_v32 = vadd.f32 %v3574_v48, %v3573_v25 }
 0x9ae   :  { %v3578_v15 = vsel %vm1061_vm8, %v3552_v17, 0.0 }
 0x9af   :  { %v3441_v58 = vpop.f32.mrf.mxu3 }
 0x9b0   :  { %v3492_v5 = vpop.f32.mrf.mxu0  ;;  %v3442_v57 = vadd.f32 %v3441_v58, %v3392_v37  ;;  %v3521_v37 = vsel %vm1061_vm8, %v8214_v27, 0.0  ;;  %v3551_v58 = vmul.f32 %v8226_v49, %v8226_v49 }
 0x9b1   :  { %v3522_v34 = vadd.f32 %v3521_v37, %v3520_v61 }
 0x9b2   :  { %v8242_v46 = vadd.f32 %v8173_v1, %v3442_v57  ;;  %v3576_v1 = vsel %vm1061_vm8, %v3551_v58, 0.0 }
 0x9b3   :  { %v3524_v7 = vadd.f32 %v3523_v2, %v3522_v34 }
 0x9b4   :  { %v3553_v51 = vmul.f32 %v8242_v46, %v8242_v46  ;;  %v3527_v0 = vsel %vm1061_vm8, %v8242_v46, 0.0 }
 0x9b5   :  { %v3397_v12 = vpop.f32.mrf.mxu2  ;;  %v3526_v62 = vadd.f32 %v3525_v22, %v3524_v7 }
 0x9b6   :  { %v3580_v38 = vsel %vm1061_vm8, %v3553_v51, 0.0 }
 0x9b7   :  { %v3443_v13 = vpop.f32.mrf.mxu3 }
 0x9b8   :  { %v3444_v18 = vadd.f32 %v3443_v13, %v3394_v31  ;;  %v3495_v53 = vpop.f32.mrf.mxu0  ;;  %v3528_v13 = vadd.f32 %v3527_v0, %v3526_v62  ;;  %v4980_v62 = vld [vmem:[%s9019_s4 + $0x1] sm:$0x1] }
 0x9ba   :  { %v8249_v30 = vadd.f32 %v3492_v5, %v3444_v18  ;;  %v3577_v5 = vadd.f32 %v3576_v1, %v3575_v32 }
 0x9bc   :  { %v3554_v31 = vmul.f32 %v8249_v30, %v8249_v30  ;;  %v3529_v56 = vsel %vm1061_vm8, %v8249_v30, 0.0  ;;  %v3579_v11 = vadd.f32 %v3578_v15, %v3577_v5 }
 0x9bd   :  { %v3399_v40 = vpop.f32.mrf.mxu2  ;;  %v3530_v16 = vadd.f32 %v3529_v56, %v3528_v13 }
 0x9be   :  { %v3582_v4 = vsel %vm1061_vm8, %v3554_v31, 0.0  ;;  %v3581_v9 = vadd.f32 %v3580_v38, %v3579_v11  ;;  %v4981_v11 = vld [vmem:[%s9020_s5 + $0x1] sm:$0x1] }
 0x9bf   :  { %v3446_v21 = vpop.f32.mrf.mxu3 }
 0x9c0   :  { %v3447_v43 = vadd.f32 %v3446_v21, %v3397_v12  ;;  %v3497_v28 = vpop.f32.mrf.mxu0  ;;  %v3583_v54 = vadd.f32 %v3582_v4, %v3581_v9 }
 0x9c2   :  { %v8256_v42 = vadd.f32 %v3495_v53, %v3447_v43 }
 0x9c4   :  { %v3555_v35 = vmul.f32 %v8256_v42, %v8256_v42  ;;  %v3531_v47 = vsel %vm1061_vm8, %v8256_v42, 0.0 }
 0x9c5   :  { %v3532_v60 = vadd.f32 %v3531_v47, %v3530_v16 }
 0x9c6   :  { %v3584_v36 = vsel %vm1061_vm8, %v3555_v35, 0.0 }
 0x9c7   :  { %v3448_v19 = vpop.f32.mrf.mxu3  ;;  %v3585_v23 = vadd.f32 %v3584_v36, %v3583_v54 }
 0x9c8   :  { %v3449_v29 = vadd.f32 %v3448_v19, %v3399_v40 }
 0x9ca   :  { %v3498_v57 = vadd.f32 %v3497_v28, %v3449_v29 }
 0x9cc   :  { %v3533_v20 = vsel %vm1061_vm8, %v3498_v57, 0.0  ;;  %v3556_v6 = vmul.f32 %v3498_v57, %v3498_v57 }
 0x9cd   :  { %v3534_v18 = vadd.f32 %v3533_v20, %v3532_v60 }
 0x9ce   :  { %v3586_v59 = vsel %vm1061_vm8, %v3556_v6, 0.0 }
 0x9cf   :  { %v3535_v41 = vrot.slane %v3534_v18, 4  ;;  %v3587_v12 = vadd.f32 %v3586_v59, %v3585_v23 }
 0x9d1   :  { %v3536_v10 = vadd.f32 %v3535_v41, %v3534_v18  ;;  %v3588_v37 = vrot.slane %v3587_v12, 4 }
 0x9d3   :  { %v3537_v58 = vrot.slane %v3536_v10, 2  ;;  %v3589_v24 = vadd.f32 %v3588_v37, %v3587_v12 }
 0x9d5   :  { %v3538_v61 = vadd.f32 %v3537_v58, %v3536_v10  ;;  %v3590_v48 = vrot.slane %v3589_v24, 2 }
 0x9d7   :  { %v3539_v53 = vrot.slane %v3538_v61, 1  ;;  %v3591_v21 = vadd.f32 %v3590_v48, %v3589_v24 }
 0x9d9   :  { %v3540_v2 = vadd.f32 %v3539_v53, %v3538_v61  ;;  %v3592_v17 = vrot.slane %v3591_v21, 1 }
 0x9db   :  { %v3593_v43 = vadd.f32 %v3592_v17, %v3591_v21  ;;  %v3594_v25 = vmul.f32 0.0078125, %v3540_v2 }
 0x9dd   :  { %v3595_v34 = vmul.f32 0.0078125, %v3593_v43  ;;  %v3596_v1 = vmul.f32 %v3594_v25, %v3594_v25 }
 0x9df   :  { %v3597_v22 = vsub.f32 %v3595_v34, %v3596_v1 }
 0x9e1   :  { %v3598_v51 = vmax.f32 %v3597_v22, 0.0 }
 0x9e3   :  { %v3599_v32 = vadd.f32 1e-05, %v3598_v51 }
 0x9e5   :  { %5948 = vrsqrt.f32 %v3599_v32  ;;  %vm3606_vm5 = vweird.f32 %v3599_v32 }
 0x9eb   :  { %v5949_v7 = vpop.eup %5948 }
 0x9ec   :  { %v3601_v15 = vmul.f32 %v5949_v7, %v3599_v32  ;;  %vm3607_vm4 = vweird.f32 %v5949_v7 }
 0x9ed   :  { %vm3608_vm6 = vmor %vm3606_vm5, %vm3607_vm4 }
 0x9ee   :  { %v3602_v0 = vmul.f32 %v5949_v7, %v3601_v15 }
 0x9f0   :  { %v3603_v31 = vmul.f32 0.5, %v3602_v0 }
 0x9f2   :  { %v3604_v5 = vsub.f32 1.5, %v3603_v31 }
 0x9f4   :  { %v3605_v38 = vmul.f32 %v5949_v7, %v3604_v5 }
 0x9f6   :  { %v3609_v56 = vsel %vm3608_vm6, %v5949_v7, %v3605_v38 }
 0x9f7   :  { %v3610_v35 = vmul.f32 %v4980_v62, %v3609_v56 }
 0x9f9   :  { %v3611_v13 = vmul.f32 %v3610_v35, %v3594_v25  ;;  %v8280_v40 = vperm.slane %v3610_v35, 0 }
 0x9fb   :  { %v3612_v19 = vsub.f32 %v4981_v11, %v3611_v13  ;;  %v3631_v4 = vmul.f32 %v8280_v40, %v3498_v57  ;;  %v3618_v29 = vmul.f32 %v8280_v40, %v8136_v8  ;;  %v3619_v9 = vmul.f32 %v8280_v40, %v8175_v3 }
 0x9fc   :  { %v3616_v16 = vmul.f32 %v8280_v40, %v8115_v26  ;;  %v3617_v28 = vmul.f32 %v8280_v40, %v8169_v39  ;;  %v3620_v36 = vmul.f32 %v8280_v40, %v8152_v14  ;;  %v3621_v57 = vmul.f32 %v8280_v40, %v8190_v33 }
 0x9fd   :  { %v8283_v47 = vperm.slane %v3612_v19, 0  ;;  %v3622_v54 = vmul.f32 %v8280_v40, %v8193_v52  ;;  %v3623_v18 = vmul.f32 %v8280_v40, %v8205_v50 }
 0x9ff   :  { %v8300_v8 = vadd.f32 %v8283_v47, %v3631_v4  ;;  %v3637_v3 = vadd.f32 %v8283_v47, %v3618_v29  ;;  %v3638_v60 = vadd.f32 %v8283_v47, %v3619_v9  ;;  %v3635_v26 = vadd.f32 %v8283_v47, %v3616_v16 }
 0xa00   :  { %v3636_v39 = vadd.f32 %v8283_v47, %v3617_v28  ;;  %v3639_v20 = vadd.f32 %v8283_v47, %v3620_v36  ;;  %v3640_v14 = vadd.f32 %v8283_v47, %v3621_v57  ;;  %v8309_v33 = vadd.f32 %v8283_v47, %v3622_v54 }
 0xa01   :  { %v3653_v6 = vmax.f32 %v3637_v3, 0.0  ;;  %v3654_v52 = vmax.f32 %v3638_v60, 0.0  ;;  %v3651_v23 = vmax.f32 %v3635_v26, 0.0  ;;  %v8314_v24 = vadd.f32 %v8283_v47, %v3623_v18 }
 0xa02   :  { %v3652_v59 = vmax.f32 %v3636_v39, 0.0  ;;  %v3655_v41 = vmax.f32 %v3639_v20, 0.0  ;;  %v3656_v12 = vmax.f32 %v3640_v14, 0.0  ;;  %v3657_v21 = vmax.f32 %v8309_v33, 0.0 }
 0xa03   :  { %v3722_v10 = vrot.slane %v3653_v6, 7  ;;  %v3723_v37 = vrot.slane %v3654_v52, 7  ;;  %v3720_v58 = vrot.slane %v3651_v23, 7 }
 0xa04   :  { %v3721_v61 = vrot.slane %v3652_v59, 7  ;;  %v3724_v48 = vrot.slane %v3655_v41, 7  ;;  %v3725_v53 = vrot.slane %v3656_v12, 7 }
 0xa05   :  { %v8318_v2 = vsel %vm115_vm0, 0.0, %v3722_v10  ;;  %v8321_v17 = vsel %vm115_vm0, 0.0, %v3723_v37  ;;  %v3770_v50 = vsel %vm115_vm0, %v3722_v10, 0.0  ;;  %v3771_v43 = vsel %vm115_vm0, %v3723_v37, 0.0 }
 0xa06   :  { %v3822_v25 = vrot.slane %v8318_v2, 1  ;;  %v3823_v34 = vrot.slane %v3770_v50, 1  ;;  %v3825_v1 = vrot.slane %v8321_v17, 1  ;;  %v3826_v22 = vrot.slane %v3771_v43, 1 }
 0xa07   :  { %v8328_v51 = vsel %vm115_vm0, 0.0, %v3720_v58  ;;  %v8331_v32 = vsel %vm115_vm0, 0.0, %v3721_v61  ;;  %v3768_v7 = vsel %vm115_vm0, %v3720_v58, 0.0  ;;  %v3769_v15 = vsel %vm115_vm0, %v3721_v61, 0.0 }
 0xa08   :  { %v3824_v0 = vsel %vm184_vm1, %v3822_v25, %v3823_v34  ;;  %v3827_v31 = vsel %vm184_vm1, %v3825_v1, %v3826_v22  ;;  %v3912_v5 = vrot.slane %v8328_v51, 2  ;;  %v3913_v62 = vrot.slane %v3768_v7, 2 }
 0xa09   :  { %v5803_v38 = vpack.i.bf16 %v3827_v31, %v3824_v0  ;;  %v3915_v56 = vrot.slane %v8331_v32, 2  ;;  %v3916_v35 = vrot.slane %v3769_v15, 2  ;;  %v3816_v11 = vrot.slane %v8328_v51, 1 }
 0xa0a   :  { %v3914_v13 = vsel %vm287_vm2, %v3912_v5, %v3913_v62  ;;  %v3817_v19 = vrot.slane %v3768_v7, 1  ;;  %v3819_v4 = vrot.slane %v8331_v32, 1  ;;  %v3820_v29 = vrot.slane %v3769_v15, 1 }
 0xa0b   :  { %5804 = vrot.lane.b32.xlu0 %v5803_v38, %s5957_s2  ;;  %v3917_v9 = vsel %vm287_vm2, %v3915_v56, %v3916_v35  ;;  %v8345_v16 = vsel %vm115_vm0, 0.0, %v3724_v48  ;;  %v8348_v28 = vsel %vm115_vm0, 0.0, %v3725_v53  ;;  %v3772_v36 = vsel %vm115_vm0, %v3724_v48, 0.0 }
 0xa0c   :  { %v5808_v57 = vpack.i.bf16 %v3917_v9, %v3914_v13  ;;  %v3818_v54 = vsel %vm184_vm1, %v3816_v11, %v3817_v19  ;;  %v3821_v3 = vsel %vm184_vm1, %v3819_v4, %v3820_v29  ;;  %v3773_v60 = vsel %vm115_vm0, %v3725_v53, 0.0 }
 0xa0d   :  { %v5798_v26 = vpack.i.bf16 %v3821_v3, %v3818_v54  ;;  %v3828_v39 = vrot.slane %v8345_v16, 1  ;;  %v3829_v20 = vrot.slane %v3772_v36, 1  ;;  %v3831_v14 = vrot.slane %v8348_v28, 1 }
 0xa0e   :  { %5809 = vrot.lane.b32.xlu1 %v5808_v57, %s5958_s20  ;;  %v3832_v33 = vrot.slane %v3773_v60, 1  ;;  %v3924_v6 = vrot.slane %v8345_v16, 2  ;;  %v3925_v52 = vrot.slane %v3772_v36, 2  ;;  %v3927_v23 = vrot.slane %v8348_v28, 2 }
 0xa0f   :  { %5799 = vrot.lane.b32.xlu2 %v5798_v26, %s5957_s2  ;;  %v3830_v18 = vsel %vm184_vm1, %v3828_v39, %v3829_v20  ;;  %v3928_v59 = vrot.slane %v3773_v60, 2  ;;  %v3918_v41 = vrot.slane %v8318_v2, 2  ;;  %v3919_v12 = vrot.slane %v3770_v50, 2 }
 0xa10   :  { %v3833_v10 = vsel %vm184_vm1, %v3831_v14, %v3832_v33  ;;  %v3926_v37 = vsel %vm287_vm2, %v3924_v6, %v3925_v52  ;;  %v3921_v58 = vrot.slane %v8321_v17, 2  ;;  %v3922_v61 = vrot.slane %v3771_v43, 2 }
 0xa11   :  { %v5818_v48 = vpack.i.bf16 %v3833_v10, %v3830_v18  ;;  %v3929_v53 = vsel %vm287_vm2, %v3927_v23, %v3928_v59  ;;  %v3920_v25 = vsel %vm287_vm2, %v3918_v41, %v3919_v12  ;;  %v3658_v34 = vmax.f32 %v8314_v24, 0.0 }
 0xa12   :  { %v3923_v1 = vsel %vm287_vm2, %v3921_v58, %v3922_v61  ;;  %v3726_v22 = vrot.slane %v3657_v21, 7  ;;  %v3624_v50 = vmul.f32 %v8280_v40, %v8212_v63  ;;  %v5823_v7 = vpack.i.bf16 %v3929_v53, %v3926_v37 }
 0xa13   :  { %5819 = vrot.lane.b32.xlu0 %v5818_v48, %s5957_s2  ;;  %v5813_v15 = vpack.i.bf16 %v3923_v1, %v3920_v25  ;;  %v3727_v0 = vrot.slane %v3658_v34, 7  ;;  %v3625_v24 = vmul.f32 %v8280_v40, %v8214_v27  ;;  %v3626_v27 = vmul.f32 %v8280_v40, %v8226_v49 }
 0xa14   :  { %v8373_v43 = vsel %vm115_vm0, 0.0, %v3726_v22  ;;  %v8376_v31 = vsel %vm115_vm0, %v3726_v22, 0.0  ;;  %v3643_v5 = vadd.f32 %v8283_v47, %v3624_v50  ;;  %v3627_v13 = vmul.f32 %v8280_v40, %v8234_v45 }
 0xa15   :  { %v8382_v21 = vsel %vm115_vm0, 0.0, %v3727_v0  ;;  %v8385_v63 = vsel %vm115_vm0, %v3727_v0, 0.0  ;;  %v3834_v62 = vrot.slane %v8373_v43, 1  ;;  %v3835_v38 = vrot.slane %v8376_v31, 1 }
 0xa16   :  { %5824 = vrot.lane.b32.xlu1 %v5823_v7, %s5958_s20  ;;  %v3837_v56 = vrot.slane %v8382_v21, 1  ;;  %v3838_v35 = vrot.slane %v8385_v63, 1  ;;  %v3644_v11 = vadd.f32 %v8283_v47, %v3625_v24  ;;  %v3659_v29 = vmax.f32 %v3643_v5, 0.0 }
 0xa17   :  { %5814 = vrot.lane.b32.xlu2 %v5813_v15, %s5958_s20  ;;  %v3836_v19 = vsel %vm184_vm1, %v3834_v62, %v3835_v38  ;;  %v3645_v9 = vadd.f32 %v8283_v47, %v3626_v27  ;;  %v3646_v57 = vadd.f32 %v8283_v47, %v3627_v13  ;;  %v3628_v49 = vmul.f32 %v8280_v40, %v8242_v46 }
 0xa18   :  { %v3839_v4 = vsel %vm184_vm1, %v3837_v56, %v3838_v35  ;;  %v3660_v36 = vmax.f32 %v3644_v11, 0.0  ;;  %v3728_v54 = vrot.slane %v3659_v29, 7  ;;  %v3629_v41 = vmul.f32 %v8280_v40, %v8249_v30 }
 0xa19   :  { %v3661_v3 = vmax.f32 %v3645_v9, 0.0  ;;  %v5828_v60 = vpack.i.bf16 %v3839_v4, %v3836_v19  ;;  %v3662_v39 = vmax.f32 %v3646_v57, 0.0  ;;  %v3647_v33 = vadd.f32 %v8283_v47, %v3628_v49 }
 0xa1a   :  { %v3729_v26 = vrot.slane %v3660_v36, 7  ;;  %v8405_v45 = vsel %vm115_vm0, 0.0, %v3728_v54  ;;  %v3776_v20 = vsel %vm115_vm0, %v3728_v54, 0.0  ;;  %v3630_v12 = vmul.f32 %v8280_v40, %v8256_v42 }
 0xa1b   :  { %v3730_v14 = vrot.slane %v3661_v3, 7  ;;  %v3840_v23 = vrot.slane %v8405_v45, 1  ;;  %v3841_v18 = vrot.slane %v3776_v20, 1  ;;  %v3731_v37 = vrot.slane %v3662_v39, 7 }
 0xa1c   :  { %v8410_v6 = vsel %vm115_vm0, 0.0, %v3729_v26  ;;  %v3777_v52 = vsel %vm115_vm0, %v3729_v26, 0.0  ;;  %v3937_v53 = vrot.slane %v3776_v20, 2  ;;  %v3936_v15 = vrot.slane %v8405_v45, 2 }
 0xa1d   :  { %v3843_v46 = vrot.slane %v8410_v6, 1  ;;  %v3844_v59 = vrot.slane %v3777_v52, 1  ;;  %v8421_v10 = vsel %vm184_vm1, %v3840_v23, %v3841_v18  ;;  %v8424_v58 = vsel %vm115_vm0, 0.0, %v3730_v14 }
 0xa1e   :  { %v8427_v61 = vsel %vm115_vm0, %v3730_v14, 0.0  ;;  %v3846_v30 = vrot.slane %v8424_v58, 1  ;;  %v3940_v40 = vrot.slane %v3777_v52, 2  ;;  %v8437_v34 = vsel %vm115_vm0, 0.0, %v3731_v37 }
 0xa1f   :  { %5829 = vrot.lane.b32.xlu2 %v5828_v60, %s5957_s2  ;;  %v8430_v48 = vsel %vm184_vm1, %v3843_v46, %v3844_v59  ;;  %v3847_v42 = vrot.slane %v8427_v61, 1  ;;  %v8440_v1 = vsel %vm115_vm0, %v3731_v37, 0.0  ;;  %v3849_v50 = vrot.slane %v8437_v34, 1 }
 0xa20   :  { %v5848_v25 = vpack.i.bf16 %v8430_v48, %v8421_v10  ;;  %v3850_v7 = vrot.slane %v8440_v1, 1  ;;  %v3939_v0 = vrot.slane %v8410_v6, 2  ;;  %v3648_v24 = vadd.f32 %v8283_v47, %v3629_v41 }
 0xa21   :  { %v8443_v22 = vsel %vm184_vm1, %v3846_v30, %v3847_v42  ;;  %v3663_v5 = vmax.f32 %v3647_v33, 0.0  ;;  %v8454_v38 = vsel %vm287_vm2, %v3936_v15, %v3937_v53  ;;  %v3649_v56 = vadd.f32 %v8283_v47, %v3630_v12 }
 0xa22   :  { %v8451_v62 = vsel %vm184_vm1, %v3849_v50, %v3850_v7  ;;  %v8460_v27 = vsel %vm287_vm2, %v3939_v0, %v3940_v40  ;;  %v3664_v11 = vmax.f32 %v3648_v24, 0.0  ;;  %v3933_v40 = vrot.slane %v8382_v21, 2 }
 0xa23   :  { %v5858_v35 = vpack.i.bf16 %v8451_v62, %v8443_v22  ;;  %v3732_v13 = vrot.slane %v3663_v5, 7  ;;  %v5868_v19 = vpack.i.bf16 %v8460_v27, %v8454_v38  ;;  %v3665_v4 = vmax.f32 %v3649_v56, 0.0  ;;  %v5167_v22 = vld [vmem:[%s9021_s6 + $0xc0] sm:$0xff]  ;;  %v5166_v38 = vld [vmem:[%s9021_s6 + $0xb8] sm:$0xff]  ;;  %v5165_v27 = vld [vmem:[%s9021_s6 + $0xb0] sm:$0xff] }
 0xa24   :  { %v3733_v29 = vrot.slane %v3664_v11, 7  ;;  %v3934_v50 = vrot.slane %v8385_v63, 2  ;;  %v3930_v5 = vrot.slane %v8373_v43, 2  ;;  %v3931_v56 = vrot.slane %v8376_v31, 2  ;;  %v5175_v62 = vld [vmem:[%s9021_s6 + $0x100] sm:$0xff] }
 0xa25   :  { %v8465_v9 = vsel %vm115_vm0, 0.0, %v3732_v13  ;;  %v8468_v36 = vsel %vm115_vm0, %v3732_v13, 0.0  ;;  %v3734_v54 = vrot.slane %v3665_v4, 7 }
 0xa26   :  { %v3852_v47 = vrot.slane %v8465_v9, 1  ;;  %v3853_v57 = vrot.slane %v8468_v36, 1  ;;  %v8473_v3 = vsel %vm115_vm0, 0.0, %v3733_v29  ;;  %v3781_v49 = vsel %vm115_vm0, %v3733_v29, 0.0 }
 0xa27   :  { %v3855_v26 = vrot.slane %v8473_v3, 1  ;;  %v3856_v39 = vrot.slane %v3781_v49, 1  ;;  %v8481_v20 = vsel %vm115_vm0, 0.0, %v3734_v54  ;;  %v8484_v14 = vsel %vm115_vm0, %v3734_v54, 0.0 }
 0xa28   :  { %v8477_v60 = vsel %vm184_vm1, %v3852_v47, %v3853_v57  ;;  %v3954_v33 = vrot.slane %v8481_v20, 2  ;;  %v3955_v23 = vrot.slane %v8484_v14, 2  ;;  %v3951_v18 = vrot.slane %v8473_v3, 2 }
 0xa29   :  { %v8488_v52 = vsel %vm184_vm1, %v3855_v26, %v3856_v39  ;;  %v3952_v59 = vrot.slane %v3781_v49, 2  ;;  %v3935_v47 = vsel %vm287_vm2, %v3933_v40, %v3934_v50  ;;  %v3932_v26 = vsel %vm287_vm2, %v3930_v5, %v3931_v56 }
 0xa2a   :  { %v5888_v46 = vpack.i.bf16 %v8488_v52, %v8477_v60  ;;  %v8495_v41 = vsel %vm287_vm2, %v3954_v33, %v3955_v23  ;;  %v3942_v56 = vrot.slane %v8424_v58, 2  ;;  %v3859_v48 = vrot.slane %v8484_v14, 1  ;;  %v5164_v60 = vld [vmem:[%s9021_s6 + $0xa8] sm:$0xff]  ;;  %v5163_v52 = vld [vmem:[%s9021_s6 + $0xa0] sm:$0xff] }
 0xa2b   :  { %v8498_v12 = vsel %vm287_vm2, %v3951_v18, %v3952_v59  ;;  %v5172_v14 = vld [vmem:[%s9021_s6 + $0xe8] sm:$0xff] }
 0xa2c   :  { %v5903_v37 = vpack.i.bf16 %v8495_v41, %v8498_v12  ;;  %v3946_v41 = vrot.slane %v8440_v1, 2 }
 0xa69   :  { %v5800_v53 = vpop.permute.xlu2 %5799 }
 0xa6a   :  { %v5802_v7 = vunpack.i.h.bf16 %v5800_v53  ;;  %v5801_v15 = vunpack.i.l.bf16 %v5800_v53 }
 0xa6c   :  { %v4009_v63 = vsel %vm1061_vm8, %v8331_v32, %v5802_v7  ;;  %v4008_v54 = vsel %vm1061_vm8, %v8328_v51, %v5801_v15  ;;  %v5168_v51 = vld [vmem:[%s9021_s6 + $0xc8] sm:$0xff] }
 0xa6d   :  { %v5176_v32 = vld [vmem:[%s9021_s6 + $0x108] sm:$0xff]  ;;  %4334 = vmatpush.bf16.msrb.mxu1 %v5168_v51 }
 0xa6e   :  { %4383 = vmatpush.bf16.msra.mxu2 %v5176_v32  ;;  %v5178_v32 = vld [vmem:[%s9021_s6 + $0x118] sm:$0xff] }
 0xa6f   :  { %5188 = vmatpush.bf16.msrb.mxu3 %v5178_v32 }
 0xa71   :  { %v5815_v30 = vpop.permute.xlu2 %5814  ;;  %4335 = vmatpush.bf16.msrb.mxu1 %v5167_v22 }
 0xa72   :  { %v5816_v24 = vunpack.i.l.bf16 %v5815_v30  ;;  %4384 = vmatpush.bf16.msra.mxu2 %v5175_v62 }
 0xa75   :  { %4336 = vmatpush.bf16.msrb.mxu1 %v5166_v38 }
 0xa79   :  { %4337 = vmatpush.bf16.msrb.mxu1 %v5165_v27 }
 0xa7d   :  { %v5805_v42 = vpop.permute.xlu0 %5804  ;;  %4338 = vmatpush.bf16.msrb.mxu1 %v5164_v60 }
 0xa7e   :  { %v5806_v0 = vunpack.i.l.bf16 %v5805_v42  ;;  %v5807_v49 = vunpack.i.h.bf16 %v5805_v42  ;;  %v5817_v42 = vunpack.i.h.bf16 %v5815_v30 }
 0xa80   :  { %v4010_v11 = vsel %vm1061_vm8, %v8318_v2, %v5806_v0  ;;  %v5810_v13 = vpop.permute.xlu1 %5809  ;;  %v4011_v59 = vsel %vm1061_vm8, %v8321_v17, %v5807_v49  ;;  %v3948_v49 = vrot.slane %v8465_v9, 2 }
 0xa81   :  { %v5812_v4 = vunpack.i.h.bf16 %v5810_v13  ;;  %v5811_v29 = vunpack.i.l.bf16 %v5810_v13  ;;  %v8510_v57 = vsel %vm1079_vm9, %v4010_v11, %v5816_v24  ;;  %v8541_v0 = vsel %vm1079_vm9, %v4011_v59, %v5817_v42  ;;  %4339 = vmatpush.bf16.msrb.mxu1 %v5163_v52  ;;  %v5177_v42 = vld [vmem:[%s9021_s6 + $0x110] sm:$0xff] }
 0xa82   :  { %v5843_v31 = vpack.i.bf16 %v3935_v47, %v8510_v57  ;;  %v5853_v30 = vpack.i.bf16 %v8541_v0, %v8510_v57  ;;  %v3943_v11 = vrot.slane %v8427_v61, 2  ;;  %v3858_v61 = vrot.slane %v8481_v20, 1  ;;  %v5170_v47 = vld [vmem:[%s9021_s6 + $0xd8] sm:$0xff]  ;;  %5189 = vmatpush.bf16.msrb.mxu3 %v5177_v42 }
 0xa83   :  { %v8519_v2 = vsel %vm1079_vm9, %v4009_v63, %v5812_v4  ;;  %v8522_v39 = vsel %vm1079_vm9, %v4008_v54, %v5811_v29  ;;  %v5162_v29 = vld [vmem:[%s9021_s6 + $0x98] sm:$0xff]  ;;  %v5830_v63 = vpop.permute.xlu2 %5829 }
 0xa84   :  { %v5833_v33 = vpack.i.bf16 %v8519_v2, %v3932_v26  ;;  %v5838_v23 = vpack.i.bf16 %v8519_v2, %v8522_v39  ;;  %5844 = vrot.lane.b32.xlu2 %v5843_v31, %s5958_s20  ;;  %v3944_v13 = vsel %vm287_vm2, %v3942_v56, %v3943_v11  ;;  %v5832_v54 = vunpack.i.h.bf16 %v5830_v63  ;;  %v5161_v26 = vld [vmem:[%s9021_s6 + $0x90] sm:$0xff] }
 0xa85   :  { %v5820_v18 = vpop.permute.xlu0 %5819  ;;  %4340 = vmatpush.bf16.msrb.mxu1 %v5162_v29  ;;  %v3949_v31 = vrot.slane %v8468_v36, 2 }
 0xa86   :  { %5834 = vrot.lane.b32.xlu0 %v5833_v33, %s5958_s20  ;;  %5839 = vrot.lane.b32.xlu1 %v5838_v23, %s5959_s12  ;;  %v5821_v53 = vunpack.i.l.bf16 %v5820_v18  ;;  %v5822_v40 = vunpack.i.h.bf16 %v5820_v18  ;;  %v5169_v33 = vld [vmem:[%s9021_s6 + $0xd0] sm:$0xff]  ;;  %v4015_v18 = vsel %vm1061_vm8, %v8382_v21, %v5832_v54 }
 0xa87   :  { %v3950_v36 = vsel %vm287_vm2, %v3948_v49, %v3949_v31 }
 0xa88   :  { %v4012_v50 = vsel %vm1061_vm8, %v8345_v16, %v5821_v53  ;;  %v5825_v7 = vpop.permute.xlu1 %5824  ;;  %v4013_v5 = vsel %vm1061_vm8, %v8348_v28, %v5822_v40  ;;  %v3666_v40 = vmax.f32 %v8300_v8, 0.0 }
 0xa89   :  { %v5826_v15 = vunpack.i.l.bf16 %v5825_v7  ;;  %v5827_v24 = vunpack.i.h.bf16 %v5825_v7  ;;  %4341 = vmatpush.bf16.msrb.mxu1 %v5161_v26 }
 0xa8b   :  { %v8544_v17 = vsel %vm1079_vm9, %v4012_v50, %v5826_v15  ;;  %v8561_v28 = vsel %vm1079_vm9, %v4013_v5, %v5827_v24  ;;  %v3735_v50 = vrot.slane %v3666_v40, 7  ;;  %v5831_v5 = vunpack.i.l.bf16 %v5830_v63 }
 0xa8c   :  { %5849 = vrot.lane.b32.xlu2 %v5848_v25, %s5957_s2  ;;  %v5863_v16 = vpack.i.bf16 %v8544_v17, %v8541_v0  ;;  %v5873_v4 = vpack.i.bf16 %v8561_v28, %v3944_v13  ;;  %v5878_v10 = vpack.i.bf16 %v8561_v28, %v8544_v17  ;;  %v3860_v25 = vsel %vm184_vm1, %v3858_v61, %v3859_v48 }
 0xa8d   :  { %v8646_v21 = vsel %vm115_vm0, 0.0, %v3735_v50  ;;  %v8649_v7 = vsel %vm115_vm0, %v3735_v50, 0.0 }
 0xa8e   :  { %5854 = vrot.lane.b32.xlu0 %v5853_v30, %s5959_s12  ;;  %5864 = vrot.lane.b32.xlu1 %v5863_v16, %s5958_s20  ;;  %v3861_v15 = vrot.slane %v8646_v21, 1  ;;  %v3862_v8 = vrot.slane %v8649_v7, 1  ;;  %v3945_v30 = vrot.slane %v8437_v34, 2 }
 0xa90   :  { %v3863_v24 = vsel %vm184_vm1, %v3861_v15, %v3862_v8  ;;  %v3947_v61 = vsel %vm287_vm2, %v3945_v30, %v3946_v41  ;;  %v3957_v30 = vrot.slane %v8646_v21, 2  ;;  %v3958_v41 = vrot.slane %v8649_v7, 2 }
 0xa94   :  { %5874 = vrot.lane.b32.xlu2 %v5873_v4, %s5958_s20 }
 0xa96   :  { %5859 = vrot.lane.b32.xlu0 %v5858_v35, %s5957_s2  ;;  %5869 = vrot.lane.b32.xlu1 %v5868_v19, %s5958_s20  ;;  %v5174_v35 = vld [vmem:[%s9021_s6 + $0xf8] sm:$0xff]  ;;  %v5173_v19 = vld [vmem:[%s9021_s6 + $0xf0] sm:$0xff] }
 0xa97   :  { %4385 = vmatpush.bf16.msra.mxu2 %v5174_v35 }
 0xa9b   :  { %4386 = vmatpush.bf16.msra.mxu2 %v5173_v19 }
 0xa9c   :  { %5889 = vrot.lane.b32.xlu2 %v5888_v46, %s5957_s2  ;;  %v5171_v46 = vld [vmem:[%s9021_s6 + $0xe0] sm:$0xff] }
 0xa9e   :  { %5879 = vrot.lane.b32.xlu0 %v5878_v10, %s5959_s12  ;;  %v4014_v10 = vsel %vm1061_vm8, %v8373_v43, %v5831_v5 }
 0xa9f   :  { %4387 = vmatpush.bf16.msra.mxu2 %v5172_v14 }
 0xaa3   :  { %4388 = vmatpush.bf16.msra.mxu2 %v5171_v46 }
 0xaa4   :  { %3892 = vrot.lane.b32.xlu2 %v3860_v25, %s5957_s2 }
 0xaa7   :  { %4389 = vmatpush.bf16.msra.mxu2 %v5170_v47 }
 0xaab   :  { %4390 = vmatpush.bf16.msra.mxu2 %v5169_v33 }
 0xaaf   :  { %4438 = vmatpush.bf16.msrb.mxu2 %v5178_v32 }
 0xab3   :  { %4439 = vmatpush.bf16.msrb.mxu2 %v5177_v42 }
 0xade   :  { %v5845_v23 = vpop.permute.xlu2 %5844 }
 0xadf   :  { %v5847_v51 = vunpack.i.h.bf16 %v5845_v23  ;;  %v5846_v12 = vunpack.i.l.bf16 %v5845_v23 }
 0xae1   :  { %v4031_v59 = vsel %vm1079_vm9, %v4015_v18, %v5847_v51 }
 0xae2   :  { %v5893_v53 = vpack.i.bf16 %v4031_v59, %v3950_v36 }
 0xae4   :  { %5894 = vrot.lane.b32.xlu0 %v5893_v53, %s5958_s20 }
 0xae6   :  { %v5850_v62 = vpop.permute.xlu2 %5849 }
 0xae7   :  { %v5852_v29 = vunpack.i.h.bf16 %v5850_v62  ;;  %v5851_v47 = vunpack.i.l.bf16 %v5850_v62 }
 0xae9   :  { %v4017_v26 = vsel %vm1061_vm8, %v8410_v6, %v5852_v29  ;;  %v4016_v33 = vsel %vm1061_vm8, %v8405_v45, %v5851_v47 }
 0xaec   :  { %5904 = vrot.lane.b32.xlu0 %v5903_v37, %s5958_s20 }
 0xaee   :  { %v5875_v54 = vpop.permute.xlu2 %5874 }
 0xaef   :  { %v5876_v32 = vunpack.i.l.bf16 %v5875_v54 }
 0xaf4   :  { %3894 = vrot.lane.b32.xlu0 %v3863_v24, %s5957_s2 }
 0xaf8   :  { %v5835_v37 = vpop.permute.xlu0 %5834  ;;  %v5840_v16 = vpop.permute.xlu1 %5839 }
 0xaf9   :  { %v5837_v56 = vunpack.i.h.bf16 %v5835_v37  ;;  %v5836_v11 = vunpack.i.l.bf16 %v5835_v37  ;;  %v5842_v13 = vunpack.i.h.bf16 %v5840_v16  ;;  %v5841_v4 = vunpack.i.l.bf16 %v5840_v16 }
 0xafa   :  { %v3959_v37 = vsel %vm287_vm2, %v3957_v30, %v3958_v41  ;;  %v5877_v16 = vunpack.i.h.bf16 %v5875_v54 }
 0xafb   :  { %v8660_v48 = vpack.c.bf16 %v5846_v12, %v5837_v56  ;;  %v8663_v25 = vsel %vm1079_vm9, %v4014_v10, %v5836_v11  ;;  %v4147_v1 = vsel %vm1207_vm10, %v8522_v39, %v5842_v13  ;;  %v4163_v22 = vsel %vm1079_vm9, %v5842_v13, %v5846_v12 }
 0xafc   :  { %v4146_v38 = vsel %vm1207_vm10, %v6732_v55, %v5841_v4  ;;  %v4162_v35 = vsel %vm1079_vm9, %v5841_v4, %v5837_v56  ;;  %v5883_v43 = vpack.i.bf16 %v3947_v61, %v8663_v25  ;;  %v5898_v63 = vpack.i.bf16 %v4031_v59, %v8663_v25 }
 0xafd   :  { %v4178_v27 = vpack.c.bf16 %v4147_v1, %v4146_v38  ;;  %v4179_v19 = vpack.c.bf16 %v4163_v22, %v4162_v35  ;;  %v5890_v1 = vpop.permute.xlu2 %5889 }
 0xafe   :  { %5884 = vrot.lane.b32.xlu1 %v5883_v43, %s5958_s20  ;;  %v5892_v7 = vunpack.i.h.bf16 %v5890_v1  ;;  %v5891_v22 = vunpack.i.l.bf16 %v5890_v1 }
 0xaff   :  { %4342 = vmatmul.bf16.vlgmr.msrb.gmra.mxu1 %v4178_v27  ;;  %4391 = vmatmul.bf16.vlgmr.msra.gmra.mxu2 %v4179_v19 }
 0xb00   :  { %v5855_v60 = vpop.permute.xlu0 %5854  ;;  %v5865_v14 = vpop.permute.xlu1 %5864  ;;  %v4021_v43 = vsel %vm1061_vm8, %v8473_v3, %v5892_v7  ;;  %v4020_v27 = vsel %vm1061_vm8, %v8465_v9, %v5891_v22 }
 0xb01   :  { %v5867_v52 = vunpack.i.h.bf16 %v5865_v14  ;;  %v5866_v39 = vunpack.i.l.bf16 %v5865_v14  ;;  %v5857_v49 = vunpack.i.h.bf16 %v5855_v60  ;;  %v5856_v31 = vunpack.i.l.bf16 %v5855_v60 }
 0xb03   :  { %v4183_v46 = vpack.c.bf16 %v5867_v52, %v5866_v39  ;;  %v4148_v59 = vsel %vm1207_vm10, %v8519_v2, %v5856_v31  ;;  %v4149_v42 = vsel %vm1207_vm10, %v8510_v57, %v5857_v49  ;;  %v4164_v40 = vsel %vm1079_vm9, %v5856_v31, %v5866_v39 }
 0xb04   :  { %v4165_v50 = vsel %vm1079_vm9, %v5857_v49, %v5867_v52  ;;  %v4181_v57 = vpack.c.bf16 %v4149_v42, %v4148_v59 }
 0xb05   :  { %5091 = vmatmul.msk.bf16.vlgmr.msrb.gmra.mxu3 %vm1061_vm8, %v4183_v46  ;;  %v4182_v24 = vpack.c.bf16 %v4165_v50, %v4164_v40  ;;  %v3893_v49 = vpop.permute.xlu2 %3892 }
 0xb06   :  { %5899 = vrot.lane.b32.xlu1 %v5898_v63, %s5959_s12 }
 0xb08   :  { %v5860_v23 = vpop.permute.xlu0 %5859  ;;  %v5870_v51 = vpop.permute.xlu1 %5869 }
 0xb09   :  { %v5861_v18 = vunpack.i.l.bf16 %v5860_v23  ;;  %v5872_v36 = vunpack.i.h.bf16 %v5870_v51  ;;  %v5871_v53 = vunpack.i.l.bf16 %v5870_v51  ;;  %v5862_v60 = vunpack.i.h.bf16 %v5860_v23 }
 0xb0b   :  { %v4018_v6 = vsel %vm1061_vm8, %v8424_v58, %v5861_v18  ;;  %v8689_v45 = vsel %vm1079_vm9, %v4017_v26, %v5872_v36  ;;  %v8692_v15 = vsel %vm1079_vm9, %v4016_v33, %v5871_v53  ;;  %v4019_v3 = vsel %vm1061_vm8, %v8437_v34, %v5862_v60 }
 0xb0c   :  { %v8695_v8 = vsel %vm1079_vm9, %v4018_v6, %v5876_v32  ;;  %v5908_v2 = vpack.i.bf16 %v8689_v45, %v8692_v15  ;;  %v4022_v34 = vsel %vm1061_vm8, %v8481_v20, %v3893_v49 }
 0xb0d   :  { %v5913_v5 = vpack.i.bf16 %v8695_v8, %v8689_v45 }
 0xb0e   :  { %5909 = vrot.lane.b32.xlu1 %v5908_v2, %s5959_s12 }
 0xb0f   :  { %4347 = vmatmul.bf16.gmra.mxu1 %v4181_v57  ;;  %4396 = vmatmul.bf16.gmra.mxu2 %v4182_v24 }
 0xb10   :  { %5914 = vrot.lane.b32.xlu2 %v5913_v5, %s5958_s20  ;;  %v5880_v58 = vpop.permute.xlu0 %5879 }
 0xb11   :  { %v5881_v12 = vunpack.i.l.bf16 %v5880_v58  ;;  %v5882_v56 = vunpack.i.h.bf16 %v5880_v58 }
 0xb13   :  { %v4166_v11 = vsel %vm1079_vm9, %v5881_v12, %v5877_v16  ;;  %v4150_v13 = vsel %vm1207_vm10, %v8541_v0, %v5881_v12  ;;  %v4151_v4 = vsel %vm1207_vm10, %v8544_v17, %v5882_v56 }
 0xb14   :  { %v4184_v10 = vpack.c.bf16 %v4151_v4, %v4150_v13 }
 0xb16   :  { %3990 = vrot.lane.b32.xlu1 %v3959_v37, %s5958_s20 }
 0xb1f   :  { %4352 = vmatmul.bf16.gmra.mxu1 %v4184_v10 }
 0xb56   :  { %v5895_v61 = vpop.permute.xlu0 %5894 }
 0xb57   :  { %v5896_v62 = vunpack.i.l.bf16 %v5895_v61  ;;  %v5897_v20 = vunpack.i.h.bf16 %v5895_v61 }
 0xb59   :  { %v8717_v0 = vsel %vm1079_vm9, %v4020_v27, %v5896_v62 }
 0xb5e   :  { %v5905_v38 = vpop.permute.xlu0 %5904 }
 0xb5f   :  { %v5906_v35 = vunpack.i.l.bf16 %v5905_v38  ;;  %v5907_v31 = vunpack.i.h.bf16 %v5905_v38 }
 0xb61   :  { %v8720_v17 = vsel %vm1079_vm9, %v4021_v43, %v5906_v35  ;;  %v8741_v33 = vsel %vm1079_vm9, %v4022_v34, %v5907_v31 }
 0xb62   :  { %v5928_v19 = vpack.i.bf16 %v8720_v17, %v8717_v0  ;;  %v5933_v36 = vpack.i.bf16 %v8741_v33, %v8720_v17 }
 0xb64   :  { %5929 = vrot.lane.b32.xlu1 %v5928_v19, %s5959_s12 }
 0xb6a   :  { %v5915_v4 = vpop.permute.xlu2 %5914 }
 0xb6b   :  { %v5917_v10 = vunpack.i.h.bf16 %v5915_v4  ;;  %v5916_v61 = vunpack.i.l.bf16 %v5915_v4 }
 0xb6d   :  { %v4192_v22 = vpack.c.bf16 %v5917_v10, %v5916_v61 }
 0xb70   :  { %v5885_v14 = vpop.permute.xlu1 %5884 }
 0xb71   :  { %v5887_v52 = vunpack.i.h.bf16 %v5885_v14  ;;  %v5886_v39 = vunpack.i.l.bf16 %v5885_v14 }
 0xb73   :  { %v8728_v9 = vsel %vm1079_vm9, %v4019_v3, %v5887_v52  ;;  %v4186_v46 = vpack.c.bf16 %v5886_v39, %v5877_v16  ;;  %v4167_v29 = vsel %vm1079_vm9, %v5882_v56, %v5886_v39 }
 0xb74   :  { %v5923_v47 = vpack.i.bf16 %v8717_v0, %v8728_v9  ;;  %v5918_v63 = vpack.i.bf16 %v8728_v9, %v8695_v8  ;;  %v4185_v54 = vpack.c.bf16 %v4167_v29, %v4166_v11 }
 0xb75   :  { %5092 = vmatmul.msk.bf16.gmra.mxu3 %vm1061_vm8, %v4186_v46 }
 0xb76   :  { %5924 = vrot.lane.b32.xlu0 %v5923_v47, %s5958_s20  ;;  %5919 = vrot.lane.b32.xlu2 %v5918_v63, %s5959_s12 }
 0xb77   :  { %4401 = vmatmul.bf16.gmra.mxu2 %v4185_v54 }
 0xb78   :  { %v5900_v26 = vpop.permute.xlu1 %5899 }
 0xb79   :  { %v5902_v23 = vunpack.i.h.bf16 %v5900_v26  ;;  %v5901_v51 = vunpack.i.l.bf16 %v5900_v26 }
 0xb7b   :  { %v4152_v32 = vsel %vm1207_vm10, %v8561_v28, %v5901_v51  ;;  %v4153_v18 = vsel %vm1207_vm10, %v8663_v25, %v5902_v23  ;;  %v4168_v50 = vsel %vm1079_vm9, %v5901_v51, %v5897_v20  ;;  %v4169_v6 = vsel %vm1079_vm9, %v5902_v23, %v6814_v44  ;;  %v3895_v25 = vpop.permute.xlu0 %3894 }
 0xb7c   :  { %v4187_v53 = vpack.c.bf16 %v4153_v18, %v4152_v32  ;;  %v4343_v59 = vpop.f32.mrf.mxu1  ;;  %v4189_v28 = vpack.c.bf16 %v6814_v44, %v5897_v20  ;;  %v4188_v5 = vpack.c.bf16 %v4169_v6, %v4168_v50  ;;  %v4023_v58 = vsel %vm1061_vm8, %v8646_v21, %v3895_v25 }
 0xb7e   :  { %5934 = vrot.lane.b32.xlu2 %v5933_v36, %s5958_s20  ;;  %4357 = vmatmul.bf16.gmra.mxu1 %v4187_v53 }
 0xb80   :  { %v5910_v42 = vpop.permute.xlu1 %5909 }
 0xb81   :  { %v5912_v57 = vunpack.i.h.bf16 %v5910_v42  ;;  %v5911_v24 = vunpack.i.l.bf16 %v5910_v42 }
 0xb82   :  { %v4392_v40 = vpop.f32.mrf.mxu2 }
 0xb83   :  { %v8754_v2 = vadd.f32 %v4392_v40, %v4343_v59  ;;  %v4154_v37 = vsel %vm1207_vm10, %v6732_v55, %v5911_v24  ;;  %v4155_v16 = vsel %vm1207_vm10, %v8692_v15, %v5912_v57  ;;  %v4170_v55 = vsel %vm1079_vm9, %v5911_v24, %v5916_v61 }
 0xb84   :  { %v4345_v30 = vpop.f32.mrf.mxu1  ;;  %v4190_v21 = vpack.c.bf16 %v4155_v16, %v4154_v37  ;;  %v4171_v15 = vsel %vm1079_vm9, %v5912_v57, %v5917_v10 }
 0xb85   :  { %5093 = vmatmul.msk.bf16.gmra.mxu3 %vm1061_vm8, %v4189_v28  ;;  %v4191_v43 = vpack.c.bf16 %v4171_v15, %v4170_v55 }
 0xb87   :  { %4406 = vmatmul.bf16.gmra.mxu2 %v4188_v5 }
 0xb88   :  { %v3991_v41 = vpop.permute.xlu1 %3990  ;;  %v4446_v38 = vpop.f32.mrf.mxu3 }
 0xb89   :  { %v4039_v12 = vsel %vm1079_vm9, %v4023_v58, %v3991_v41 }
 0xb8a   :  { %v5938_v56 = vpack.i.bf16 %v4039_v12, %v8741_v33  ;;  %v4394_v11 = vpop.f32.mrf.mxu2  ;;  %4130 = vrot.lane.b32.xlu1 %v4039_v12, %s5958_s20 }
 0xb8b   :  { %v8766_v13 = vadd.f32 %v4394_v11, %v4345_v30 }
 0xb8c   :  { %5939 = vrot.lane.b32.xlu0 %v5938_v56, %s5959_s12  ;;  %v4348_v1 = vpop.f32.mrf.mxu1 }
 0xb8e   :  { %4362 = vmatmul.bf16.gmra.mxu1 %v4190_v21 }
 0xb90   :  { %v4448_v18 = vpop.f32.mrf.mxu3 }
 0xb92   :  { %v4397_v7 = vpop.f32.mrf.mxu2 }
 0xb93   :  { %v4398_v62 = vadd.f32 %v4397_v7, %v4348_v1 }
 0xb94   :  { %v4350_v51 = vpop.f32.mrf.mxu1 }
 0xb95   :  { %v8771_v35 = vadd.f32 %v4446_v38, %v4398_v62  ;;  %5094 = vmatmul.msk.bf16.gmra.mxu3 %vm1061_vm8, %v4192_v22 }
 0xb97   :  { %4411 = vmatmul.bf16.gmra.mxu2 %v4191_v43 }
 0xb9a   :  { %v4399_v32 = vpop.f32.mrf.mxu2 }
 0xb9c   :  { %v4353_v20 = vpop.f32.mrf.mxu1 }
 0xba4   :  { %v4355_v10 = vpop.f32.mrf.mxu1 }
 0xbd0   :  { %v5920_v27 = vpop.permute.xlu2 %5919 }
 0xbd1   :  { %v5922_v19 = vunpack.i.h.bf16 %v5920_v27  ;;  %v5921_v60 = vunpack.i.l.bf16 %v5920_v27 }
 0xbd3   :  { %v4156_v14 = vsel %vm1207_vm10, %v8689_v45, %v5921_v60  ;;  %v4157_v52 = vsel %vm1207_vm10, %v8695_v8, %v5922_v19 }
 0xbd4   :  { %v4193_v39 = vpack.c.bf16 %v4157_v52, %v4156_v14 }
 0xbd6   :  { %4367 = vmatmul.bf16.gmra.mxu1 %v4193_v39  ;;  %v5930_v3 = vpop.permute.xlu1 %5929 }
 0xbd7   :  { %v5932_v46 = vunpack.i.h.bf16 %v5930_v3  ;;  %v5931_v29 = vunpack.i.l.bf16 %v5930_v3 }
 0xbd9   :  { %v4158_v47 = vsel %vm1207_vm10, %v8728_v9, %v5931_v29  ;;  %v4159_v63 = vsel %vm1207_vm10, %v8717_v0, %v5932_v46  ;;  %v5935_v9 = vpop.permute.xlu2 %5934 }
 0xbda   :  { %v4196_v54 = vpack.c.bf16 %v4159_v63, %v4158_v47  ;;  %v5937_v36 = vunpack.i.h.bf16 %v5935_v9  ;;  %v5936_v0 = vunpack.i.l.bf16 %v5935_v9 }
 0xbdc   :  { %v4174_v53 = vsel %vm1079_vm9, %v5931_v29, %v5936_v0  ;;  %v4175_v59 = vsel %vm1079_vm9, %v5932_v46, %v5937_v36  ;;  %v4198_v40 = vpack.c.bf16 %v5937_v36, %v5936_v0 }
 0xbdd   :  { %v4197_v28 = vpack.c.bf16 %v4175_v59, %v4174_v53 }
 0xbe6   :  { %4372 = vmatmul.bf16.gmra.mxu1 %v4196_v54 }
 0xbe8   :  { %v5925_v49 = vpop.permute.xlu0 %5924 }
 0xbe9   :  { %v5927_v31 = vunpack.i.h.bf16 %v5925_v49  ;;  %v5926_v34 = vunpack.i.l.bf16 %v5925_v49  ;;  %v4400_v49 = vadd.f32 %v4399_v32, %v4350_v51  ;;  %v4488_v51 = vsel %vm1061_vm8, %v8771_v35, 0.0 }
 0xbeb   :  { %v4195_v45 = vpack.c.bf16 %v5927_v31, %v5926_v34  ;;  %v4172_v26 = vsel %vm1079_vm9, %v5921_v60, %v5926_v34  ;;  %v4173_v8 = vsel %vm1079_vm9, %v5922_v19, %v5927_v31 }
 0xbec   :  { %v4194_v23 = vpack.c.bf16 %v4173_v8, %v4172_v26  ;;  %v8819_v26 = vadd.f32 %v4448_v18, %v4400_v49 }
 0xbed   :  { %5095 = vmatmul.msk.bf16.gmra.mxu3 %vm1061_vm8, %v4195_v45 }
 0xbee   :  { %4416 = vmatmul.bf16.gmra.mxu2 %v4194_v23  ;;  %v4490_v18 = vsel %vm1061_vm8, %v8819_v26, 0.0 }
 0xbf8   :  { %v4451_v6 = vpop.f32.mrf.mxu3 }
 0xbfa   :  { %v4402_v42 = vpop.f32.mrf.mxu2 }
 0xbfb   :  { %v4403_v50 = vadd.f32 %v4402_v42, %v4353_v20  ;;  %v4358_v1 = vpop.f32.mrf.mxu1  ;;  %v4524_v42 = vmul.f32 %v8771_v35, %v8771_v35 }
 0xbfc   :  { %v4131_v12 = vpop.permute.xlu1 %4130 }
 0xbfd   :  { %v8787_v25 = vadd.f32 %v4451_v6, %v4403_v50  ;;  %5096 = vmatmul.msk.bf16.gmra.mxu3 %vm1061_vm8, %v4198_v40  ;;  %v4201_v56 = vpack.c.bf16 %v6814_v44, %v4131_v12 }
 0xbfe   :  { %4421 = vmatmul.bf16.gmra.mxu2 %v4197_v28  ;;  %v5940_v57 = vpop.permute.xlu0 %5939 }
 0xbff   :  { %v5942_v24 = vunpack.i.h.bf16 %v5940_v57  ;;  %v5941_v5 = vunpack.i.l.bf16 %v5940_v57  ;;  %v4492_v6 = vsel %vm1061_vm8, %v8787_v25, 0.0 }
 0xc00   :  { %v4453_v61 = vpop.f32.mrf.mxu3 }
 0xc01   :  { %v4160_v58 = vsel %vm1207_vm10, %v8720_v17, %v5941_v5  ;;  %v4161_v30 = vsel %vm1207_vm10, %v8741_v33, %v5942_v24  ;;  %v4176_v37 = vsel %vm1079_vm9, %v5941_v5, %v4131_v12  ;;  %v4177_v16 = vsel %vm1079_vm9, %v5942_v24, %v6814_v44 }
 0xc02   :  { %v4199_v41 = vpack.c.bf16 %v4161_v30, %v4160_v58  ;;  %v4200_v11 = vpack.c.bf16 %v4177_v16, %v4176_v37  ;;  %v4404_v17 = vpop.f32.mrf.mxu2  ;;  %v4525_v24 = vmul.f32 %v8819_v26, %v8819_v26 }
 0xc03   :  { %v4360_v22 = vpop.f32.mrf.mxu1  ;;  %v4405_v8 = vadd.f32 %v4404_v17, %v4355_v10 }
 0xc04   :  { %4377 = vmatmul.bf16.gmra.mxu1 %v4199_v41 }
 0xc05   :  { %v8831_v59 = vadd.f32 %v4453_v61, %v4405_v8 }
 0xc07   :  { %v4494_v41 = vsel %vm1061_vm8, %v8831_v59, 0.0 }
 0xc08   :  { %v4456_v55 = vpop.f32.mrf.mxu3 }
 0xc0a   :  { %v4407_v4 = vpop.f32.mrf.mxu2 }
 0xc0b   :  { %v4363_v38 = vpop.f32.mrf.mxu1 }
 0xc0d   :  { %5097 = vmatmul.msk.bf16.gmra.mxu3 %vm1061_vm8, %v4201_v56  ;;  %v4541_v56 = vsel %vm1061_vm8, %v4524_v42, 0.0 }
 0xc0e   :  { %4426 = vmatmul.bf16.gmra.mxu2 %v4200_v11  ;;  %v4526_v11 = vmul.f32 %v8787_v25, %v8787_v25 }
 0xc10   :  { %v4458_v62 = vpop.f32.mrf.mxu3 }
 0xc12   :  { %v4409_v33 = vpop.f32.mrf.mxu2 }
 0xc13   :  { %v4365_v19 = vpop.f32.mrf.mxu1  ;;  %v4410_v20 = vadd.f32 %v4409_v33, %v4360_v22 }
 0xc15   :  { %v8847_v12 = vadd.f32 %v4458_v62, %v4410_v20 }
 0xc17   :  { %v4498_v22 = vsel %vm1061_vm8, %v8847_v12, 0.0 }
 0xc18   :  { %v4461_v43 = vpop.f32.mrf.mxu3 }
 0xc1a   :  { %v4412_v21 = vpop.f32.mrf.mxu2 }
 0xc1b   :  { %v4413_v57 = vadd.f32 %v4412_v21, %v4363_v38 }
 0xc1d   :  { %v8854_v21 = vadd.f32 %v4461_v43, %v4413_v57 }
 0xc1e   :  { %5090 = vmatmul.msk.bf16.vlgmr.msrb.gmra.mxu2 %vm1061_vm8, %v8660_v48 }
 0xc1f   :  { %v4500_v49 = vsel %vm1061_vm8, %v8854_v21, 0.0 }
 0xc20   :  { %v4463_v60 = vpop.f32.mrf.mxu3 }
 0xc22   :  { %v4414_v7 = vpop.f32.mrf.mxu2 }
 0xc23   :  { %v4415_v37 = vadd.f32 %v4414_v7, %v4365_v19  ;;  %v4527_v7 = vmul.f32 %v8831_v59, %v8831_v59 }
 0xc25   :  { %v8861_v62 = vadd.f32 %v4463_v60, %v4415_v37  ;;  %v4547_v60 = vsel %vm1061_vm8, %v4527_v7, 0.0 }
 0xc53   :  { %v4368_v14 = vpop.f32.mrf.mxu1 }
 0xc5b   :  { %v4370_v3 = vpop.f32.mrf.mxu1 }
 0xc63   :  { %v4373_v63 = vpop.f32.mrf.mxu1 }
 0xc6b   :  { %v4375_v36 = vpop.f32.mrf.mxu1 }
 0xc70   :  { %v4466_v52 = vpop.f32.mrf.mxu3 }
 0xc71   :  { %v4417_v15 = vpop.f32.mrf.mxu2 }
 0xc72   :  { %v4418_v10 = vadd.f32 %v4417_v15, %v4368_v14 }
 0xc78   :  { %v8809_v29 = vpop.f32.mrf.mxu3 }
 0xc79   :  { %v4419_v44 = vpop.f32.mrf.mxu2 }
 0xc7a   :  { %v4420_v38 = vadd.f32 %v4419_v44, %v4370_v3  ;;  %v4529_v44 = vmul.f32 %v8847_v12, %v8847_v12 }
 0xc80   :  { %v8811_v54 = vpop.f32.mrf.mxu3 }
 0xc81   :  { %v8801_v27 = vpop.f32.mrf.mxu2  ;;  %v4378_v17 = vpop.f32.mrf.mxu1 }
 0xc82   :  { %v4423_v8 = vadd.f32 %v8801_v27, %v4373_v63  ;;  %v4530_v27 = vmul.f32 %v8854_v21, %v8854_v21 }
 0xc88   :  { %v4473_v32 = vpop.f32.mrf.mxu3 }
 0xc89   :  { %v8803_v48 = vpop.f32.mrf.mxu2 }
 0xc90   :  { %v4476_v15 = vpop.f32.mrf.mxu3 }
 0xc91   :  { %v8805_v39 = vpop.f32.mrf.mxu2 }
 0xc98   :  { %v4478_v37 = vpop.f32.mrf.mxu3 }
 0xc99   :  { %v8807_v46 = vpop.f32.mrf.mxu2 }
 0xca1   :  { %v4441_v47 = vpop.f32.mrf.mxu2 }
 0xca2   :  { %v8814_v31 = vadd.f32 %v4441_v47, %v8754_v2  ;;  %v4408_v2 = vadd.f32 %v4407_v4, %v4358_v1  ;;  %v4543_v1 = vsel %vm1061_vm8, %v4525_v24, 0.0  ;;  %v4545_v47 = vsel %vm1061_vm8, %v4526_v11, 0.0 }
 0xca4   :  { %v4485_v23 = vsel %vm1061_vm8, %v8814_v31, 0.0  ;;  %v8839_v28 = vadd.f32 %v4456_v55, %v4408_v2 }
 0xca6   :  { %v4496_v33 = vsel %vm1061_vm8, %v8839_v28, 0.0  ;;  %v4528_v43 = vmul.f32 %v8839_v28, %v8839_v28 }
 0xca9   :  { %v4443_v34 = vpop.f32.mrf.mxu2 }
 0xcaa   :  { %v8817_v45 = vadd.f32 %v4443_v34, %v8766_v13  ;;  %v4522_v13 = vmul.f32 %v8814_v31, %v8814_v31  ;;  %v8868_v34 = vadd.f32 %v4466_v52, %v4418_v10  ;;  %v4549_v52 = vsel %vm1061_vm8, %v4528_v43, 0.0 }
 0xcac   :  { %v4486_v9 = vsel %vm1061_vm8, %v8817_v45, 0.0  ;;  %v4523_v50 = vmul.f32 %v8817_v45, %v8817_v45  ;;  %v4538_v5 = vsel %vm1061_vm8, %v4522_v13, 0.0  ;;  %v4504_v13 = vsel %vm1061_vm8, %v8868_v34, 0.0 }
 0xcad   :  { %v4487_v0 = vadd.f32 %v4486_v9, %v4485_v23  ;;  %v4502_v9 = vsel %vm1061_vm8, %v8861_v62, 0.0 }
 0xcae   :  { %v4539_v30 = vsel %vm1061_vm8, %v4523_v50, 0.0 }
 0xcaf   :  { %v4489_v53 = vadd.f32 %v4488_v51, %v4487_v0  ;;  %v4540_v16 = vadd.f32 %v4539_v30, %v4538_v5  ;;  %v8877_v0 = vadd.f32 %v8809_v29, %v4420_v38  ;;  %v4425_v51 = vadd.f32 %v8803_v48, %v4375_v36  ;;  %v4380_v36 = vpop.f32.mrf.mxu1 }
 0xcb0   :  { %v4551_v29 = vsel %vm1061_vm8, %v4529_v44, 0.0  ;;  %v4531_v48 = vmul.f32 %v8861_v62, %v8861_v62 }
 0xcb1   :  { %v4491_v40 = vadd.f32 %v4490_v18, %v4489_v53  ;;  %v4542_v61 = vadd.f32 %v4541_v56, %v4540_v16  ;;  %v8886_v53 = vadd.f32 %v8811_v54, %v4423_v8  ;;  %v4428_v18 = vadd.f32 %v8805_v39, %v4378_v17 }
 0xcb2   :  { %v8894_v50 = vadd.f32 %v4473_v32, %v4425_v51  ;;  %v4553_v54 = vsel %vm1061_vm8, %v4530_v27, 0.0  ;;  %v4532_v39 = vmul.f32 %v8868_v34, %v8868_v34  ;;  %v4533_v32 = vmul.f32 %v8877_v0, %v8877_v0 }
 0xcb3   :  { %v4493_v58 = vadd.f32 %v4492_v6, %v4491_v40  ;;  %v4544_v19 = vadd.f32 %v4543_v1, %v4542_v61  ;;  %v4506_v40 = vsel %vm1061_vm8, %v8877_v0, 0.0  ;;  %v4430_v6 = vadd.f32 %v8807_v46, %v4380_v36 }
 0xcb4   :  { %v4508_v5 = vsel %vm1061_vm8, %v8886_v53, 0.0  ;;  %v4510_v16 = vsel %vm1061_vm8, %v8894_v50, 0.0  ;;  %v4557_v17 = vsel %vm1061_vm8, %v4532_v39, 0.0  ;;  %v4559_v1 = vsel %vm1061_vm8, %v4533_v32, 0.0 }
 0xcb5   :  { %v4495_v4 = vadd.f32 %v4494_v41, %v4493_v58  ;;  %v4546_v23 = vadd.f32 %v4545_v47, %v4544_v19  ;;  %v8902_v58 = vadd.f32 %v4476_v15, %v4428_v18  ;;  %v4555_v41 = vsel %vm1061_vm8, %v4531_v48, 0.0 }
 0xcb6   :  { %v8909_v56 = vadd.f32 %v4478_v37, %v4430_v6  ;;  %v4535_v7 = vmul.f32 %v8894_v50, %v8894_v50  ;;  %v5098_v37 = vld [vmem:[%s9022_s7 + $0x1] sm:$0x1] }
 0xcb7   :  { %v4497_v55 = vadd.f32 %v4496_v33, %v4495_v4  ;;  %v4548_v2 = vadd.f32 %v4547_v60, %v4546_v23  ;;  %v4534_v4 = vmul.f32 %v8886_v53, %v8886_v53  ;;  %v4512_v10 = vsel %vm1061_vm8, %v8902_v58, 0.0 }
 0xcb8   :  { %v4536_v47 = vmul.f32 %v8902_v58, %v8902_v58 }
 0xcb9   :  { %v4499_v14 = vadd.f32 %v4498_v22, %v4497_v55  ;;  %v4550_v20 = vadd.f32 %v4549_v52, %v4548_v2  ;;  %v4514_v22 = vsel %vm1061_vm8, %v8909_v56, 0.0  ;;  %v4561_v19 = vsel %vm1061_vm8, %v4534_v4, 0.0 }
 0xcba   :  { %v4565_v60 = vsel %vm1061_vm8, %v4536_v47, 0.0 }
 0xcbb   :  { %v4501_v3 = vadd.f32 %v4500_v49, %v4499_v14  ;;  %v4552_v57 = vadd.f32 %v4551_v29, %v4550_v20  ;;  %v4563_v14 = vsel %vm1061_vm8, %v4535_v7, 0.0  ;;  %v4537_v49 = vmul.f32 %v8909_v56, %v8909_v56 }
 0xcbd   :  { %v4503_v63 = vadd.f32 %v4502_v9, %v4501_v3  ;;  %v4554_v30 = vadd.f32 %v4553_v54, %v4552_v57  ;;  %v4567_v9 = vsel %vm1061_vm8, %v4537_v49, 0.0 }
 0xcbf   :  { %v4505_v42 = vadd.f32 %v4504_v13, %v4503_v63  ;;  %v4556_v11 = vadd.f32 %v4555_v41, %v4554_v30 }
 0xcc1   :  { %v4507_v24 = vadd.f32 %v4506_v40, %v4505_v42  ;;  %v4558_v61 = vadd.f32 %v4557_v17, %v4556_v11  ;;  %v5099_v17 = vld [vmem:[%s9023_s8 + $0x1] sm:$0x1] }
 0xcc3   :  { %v4509_v46 = vadd.f32 %v4508_v5, %v4507_v24  ;;  %v4560_v38 = vadd.f32 %v4559_v1, %v4558_v61 }
 0xcc5   :  { %v4511_v33 = vadd.f32 %v4510_v16, %v4509_v46  ;;  %v4562_v15 = vadd.f32 %v4561_v19, %v4560_v38 }
 0xcc7   :  { %v4513_v55 = vadd.f32 %v4512_v10, %v4511_v33  ;;  %v4564_v23 = vadd.f32 %v4563_v14, %v4562_v15 }
 0xcc9   :  { %v4515_v43 = vadd.f32 %v4514_v22, %v4513_v55  ;;  %v4566_v3 = vadd.f32 %v4565_v60, %v4564_v23 }
 0xccb   :  { %v4516_v8 = vrot.slane %v4515_v43, 4  ;;  %v4568_v2 = vadd.f32 %v4567_v9, %v4566_v3 }
 0xccd   :  { %v4517_v44 = vadd.f32 %v4516_v8, %v4515_v43  ;;  %v4569_v27 = vrot.slane %v4568_v2, 4 }
 0xccf   :  { %v4518_v51 = vrot.slane %v4517_v44, 2  ;;  %v4570_v13 = vadd.f32 %v4569_v27, %v4568_v2 }
 0xcd1   :  { %v4519_v52 = vadd.f32 %v4518_v51, %v4517_v44  ;;  %v4571_v20 = vrot.slane %v4570_v13, 2 }
 0xcd3   :  { %v4520_v63 = vrot.slane %v4519_v52, 1  ;;  %v4572_v29 = vadd.f32 %v4571_v20, %v4570_v13 }
 0xcd5   :  { %v4521_v18 = vadd.f32 %v4520_v63, %v4519_v52  ;;  %v4573_v36 = vrot.slane %v4572_v29, 1 }
 0xcd7   :  { %v4575_v48 = vmul.f32 0.0078125, %v4521_v18  ;;  %v4574_v42 = vadd.f32 %v4573_v36, %v4572_v29 }
 0xcd9   :  { %v4577_v40 = vmul.f32 %v4575_v48, %v4575_v48  ;;  %v4576_v6 = vmul.f32 0.0078125, %v4574_v42 }
 0xcdb   :  { %v4578_v57 = vsub.f32 %v4576_v6, %v4577_v40 }
 0xcdd   :  { %v4579_v54 = vmax.f32 %v4578_v57, 0.0 }
 0xcdf   :  { %v4580_v39 = vadd.f32 1e-05, %v4579_v54 }
 0xce1   :  { %5950 = vrsqrt.f32 %v4580_v39  ;;  %vm4587_vm1 = vweird.f32 %v4580_v39 }
 0xce7   :  { %v5951_v24 = vpop.eup %5950 }
 0xce8   :  { %v4582_v5 = vmul.f32 %v5951_v24, %v4580_v39  ;;  %vm4588_vm0 = vweird.f32 %v5951_v24 }
 0xce9   :  { %vm4589_vm2 = vmor %vm4587_vm1, %vm4588_vm0 }
 0xcea   :  { %v4583_v30 = vmul.f32 %v5951_v24, %v4582_v5 }
 0xcec   :  { %v4584_v41 = vmul.f32 0.5, %v4583_v30 }
 0xcee   :  { %v4585_v32 = vsub.f32 1.5, %v4584_v41 }
 0xcf0   :  { %v4586_v46 = vmul.f32 %v5951_v24, %v4585_v32 }
 0xcf2   :  { %v4590_v16 = vsel %vm4589_vm2, %v5951_v24, %v4586_v46 }
 0xcf3   :  { %v4591_v11 = vmul.f32 %v5098_v37, %v4590_v16 }
 0xcf5   :  { %v4592_v4 = vmul.f32 %v4591_v11, %v4575_v48  ;;  %v4595_v33 = vperm.slane %v4591_v11, 0 }
 0xcf7   :  { %v4593_v10 = vsub.f32 %v5099_v17, %v4592_v4  ;;  %v4597_v61 = vmul.f32 %v4595_v33, %v8814_v31  ;;  %v4598_v1 = vmul.f32 %v4595_v33, %v8817_v45  ;;  %v4599_v7 = vmul.f32 %v4595_v33, %v8771_v35 }
 0xcf8   :  { %v4600_v55 = vmul.f32 %v4595_v33, %v8819_v26  ;;  %v4601_v22 = vmul.f32 %v4595_v33, %v8787_v25  ;;  %v4602_v38 = vmul.f32 %v4595_v33, %v8831_v59  ;;  %v4603_v19 = vmul.f32 %v4595_v33, %v8839_v28 }
 0xcf9   :  { %v4604_v47 = vmul.f32 %v4595_v33, %v8847_v12  ;;  %v4605_v43 = vmul.f32 %v4595_v33, %v8854_v21  ;;  %v4606_v15 = vmul.f32 %v4595_v33, %v8861_v62  ;;  %v4607_v31 = vmul.f32 %v4595_v33, %v8868_v34 }
 0xcfa   :  { %v4612_v45 = vmul.f32 %v4595_v33, %v8909_v56  ;;  %v4614_v14 = vperm.slane %v4593_v10, 0  ;;  %v4608_v35 = vmul.f32 %v4595_v33, %v8877_v0  ;;  %v4609_v26 = vmul.f32 %v4595_v33, %v8886_v53 }
 0xcfb   :  { %v4610_v25 = vmul.f32 %v4595_v33, %v8894_v50  ;;  %v4611_v59 = vmul.f32 %v4595_v33, %v8902_v58 }
 0xcfc   :  { %v4616_v28 = vadd.f32 %v4614_v14, %v4597_v61  ;;  %v4617_v49 = vadd.f32 %v4614_v14, %v4598_v1  ;;  %v4618_v12 = vadd.f32 %v4614_v14, %v4599_v7  ;;  %v4619_v8 = vadd.f32 %v4614_v14, %v4600_v55 }
 0xcfd   :  { %v4620_v21 = vadd.f32 %v4614_v14, %v4601_v22  ;;  %v4621_v23 = vadd.f32 %v4614_v14, %v4602_v38  ;;  %v4622_v62 = vadd.f32 %v4614_v14, %v4603_v19  ;;  %v4623_v60 = vadd.f32 %v4614_v14, %v4604_v47 }
 0xcfe   :  { %v4624_v34 = vadd.f32 %v4614_v14, %v4605_v43  ;;  %v4625_v44 = vadd.f32 %v4614_v14, %v4606_v15  ;;  %v4626_v56 = vadd.f32 %v4614_v14, %v4607_v31  ;;  %v4627_v3 = vadd.f32 %v4614_v14, %v4608_v35 }
 0xcff   :  { %v4628_v9 = vadd.f32 %v4614_v14, %v4609_v26  ;;  %v4629_v0 = vadd.f32 %v4614_v14, %v4610_v25  ;;  %v4630_v51 = vadd.f32 %v4614_v14, %v4611_v59  ;;  %v4631_v53 = vadd.f32 %v4614_v14, %v4612_v45 }
 0xd00   :  { %v4632_v2 = vmax.f32 %v4616_v28, 0.0  ;;  %v4633_v50 = vmax.f32 %v4617_v49, 0.0  ;;  %v4634_v52 = vmax.f32 %v4618_v12, 0.0  ;;  %v4635_v58 = vmax.f32 %v4619_v8, 0.0 }
 0xd01   :  { %v4636_v27 = vmax.f32 %v4620_v21, 0.0  ;;  %v4637_v63 = vmax.f32 %v4621_v23, 0.0  ;;  %v4638_v13 = vmax.f32 %v4622_v62, 0.0  ;;  %v4639_v18 = vmax.f32 %v4623_v60, 0.0 }
 0xd02   :  { %4648 = vst.msk [vmem:[%s9024_s9] sm:$0xff] %vm1061_vm8, %v4632_v2  ;;  %v4640_v20 = vmax.f32 %v4624_v34, 0.0  ;;  %v4641_v29 = vmax.f32 %v4625_v44, 0.0  ;;  %v4642_v48 = vmax.f32 %v4626_v56, 0.0  ;;  %v4643_v36 = vmax.f32 %v4627_v3, 0.0 }
 0xd03   :  { %4649 = vst.msk [vmem:[%s9024_s9 + $0x8] sm:$0xff] %vm1061_vm8, %v4633_v50  ;;  %v4644_v42 = vmax.f32 %v4628_v9, 0.0  ;;  %v4645_v40 = vmax.f32 %v4629_v0, 0.0  ;;  %v4646_v6 = vmax.f32 %v4630_v51, 0.0  ;;  %v4647_v57 = vmax.f32 %v4631_v53, 0.0 }
 0xd04   :  { %4650 = vst.msk [vmem:[%s9024_s9 + $0x10] sm:$0xff] %vm1061_vm8, %v4634_v52 }
 0xd05   :  { %4651 = vst.msk [vmem:[%s9024_s9 + $0x18] sm:$0xff] %vm1061_vm8, %v4635_v58 }
 0xd06   :  { %4652 = vst.msk [vmem:[%s9024_s9 + $0x20] sm:$0xff] %vm1061_vm8, %v4636_v27 }
 0xd07   :  { %4653 = vst.msk [vmem:[%s9024_s9 + $0x28] sm:$0xff] %vm1061_vm8, %v4637_v63 }
 0xd08   :  { %4654 = vst.msk [vmem:[%s9024_s9 + $0x30] sm:$0xff] %vm1061_vm8, %v4638_v13 }
 0xd09   :  { %4655 = vst.msk [vmem:[%s9024_s9 + $0x38] sm:$0xff] %vm1061_vm8, %v4639_v18 }
 0xd0a   :  { %4656 = vst.msk [vmem:[%s9024_s9 + $0x40] sm:$0xff] %vm1061_vm8, %v4640_v20 }
 0xd0b   :  { %4657 = vst.msk [vmem:[%s9024_s9 + $0x48] sm:$0xff] %vm1061_vm8, %v4641_v29 }
 0xd0c   :  { %4658 = vst.msk [vmem:[%s9024_s9 + $0x50] sm:$0xff] %vm1061_vm8, %v4642_v48 }
 0xd0d   :  { %4659 = vst.msk [vmem:[%s9024_s9 + $0x58] sm:$0xff] %vm1061_vm8, %v4643_v36 }
 0xd0e   :  { %4660 = vst.msk [vmem:[%s9024_s9 + $0x60] sm:$0xff] %vm1061_vm8, %v4644_v42 }
 0xd0f   :  { %4661 = vst.msk [vmem:[%s9024_s9 + $0x68] sm:$0xff] %vm1061_vm8, %v4645_v40 }
 0xd10   :  { %4662 = vst.msk [vmem:[%s9024_s9 + $0x70] sm:$0xff] %vm1061_vm8, %v4646_v6 }
 0xd11   :  { %4663 = vst.msk [vmem:[%s9024_s9 + $0x78] sm:$0xff] %vm1061_vm8, %v4647_v57 }

</bundles_post_ra>
